<compile_context>
chip_gen: v7x
topology: tpu7x:2x2x1
jax: 0.10.0
libtpu: 0.0.40
codegen_flags: <defaults>
</compile_context>

<pallas_src>
import functools
import math

import jax
import jax.numpy as jnp
from jax.experimental import pallas as pl
from jax.experimental.pallas import tpu as pltpu


MXU_DTYPE = jnp.bfloat16          # matmul-operand dtype (f32 accumulation)
LN_EPS = 1e-5
VMEM_LIMIT_BYTES = 64 * 1024 * 1024   # explicit scoped-VMEM limit (> defaults)


# ---------------------------------------------------------------------------
# In-kernel helpers (operate on VMEM-resident values / refs)
# ---------------------------------------------------------------------------
def _layernorm(x, g_ref, b_ref, eps):
    mean = jnp.mean(x, axis=-1, keepdims=True)
    c = x - mean
    var = jnp.mean(c * c, axis=-1, keepdims=True)
    inv = jax.lax.rsqrt(var + eps)
    return (c * inv) * g_ref[...] + b_ref[...]


def _ffn(x, w1_ref, b1_ref, w2_ref, b2_ref):
    h = jnp.dot(x.astype(MXU_DTYPE), w1_ref[...],
                preferred_element_type=jnp.float32) + b1_ref[...]
    h = jnp.maximum(h, 0.0)
    return jnp.dot(h.astype(MXU_DTYPE), w2_ref[...],
                   preferred_element_type=jnp.float32) + b2_ref[...]


def _attention(xq, xkv, wq_ref, bq_ref, wk_ref, bk_ref, wv_ref, bv_ref,
               wo_ref, bo_ref, *, nhead):
    """Multi-head attention on VMEM-resident activations.

    xq: (Lq, D) f32, xkv: (Lk, D) f32.  Weights are head-stacked on the
    leading axis, so per-head access is a leading-axis read (no lane slicing)
    and head merge is an accumulation (no lane concat).  The 1/sqrt(dh) scale
    is already folded into wq/bq.
    """
    xq_b = xq.astype(MXU_DTYPE)
    xkv_b = xkv.astype(MXU_DTYPE)
    out = None
    for h in range(nhead):                       # static unroll over heads
        q = jnp.dot(xq_b, wq_ref[h], preferred_element_type=jnp.float32) + bq_ref[h]
        k = jnp.dot(xkv_b, wk_ref[h], preferred_element_type=jnp.float32) + bk_ref[h]
        v = jnp.dot(xkv_b, wv_ref[h], preferred_element_type=jnp.float32) + bv_ref[h]
        # QK^T: bf16 MXU operands, f32 accumulation.
        s = jax.lax.dot_general(q.astype(MXU_DTYPE), k.astype(MXU_DTYPE),
                                (((1,), (1,)), ((), ())),
                                preferred_element_type=jnp.float32)  # (Lq, Lk)
        s = s - jnp.max(s, axis=-1, keepdims=True)
        p = jnp.exp(s)
        denom = jnp.sum(p, axis=-1, keepdims=True)
        p = p * pl.reciprocal(denom, approx=True)
        o = jnp.dot(p.astype(MXU_DTYPE), v.astype(MXU_DTYPE),
                    preferred_element_type=jnp.float32)              # (Lq, dh)
        part = jnp.dot(o.astype(MXU_DTYPE), wo_ref[h],
                       preferred_element_type=jnp.float32)           # (Lq, D)
        out = part if out is None else out + part
    return out + bo_ref[...]


# ---------------------------------------------------------------------------
# Kernel 1: fused encoder layer (self-attn + LN + FFN + LN), one batch/step
# ---------------------------------------------------------------------------
def _encoder_layer_kernel(x_ref,
                          wq, bq, wk, bk, wv, bv, wo, bo,
                          n1g, n1b,
                          w1, b1, w2, b2,
                          n2g, n2b,
                          o_ref, *, nhead, eps):
    x = x_ref[...].astype(jnp.float32)                       # (seq, D)
    a = _attention(x, x, wq, bq, wk, bk, wv, bv, wo, bo, nhead=nhead)
    h = _layernorm(x + a, n1g, n1b, eps)
    f = _ffn(h, w1, b1, w2, b2)
    o_ref[...] = _layernorm(h + f, n2g, n2b, eps).astype(o_ref.dtype)


# ---------------------------------------------------------------------------
# Kernel 2: fused decoder layer (self-attn + LN + cross-attn + LN + FFN + LN)
# ---------------------------------------------------------------------------
def _decoder_layer_kernel(x_ref, mem_ref,
                          s_wq, s_bq, s_wk, s_bk, s_wv, s_bv, s_wo, s_bo,
                          n1g, n1b,
                          c_wq, c_bq, c_wk, c_bk, c_wv, c_bv, c_wo, c_bo,
                          n2g, n2b,
                          w1, b1, w2, b2,
                          n3g, n3b,
                          o_ref, *, nhead, eps):
    x = x_ref[...].astype(jnp.float32)                       # (seq, D)
    mem = mem_ref[...].astype(jnp.float32)                   # (seq, D)
    a = _attention(x, x, s_wq, s_bq, s_wk, s_bk, s_wv, s_bv, s_wo, s_bo,
                   nhead=nhead)
    h = _layernorm(x + a, n1g, n1b, eps)
    a2 = _attention(h, mem, c_wq, c_bq, c_wk, c_bk, c_wv, c_bv, c_wo, c_bo,
                    nhead=nhead)
    h2 = _layernorm(h + a2, n2g, n2b, eps)
    f = _ffn(h2, w1, b1, w2, b2)
    o_ref[...] = _layernorm(h2 + f, n3g, n3b, eps).astype(o_ref.dtype)


# ---------------------------------------------------------------------------
# Kernel 3: plain row-tiled LayerNorm (encoder final norm)
# ---------------------------------------------------------------------------
def _ln_kernel(x_ref, g_ref, b_ref, o_ref, *, eps):
    x = x_ref[...].astype(jnp.float32)
    o_ref[...] = _layernorm(x, g_ref, b_ref, eps).astype(o_ref.dtype)


# ---------------------------------------------------------------------------
# Kernel 4: final head on last-timestep rows only: LayerNorm + Linear
# ---------------------------------------------------------------------------
def _final_head_kernel(x_ref, g_ref, bn_ref, w_ref, b_ref, o_ref, *, eps):
    x = x_ref[...].astype(jnp.float32)
    h = _layernorm(x, g_ref, bn_ref, eps)
    y = jnp.dot(h.astype(MXU_DTYPE), w_ref[...],
                preferred_element_type=jnp.float32) + b_ref[...]
    o_ref[...] = y.astype(o_ref.dtype)


# ---------------------------------------------------------------------------
# pallas_call wrappers
# ---------------------------------------------------------------------------
def _const_spec(shape):
    """BlockSpec for a weight broadcast whole to every grid step."""
    zeros = (0,) * len(shape)
    return pl.BlockSpec(shape, lambda *idx, _z=zeros: _z)


def _row_tile(n, cap=512):
    """Row tile: full array if small, else a 512-row (multiple-of-8) tile.
    Used with grid=cdiv(n, tile); partial last tiles are masked by Pallas."""
    return n if n <= cap else cap


def _attn_params_list(ap):
    return [ap["wq"], ap["bq"], ap["wk"], ap["bk"],
            ap["wv"], ap["bv"], ap["wo"], ap["bo"]]


def encoder_layer(x, p, *, batch, seq, nhead, eps=LN_EPS):
    n, d = x.shape
    consts = (_attn_params_list(p["attn"])
              + [p["norm1_g"], p["norm1_b"],
                 p["w1"], p["b1"], p["w2"], p["b2"],
                 p["norm2_g"], p["norm2_b"]])
    in_specs = ([pl.BlockSpec((seq, d), lambda b: (b, 0))]
                + [_const_spec(c.shape) for c in consts])
    return pl.pallas_call(
        functools.partial(_encoder_layer_kernel, nhead=nhead, eps=eps),
        grid=(batch,),
        in_specs=in_specs,
        out_specs=pl.BlockSpec((seq, d), lambda b: (b, 0)),
        out_shape=jax.ShapeDtypeStruct((n, d), x.dtype),
        compiler_params=pltpu.CompilerParams(
            dimension_semantics=("parallel",),
            vmem_limit_bytes=VMEM_LIMIT_BYTES),
    )(x, *consts)


def decoder_layer(x, mem, p, *, batch, seq, nhead, eps=LN_EPS):
    n, d = x.shape
    consts = (_attn_params_list(p["self_attn"])
              + [p["norm1_g"], p["norm1_b"]]
              + _attn_params_list(p["cross_attn"])
              + [p["norm2_g"], p["norm2_b"],
                 p["w1"], p["b1"], p["w2"], p["b2"],
                 p["norm3_g"], p["norm3_b"]])
    in_specs = ([pl.BlockSpec((seq, d), lambda b: (b, 0)),
                 pl.BlockSpec((seq, d), lambda b: (b, 0))]
                + [_const_spec(c.shape) for c in consts])
    return pl.pallas_call(
        functools.partial(_decoder_layer_kernel, nhead=nhead, eps=eps),
        grid=(batch,),
        in_specs=in_specs,
        out_specs=pl.BlockSpec((seq, d), lambda b: (b, 0)),
        out_shape=jax.ShapeDtypeStruct((n, d), x.dtype),
        compiler_params=pltpu.CompilerParams(
            dimension_semantics=("parallel",),
            vmem_limit_bytes=VMEM_LIMIT_BYTES),
    )(x, mem, *consts)


def layernorm(x, g, b, eps=LN_EPS):
    n, d = x.shape
    tn = _row_tile(n)
    return pl.pallas_call(
        functools.partial(_ln_kernel, eps=eps),
        grid=(pl.cdiv(n, tn),),
        in_specs=[pl.BlockSpec((tn, d), lambda i: (i, 0)),
                  pl.BlockSpec((1, d), lambda i: (0, 0)),
                  pl.BlockSpec((1, d), lambda i: (0, 0))],
        out_specs=pl.BlockSpec((tn, d), lambda i: (i, 0)),
        out_shape=jax.ShapeDtypeStruct((n, d), x.dtype),
        compiler_params=pltpu.CompilerParams(
            dimension_semantics=("parallel",),
            vmem_limit_bytes=VMEM_LIMIT_BYTES),
    )(x, g, b)


def final_head(x, g, bn, w, b, eps=LN_EPS):
    """LayerNorm(x) @ w + b on the (batch, D) last-timestep rows."""
    n, d = x.shape
    d_out = w.shape[1]
    tn = _row_tile(n)
    return pl.pallas_call(
        functools.partial(_final_head_kernel, eps=eps),
        grid=(pl.cdiv(n, tn),),
        in_specs=[pl.BlockSpec((tn, d), lambda i: (i, 0)),
                  pl.BlockSpec((1, d), lambda i: (0, 0)),
                  pl.BlockSpec((1, d), lambda i: (0, 0)),
                  pl.BlockSpec((d, d_out), lambda i: (0, 0)),
                  pl.BlockSpec((1, d_out), lambda i: (0, 0))],
        out_specs=pl.BlockSpec((tn, d_out), lambda i: (i, 0)),
        out_shape=jax.ShapeDtypeStruct((n, d_out), x.dtype),
        compiler_params=pltpu.CompilerParams(
            dimension_semantics=("parallel",),
            vmem_limit_bytes=VMEM_LIMIT_BYTES),
    )(x, g, bn, w, b)


# ---------------------------------------------------------------------------
# Parameter init (deterministic, PyTorch-like uniform fan-in init).
# Weights are stored pre-transposed (Din, Dout) and in bf16 (MXU operands);
# attention weights are additionally head-stacked on the leading axis and the
# 1/sqrt(dh) scale is folded into wq/bq.  Biases / LN params stay f32.
# ---------------------------------------------------------------------------
def _uni(key, shape, fan_in, dtype=jnp.float32):
    bound = 1.0 / math.sqrt(fan_in)
    return jax.random.uniform(key, shape, jnp.float32, -bound, bound).astype(dtype)


def _init_mha(key, d, nhead):
    dh = d // nhead
    scale = 1.0 / math.sqrt(dh)
    k1, k2, k3, k4 = jax.random.split(key, 4)

    w_in = _uni(k1, (d, 3 * d), d)           # fused in_proj, f32 master copy
    b_in = _uni(k2, (1, 3 * d), d)
    wq, wk, wv = w_in[:, :d] * scale, w_in[:, d:2 * d], w_in[:, 2 * d:]
    bq, bk, bv = b_in[:, :d] * scale, b_in[:, d:2 * d], b_in[:, 2 * d:]

    def stack_w(w):   # (d, d) -> (nhead, d, dh): head h == columns h*dh:(h+1)*dh
        return jnp.transpose(w.reshape(d, nhead, dh), (1, 0, 2))

    def stack_b(b):   # (1, d) -> (nhead, 1, dh)
        return jnp.transpose(b.reshape(1, nhead, dh), (1, 0, 2))

    w_out = _uni(k3, (d, d), d)               # (Din=d, Dout=d)
    b_out = _uni(k4, (1, d), d)

    return {
        "wq": stack_w(wq).astype(MXU_DTYPE),
        "wk": stack_w(wk).astype(MXU_DTYPE),
        "wv": stack_w(wv).astype(MXU_DTYPE),
        "bq": stack_b(bq), "bk": stack_b(bk), "bv": stack_b(bv),
        "wo": w_out.reshape(nhead, dh, d).astype(MXU_DTYPE),  # row-sliced per head
        "bo": b_out,
    }


def _ln_params(d):
    return jnp.ones((1, d), jnp.float32), jnp.zeros((1, d), jnp.float32)


def _init_enc_layer(key, d, ff, nhead):
    ks = jax.random.split(key, 5)
    g1, b1 = _ln_params(d)
    g2, b2 = _ln_params(d)
    return {
        "attn": _init_mha(ks[0], d, nhead),
        "w1": _uni(ks[1], (d, ff), d, MXU_DTYPE), "b1": _uni(ks[2], (1, ff), d),
        "w2": _uni(ks[3], (ff, d), ff, MXU_DTYPE), "b2": _uni(ks[4], (1, d), ff),
        "norm1_g": g1, "norm1_b": b1, "norm2_g": g2, "norm2_b": b2,
    }


def _init_dec_layer(key, d, ff, nhead):
    ks = jax.random.split(key, 6)
    p = {
        "self_attn": _init_mha(ks[0], d, nhead),
        "cross_attn": _init_mha(ks[1], d, nhead),
        "w1": _uni(ks[2], (d, ff), d, MXU_DTYPE), "b1": _uni(ks[3], (1, ff), d),
        "w2": _uni(ks[4], (ff, d), ff, MXU_DTYPE), "b2": _uni(ks[5], (1, d), ff),
    }
    for i in (1, 2, 3):
        g, b = _ln_params(d)
        p[f"norm{i}_g"], p[f"norm{i}_b"] = g, b
    return p


# ---------------------------------------------------------------------------
# Model
# ---------------------------------------------------------------------------
class TransformerTimeSeriesModel:
    """Mirrors the PyTorch module.

    NOTE: the PyTorch constructor calls nn.Transformer(d_model, nhead,
    num_layers, dim_feedforward) *positionally*, which maps to
    (d_model, nhead, num_encoder_layers, num_decoder_layers) while the FFN
    width stays at nn.Transformer's default of 2048.  We reproduce that
    mapping exactly (post-norm layers, ReLU FFN, final LayerNorm on both the
    encoder and decoder stacks, eps=1e-5, dropout=identity, no masks).
    """

    FFN_DIM = 2048  # nn.Transformer default dim_feedforward

    def __init__(self, d_model, nhead, num_layers, dim_feedforward, key):
        assert d_model % nhead == 0
        self.d_model = d_model
        self.nhead = nhead
        num_encoder_layers = num_layers
        num_decoder_layers = dim_feedforward  # positional-arg mapping quirk
        keys = jax.random.split(key, num_encoder_layers + num_decoder_layers + 1)
        self.enc_layers = [_init_enc_layer(keys[i], d_model, self.FFN_DIM, nhead)
                           for i in range(num_encoder_layers)]
        self.dec_layers = [_init_dec_layer(keys[num_encoder_layers + i],
                                           d_model, self.FFN_DIM, nhead)
                           for i in range(num_decoder_layers)]
        self.enc_norm_g, self.enc_norm_b = _ln_params(d_model)
        self.dec_norm_g, self.dec_norm_b = _ln_params(d_model)
        kw, kb = jax.random.split(keys[-1])
        self.head_w = _uni(kw, (d_model, d_model), d_model, MXU_DTYPE)
        self.head_b = _uni(kb, (1, d_model), d_model)

    def __call__(self, x):
        # x: (batch, seq, d_model).  PyTorch permutes to (seq, batch, d) only
        # as nn.Transformer's layout convention; the math is batch-symmetric,
        # so we use a batch-major flat layout (row = b*seq + s) and never
        # transpose.  The fused layer kernels pick batch b via index_map.
        batch, seq, d = x.shape
        x_flat = x.reshape(batch * seq, d)

        mem = x_flat
        for p in self.enc_layers:
            mem = encoder_layer(mem, p, batch=batch, seq=seq, nhead=self.nhead)
        mem = layernorm(mem, self.enc_norm_g, self.enc_norm_b)

        out = x_flat
        for p in self.dec_layers:
            out = decoder_layer(out, mem, p, batch=batch, seq=seq,
                                nhead=self.nhead)

        # Only the last time step is returned: gather (batch, D) rows FIRST,
        # then apply the decoder's final LayerNorm + linear head to them only.
        last = out.reshape(batch, seq, d)[:, -1, :]
        return final_head(last, self.dec_norm_g, self.dec_norm_b,
                          self.head_w, self.head_b)   # (batch, d_model)


# ---------------------------------------------------------------------------
if __name__ == "__main__":
    key = jax.random.PRNGKey(0)
    k_params, k_x = jax.random.split(key)

    d_model, nhead = 32, 4
    num_layers, dim_feedforward = 1, 1   # -> 1 encoder layer, 1 decoder layer
    batch, seq = 2, 8

    model = TransformerTimeSeriesModel(d_model, nhead, num_layers,
                                       dim_feedforward, k_params)
    x = jax.random.normal(k_x, (batch, seq, d_model), jnp.float32)

    fwd = jax.jit(model.__call__)
    y = jax.block_until_ready(fwd(x))
    assert y.shape == (batch, d_model), y.shape
    assert jnp.all(jnp.isfinite(y))
    print("KERNEL_OK")
</pallas_src>

<mosaic_0001>
module attributes {stable_mosaic.version = 11 : i64} {
  func.func @_ln_kernel(%arg0: i32, %arg1: memref<16x32xf32, #tpu.memory_space<vmem>>, %arg2: memref<1x32xf32, #tpu.memory_space<vmem>>, %arg3: memref<1x32xf32, #tpu.memory_space<vmem>>, %arg4: memref<16x32xf32, #tpu.memory_space<vmem>>) attributes {dimension_semantics = [#tpu.dimension_semantics<parallel>], iteration_bounds = array<i64: 1>, scalar_prefetch = 0 : i64, scratch_operands = 0 : i64, tpu.core_type = #tpu.core_type<tc>, window_params = [{transform_indices = @transform_0, window_bounds = array<i64: 16, 32>}, {pipeline_mode = #tpu.pipeline_mode<synchronous>, transform_indices = @transform_1, window_bounds = array<i64: 1, 32>}, {pipeline_mode = #tpu.pipeline_mode<synchronous>, transform_indices = @transform_2, window_bounds = array<i64: 1, 32>}, {transform_indices = @transform_3, window_bounds = array<i64: 16, 32>}]} {
    %c0 = arith.constant 0 : index
    %c0_0 = arith.constant 0 : index
    %0 = vector.load %arg1[%c0, %c0_0] : memref<16x32xf32, #tpu.memory_space<vmem>>, vector<16x32xf32>
    %cst = arith.constant dense<0.000000e+00> : vector<16xf32>
    %1 = vector.multi_reduction <add>, %0, %cst [1] : vector<16x32xf32> to vector<16xf32>
    %2 = vector.shape_cast %1 : vector<16xf32> to vector<16x1xf32>
    %cst_1 = arith.constant 3.200000e+01 : f32
    %3 = vector.broadcast %cst_1 : f32 to vector<16x1xf32>
    %4 = arith.divf %2, %3 : vector<16x1xf32>
    %5 = vector.broadcast %4 : vector<16x1xf32> to vector<16x32xf32>
    %6 = arith.subf %0, %5 : vector<16x32xf32>
    %7 = arith.mulf %6, %6 : vector<16x32xf32>
    %cst_2 = arith.constant dense<0.000000e+00> : vector<16xf32>
    %8 = vector.multi_reduction <add>, %7, %cst_2 [1] : vector<16x32xf32> to vector<16xf32>
    %9 = vector.shape_cast %8 : vector<16xf32> to vector<16x1xf32>
    %cst_3 = arith.constant 3.200000e+01 : f32
    %10 = vector.broadcast %cst_3 : f32 to vector<16x1xf32>
    %11 = arith.divf %9, %10 : vector<16x1xf32>
    %cst_4 = arith.constant 9.99999974E-6 : f32
    %12 = vector.broadcast %cst_4 : f32 to vector<16x1xf32>
    %13 = arith.addf %11, %12 : vector<16x1xf32>
    %14 = math.rsqrt %13 : vector<16x1xf32>
    %15 = vector.broadcast %14 : vector<16x1xf32> to vector<16x32xf32>
    %16 = arith.mulf %6, %15 : vector<16x32xf32>
    %c0_5 = arith.constant 0 : index
    %c0_6 = arith.constant 0 : index
    %17 = vector.load %arg2[%c0_5, %c0_6] : memref<1x32xf32, #tpu.memory_space<vmem>>, vector<1x32xf32>
    %18 = vector.broadcast %17 : vector<1x32xf32> to vector<16x32xf32>
    %19 = arith.mulf %16, %18 : vector<16x32xf32>
    %c0_7 = arith.constant 0 : index
    %c0_8 = arith.constant 0 : index
    %20 = vector.load %arg3[%c0_7, %c0_8] : memref<1x32xf32, #tpu.memory_space<vmem>>, vector<1x32xf32>
    %21 = vector.broadcast %20 : vector<1x32xf32> to vector<16x32xf32>
    %22 = arith.addf %19, %21 : vector<16x32xf32>
    %c0_9 = arith.constant 0 : index
    %c0_10 = arith.constant 0 : index
    %23 = vector.load %arg4[%c0_9, %c0_10] : memref<16x32xf32, #tpu.memory_space<vmem>>, vector<16x32xf32>
    tpu.vector_store %arg4[%c0_9, %c0_10], %22 {strides = array<i32>} : memref<16x32xf32, #tpu.memory_space<vmem>>, vector<16x32xf32>,
    return
  }
  func.func @transform_0(%arg0: i32) -> (i32, i32) {
    %c0_i32 = arith.constant 0 : i32
    %c0_i32_0 = arith.constant 0 : i32
    return %arg0, %c0_i32 : i32, i32
  }
  func.func @transform_1(%arg0: i32) -> (i32, i32) {
    %c0_i32 = arith.constant 0 : i32
    %c0_i32_0 = arith.constant 0 : i32
    %c0_i32_1 = arith.constant 0 : i32
    return %c0_i32, %c0_i32_0 : i32, i32
  }
  func.func @transform_2(%arg0: i32) -> (i32, i32) {
    %c0_i32 = arith.constant 0 : i32
    %c0_i32_0 = arith.constant 0 : i32
    %c0_i32_1 = arith.constant 0 : i32
    return %c0_i32, %c0_i32_0 : i32, i32
  }
  func.func @transform_3(%arg0: i32) -> (i32, i32) {
    %c0_i32 = arith.constant 0 : i32
    %c0_i32_0 = arith.constant 0 : i32
    return %arg0, %c0_i32 : i32, i32
  }
}

module attributes {stable_mosaic.version = 11 : i64} {
  func.func @_encoder_layer_kernel(%arg0: i32, %arg1: memref<8x32xf32, #tpu.memory_space<vmem>>, %arg2: memref<4x32x8xbf16, #tpu.memory_space<vmem>>, %arg3: memref<4x1x8xf32, #tpu.memory_space<vmem>>, %arg4: memref<4x32x8xbf16, #tpu.memory_space<vmem>>, %arg5: memref<4x1x8xf32, #tpu.memory_space<vmem>>, %arg6: memref<4x32x8xbf16, #tpu.memory_space<vmem>>, %arg7: memref<4x1x8xf32, #tpu.memory_space<vmem>>, %arg8: memref<4x8x32xbf16, #tpu.memory_space<vmem>>, %arg9: memref<1x32xf32, #tpu.memory_space<vmem>>, %arg10: memref<1x32xf32, #tpu.memory_space<vmem>>, %arg11: memref<1x32xf32, #tpu.memory_space<vmem>>, %arg12: memref<32x2048xbf16, #tpu.memory_space<vmem>>, %arg13: memref<1x2048xf32, #tpu.memory_space<vmem>>, %arg14: memref<2048x32xbf16, #tpu.memory_space<vmem>>, %arg15: memref<1x32xf32, #tpu.memory_space<vmem>>, %arg16: memref<1x32xf32, #tpu.memory_space<vmem>>, %arg17: memref<1x32xf32, #tpu.memory_space<vmem>>, %arg18: memref<8x32xf32, #tpu.memory_space<vmem>>) attributes {dimension_semantics = [#tpu.dimension_semantics<parallel>], iteration_bounds = array<i64: 2>, scalar_prefetch = 0 : i64, scratch_operands = 0 : i64, tpu.core_type = #tpu.core_type<tc>, window_params = [{transform_indices = @transform_0, window_bounds = array<i64: 8, 32>}, {pipeline_mode = #tpu.pipeline_mode<synchronous>, transform_indices = @transform_1, window_bounds = array<i64: 4, 32, 8>}, {pipeline_mode = #tpu.pipeline_mode<synchronous>, transform_indices = @transform_2, window_bounds = array<i64: 4, 1, 8>}, {pipeline_mode = #tpu.pipeline_mode<synchronous>, transform_indices = @transform_3, window_bounds = array<i64: 4, 32, 8>}, {pipeline_mode = #tpu.pipeline_mode<synchronous>, transform_indices = @transform_4, window_bounds = array<i64: 4, 1, 8>}, {pipeline_mode = #tpu.pipeline_mode<synchronous>, transform_indices = @transform_5, window_bounds = array<i64: 4, 32, 8>}, {pipeline_mode = #tpu.pipeline_mode<synchronous>, transform_indices = @transform_6, window_bounds = array<i64: 4, 1, 8>}, {pipeline_mode = #tpu.pipeline_mode<synchronous>, transform_indices = @transform_7, window_bounds = array<i64: 4, 8, 32>}, {pipeline_mode = #tpu.pipeline_mode<synchronous>, transform_indices = @transform_8, window_bounds = array<i64: 1, 32>}, {pipeline_mode = #tpu.pipeline_mode<synchronous>, transform_indices = @transform_9, window_bounds = array<i64: 1, 32>}, {pipeline_mode = #tpu.pipeline_mode<synchronous>, transform_indices = @transform_10, window_bounds = array<i64: 1, 32>}, {pipeline_mode = #tpu.pipeline_mode<synchronous>, transform_indices = @transform_11, window_bounds = array<i64: 32, 2048>}, {pipeline_mode = #tpu.pipeline_mode<synchronous>, transform_indices = @transform_12, window_bounds = array<i64: 1, 2048>}, {pipeline_mode = #tpu.pipeline_mode<synchronous>, transform_indices = @transform_13, window_bounds = array<i64: 2048, 32>}, {pipeline_mode = #tpu.pipeline_mode<synchronous>, transform_indices = @transform_14, window_bounds = array<i64: 1, 32>}, {pipeline_mode = #tpu.pipeline_mode<synchronous>, transform_indices = @transform_15, window_bounds = array<i64: 1, 32>}, {pipeline_mode = #tpu.pipeline_mode<synchronous>, transform_indices = @transform_16, window_bounds = array<i64: 1, 32>}, {transform_indices = @transform_17, window_bounds = array<i64: 8, 32>}]} {
    %c0 = arith.constant 0 : index
    %c0_0 = arith.constant 0 : index
    %0 = vector.load %arg1[%c0, %c0_0] : memref<8x32xf32, #tpu.memory_space<vmem>>, vector<8x32xf32>
    %1 = arith.truncf %0 : vector<8x32xf32> to vector<8x32xbf16>
    %2 = arith.truncf %0 : vector<8x32xf32> to vector<8x32xbf16>
    %c0_1 = arith.constant 0 : index
    %c0_2 = arith.constant 0 : index
    %c0_3 = arith.constant 0 : index
    %3 = vector.load %arg2[%c0_1, %c0_2, %c0_3] : memref<4x32x8xbf16, #tpu.memory_space<vmem>>, vector<1x32x8xbf16>
    %4 = vector.shape_cast %3 : vector<1x32x8xbf16> to vector<32x8xbf16>
    %cst = arith.constant dense<0.000000e+00> : vector<8x8xf32>
    %5 = tpu.matmul %1, %4, %cst {dimension_numbers = #tpu.dot_dimension_numbers<[1], [0], [0], [1], [0, 0, 1, 1], [], []>} : vector<8x32xbf16>, vector<32x8xbf16>, vector<8x8xf32> -> vector<8x8xf32>
    %c0_4 = arith.constant 0 : index
    %c0_5 = arith.constant 0 : index
    %c0_6 = arith.constant 0 : index
    %6 = vector.load %arg3[%c0_4, %c0_5, %c0_6] : memref<4x1x8xf32, #tpu.memory_space<vmem>>, vector<1x1x8xf32>
    %7 = vector.shape_cast %6 : vector<1x1x8xf32> to vector<1x8xf32>
    %8 = vector.broadcast %7 : vector<1x8xf32> to vector<8x8xf32>
    %9 = arith.addf %5, %8 : vector<8x8xf32>
    %c0_7 = arith.constant 0 : index
    %c0_8 = arith.constant 0 : index
    %c0_9 = arith.constant 0 : index
    %10 = vector.load %arg4[%c0_7, %c0_8, %c0_9] : memref<4x32x8xbf16, #tpu.memory_space<vmem>>, vector<1x32x8xbf16>
    %11 = vector.shape_cast %10 : vector<1x32x8xbf16> to vector<32x8xbf16>
    %cst_10 = arith.constant dense<0.000000e+00> : vector<8x8xf32>
    %12 = tpu.matmul %2, %11, %cst_10 {dimension_numbers = #tpu.dot_dimension_numbers<[1], [0], [0], [1], [0, 0, 1, 1], [], []>} : vector<8x32xbf16>, vector<32x8xbf16>, vector<8x8xf32> -> vector<8x8xf32>
    %c0_11 = arith.constant 0 : index
    %c0_12 = arith.constant 0 : index
    %c0_13 = arith.constant 0 : index
    %13 = vector.load %arg5[%c0_11, %c0_12, %c0_13] : memref<4x1x8xf32, #tpu.memory_space<vmem>>, vector<1x1x8xf32>
    %14 = vector.shape_cast %13 : vector<1x1x8xf32> to vector<1x8xf32>
    %15 = vector.broadcast %14 : vector<1x8xf32> to vector<8x8xf32>
    %16 = arith.addf %12, %15 : vector<8x8xf32>
    %c0_14 = arith.constant 0 : index
    %c0_15 = arith.constant 0 : index
    %c0_16 = arith.constant 0 : index
    %17 = vector.load %arg6[%c0_14, %c0_15, %c0_16] : memref<4x32x8xbf16, #tpu.memory_space<vmem>>, vector<1x32x8xbf16>
    %18 = vector.shape_cast %17 : vector<1x32x8xbf16> to vector<32x8xbf16>
    %cst_17 = arith.constant dense<0.000000e+00> : vector<8x8xf32>
    %19 = tpu.matmul %2, %18, %cst_17 {dimension_numbers = #tpu.dot_dimension_numbers<[1], [0], [0], [1], [0, 0, 1, 1], [], []>} : vector<8x32xbf16>, vector<32x8xbf16>, vector<8x8xf32> -> vector<8x8xf32>
    %c0_18 = arith.constant 0 : index
    %c0_19 = arith.constant 0 : index
    %c0_20 = arith.constant 0 : index
    %20 = vector.load %arg7[%c0_18, %c0_19, %c0_20] : memref<4x1x8xf32, #tpu.memory_space<vmem>>, vector<1x1x8xf32>
    %21 = vector.shape_cast %20 : vector<1x1x8xf32> to vector<1x8xf32>
    %22 = vector.broadcast %21 : vector<1x8xf32> to vector<8x8xf32>
    %23 = arith.addf %19, %22 : vector<8x8xf32>
    %24 = arith.truncf %9 : vector<8x8xf32> to vector<8x8xbf16>
    %25 = arith.truncf %16 : vector<8x8xf32> to vector<8x8xbf16>
    %cst_21 = arith.constant dense<0.000000e+00> : vector<8x8xf32>
    %26 = tpu.matmul %24, %25, %cst_21 {dimension_numbers = #tpu.dot_dimension_numbers<[1], [1], [0], [0], [0, 0, 1, 0], [], []>} : vector<8x8xbf16>, vector<8x8xbf16>, vector<8x8xf32> -> vector<8x8xf32>
    %cst_22 = arith.constant dense<0xFF800000> : vector<8xf32>
    %27 = vector.multi_reduction <maximumf>, %26, %cst_22 [1] : vector<8x8xf32> to vector<8xf32>
    %28 = vector.shape_cast %27 : vector<8xf32> to vector<8x1xf32>
    %29 = vector.broadcast %28 : vector<8x1xf32> to vector<8x8xf32>
    %30 = arith.subf %26, %29 : vector<8x8xf32>
    %31 = math.exp %30 : vector<8x8xf32>
    %cst_23 = arith.constant dense<0.000000e+00> : vector<8xf32>
    %32 = vector.multi_reduction <add>, %31, %cst_23 [1] : vector<8x8xf32> to vector<8xf32>
    %33 = vector.shape_cast %32 : vector<8xf32> to vector<8x1xf32>
    %34 = tpu.reciprocal %33 {approx = true} : vector<8x1xf32> -> vector<8x1xf32>
    %35 = vector.broadcast %34 : vector<8x1xf32> to vector<8x8xf32>
    %36 = arith.mulf %31, %35 : vector<8x8xf32>
    %37 = arith.truncf %36 : vector<8x8xf32> to vector<8x8xbf16>
    %38 = arith.truncf %23 : vector<8x8xf32> to vector<8x8xbf16>
    %cst_24 = arith.constant dense<0.000000e+00> : vector<8x8xf32>
    %39 = tpu.matmul %37, %38, %cst_24 {dimension_numbers = #tpu.dot_dimension_numbers<[1], [0], [0], [1], [0, 0, 1, 1], [], []>} : vector<8x8xbf16>, vector<8x8xbf16>, vector<8x8xf32> -> vector<8x8xf32>
    %40 = arith.truncf %39 : vector<8x8xf32> to vector<8x8xbf16>
    %c0_25 = arith.constant 0 : index
    %c0_26 = arith.constant 0 : index
    %c0_27 = arith.constant 0 : index
    %41 = vector.load %arg8[%c0_25, %c0_26, %c0_27] : memref<4x8x32xbf16, #tpu.memory_space<vmem>>, vector<1x8x32xbf16>
    %42 = vector.shape_cast %41 : vector<1x8x32xbf16> to vector<8x32xbf16>
    %cst_28 = arith.constant dense<0.000000e+00> : vector<8x32xf32>
    %43 = tpu.matmul %40, %42, %cst_28 {dimension_numbers = #tpu.dot_dimension_numbers<[1], [0], [0], [1], [0, 0, 1, 1], [], []>} : vector<8x8xbf16>, vector<8x32xbf16>, vector<8x32xf32> -> vector<8x32xf32>
    %c1 = arith.constant 1 : index
    %c0_29 = arith.constant 0 : index
    %c0_30 = arith.constant 0 : index
    %44 = vector.load %arg2[%c1, %c0_29, %c0_30] : memref<4x32x8xbf16, #tpu.memory_space<vmem>>, vector<1x32x8xbf16>
    %45 = vector.shape_cast %44 : vector<1x32x8xbf16> to vector<32x8xbf16>
    %cst_31 = arith.constant dense<0.000000e+00> : vector<8x8xf32>
    %46 = tpu.matmul %1, %45, %cst_31 {dimension_numbers = #tpu.dot_dimension_numbers<[1], [0], [0], [1], [0, 0, 1, 1], [], []>} : vector<8x32xbf16>, vector<32x8xbf16>, vector<8x8xf32> -> vector<8x8xf32>
    %c1_32 = arith.constant 1 : index
    %c0_33 = arith.constant 0 : index
    %c0_34 = arith.constant 0 : index
    %47 = vector.load %arg3[%c1_32, %c0_33, %c0_34] : memref<4x1x8xf32, #tpu.memory_space<vmem>>, vector<1x1x8xf32>
    %48 = vector.shape_cast %47 : vector<1x1x8xf32> to vector<1x8xf32>
    %49 = vector.broadcast %48 : vector<1x8xf32> to vector<8x8xf32>
    %50 = arith.addf %46, %49 : vector<8x8xf32>
    %c1_35 = arith.constant 1 : index
    %c0_36 = arith.constant 0 : index
    %c0_37 = arith.constant 0 : index
    %51 = vector.load %arg4[%c1_35, %c0_36, %c0_37] : memref<4x32x8xbf16, #tpu.memory_space<vmem>>, vector<1x32x8xbf16>
    %52 = vector.shape_cast %51 : vector<1x32x8xbf16> to vector<32x8xbf16>
    %cst_38 = arith.constant dense<0.000000e+00> : vector<8x8xf32>
    %53 = tpu.matmul %2, %52, %cst_38 {dimension_numbers = #tpu.dot_dimension_numbers<[1], [0], [0], [1], [0, 0, 1, 1], [], []>} : vector<8x32xbf16>, vector<32x8xbf16>, vector<8x8xf32> -> vector<8x8xf32>
    %c1_39 = arith.constant 1 : index
    %c0_40 = arith.constant 0 : index
    %c0_41 = arith.constant 0 : index
    %54 = vector.load %arg5[%c1_39, %c0_40, %c0_41] : memref<4x1x8xf32, #tpu.memory_space<vmem>>, vector<1x1x8xf32>
    %55 = vector.shape_cast %54 : vector<1x1x8xf32> to vector<1x8xf32>
    %56 = vector.broadcast %55 : vector<1x8xf32> to vector<8x8xf32>
    %57 = arith.addf %53, %56 : vector<8x8xf32>
    %c1_42 = arith.constant 1 : index
    %c0_43 = arith.constant 0 : index
    %c0_44 = arith.constant 0 : index
    %58 = vector.load %arg6[%c1_42, %c0_43, %c0_44] : memref<4x32x8xbf16, #tpu.memory_space<vmem>>, vector<1x32x8xbf16>
    %59 = vector.shape_cast %58 : vector<1x32x8xbf16> to vector<32x8xbf16>
    %cst_45 = arith.constant dense<0.000000e+00> : vector<8x8xf32>
    %60 = tpu.matmul %2, %59, %cst_45 {dimension_numbers = #tpu.dot_dimension_numbers<[1], [0], [0], [1], [0, 0, 1, 1], [], []>} : vector<8x32xbf16>, vector<32x8xbf16>, vector<8x8xf32> -> vector<8x8xf32>
    %c1_46 = arith.constant 1 : index
    %c0_47 = arith.constant 0 : index
    %c0_48 = arith.constant 0 : index
    %61 = vector.load %arg7[%c1_46, %c0_47, %c0_48] : memref<4x1x8xf32, #tpu.memory_space<vmem>>, vector<1x1x8xf32>
    %62 = vector.shape_cast %61 : vector<1x1x8xf32> to vector<1x8xf32>
    %63 = vector.broadcast %62 : vector<1x8xf32> to vector<8x8xf32>
    %64 = arith.addf %60, %63 : vector<8x8xf32>
    %65 = arith.truncf %50 : vector<8x8xf32> to vector<8x8xbf16>
    %66 = arith.truncf %57 : vector<8x8xf32> to vector<8x8xbf16>
    %cst_49 = arith.constant dense<0.000000e+00> : vector<8x8xf32>
    %67 = tpu.matmul %65, %66, %cst_49 {dimension_numbers = #tpu.dot_dimension_numbers<[1], [1], [0], [0], [0, 0, 1, 0], [], []>} : vector<8x8xbf16>, vector<8x8xbf16>, vector<8x8xf32> -> vector<8x8xf32>
    %cst_50 = arith.constant dense<0xFF800000> : vector<8xf32>
    %68 = vector.multi_reduction <maximumf>, %67, %cst_50 [1] : vector<8x8xf32> to vector<8xf32>
    %69 = vector.shape_cast %68 : vector<8xf32> to vector<8x1xf32>
    %70 = vector.broadcast %69 : vector<8x1xf32> to vector<8x8xf32>
    %71 = arith.subf %67, %70 : vector<8x8xf32>
    %72 = math.exp %71 : vector<8x8xf32>
    %cst_51 = arith.constant dense<0.000000e+00> : vector<8xf32>
    %73 = vector.multi_reduction <add>, %72, %cst_51 [1] : vector<8x8xf32> to vector<8xf32>
    %74 = vector.shape_cast %73 : vector<8xf32> to vector<8x1xf32>
    %75 = tpu.reciprocal %74 {approx = true} : vector<8x1xf32> -> vector<8x1xf32>
    %76 = vector.broadcast %75 : vector<8x1xf32> to vector<8x8xf32>
    %77 = arith.mulf %72, %76 : vector<8x8xf32>
    %78 = arith.truncf %77 : vector<8x8xf32> to vector<8x8xbf16>
    %79 = arith.truncf %64 : vector<8x8xf32> to vector<8x8xbf16>
    %cst_52 = arith.constant dense<0.000000e+00> : vector<8x8xf32>
    %80 = tpu.matmul %78, %79, %cst_52 {dimension_numbers = #tpu.dot_dimension_numbers<[1], [0], [0], [1], [0, 0, 1, 1], [], []>} : vector<8x8xbf16>, vector<8x8xbf16>, vector<8x8xf32> -> vector<8x8xf32>
    %81 = arith.truncf %80 : vector<8x8xf32> to vector<8x8xbf16>
    %c1_53 = arith.constant 1 : index
    %c0_54 = arith.constant 0 : index
    %c0_55 = arith.constant 0 : index
    %82 = vector.load %arg8[%c1_53, %c0_54, %c0_55] : memref<4x8x32xbf16, #tpu.memory_space<vmem>>, vector<1x8x32xbf16>
    %83 = vector.shape_cast %82 : vector<1x8x32xbf16> to vector<8x32xbf16>
    %cst_56 = arith.constant dense<0.000000e+00> : vector<8x32xf32>
    %84 = tpu.matmul %81, %83, %cst_56 {dimension_numbers = #tpu.dot_dimension_numbers<[1], [0], [0], [1], [0, 0, 1, 1], [], []>} : vector<8x8xbf16>, vector<8x32xbf16>, vector<8x32xf32> -> vector<8x32xf32>
    %85 = arith.addf %43, %84 : vector<8x32xf32>
    %c2 = arith.constant 2 : index
    %c0_57 = arith.constant 0 : index
    %c0_58 = arith.constant 0 : index
    %86 = vector.load %arg2[%c2, %c0_57, %c0_58] : memref<4x32x8xbf16, #tpu.memory_space<vmem>>, vector<1x32x8xbf16>
    %87 = vector.shape_cast %86 : vector<1x32x8xbf16> to vector<32x8xbf16>
    %cst_59 = arith.constant dense<0.000000e+00> : vector<8x8xf32>
    %88 = tpu.matmul %1, %87, %cst_59 {dimension_numbers = #tpu.dot_dimension_numbers<[1], [0], [0], [1], [0, 0, 1, 1], [], []>} : vector<8x32xbf16>, vector<32x8xbf16>, vector<8x8xf32> -> vector<8x8xf32>
    %c2_60 = arith.constant 2 : index
    %c0_61 = arith.constant 0 : index
    %c0_62 = arith.constant 0 : index
    %89 = vector.load %arg3[%c2_60, %c0_61, %c0_62] : memref<4x1x8xf32, #tpu.memory_space<vmem>>, vector<1x1x8xf32>
    %90 = vector.shape_cast %89 : vector<1x1x8xf32> to vector<1x8xf32>
    %91 = vector.broadcast %90 : vector<1x8xf32> to vector<8x8xf32>
    %92 = arith.addf %88, %91 : vector<8x8xf32>
    %c2_63 = arith.constant 2 : index
    %c0_64 = arith.constant 0 : index
    %c0_65 = arith.constant 0 : index
    %93 = vector.load %arg4[%c2_63, %c0_64, %c0_65] : memref<4x32x8xbf16, #tpu.memory_space<vmem>>, vector<1x32x8xbf16>
    %94 = vector.shape_cast %93 : vector<1x32x8xbf16> to vector<32x8xbf16>
    %cst_66 = arith.constant dense<0.000000e+00> : vector<8x8xf32>
    %95 = tpu.matmul %2, %94, %cst_66 {dimension_numbers = #tpu.dot_dimension_numbers<[1], [0], [0], [1], [0, 0, 1, 1], [], []>} : vector<8x32xbf16>, vector<32x8xbf16>, vector<8x8xf32> -> vector<8x8xf32>
    %c2_67 = arith.constant 2 : index
    %c0_68 = arith.constant 0 : index
    %c0_69 = arith.constant 0 : index
    %96 = vector.load %arg5[%c2_67, %c0_68, %c0_69] : memref<4x1x8xf32, #tpu.memory_space<vmem>>, vector<1x1x8xf32>
    %97 = vector.shape_cast %96 : vector<1x1x8xf32> to vector<1x8xf32>
    %98 = vector.broadcast %97 : vector<1x8xf32> to vector<8x8xf32>
    %99 = arith.addf %95, %98 : vector<8x8xf32>
    %c2_70 = arith.constant 2 : index
    %c0_71 = arith.constant 0 : index
    %c0_72 = arith.constant 0 : index
    %100 = vector.load %arg6[%c2_70, %c0_71, %c0_72] : memref<4x32x8xbf16, #tpu.memory_space<vmem>>, vector<1x32x8xbf16>
    %101 = vector.shape_cast %100 : vector<1x32x8xbf16> to vector<32x8xbf16>
    %cst_73 = arith.constant dense<0.000000e+00> : vector<8x8xf32>
    %102 = tpu.matmul %2, %101, %cst_73 {dimension_numbers = #tpu.dot_dimension_numbers<[1], [0], [0], [1], [0, 0, 1, 1], [], []>} : vector<8x32xbf16>, vector<32x8xbf16>, vector<8x8xf32> -> vector<8x8xf32>
    %c2_74 = arith.constant 2 : index
    %c0_75 = arith.constant 0 : index
    %c0_76 = arith.constant 0 : index
    %103 = vector.load %arg7[%c2_74, %c0_75, %c0_76] : memref<4x1x8xf32, #tpu.memory_space<vmem>>, vector<1x1x8xf32>
    %104 = vector.shape_cast %103 : vector<1x1x8xf32> to vector<1x8xf32>
    %105 = vector.broadcast %104 : vector<1x8xf32> to vector<8x8xf32>
    %106 = arith.addf %102, %105 : vector<8x8xf32>
    %107 = arith.truncf %92 : vector<8x8xf32> to vector<8x8xbf16>
    %108 = arith.truncf %99 : vector<8x8xf32> to vector<8x8xbf16>
    %cst_77 = arith.constant dense<0.000000e+00> : vector<8x8xf32>
    %109 = tpu.matmul %107, %108, %cst_77 {dimension_numbers = #tpu.dot_dimension_numbers<[1], [1], [0], [0], [0, 0, 1, 0], [], []>} : vector<8x8xbf16>, vector<8x8xbf16>, vector<8x8xf32> -> vector<8x8xf32>
    %cst_78 = arith.constant dense<0xFF800000> : vector<8xf32>
    %110 = vector.multi_reduction <maximumf>, %109, %cst_78 [1] : vector<8x8xf32> to vector<8xf32>
    %111 = vector.shape_cast %110 : vector<8xf32> to vector<8x1xf32>
    %112 = vector.broadcast %111 : vector<8x1xf32> to vector<8x8xf32>
    %113 = arith.subf %109, %112 : vector<8x8xf32>
    %114 = math.exp %113 : vector<8x8xf32>
    %cst_79 = arith.constant dense<0.000000e+00> : vector<8xf32>
    %115 = vector.multi_reduction <add>, %114, %cst_79 [1] : vector<8x8xf32> to vector<8xf32>
    %116 = vector.shape_cast %115 : vector<8xf32> to vector<8x1xf32>
    %117 = tpu.reciprocal %116 {approx = true} : vector<8x1xf32> -> vector<8x1xf32>
    %118 = vector.broadcast %117 : vector<8x1xf32> to vector<8x8xf32>
    %119 = arith.mulf %114, %118 : vector<8x8xf32>
    %120 = arith.truncf %119 : vector<8x8xf32> to vector<8x8xbf16>
    %121 = arith.truncf %106 : vector<8x8xf32> to vector<8x8xbf16>
    %cst_80 = arith.constant dense<0.000000e+00> : vector<8x8xf32>
    %122 = tpu.matmul %120, %121, %cst_80 {dimension_numbers = #tpu.dot_dimension_numbers<[1], [0], [0], [1], [0, 0, 1, 1], [], []>} : vector<8x8xbf16>, vector<8x8xbf16>, vector<8x8xf32> -> vector<8x8xf32>
    %123 = arith.truncf %122 : vector<8x8xf32> to vector<8x8xbf16>
    %c2_81 = arith.constant 2 : index
    %c0_82 = arith.constant 0 : index
    %c0_83 = arith.constant 0 : index
    %124 = vector.load %arg8[%c2_81, %c0_82, %c0_83] : memref<4x8x32xbf16, #tpu.memory_space<vmem>>, vector<1x8x32xbf16>
    %125 = vector.shape_cast %124 : vector<1x8x32xbf16> to vector<8x32xbf16>
    %cst_84 = arith.constant dense<0.000000e+00> : vector<8x32xf32>
    %126 = tpu.matmul %123, %125, %cst_84 {dimension_numbers = #tpu.dot_dimension_numbers<[1], [0], [0], [1], [0, 0, 1, 1], [], []>} : vector<8x8xbf16>, vector<8x32xbf16>, vector<8x32xf32> -> vector<8x32xf32>
    %127 = arith.addf %85, %126 : vector<8x32xf32>
    %c3 = arith.constant 3 : index
    %c0_85 = arith.constant 0 : index
    %c0_86 = arith.constant 0 : index
    %128 = vector.load %arg2[%c3, %c0_85, %c0_86] : memref<4x32x8xbf16, #tpu.memory_space<vmem>>, vector<1x32x8xbf16>
    %129 = vector.shape_cast %128 : vector<1x32x8xbf16> to vector<32x8xbf16>
    %cst_87 = arith.constant dense<0.000000e+00> : vector<8x8xf32>
    %130 = tpu.matmul %1, %129, %cst_87 {dimension_numbers = #tpu.dot_dimension_numbers<[1], [0], [0], [1], [0, 0, 1, 1], [], []>} : vector<8x32xbf16>, vector<32x8xbf16>, vector<8x8xf32> -> vector<8x8xf32>
    %c3_88 = arith.constant 3 : index
    %c0_89 = arith.constant 0 : index
    %c0_90 = arith.constant 0 : index
    %131 = vector.load %arg3[%c3_88, %c0_89, %c0_90] : memref<4x1x8xf32, #tpu.memory_space<vmem>>, vector<1x1x8xf32>
    %132 = vector.shape_cast %131 : vector<1x1x8xf32> to vector<1x8xf32>
    %133 = vector.broadcast %132 : vector<1x8xf32> to vector<8x8xf32>
    %134 = arith.addf %130, %133 : vector<8x8xf32>
    %c3_91 = arith.constant 3 : index
    %c0_92 = arith.constant 0 : index
    %c0_93 = arith.constant 0 : index
    %135 = vector.load %arg4[%c3_91, %c0_92, %c0_93] : memref<4x32x8xbf16, #tpu.memory_space<vmem>>, vector<1x32x8xbf16>
    %136 = vector.shape_cast %135 : vector<1x32x8xbf16> to vector<32x8xbf16>
    %cst_94 = arith.constant dense<0.000000e+00> : vector<8x8xf32>
    %137 = tpu.matmul %2, %136, %cst_94 {dimension_numbers = #tpu.dot_dimension_numbers<[1], [0], [0], [1], [0, 0, 1, 1], [], []>} : vector<8x32xbf16>, vector<32x8xbf16>, vector<8x8xf32> -> vector<8x8xf32>
    %c3_95 = arith.constant 3 : index
    %c0_96 = arith.constant 0 : index
    %c0_97 = arith.constant 0 : index
    %138 = vector.load %arg5[%c3_95, %c0_96, %c0_97] : memref<4x1x8xf32, #tpu.memory_space<vmem>>, vector<1x1x8xf32>
    %139 = vector.shape_cast %138 : vector<1x1x8xf32> to vector<1x8xf32>
    %140 = vector.broadcast %139 : vector<1x8xf32> to vector<8x8xf32>
    %141 = arith.addf %137, %140 : vector<8x8xf32>
    %c3_98 = arith.constant 3 : index
    %c0_99 = arith.constant 0 : index
    %c0_100 = arith.constant 0 : index
    %142 = vector.load %arg6[%c3_98, %c0_99, %c0_100] : memref<4x32x8xbf16, #tpu.memory_space<vmem>>, vector<1x32x8xbf16>
    %143 = vector.shape_cast %142 : vector<1x32x8xbf16> to vector<32x8xbf16>
    %cst_101 = arith.constant dense<0.000000e+00> : vector<8x8xf32>
    %144 = tpu.matmul %2, %143, %cst_101 {dimension_numbers = #tpu.dot_dimension_numbers<[1], [0], [0], [1], [0, 0, 1, 1], [], []>} : vector<8x32xbf16>, vector<32x8xbf16>, vector<8x8xf32> -> vector<8x8xf32>
    %c3_102 = arith.constant 3 : index
    %c0_103 = arith.constant 0 : index
    %c0_104 = arith.constant 0 : index
    %145 = vector.load %arg7[%c3_102, %c0_103, %c0_104] : memref<4x1x8xf32, #tpu.memory_space<vmem>>, vector<1x1x8xf32>
    %146 = vector.shape_cast %145 : vector<1x1x8xf32> to vector<1x8xf32>
    %147 = vector.broadcast %146 : vector<1x8xf32> to vector<8x8xf32>
    %148 = arith.addf %144, %147 : vector<8x8xf32>
    %149 = arith.truncf %134 : vector<8x8xf32> to vector<8x8xbf16>
    %150 = arith.truncf %141 : vector<8x8xf32> to vector<8x8xbf16>
    %cst_105 = arith.constant dense<0.000000e+00> : vector<8x8xf32>
    %151 = tpu.matmul %149, %150, %cst_105 {dimension_numbers = #tpu.dot_dimension_numbers<[1], [1], [0], [0], [0, 0, 1, 0], [], []>} : vector<8x8xbf16>, vector<8x8xbf16>, vector<8x8xf32> -> vector<8x8xf32>
    %cst_106 = arith.constant dense<0xFF800000> : vector<8xf32>
    %152 = vector.multi_reduction <maximumf>, %151, %cst_106 [1] : vector<8x8xf32> to vector<8xf32>
    %153 = vector.shape_cast %152 : vector<8xf32> to vector<8x1xf32>
    %154 = vector.broadcast %153 : vector<8x1xf32> to vector<8x8xf32>
    %155 = arith.subf %151, %154 : vector<8x8xf32>
    %156 = math.exp %155 : vector<8x8xf32>
    %cst_107 = arith.constant dense<0.000000e+00> : vector<8xf32>
    %157 = vector.multi_reduction <add>, %156, %cst_107 [1] : vector<8x8xf32> to vector<8xf32>
    %158 = vector.shape_cast %157 : vector<8xf32> to vector<8x1xf32>
    %159 = tpu.reciprocal %158 {approx = true} : vector<8x1xf32> -> vector<8x1xf32>
    %160 = vector.broadcast %159 : vector<8x1xf32> to vector<8x8xf32>
    %161 = arith.mulf %156, %160 : vector<8x8xf32>
    %162 = arith.truncf %161 : vector<8x8xf32> to vector<8x8xbf16>
    %163 = arith.truncf %148 : vector<8x8xf32> to vector<8x8xbf16>
    %cst_108 = arith.constant dense<0.000000e+00> : vector<8x8xf32>
    %164 = tpu.matmul %162, %163, %cst_108 {dimension_numbers = #tpu.dot_dimension_numbers<[1], [0], [0], [1], [0, 0, 1, 1], [], []>} : vector<8x8xbf16>, vector<8x8xbf16>, vector<8x8xf32> -> vector<8x8xf32>
    %165 = arith.truncf %164 : vector<8x8xf32> to vector<8x8xbf16>
    %c3_109 = arith.constant 3 : index
    %c0_110 = arith.constant 0 : index
    %c0_111 = arith.constant 0 : index
    %166 = vector.load %arg8[%c3_109, %c0_110, %c0_111] : memref<4x8x32xbf16, #tpu.memory_space<vmem>>, vector<1x8x32xbf16>
    %167 = vector.shape_cast %166 : vector<1x8x32xbf16> to vector<8x32xbf16>
    %cst_112 = arith.constant dense<0.000000e+00> : vector<8x32xf32>
    %168 = tpu.matmul %165, %167, %cst_112 {dimension_numbers = #tpu.dot_dimension_numbers<[1], [0], [0], [1], [0, 0, 1, 1], [], []>} : vector<8x8xbf16>, vector<8x32xbf16>, vector<8x32xf32> -> vector<8x32xf32>
    %169 = arith.addf %127, %168 : vector<8x32xf32>
    %c0_113 = arith.constant 0 : index
    %c0_114 = arith.constant 0 : index
    %170 = vector.load %arg9[%c0_113, %c0_114] : memref<1x32xf32, #tpu.memory_space<vmem>>, vector<1x32xf32>
    %171 = vector.broadcast %170 : vector<1x32xf32> to vector<8x32xf32>
    %172 = arith.addf %169, %171 : vector<8x32xf32>
    %173 = arith.addf %0, %172 : vector<8x32xf32>
    %cst_115 = arith.constant dense<0.000000e+00> : vector<8xf32>
    %174 = vector.multi_reduction <add>, %173, %cst_115 [1] : vector<8x32xf32> to vector<8xf32>
    %175 = vector.shape_cast %174 : vector<8xf32> to vector<8x1xf32>
    %cst_116 = arith.constant 3.200000e+01 : f32
    %176 = vector.broadcast %cst_116 : f32 to vector<8x1xf32>
    %177 = arith.divf %175, %176 : vector<8x1xf32>
    %178 = vector.broadcast %177 : vector<8x1xf32> to vector<8x32xf32>
    %179 = arith.subf %173, %178 : vector<8x32xf32>
    %180 = arith.mulf %179, %179 : vector<8x32xf32>
    %cst_117 = arith.constant dense<0.000000e+00> : vector<8xf32>
    %181 = vector.multi_reduction <add>, %180, %cst_117 [1] : vector<8x32xf32> to vector<8xf32>
    %182 = vector.shape_cast %181 : vector<8xf32> to vector<8x1xf32>
    %cst_118 = arith.constant 3.200000e+01 : f32
    %183 = vector.broadcast %cst_118 : f32 to vector<8x1xf32>
    %184 = arith.divf %182, %183 : vector<8x1xf32>
    %cst_119 = arith.constant 9.99999974E-6 : f32
    %185 = vector.broadcast %cst_119 : f32 to vector<8x1xf32>
    %186 = arith.addf %184, %185 : vector<8x1xf32>
    %187 = math.rsqrt %186 : vector<8x1xf32>
    %188 = vector.broadcast %187 : vector<8x1xf32> to vector<8x32xf32>
    %189 = arith.mulf %179, %188 : vector<8x32xf32>
    %c0_120 = arith.constant 0 : index
    %c0_121 = arith.constant 0 : index
    %190 = vector.load %arg10[%c0_120, %c0_121] : memref<1x32xf32, #tpu.memory_space<vmem>>, vector<1x32xf32>
    %191 = vector.broadcast %190 : vector<1x32xf32> to vector<8x32xf32>
    %192 = arith.mulf %189, %191 : vector<8x32xf32>
    %c0_122 = arith.constant 0 : index
    %c0_123 = arith.constant 0 : index
    %193 = vector.load %arg11[%c0_122, %c0_123] : memref<1x32xf32, #tpu.memory_space<vmem>>, vector<1x32xf32>
    %194 = vector.broadcast %193 : vector<1x32xf32> to vector<8x32xf32>
    %195 = arith.addf %192, %194 : vector<8x32xf32>
    %196 = arith.truncf %195 : vector<8x32xf32> to vector<8x32xbf16>
    %c0_124 = arith.constant 0 : index
    %c0_125 = arith.constant 0 : index
    %197 = vector.load %arg12[%c0_124, %c0_125] : memref<32x2048xbf16, #tpu.memory_space<vmem>>, vector<32x2048xbf16>
    %cst_126 = arith.constant dense<0.000000e+00> : vector<8x2048xf32>
    %198 = tpu.matmul %196, %197, %cst_126 {dimension_numbers = #tpu.dot_dimension_numbers<[1], [0], [0], [1], [0, 0, 1, 1], [], []>} : vector<8x32xbf16>, vector<32x2048xbf16>, vector<8x2048xf32> -> vector<8x2048xf32>
    %c0_127 = arith.constant 0 : index
    %c0_128 = arith.constant 0 : index
    %199 = vector.load %arg13[%c0_127, %c0_128] : memref<1x2048xf32, #tpu.memory_space<vmem>>, vector<1x2048xf32>
    %200 = vector.broadcast %199 : vector<1x2048xf32> to vector<8x2048xf32>
    %201 = arith.addf %198, %200 : vector<8x2048xf32>
    %cst_129 = arith.constant 0.000000e+00 : f32
    %202 = vector.broadcast %cst_129 : f32 to vector<8x2048xf32>
    %203 = arith.maximumf %201, %202 : vector<8x2048xf32>
    %204 = arith.truncf %203 : vector<8x2048xf32> to vector<8x2048xbf16>
    %c0_130 = arith.constant 0 : index
    %c0_131 = arith.constant 0 : index
    %205 = vector.load %arg14[%c0_130, %c0_131] : memref<2048x32xbf16, #tpu.memory_space<vmem>>, vector<2048x32xbf16>
    %cst_132 = arith.constant dense<0.000000e+00> : vector<8x32xf32>
    %206 = tpu.matmul %204, %205, %cst_132 {dimension_numbers = #tpu.dot_dimension_numbers<[1], [0], [0], [1], [0, 0, 1, 1], [], []>} : vector<8x2048xbf16>, vector<2048x32xbf16>, vector<8x32xf32> -> vector<8x32xf32>
    %c0_133 = arith.constant 0 : index
    %c0_134 = arith.constant 0 : index
    %207 = vector.load %arg15[%c0_133, %c0_134] : memref<1x32xf32, #tpu.memory_space<vmem>>, vector<1x32xf32>
    %208 = vector.broadcast %207 : vector<1x32xf32> to vector<8x32xf32>
    %209 = arith.addf %206, %208 : vector<8x32xf32>
    %210 = arith.addf %195, %209 : vector<8x32xf32>
    %cst_135 = arith.constant dense<0.000000e+00> : vector<8xf32>
    %211 = vector.multi_reduction <add>, %210, %cst_135 [1] : vector<8x32xf32> to vector<8xf32>
    %212 = vector.shape_cast %211 : vector<8xf32> to vector<8x1xf32>
    %cst_136 = arith.constant 3.200000e+01 : f32
    %213 = vector.broadcast %cst_136 : f32 to vector<8x1xf32>
    %214 = arith.divf %212, %213 : vector<8x1xf32>
    %215 = vector.broadcast %214 : vector<8x1xf32> to vector<8x32xf32>
    %216 = arith.subf %210, %215 : vector<8x32xf32>
    %217 = arith.mulf %216, %216 : vector<8x32xf32>
    %cst_137 = arith.constant dense<0.000000e+00> : vector<8xf32>
    %218 = vector.multi_reduction <add>, %217, %cst_137 [1] : vector<8x32xf32> to vector<8xf32>
    %219 = vector.shape_cast %218 : vector<8xf32> to vector<8x1xf32>
    %cst_138 = arith.constant 3.200000e+01 : f32
    %220 = vector.broadcast %cst_138 : f32 to vector<8x1xf32>
    %221 = arith.divf %219, %220 : vector<8x1xf32>
    %cst_139 = arith.constant 9.99999974E-6 : f32
    %222 = vector.broadcast %cst_139 : f32 to vector<8x1xf32>
    %223 = arith.addf %221, %222 : vector<8x1xf32>
    %224 = math.rsqrt %223 : vector<8x1xf32>
    %225 = vector.broadcast %224 : vector<8x1xf32> to vector<8x32xf32>
    %226 = arith.mulf %216, %225 : vector<8x32xf32>
    %c0_140 = arith.constant 0 : index
    %c0_141 = arith.constant 0 : index
    %227 = vector.load %arg16[%c0_140, %c0_141] : memref<1x32xf32, #tpu.memory_space<vmem>>, vector<1x32xf32>
    %228 = vector.broadcast %227 : vector<1x32xf32> to vector<8x32xf32>
    %229 = arith.mulf %226, %228 : vector<8x32xf32>
    %c0_142 = arith.constant 0 : index
    %c0_143 = arith.constant 0 : index
    %230 = vector.load %arg17[%c0_142, %c0_143] : memref<1x32xf32, #tpu.memory_space<vmem>>, vector<1x32xf32>
    %231 = vector.broadcast %230 : vector<1x32xf32> to vector<8x32xf32>
    %232 = arith.addf %229, %231 : vector<8x32xf32>
    %c0_144 = arith.constant 0 : index
    %c0_145 = arith.constant 0 : index
    %233 = vector.load %arg18[%c0_144, %c0_145] : memref<8x32xf32, #tpu.memory_space<vmem>>, vector<8x32xf32>
    tpu.vector_store %arg18[%c0_144, %c0_145], %232 {strides = array<i32>} : memref<8x32xf32, #tpu.memory_space<vmem>>, vector<8x32xf32>,
    return
  }
  func.func @transform_0(%arg0: i32) -> (i32, i32) {
    %c0_i32 = arith.constant 0 : i32
    %c0_i32_0 = arith.constant 0 : i32
    return %arg0, %c0_i32 : i32, i32
  }
  func.func @transform_1(%arg0: i32) -> (i32, i32, i32) {
    %c0_i32 = arith.constant 0 : i32
    %c0_i32_0 = arith.constant 0 : i32
    %c0_i32_1 = arith.constant 0 : i32
    %c0_i32_2 = arith.constant 0 : i32
    return %c0_i32, %c0_i32_0, %c0_i32_1 : i32, i32, i32
  }
  func.func @transform_2(%arg0: i32) -> (i32, i32, i32) {
    %c0_i32 = arith.constant 0 : i32
    %c0_i32_0 = arith.constant 0 : i32
    %c0_i32_1 = arith.constant 0 : i32
    %c0_i32_2 = arith.constant 0 : i32
    return %c0_i32, %c0_i32_0, %c0_i32_1 : i32, i32, i32
  }
  func.func @transform_3(%arg0: i32) -> (i32, i32, i32) {
    %c0_i32 = arith.constant 0 : i32
    %c0_i32_0 = arith.constant 0 : i32
    %c0_i32_1 = arith.constant 0 : i32
    %c0_i32_2 = arith.constant 0 : i32
    return %c0_i32, %c0_i32_0, %c0_i32_1 : i32, i32, i32
  }
  func.func @transform_4(%arg0: i32) -> (i32, i32, i32) {
    %c0_i32 = arith.constant 0 : i32
    %c0_i32_0 = arith.constant 0 : i32
    %c0_i32_1 = arith.constant 0 : i32
    %c0_i32_2 = arith.constant 0 : i32
    return %c0_i32, %c0_i32_0, %c0_i32_1 : i32, i32, i32
  }
  func.func @transform_5(%arg0: i32) -> (i32, i32, i32) {
    %c0_i32 = arith.constant 0 : i32
    %c0_i32_0 = arith.constant 0 : i32
    %c0_i32_1 = arith.constant 0 : i32
    %c0_i32_2 = arith.constant 0 : i32
    return %c0_i32, %c0_i32_0, %c0_i32_1 : i32, i32, i32
  }
  func.func @transform_6(%arg0: i32) -> (i32, i32, i32) {
    %c0_i32 = arith.constant 0 : i32
    %c0_i32_0 = arith.constant 0 : i32
    %c0_i32_1 = arith.constant 0 : i32
    %c0_i32_2 = arith.constant 0 : i32
    return %c0_i32, %c0_i32_0, %c0_i32_1 : i32, i32, i32
  }
  func.func @transform_7(%arg0: i32) -> (i32, i32, i32) {
    %c0_i32 = arith.constant 0 : i32
    %c0_i32_0 = arith.constant 0 : i32
    %c0_i32_1 = arith.constant 0 : i32
    %c0_i32_2 = arith.constant 0 : i32
    return %c0_i32, %c0_i32_0, %c0_i32_1 : i32, i32, i32
  }
  func.func @transform_8(%arg0: i32) -> (i32, i32) {
    %c0_i32 = arith.constant 0 : i32
    %c0_i32_0 = arith.constant 0 : i32
    %c0_i32_1 = arith.constant 0 : i32
    return %c0_i32, %c0_i32_0 : i32, i32
  }
  func.func @transform_9(%arg0: i32) -> (i32, i32) {
    %c0_i32 = arith.constant 0 : i32
    %c0_i32_0 = arith.constant 0 : i32
    %c0_i32_1 = arith.constant 0 : i32
    return %c0_i32, %c0_i32_0 : i32, i32
  }
  func.func @transform_10(%arg0: i32) -> (i32, i32) {
    %c0_i32 = arith.constant 0 : i32
    %c0_i32_0 = arith.constant 0 : i32
    %c0_i32_1 = arith.constant 0 : i32
    return %c0_i32, %c0_i32_0 : i32, i32
  }
  func.func @transform_11(%arg0: i32) -> (i32, i32) {
    %c0_i32 = arith.constant 0 : i32
    %c0_i32_0 = arith.constant 0 : i32
    %c0_i32_1 = arith.constant 0 : i32
    return %c0_i32, %c0_i32_0 : i32, i32
  }
  func.func @transform_12(%arg0: i32) -> (i32, i32) {
    %c0_i32 = arith.constant 0 : i32
    %c0_i32_0 = arith.constant 0 : i32
    %c0_i32_1 = arith.constant 0 : i32
    return %c0_i32, %c0_i32_0 : i32, i32
  }
  func.func @transform_13(%arg0: i32) -> (i32, i32) {
    %c0_i32 = arith.constant 0 : i32
    %c0_i32_0 = arith.constant 0 : i32
    %c0_i32_1 = arith.constant 0 : i32
    return %c0_i32, %c0_i32_0 : i32, i32
  }
  func.func @transform_14(%arg0: i32) -> (i32, i32) {
    %c0_i32 = arith.constant 0 : i32
    %c0_i32_0 = arith.constant 0 : i32
    %c0_i32_1 = arith.constant 0 : i32
    return %c0_i32, %c0_i32_0 : i32, i32
  }
  func.func @transform_15(%arg0: i32) -> (i32, i32) {
    %c0_i32 = arith.constant 0 : i32
    %c0_i32_0 = arith.constant 0 : i32
    %c0_i32_1 = arith.constant 0 : i32
    return %c0_i32, %c0_i32_0 : i32, i32
  }
  func.func @transform_16(%arg0: i32) -> (i32, i32) {
    %c0_i32 = arith.constant 0 : i32
    %c0_i32_0 = arith.constant 0 : i32
    %c0_i32_1 = arith.constant 0 : i32
    return %c0_i32, %c0_i32_0 : i32, i32
  }
  func.func @transform_17(%arg0: i32) -> (i32, i32) {
    %c0_i32 = arith.constant 0 : i32
    %c0_i32_0 = arith.constant 0 : i32
    return %arg0, %c0_i32 : i32, i32
  }
}

module attributes {stable_mosaic.version = 11 : i64} {
  func.func @_final_head_kernel(%arg0: i32, %arg1: memref<2x32xf32, #tpu.memory_space<vmem>>, %arg2: memref<1x32xf32, #tpu.memory_space<vmem>>, %arg3: memref<1x32xf32, #tpu.memory_space<vmem>>, %arg4: memref<32x32xbf16, #tpu.memory_space<vmem>>, %arg5: memref<1x32xf32, #tpu.memory_space<vmem>>, %arg6: memref<2x32xf32, #tpu.memory_space<vmem>>) attributes {dimension_semantics = [#tpu.dimension_semantics<parallel>], iteration_bounds = array<i64: 1>, scalar_prefetch = 0 : i64, scratch_operands = 0 : i64, tpu.core_type = #tpu.core_type<tc>, window_params = [{transform_indices = @transform_0, window_bounds = array<i64: 2, 32>}, {pipeline_mode = #tpu.pipeline_mode<synchronous>, transform_indices = @transform_1, window_bounds = array<i64: 1, 32>}, {pipeline_mode = #tpu.pipeline_mode<synchronous>, transform_indices = @transform_2, window_bounds = array<i64: 1, 32>}, {pipeline_mode = #tpu.pipeline_mode<synchronous>, transform_indices = @transform_3, window_bounds = array<i64: 32, 32>}, {pipeline_mode = #tpu.pipeline_mode<synchronous>, transform_indices = @transform_4, window_bounds = array<i64: 1, 32>}, {transform_indices = @transform_5, window_bounds = array<i64: 2, 32>}]} {
    %c0 = arith.constant 0 : index
    %c0_0 = arith.constant 0 : index
    %0 = vector.load %arg1[%c0, %c0_0] : memref<2x32xf32, #tpu.memory_space<vmem>>, vector<2x32xf32>
    %cst = arith.constant dense<0.000000e+00> : vector<2xf32>
    %1 = vector.multi_reduction <add>, %0, %cst [1] : vector<2x32xf32> to vector<2xf32>
    %2 = vector.shape_cast %1 : vector<2xf32> to vector<2x1xf32>
    %cst_1 = arith.constant 3.200000e+01 : f32
    %3 = vector.broadcast %cst_1 : f32 to vector<2x1xf32>
    %4 = arith.divf %2, %3 : vector<2x1xf32>
    %5 = vector.broadcast %4 : vector<2x1xf32> to vector<2x32xf32>
    %6 = arith.subf %0, %5 : vector<2x32xf32>
    %7 = arith.mulf %6, %6 : vector<2x32xf32>
    %cst_2 = arith.constant dense<0.000000e+00> : vector<2xf32>
    %8 = vector.multi_reduction <add>, %7, %cst_2 [1] : vector<2x32xf32> to vector<2xf32>
    %9 = vector.shape_cast %8 : vector<2xf32> to vector<2x1xf32>
    %cst_3 = arith.constant 3.200000e+01 : f32
    %10 = vector.broadcast %cst_3 : f32 to vector<2x1xf32>
    %11 = arith.divf %9, %10 : vector<2x1xf32>
    %cst_4 = arith.constant 9.99999974E-6 : f32
    %12 = vector.broadcast %cst_4 : f32 to vector<2x1xf32>
    %13 = arith.addf %11, %12 : vector<2x1xf32>
    %14 = math.rsqrt %13 : vector<2x1xf32>
    %15 = vector.broadcast %14 : vector<2x1xf32> to vector<2x32xf32>
    %16 = arith.mulf %6, %15 : vector<2x32xf32>
    %c0_5 = arith.constant 0 : index
    %c0_6 = arith.constant 0 : index
    %17 = vector.load %arg2[%c0_5, %c0_6] : memref<1x32xf32, #tpu.memory_space<vmem>>, vector<1x32xf32>
    %18 = vector.broadcast %17 : vector<1x32xf32> to vector<2x32xf32>
    %19 = arith.mulf %16, %18 : vector<2x32xf32>
    %c0_7 = arith.constant 0 : index
    %c0_8 = arith.constant 0 : index
    %20 = vector.load %arg3[%c0_7, %c0_8] : memref<1x32xf32, #tpu.memory_space<vmem>>, vector<1x32xf32>
    %21 = vector.broadcast %20 : vector<1x32xf32> to vector<2x32xf32>
    %22 = arith.addf %19, %21 : vector<2x32xf32>
    %23 = arith.truncf %22 : vector<2x32xf32> to vector<2x32xbf16>
    %c0_9 = arith.constant 0 : index
    %c0_10 = arith.constant 0 : index
    %24 = vector.load %arg4[%c0_9, %c0_10] : memref<32x32xbf16, #tpu.memory_space<vmem>>, vector<32x32xbf16>
    %cst_11 = arith.constant dense<0.000000e+00> : vector<2x32xf32>
    %25 = tpu.matmul %23, %24, %cst_11 {dimension_numbers = #tpu.dot_dimension_numbers<[1], [0], [0], [1], [0, 0, 1, 1], [], []>} : vector<2x32xbf16>, vector<32x32xbf16>, vector<2x32xf32> -> vector<2x32xf32>
    %c0_12 = arith.constant 0 : index
    %c0_13 = arith.constant 0 : index
    %26 = vector.load %arg5[%c0_12, %c0_13] : memref<1x32xf32, #tpu.memory_space<vmem>>, vector<1x32xf32>
    %27 = vector.broadcast %26 : vector<1x32xf32> to vector<2x32xf32>
    %28 = arith.addf %25, %27 : vector<2x32xf32>
    %c0_14 = arith.constant 0 : index
    %c0_15 = arith.constant 0 : index
    %29 = vector.load %arg6[%c0_14, %c0_15] : memref<2x32xf32, #tpu.memory_space<vmem>>, vector<2x32xf32>
    tpu.vector_store %arg6[%c0_14, %c0_15], %28 {strides = array<i32>} : memref<2x32xf32, #tpu.memory_space<vmem>>, vector<2x32xf32>,
    return
  }
  func.func @transform_0(%arg0: i32) -> (i32, i32) {
    %c0_i32 = arith.constant 0 : i32
    %c0_i32_0 = arith.constant 0 : i32
    return %arg0, %c0_i32 : i32, i32
  }
  func.func @transform_1(%arg0: i32) -> (i32, i32) {
    %c0_i32 = arith.constant 0 : i32
    %c0_i32_0 = arith.constant 0 : i32
    %c0_i32_1 = arith.constant 0 : i32
    return %c0_i32, %c0_i32_0 : i32, i32
  }
  func.func @transform_2(%arg0: i32) -> (i32, i32) {
    %c0_i32 = arith.constant 0 : i32
    %c0_i32_0 = arith.constant 0 : i32
    %c0_i32_1 = arith.constant 0 : i32
    return %c0_i32, %c0_i32_0 : i32, i32
  }
  func.func @transform_3(%arg0: i32) -> (i32, i32) {
    %c0_i32 = arith.constant 0 : i32
    %c0_i32_0 = arith.constant 0 : i32
    %c0_i32_1 = arith.constant 0 : i32
    return %c0_i32, %c0_i32_0 : i32, i32
  }
  func.func @transform_4(%arg0: i32) -> (i32, i32) {
    %c0_i32 = arith.constant 0 : i32
    %c0_i32_0 = arith.constant 0 : i32
    %c0_i32_1 = arith.constant 0 : i32
    return %c0_i32, %c0_i32_0 : i32, i32
  }
  func.func @transform_5(%arg0: i32) -> (i32, i32) {
    %c0_i32 = arith.constant 0 : i32
    %c0_i32_0 = arith.constant 0 : i32
    return %arg0, %c0_i32 : i32, i32
  }
}

module attributes {stable_mosaic.version = 11 : i64} {
  func.func @_decoder_layer_kernel(%arg0: i32, %arg1: memref<8x32xf32, #tpu.memory_space<vmem>>, %arg2: memref<8x32xf32, #tpu.memory_space<vmem>>, %arg3: memref<4x32x8xbf16, #tpu.memory_space<vmem>>, %arg4: memref<4x1x8xf32, #tpu.memory_space<vmem>>, %arg5: memref<4x32x8xbf16, #tpu.memory_space<vmem>>, %arg6: memref<4x1x8xf32, #tpu.memory_space<vmem>>, %arg7: memref<4x32x8xbf16, #tpu.memory_space<vmem>>, %arg8: memref<4x1x8xf32, #tpu.memory_space<vmem>>, %arg9: memref<4x8x32xbf16, #tpu.memory_space<vmem>>, %arg10: memref<1x32xf32, #tpu.memory_space<vmem>>, %arg11: memref<1x32xf32, #tpu.memory_space<vmem>>, %arg12: memref<1x32xf32, #tpu.memory_space<vmem>>, %arg13: memref<4x32x8xbf16, #tpu.memory_space<vmem>>, %arg14: memref<4x1x8xf32, #tpu.memory_space<vmem>>, %arg15: memref<4x32x8xbf16, #tpu.memory_space<vmem>>, %arg16: memref<4x1x8xf32, #tpu.memory_space<vmem>>, %arg17: memref<4x32x8xbf16, #tpu.memory_space<vmem>>, %arg18: memref<4x1x8xf32, #tpu.memory_space<vmem>>, %arg19: memref<4x8x32xbf16, #tpu.memory_space<vmem>>, %arg20: memref<1x32xf32, #tpu.memory_space<vmem>>, %arg21: memref<1x32xf32, #tpu.memory_space<vmem>>, %arg22: memref<1x32xf32, #tpu.memory_space<vmem>>, %arg23: memref<32x2048xbf16, #tpu.memory_space<vmem>>, %arg24: memref<1x2048xf32, #tpu.memory_space<vmem>>, %arg25: memref<2048x32xbf16, #tpu.memory_space<vmem>>, %arg26: memref<1x32xf32, #tpu.memory_space<vmem>>, %arg27: memref<1x32xf32, #tpu.memory_space<vmem>>, %arg28: memref<1x32xf32, #tpu.memory_space<vmem>>, %arg29: memref<8x32xf32, #tpu.memory_space<vmem>>) attributes {dimension_semantics = [#tpu.dimension_semantics<parallel>], iteration_bounds = array<i64: 2>, scalar_prefetch = 0 : i64, scratch_operands = 0 : i64, tpu.core_type = #tpu.core_type<tc>, window_params = [{transform_indices = @transform_0, window_bounds = array<i64: 8, 32>}, {transform_indices = @transform_1, window_bounds = array<i64: 8, 32>}, {pipeline_mode = #tpu.pipeline_mode<synchronous>, transform_indices = @transform_2, window_bounds = array<i64: 4, 32, 8>}, {pipeline_mode = #tpu.pipeline_mode<synchronous>, transform_indices = @transform_3, window_bounds = array<i64: 4, 1, 8>}, {pipeline_mode = #tpu.pipeline_mode<synchronous>, transform_indices = @transform_4, window_bounds = array<i64: 4, 32, 8>}, {pipeline_mode = #tpu.pipeline_mode<synchronous>, transform_indices = @transform_5, window_bounds = array<i64: 4, 1, 8>}, {pipeline_mode = #tpu.pipeline_mode<synchronous>, transform_indices = @transform_6, window_bounds = array<i64: 4, 32, 8>}, {pipeline_mode = #tpu.pipeline_mode<synchronous>, transform_indices = @transform_7, window_bounds = array<i64: 4, 1, 8>}, {pipeline_mode = #tpu.pipeline_mode<synchronous>, transform_indices = @transform_8, window_bounds = array<i64: 4, 8, 32>}, {pipeline_mode = #tpu.pipeline_mode<synchronous>, transform_indices = @transform_9, window_bounds = array<i64: 1, 32>}, {pipeline_mode = #tpu.pipeline_mode<synchronous>, transform_indices = @transform_10, window_bounds = array<i64: 1, 32>}, {pipeline_mode = #tpu.pipeline_mode<synchronous>, transform_indices = @transform_11, window_bounds = array<i64: 1, 32>}, {pipeline_mode = #tpu.pipeline_mode<synchronous>, transform_indices = @transform_12, window_bounds = array<i64: 4, 32, 8>}, {pipeline_mode = #tpu.pipeline_mode<synchronous>, transform_indices = @transform_13, window_bounds = array<i64: 4, 1, 8>}, {pipeline_mode = #tpu.pipeline_mode<synchronous>, transform_indices = @transform_14, window_bounds = array<i64: 4, 32, 8>}, {pipeline_mode = #tpu.pipeline_mode<synchronous>, transform_indices = @transform_15, window_bounds = array<i64: 4, 1, 8>}, {pipeline_mode = #tpu.pipeline_mode<synchronous>, transform_indices = @transform_16, window_bounds = array<i64: 4, 32, 8>}, {pipeline_mode = #tpu.pipeline_mode<synchronous>, transform_indices = @transform_17, window_bounds = array<i64: 4, 1, 8>}, {pipeline_mode = #tpu.pipeline_mode<synchronous>, transform_indices = @transform_18, window_bounds = array<i64: 4, 8, 32>}, {pipeline_mode = #tpu.pipeline_mode<synchronous>, transform_indices = @transform_19, window_bounds = array<i64: 1, 32>}, {pipeline_mode = #tpu.pipeline_mode<synchronous>, transform_indices = @transform_20, window_bounds = array<i64: 1, 32>}, {pipeline_mode = #tpu.pipeline_mode<synchronous>, transform_indices = @transform_21, window_bounds = array<i64: 1, 32>}, {pipeline_mode = #tpu.pipeline_mode<synchronous>, transform_indices = @transform_22, window_bounds = array<i64: 32, 2048>}, {pipeline_mode = #tpu.pipeline_mode<synchronous>, transform_indices = @transform_23, window_bounds = array<i64: 1, 2048>}, {pipeline_mode = #tpu.pipeline_mode<synchronous>, transform_indices = @transform_24, window_bounds = array<i64: 2048, 32>}, {pipeline_mode = #tpu.pipeline_mode<synchronous>, transform_indices = @transform_25, window_bounds = array<i64: 1, 32>}, {pipeline_mode = #tpu.pipeline_mode<synchronous>, transform_indices = @transform_26, window_bounds = array<i64: 1, 32>}, {pipeline_mode = #tpu.pipeline_mode<synchronous>, transform_indices = @transform_27, window_bounds = array<i64: 1, 32>}, {transform_indices = @transform_28, window_bounds = array<i64: 8, 32>}]} {
    %c0 = arith.constant 0 : index
    %c0_0 = arith.constant 0 : index
    %0 = vector.load %arg1[%c0, %c0_0] : memref<8x32xf32, #tpu.memory_space<vmem>>, vector<8x32xf32>
    %c0_1 = arith.constant 0 : index
    %c0_2 = arith.constant 0 : index
    %1 = vector.load %arg2[%c0_1, %c0_2] : memref<8x32xf32, #tpu.memory_space<vmem>>, vector<8x32xf32>
    %2 = arith.truncf %0 : vector<8x32xf32> to vector<8x32xbf16>
    %3 = arith.truncf %0 : vector<8x32xf32> to vector<8x32xbf16>
    %c0_3 = arith.constant 0 : index
    %c0_4 = arith.constant 0 : index
    %c0_5 = arith.constant 0 : index
    %4 = vector.load %arg3[%c0_3, %c0_4, %c0_5] : memref<4x32x8xbf16, #tpu.memory_space<vmem>>, vector<1x32x8xbf16>
    %5 = vector.shape_cast %4 : vector<1x32x8xbf16> to vector<32x8xbf16>
    %cst = arith.constant dense<0.000000e+00> : vector<8x8xf32>
    %6 = tpu.matmul %2, %5, %cst {dimension_numbers = #tpu.dot_dimension_numbers<[1], [0], [0], [1], [0, 0, 1, 1], [], []>} : vector<8x32xbf16>, vector<32x8xbf16>, vector<8x8xf32> -> vector<8x8xf32>
    %c0_6 = arith.constant 0 : index
    %c0_7 = arith.constant 0 : index
    %c0_8 = arith.constant 0 : index
    %7 = vector.load %arg4[%c0_6, %c0_7, %c0_8] : memref<4x1x8xf32, #tpu.memory_space<vmem>>, vector<1x1x8xf32>
    %8 = vector.shape_cast %7 : vector<1x1x8xf32> to vector<1x8xf32>
    %9 = vector.broadcast %8 : vector<1x8xf32> to vector<8x8xf32>
    %10 = arith.addf %6, %9 : vector<8x8xf32>
    %c0_9 = arith.constant 0 : index
    %c0_10 = arith.constant 0 : index
    %c0_11 = arith.constant 0 : index
    %11 = vector.load %arg5[%c0_9, %c0_10, %c0_11] : memref<4x32x8xbf16, #tpu.memory_space<vmem>>, vector<1x32x8xbf16>
    %12 = vector.shape_cast %11 : vector<1x32x8xbf16> to vector<32x8xbf16>
    %cst_12 = arith.constant dense<0.000000e+00> : vector<8x8xf32>
    %13 = tpu.matmul %3, %12, %cst_12 {dimension_numbers = #tpu.dot_dimension_numbers<[1], [0], [0], [1], [0, 0, 1, 1], [], []>} : vector<8x32xbf16>, vector<32x8xbf16>, vector<8x8xf32> -> vector<8x8xf32>
    %c0_13 = arith.constant 0 : index
    %c0_14 = arith.constant 0 : index
    %c0_15 = arith.constant 0 : index
    %14 = vector.load %arg6[%c0_13, %c0_14, %c0_15] : memref<4x1x8xf32, #tpu.memory_space<vmem>>, vector<1x1x8xf32>
    %15 = vector.shape_cast %14 : vector<1x1x8xf32> to vector<1x8xf32>
    %16 = vector.broadcast %15 : vector<1x8xf32> to vector<8x8xf32>
    %17 = arith.addf %13, %16 : vector<8x8xf32>
    %c0_16 = arith.constant 0 : index
    %c0_17 = arith.constant 0 : index
    %c0_18 = arith.constant 0 : index
    %18 = vector.load %arg7[%c0_16, %c0_17, %c0_18] : memref<4x32x8xbf16, #tpu.memory_space<vmem>>, vector<1x32x8xbf16>
    %19 = vector.shape_cast %18 : vector<1x32x8xbf16> to vector<32x8xbf16>
    %cst_19 = arith.constant dense<0.000000e+00> : vector<8x8xf32>
    %20 = tpu.matmul %3, %19, %cst_19 {dimension_numbers = #tpu.dot_dimension_numbers<[1], [0], [0], [1], [0, 0, 1, 1], [], []>} : vector<8x32xbf16>, vector<32x8xbf16>, vector<8x8xf32> -> vector<8x8xf32>
    %c0_20 = arith.constant 0 : index
    %c0_21 = arith.constant 0 : index
    %c0_22 = arith.constant 0 : index
    %21 = vector.load %arg8[%c0_20, %c0_21, %c0_22] : memref<4x1x8xf32, #tpu.memory_space<vmem>>, vector<1x1x8xf32>
    %22 = vector.shape_cast %21 : vector<1x1x8xf32> to vector<1x8xf32>
    %23 = vector.broadcast %22 : vector<1x8xf32> to vector<8x8xf32>
    %24 = arith.addf %20, %23 : vector<8x8xf32>
    %25 = arith.truncf %10 : vector<8x8xf32> to vector<8x8xbf16>
    %26 = arith.truncf %17 : vector<8x8xf32> to vector<8x8xbf16>
    %cst_23 = arith.constant dense<0.000000e+00> : vector<8x8xf32>
    %27 = tpu.matmul %25, %26, %cst_23 {dimension_numbers = #tpu.dot_dimension_numbers<[1], [1], [0], [0], [0, 0, 1, 0], [], []>} : vector<8x8xbf16>, vector<8x8xbf16>, vector<8x8xf32> -> vector<8x8xf32>
    %cst_24 = arith.constant dense<0xFF800000> : vector<8xf32>
    %28 = vector.multi_reduction <maximumf>, %27, %cst_24 [1] : vector<8x8xf32> to vector<8xf32>
    %29 = vector.shape_cast %28 : vector<8xf32> to vector<8x1xf32>
    %30 = vector.broadcast %29 : vector<8x1xf32> to vector<8x8xf32>
    %31 = arith.subf %27, %30 : vector<8x8xf32>
    %32 = math.exp %31 : vector<8x8xf32>
    %cst_25 = arith.constant dense<0.000000e+00> : vector<8xf32>
    %33 = vector.multi_reduction <add>, %32, %cst_25 [1] : vector<8x8xf32> to vector<8xf32>
    %34 = vector.shape_cast %33 : vector<8xf32> to vector<8x1xf32>
    %35 = tpu.reciprocal %34 {approx = true} : vector<8x1xf32> -> vector<8x1xf32>
    %36 = vector.broadcast %35 : vector<8x1xf32> to vector<8x8xf32>
    %37 = arith.mulf %32, %36 : vector<8x8xf32>
    %38 = arith.truncf %37 : vector<8x8xf32> to vector<8x8xbf16>
    %39 = arith.truncf %24 : vector<8x8xf32> to vector<8x8xbf16>
    %cst_26 = arith.constant dense<0.000000e+00> : vector<8x8xf32>
    %40 = tpu.matmul %38, %39, %cst_26 {dimension_numbers = #tpu.dot_dimension_numbers<[1], [0], [0], [1], [0, 0, 1, 1], [], []>} : vector<8x8xbf16>, vector<8x8xbf16>, vector<8x8xf32> -> vector<8x8xf32>
    %41 = arith.truncf %40 : vector<8x8xf32> to vector<8x8xbf16>
    %c0_27 = arith.constant 0 : index
    %c0_28 = arith.constant 0 : index
    %c0_29 = arith.constant 0 : index
    %42 = vector.load %arg9[%c0_27, %c0_28, %c0_29] : memref<4x8x32xbf16, #tpu.memory_space<vmem>>, vector<1x8x32xbf16>
    %43 = vector.shape_cast %42 : vector<1x8x32xbf16> to vector<8x32xbf16>
    %cst_30 = arith.constant dense<0.000000e+00> : vector<8x32xf32>
    %44 = tpu.matmul %41, %43, %cst_30 {dimension_numbers = #tpu.dot_dimension_numbers<[1], [0], [0], [1], [0, 0, 1, 1], [], []>} : vector<8x8xbf16>, vector<8x32xbf16>, vector<8x32xf32> -> vector<8x32xf32>
    %c1 = arith.constant 1 : index
    %c0_31 = arith.constant 0 : index
    %c0_32 = arith.constant 0 : index
    %45 = vector.load %arg3[%c1, %c0_31, %c0_32] : memref<4x32x8xbf16, #tpu.memory_space<vmem>>, vector<1x32x8xbf16>
    %46 = vector.shape_cast %45 : vector<1x32x8xbf16> to vector<32x8xbf16>
    %cst_33 = arith.constant dense<0.000000e+00> : vector<8x8xf32>
    %47 = tpu.matmul %2, %46, %cst_33 {dimension_numbers = #tpu.dot_dimension_numbers<[1], [0], [0], [1], [0, 0, 1, 1], [], []>} : vector<8x32xbf16>, vector<32x8xbf16>, vector<8x8xf32> -> vector<8x8xf32>
    %c1_34 = arith.constant 1 : index
    %c0_35 = arith.constant 0 : index
    %c0_36 = arith.constant 0 : index
    %48 = vector.load %arg4[%c1_34, %c0_35, %c0_36] : memref<4x1x8xf32, #tpu.memory_space<vmem>>, vector<1x1x8xf32>
    %49 = vector.shape_cast %48 : vector<1x1x8xf32> to vector<1x8xf32>
    %50 = vector.broadcast %49 : vector<1x8xf32> to vector<8x8xf32>
    %51 = arith.addf %47, %50 : vector<8x8xf32>
    %c1_37 = arith.constant 1 : index
    %c0_38 = arith.constant 0 : index
    %c0_39 = arith.constant 0 : index
    %52 = vector.load %arg5[%c1_37, %c0_38, %c0_39] : memref<4x32x8xbf16, #tpu.memory_space<vmem>>, vector<1x32x8xbf16>
    %53 = vector.shape_cast %52 : vector<1x32x8xbf16> to vector<32x8xbf16>
    %cst_40 = arith.constant dense<0.000000e+00> : vector<8x8xf32>
    %54 = tpu.matmul %3, %53, %cst_40 {dimension_numbers = #tpu.dot_dimension_numbers<[1], [0], [0], [1], [0, 0, 1, 1], [], []>} : vector<8x32xbf16>, vector<32x8xbf16>, vector<8x8xf32> -> vector<8x8xf32>
    %c1_41 = arith.constant 1 : index
    %c0_42 = arith.constant 0 : index
    %c0_43 = arith.constant 0 : index
    %55 = vector.load %arg6[%c1_41, %c0_42, %c0_43] : memref<4x1x8xf32, #tpu.memory_space<vmem>>, vector<1x1x8xf32>
    %56 = vector.shape_cast %55 : vector<1x1x8xf32> to vector<1x8xf32>
    %57 = vector.broadcast %56 : vector<1x8xf32> to vector<8x8xf32>
    %58 = arith.addf %54, %57 : vector<8x8xf32>
    %c1_44 = arith.constant 1 : index
    %c0_45 = arith.constant 0 : index
    %c0_46 = arith.constant 0 : index
    %59 = vector.load %arg7[%c1_44, %c0_45, %c0_46] : memref<4x32x8xbf16, #tpu.memory_space<vmem>>, vector<1x32x8xbf16>
    %60 = vector.shape_cast %59 : vector<1x32x8xbf16> to vector<32x8xbf16>
    %cst_47 = arith.constant dense<0.000000e+00> : vector<8x8xf32>
    %61 = tpu.matmul %3, %60, %cst_47 {dimension_numbers = #tpu.dot_dimension_numbers<[1], [0], [0], [1], [0, 0, 1, 1], [], []>} : vector<8x32xbf16>, vector<32x8xbf16>, vector<8x8xf32> -> vector<8x8xf32>
    %c1_48 = arith.constant 1 : index
    %c0_49 = arith.constant 0 : index
    %c0_50 = arith.constant 0 : index
    %62 = vector.load %arg8[%c1_48, %c0_49, %c0_50] : memref<4x1x8xf32, #tpu.memory_space<vmem>>, vector<1x1x8xf32>
    %63 = vector.shape_cast %62 : vector<1x1x8xf32> to vector<1x8xf32>
    %64 = vector.broadcast %63 : vector<1x8xf32> to vector<8x8xf32>
    %65 = arith.addf %61, %64 : vector<8x8xf32>
    %66 = arith.truncf %51 : vector<8x8xf32> to vector<8x8xbf16>
    %67 = arith.truncf %58 : vector<8x8xf32> to vector<8x8xbf16>
    %cst_51 = arith.constant dense<0.000000e+00> : vector<8x8xf32>
    %68 = tpu.matmul %66, %67, %cst_51 {dimension_numbers = #tpu.dot_dimension_numbers<[1], [1], [0], [0], [0, 0, 1, 0], [], []>} : vector<8x8xbf16>, vector<8x8xbf16>, vector<8x8xf32> -> vector<8x8xf32>
    %cst_52 = arith.constant dense<0xFF800000> : vector<8xf32>
    %69 = vector.multi_reduction <maximumf>, %68, %cst_52 [1] : vector<8x8xf32> to vector<8xf32>
    %70 = vector.shape_cast %69 : vector<8xf32> to vector<8x1xf32>
    %71 = vector.broadcast %70 : vector<8x1xf32> to vector<8x8xf32>
    %72 = arith.subf %68, %71 : vector<8x8xf32>
    %73 = math.exp %72 : vector<8x8xf32>
    %cst_53 = arith.constant dense<0.000000e+00> : vector<8xf32>
    %74 = vector.multi_reduction <add>, %73, %cst_53 [1] : vector<8x8xf32> to vector<8xf32>
    %75 = vector.shape_cast %74 : vector<8xf32> to vector<8x1xf32>
    %76 = tpu.reciprocal %75 {approx = true} : vector<8x1xf32> -> vector<8x1xf32>
    %77 = vector.broadcast %76 : vector<8x1xf32> to vector<8x8xf32>
    %78 = arith.mulf %73, %77 : vector<8x8xf32>
    %79 = arith.truncf %78 : vector<8x8xf32> to vector<8x8xbf16>
    %80 = arith.truncf %65 : vector<8x8xf32> to vector<8x8xbf16>
    %cst_54 = arith.constant dense<0.000000e+00> : vector<8x8xf32>
    %81 = tpu.matmul %79, %80, %cst_54 {dimension_numbers = #tpu.dot_dimension_numbers<[1], [0], [0], [1], [0, 0, 1, 1], [], []>} : vector<8x8xbf16>, vector<8x8xbf16>, vector<8x8xf32> -> vector<8x8xf32>
    %82 = arith.truncf %81 : vector<8x8xf32> to vector<8x8xbf16>
    %c1_55 = arith.constant 1 : index
    %c0_56 = arith.constant 0 : index
    %c0_57 = arith.constant 0 : index
    %83 = vector.load %arg9[%c1_55, %c0_56, %c0_57] : memref<4x8x32xbf16, #tpu.memory_space<vmem>>, vector<1x8x32xbf16>
    %84 = vector.shape_cast %83 : vector<1x8x32xbf16> to vector<8x32xbf16>
    %cst_58 = arith.constant dense<0.000000e+00> : vector<8x32xf32>
    %85 = tpu.matmul %82, %84, %cst_58 {dimension_numbers = #tpu.dot_dimension_numbers<[1], [0], [0], [1], [0, 0, 1, 1], [], []>} : vector<8x8xbf16>, vector<8x32xbf16>, vector<8x32xf32> -> vector<8x32xf32>
    %86 = arith.addf %44, %85 : vector<8x32xf32>
    %c2 = arith.constant 2 : index
    %c0_59 = arith.constant 0 : index
    %c0_60 = arith.constant 0 : index
    %87 = vector.load %arg3[%c2, %c0_59, %c0_60] : memref<4x32x8xbf16, #tpu.memory_space<vmem>>, vector<1x32x8xbf16>
    %88 = vector.shape_cast %87 : vector<1x32x8xbf16> to vector<32x8xbf16>
    %cst_61 = arith.constant dense<0.000000e+00> : vector<8x8xf32>
    %89 = tpu.matmul %2, %88, %cst_61 {dimension_numbers = #tpu.dot_dimension_numbers<[1], [0], [0], [1], [0, 0, 1, 1], [], []>} : vector<8x32xbf16>, vector<32x8xbf16>, vector<8x8xf32> -> vector<8x8xf32>
    %c2_62 = arith.constant 2 : index
    %c0_63 = arith.constant 0 : index
    %c0_64 = arith.constant 0 : index
    %90 = vector.load %arg4[%c2_62, %c0_63, %c0_64] : memref<4x1x8xf32, #tpu.memory_space<vmem>>, vector<1x1x8xf32>
    %91 = vector.shape_cast %90 : vector<1x1x8xf32> to vector<1x8xf32>
    %92 = vector.broadcast %91 : vector<1x8xf32> to vector<8x8xf32>
    %93 = arith.addf %89, %92 : vector<8x8xf32>
    %c2_65 = arith.constant 2 : index
    %c0_66 = arith.constant 0 : index
    %c0_67 = arith.constant 0 : index
    %94 = vector.load %arg5[%c2_65, %c0_66, %c0_67] : memref<4x32x8xbf16, #tpu.memory_space<vmem>>, vector<1x32x8xbf16>
    %95 = vector.shape_cast %94 : vector<1x32x8xbf16> to vector<32x8xbf16>
    %cst_68 = arith.constant dense<0.000000e+00> : vector<8x8xf32>
    %96 = tpu.matmul %3, %95, %cst_68 {dimension_numbers = #tpu.dot_dimension_numbers<[1], [0], [0], [1], [0, 0, 1, 1], [], []>} : vector<8x32xbf16>, vector<32x8xbf16>, vector<8x8xf32> -> vector<8x8xf32>
    %c2_69 = arith.constant 2 : index
    %c0_70 = arith.constant 0 : index
    %c0_71 = arith.constant 0 : index
    %97 = vector.load %arg6[%c2_69, %c0_70, %c0_71] : memref<4x1x8xf32, #tpu.memory_space<vmem>>, vector<1x1x8xf32>
    %98 = vector.shape_cast %97 : vector<1x1x8xf32> to vector<1x8xf32>
    %99 = vector.broadcast %98 : vector<1x8xf32> to vector<8x8xf32>
    %100 = arith.addf %96, %99 : vector<8x8xf32>
    %c2_72 = arith.constant 2 : index
    %c0_73 = arith.constant 0 : index
    %c0_74 = arith.constant 0 : index
    %101 = vector.load %arg7[%c2_72, %c0_73, %c0_74] : memref<4x32x8xbf16, #tpu.memory_space<vmem>>, vector<1x32x8xbf16>
    %102 = vector.shape_cast %101 : vector<1x32x8xbf16> to vector<32x8xbf16>
    %cst_75 = arith.constant dense<0.000000e+00> : vector<8x8xf32>
    %103 = tpu.matmul %3, %102, %cst_75 {dimension_numbers = #tpu.dot_dimension_numbers<[1], [0], [0], [1], [0, 0, 1, 1], [], []>} : vector<8x32xbf16>, vector<32x8xbf16>, vector<8x8xf32> -> vector<8x8xf32>
    %c2_76 = arith.constant 2 : index
    %c0_77 = arith.constant 0 : index
    %c0_78 = arith.constant 0 : index
    %104 = vector.load %arg8[%c2_76, %c0_77, %c0_78] : memref<4x1x8xf32, #tpu.memory_space<vmem>>, vector<1x1x8xf32>
    %105 = vector.shape_cast %104 : vector<1x1x8xf32> to vector<1x8xf32>
    %106 = vector.broadcast %105 : vector<1x8xf32> to vector<8x8xf32>
    %107 = arith.addf %103, %106 : vector<8x8xf32>
    %108 = arith.truncf %93 : vector<8x8xf32> to vector<8x8xbf16>
    %109 = arith.truncf %100 : vector<8x8xf32> to vector<8x8xbf16>
    %cst_79 = arith.constant dense<0.000000e+00> : vector<8x8xf32>
    %110 = tpu.matmul %108, %109, %cst_79 {dimension_numbers = #tpu.dot_dimension_numbers<[1], [1], [0], [0], [0, 0, 1, 0], [], []>} : vector<8x8xbf16>, vector<8x8xbf16>, vector<8x8xf32> -> vector<8x8xf32>
    %cst_80 = arith.constant dense<0xFF800000> : vector<8xf32>
    %111 = vector.multi_reduction <maximumf>, %110, %cst_80 [1] : vector<8x8xf32> to vector<8xf32>
    %112 = vector.shape_cast %111 : vector<8xf32> to vector<8x1xf32>
    %113 = vector.broadcast %112 : vector<8x1xf32> to vector<8x8xf32>
    %114 = arith.subf %110, %113 : vector<8x8xf32>
    %115 = math.exp %114 : vector<8x8xf32>
    %cst_81 = arith.constant dense<0.000000e+00> : vector<8xf32>
    %116 = vector.multi_reduction <add>, %115, %cst_81 [1] : vector<8x8xf32> to vector<8xf32>
    %117 = vector.shape_cast %116 : vector<8xf32> to vector<8x1xf32>
    %118 = tpu.reciprocal %117 {approx = true} : vector<8x1xf32> -> vector<8x1xf32>
    %119 = vector.broadcast %118 : vector<8x1xf32> to vector<8x8xf32>
    %120 = arith.mulf %115, %119 : vector<8x8xf32>
    %121 = arith.truncf %120 : vector<8x8xf32> to vector<8x8xbf16>
    %122 = arith.truncf %107 : vector<8x8xf32> to vector<8x8xbf16>
    %cst_82 = arith.constant dense<0.000000e+00> : vector<8x8xf32>
    %123 = tpu.matmul %121, %122, %cst_82 {dimension_numbers = #tpu.dot_dimension_numbers<[1], [0], [0], [1], [0, 0, 1, 1], [], []>} : vector<8x8xbf16>, vector<8x8xbf16>, vector<8x8xf32> -> vector<8x8xf32>
    %124 = arith.truncf %123 : vector<8x8xf32> to vector<8x8xbf16>
    %c2_83 = arith.constant 2 : index
    %c0_84 = arith.constant 0 : index
    %c0_85 = arith.constant 0 : index
    %125 = vector.load %arg9[%c2_83, %c0_84, %c0_85] : memref<4x8x32xbf16, #tpu.memory_space<vmem>>, vector<1x8x32xbf16>
    %126 = vector.shape_cast %125 : vector<1x8x32xbf16> to vector<8x32xbf16>
    %cst_86 = arith.constant dense<0.000000e+00> : vector<8x32xf32>
    %127 = tpu.matmul %124, %126, %cst_86 {dimension_numbers = #tpu.dot_dimension_numbers<[1], [0], [0], [1], [0, 0, 1, 1], [], []>} : vector<8x8xbf16>, vector<8x32xbf16>, vector<8x32xf32> -> vector<8x32xf32>
    %128 = arith.addf %86, %127 : vector<8x32xf32>
    %c3 = arith.constant 3 : index
    %c0_87 = arith.constant 0 : index
    %c0_88 = arith.constant 0 : index
    %129 = vector.load %arg3[%c3, %c0_87, %c0_88] : memref<4x32x8xbf16, #tpu.memory_space<vmem>>, vector<1x32x8xbf16>
    %130 = vector.shape_cast %129 : vector<1x32x8xbf16> to vector<32x8xbf16>
    %cst_89 = arith.constant dense<0.000000e+00> : vector<8x8xf32>
    %131 = tpu.matmul %2, %130, %cst_89 {dimension_numbers = #tpu.dot_dimension_numbers<[1], [0], [0], [1], [0, 0, 1, 1], [], []>} : vector<8x32xbf16>, vector<32x8xbf16>, vector<8x8xf32> -> vector<8x8xf32>
    %c3_90 = arith.constant 3 : index
    %c0_91 = arith.constant 0 : index
    %c0_92 = arith.constant 0 : index
    %132 = vector.load %arg4[%c3_90, %c0_91, %c0_92] : memref<4x1x8xf32, #tpu.memory_space<vmem>>, vector<1x1x8xf32>
    %133 = vector.shape_cast %132 : vector<1x1x8xf32> to vector<1x8xf32>
    %134 = vector.broadcast %133 : vector<1x8xf32> to vector<8x8xf32>
    %135 = arith.addf %131, %134 : vector<8x8xf32>
    %c3_93 = arith.constant 3 : index
    %c0_94 = arith.constant 0 : index
    %c0_95 = arith.constant 0 : index
    %136 = vector.load %arg5[%c3_93, %c0_94, %c0_95] : memref<4x32x8xbf16, #tpu.memory_space<vmem>>, vector<1x32x8xbf16>
    %137 = vector.shape_cast %136 : vector<1x32x8xbf16> to vector<32x8xbf16>
    %cst_96 = arith.constant dense<0.000000e+00> : vector<8x8xf32>
    %138 = tpu.matmul %3, %137, %cst_96 {dimension_numbers = #tpu.dot_dimension_numbers<[1], [0], [0], [1], [0, 0, 1, 1], [], []>} : vector<8x32xbf16>, vector<32x8xbf16>, vector<8x8xf32> -> vector<8x8xf32>
    %c3_97 = arith.constant 3 : index
    %c0_98 = arith.constant 0 : index
    %c0_99 = arith.constant 0 : index
    %139 = vector.load %arg6[%c3_97, %c0_98, %c0_99] : memref<4x1x8xf32, #tpu.memory_space<vmem>>, vector<1x1x8xf32>
    %140 = vector.shape_cast %139 : vector<1x1x8xf32> to vector<1x8xf32>
    %141 = vector.broadcast %140 : vector<1x8xf32> to vector<8x8xf32>
    %142 = arith.addf %138, %141 : vector<8x8xf32>
    %c3_100 = arith.constant 3 : index
    %c0_101 = arith.constant 0 : index
    %c0_102 = arith.constant 0 : index
    %143 = vector.load %arg7[%c3_100, %c0_101, %c0_102] : memref<4x32x8xbf16, #tpu.memory_space<vmem>>, vector<1x32x8xbf16>
    %144 = vector.shape_cast %143 : vector<1x32x8xbf16> to vector<32x8xbf16>
    %cst_103 = arith.constant dense<0.000000e+00> : vector<8x8xf32>
    %145 = tpu.matmul %3, %144, %cst_103 {dimension_numbers = #tpu.dot_dimension_numbers<[1], [0], [0], [1], [0, 0, 1, 1], [], []>} : vector<8x32xbf16>, vector<32x8xbf16>, vector<8x8xf32> -> vector<8x8xf32>
    %c3_104 = arith.constant 3 : index
    %c0_105 = arith.constant 0 : index
    %c0_106 = arith.constant 0 : index
    %146 = vector.load %arg8[%c3_104, %c0_105, %c0_106] : memref<4x1x8xf32, #tpu.memory_space<vmem>>, vector<1x1x8xf32>
    %147 = vector.shape_cast %146 : vector<1x1x8xf32> to vector<1x8xf32>
    %148 = vector.broadcast %147 : vector<1x8xf32> to vector<8x8xf32>
    %149 = arith.addf %145, %148 : vector<8x8xf32>
    %150 = arith.truncf %135 : vector<8x8xf32> to vector<8x8xbf16>
    %151 = arith.truncf %142 : vector<8x8xf32> to vector<8x8xbf16>
    %cst_107 = arith.constant dense<0.000000e+00> : vector<8x8xf32>
    %152 = tpu.matmul %150, %151, %cst_107 {dimension_numbers = #tpu.dot_dimension_numbers<[1], [1], [0], [0], [0, 0, 1, 0], [], []>} : vector<8x8xbf16>, vector<8x8xbf16>, vector<8x8xf32> -> vector<8x8xf32>
    %cst_108 = arith.constant dense<0xFF800000> : vector<8xf32>
    %153 = vector.multi_reduction <maximumf>, %152, %cst_108 [1] : vector<8x8xf32> to vector<8xf32>
    %154 = vector.shape_cast %153 : vector<8xf32> to vector<8x1xf32>
    %155 = vector.broadcast %154 : vector<8x1xf32> to vector<8x8xf32>
    %156 = arith.subf %152, %155 : vector<8x8xf32>
    %157 = math.exp %156 : vector<8x8xf32>
    %cst_109 = arith.constant dense<0.000000e+00> : vector<8xf32>
    %158 = vector.multi_reduction <add>, %157, %cst_109 [1] : vector<8x8xf32> to vector<8xf32>
    %159 = vector.shape_cast %158 : vector<8xf32> to vector<8x1xf32>
    %160 = tpu.reciprocal %159 {approx = true} : vector<8x1xf32> -> vector<8x1xf32>
    %161 = vector.broadcast %160 : vector<8x1xf32> to vector<8x8xf32>
    %162 = arith.mulf %157, %161 : vector<8x8xf32>
    %163 = arith.truncf %162 : vector<8x8xf32> to vector<8x8xbf16>
    %164 = arith.truncf %149 : vector<8x8xf32> to vector<8x8xbf16>
    %cst_110 = arith.constant dense<0.000000e+00> : vector<8x8xf32>
    %165 = tpu.matmul %163, %164, %cst_110 {dimension_numbers = #tpu.dot_dimension_numbers<[1], [0], [0], [1], [0, 0, 1, 1], [], []>} : vector<8x8xbf16>, vector<8x8xbf16>, vector<8x8xf32> -> vector<8x8xf32>
    %166 = arith.truncf %165 : vector<8x8xf32> to vector<8x8xbf16>
    %c3_111 = arith.constant 3 : index
    %c0_112 = arith.constant 0 : index
    %c0_113 = arith.constant 0 : index
    %167 = vector.load %arg9[%c3_111, %c0_112, %c0_113] : memref<4x8x32xbf16, #tpu.memory_space<vmem>>, vector<1x8x32xbf16>
    %168 = vector.shape_cast %167 : vector<1x8x32xbf16> to vector<8x32xbf16>
    %cst_114 = arith.constant dense<0.000000e+00> : vector<8x32xf32>
    %169 = tpu.matmul %166, %168, %cst_114 {dimension_numbers = #tpu.dot_dimension_numbers<[1], [0], [0], [1], [0, 0, 1, 1], [], []>} : vector<8x8xbf16>, vector<8x32xbf16>, vector<8x32xf32> -> vector<8x32xf32>
    %170 = arith.addf %128, %169 : vector<8x32xf32>
    %c0_115 = arith.constant 0 : index
    %c0_116 = arith.constant 0 : index
    %171 = vector.load %arg10[%c0_115, %c0_116] : memref<1x32xf32, #tpu.memory_space<vmem>>, vector<1x32xf32>
    %172 = vector.broadcast %171 : vector<1x32xf32> to vector<8x32xf32>
    %173 = arith.addf %170, %172 : vector<8x32xf32>
    %174 = arith.addf %0, %173 : vector<8x32xf32>
    %cst_117 = arith.constant dense<0.000000e+00> : vector<8xf32>
    %175 = vector.multi_reduction <add>, %174, %cst_117 [1] : vector<8x32xf32> to vector<8xf32>
    %176 = vector.shape_cast %175 : vector<8xf32> to vector<8x1xf32>
    %cst_118 = arith.constant 3.200000e+01 : f32
    %177 = vector.broadcast %cst_118 : f32 to vector<8x1xf32>
    %178 = arith.divf %176, %177 : vector<8x1xf32>
    %179 = vector.broadcast %178 : vector<8x1xf32> to vector<8x32xf32>
    %180 = arith.subf %174, %179 : vector<8x32xf32>
    %181 = arith.mulf %180, %180 : vector<8x32xf32>
    %cst_119 = arith.constant dense<0.000000e+00> : vector<8xf32>
    %182 = vector.multi_reduction <add>, %181, %cst_119 [1] : vector<8x32xf32> to vector<8xf32>
    %183 = vector.shape_cast %182 : vector<8xf32> to vector<8x1xf32>
    %cst_120 = arith.constant 3.200000e+01 : f32
    %184 = vector.broadcast %cst_120 : f32 to vector<8x1xf32>
    %185 = arith.divf %183, %184 : vector<8x1xf32>
    %cst_121 = arith.constant 9.99999974E-6 : f32
    %186 = vector.broadcast %cst_121 : f32 to vector<8x1xf32>
    %187 = arith.addf %185, %186 : vector<8x1xf32>
    %188 = math.rsqrt %187 : vector<8x1xf32>
    %189 = vector.broadcast %188 : vector<8x1xf32> to vector<8x32xf32>
    %190 = arith.mulf %180, %189 : vector<8x32xf32>
    %c0_122 = arith.constant 0 : index
    %c0_123 = arith.constant 0 : index
    %191 = vector.load %arg11[%c0_122, %c0_123] : memref<1x32xf32, #tpu.memory_space<vmem>>, vector<1x32xf32>
    %192 = vector.broadcast %191 : vector<1x32xf32> to vector<8x32xf32>
    %193 = arith.mulf %190, %192 : vector<8x32xf32>
    %c0_124 = arith.constant 0 : index
    %c0_125 = arith.constant 0 : index
    %194 = vector.load %arg12[%c0_124, %c0_125] : memref<1x32xf32, #tpu.memory_space<vmem>>, vector<1x32xf32>
    %195 = vector.broadcast %194 : vector<1x32xf32> to vector<8x32xf32>
    %196 = arith.addf %193, %195 : vector<8x32xf32>
    %197 = arith.truncf %196 : vector<8x32xf32> to vector<8x32xbf16>
    %198 = arith.truncf %1 : vector<8x32xf32> to vector<8x32xbf16>
    %c0_126 = arith.constant 0 : index
    %c0_127 = arith.constant 0 : index
    %c0_128 = arith.constant 0 : index
    %199 = vector.load %arg13[%c0_126, %c0_127, %c0_128] : memref<4x32x8xbf16, #tpu.memory_space<vmem>>, vector<1x32x8xbf16>
    %200 = vector.shape_cast %199 : vector<1x32x8xbf16> to vector<32x8xbf16>
    %cst_129 = arith.constant dense<0.000000e+00> : vector<8x8xf32>
    %201 = tpu.matmul %197, %200, %cst_129 {dimension_numbers = #tpu.dot_dimension_numbers<[1], [0], [0], [1], [0, 0, 1, 1], [], []>} : vector<8x32xbf16>, vector<32x8xbf16>, vector<8x8xf32> -> vector<8x8xf32>
    %c0_130 = arith.constant 0 : index
    %c0_131 = arith.constant 0 : index
    %c0_132 = arith.constant 0 : index
    %202 = vector.load %arg14[%c0_130, %c0_131, %c0_132] : memref<4x1x8xf32, #tpu.memory_space<vmem>>, vector<1x1x8xf32>
    %203 = vector.shape_cast %202 : vector<1x1x8xf32> to vector<1x8xf32>
    %204 = vector.broadcast %203 : vector<1x8xf32> to vector<8x8xf32>
    %205 = arith.addf %201, %204 : vector<8x8xf32>
    %c0_133 = arith.constant 0 : index
    %c0_134 = arith.constant 0 : index
    %c0_135 = arith.constant 0 : index
    %206 = vector.load %arg15[%c0_133, %c0_134, %c0_135] : memref<4x32x8xbf16, #tpu.memory_space<vmem>>, vector<1x32x8xbf16>
    %207 = vector.shape_cast %206 : vector<1x32x8xbf16> to vector<32x8xbf16>
    %cst_136 = arith.constant dense<0.000000e+00> : vector<8x8xf32>
    %208 = tpu.matmul %198, %207, %cst_136 {dimension_numbers = #tpu.dot_dimension_numbers<[1], [0], [0], [1], [0, 0, 1, 1], [], []>} : vector<8x32xbf16>, vector<32x8xbf16>, vector<8x8xf32> -> vector<8x8xf32>
    %c0_137 = arith.constant 0 : index
    %c0_138 = arith.constant 0 : index
    %c0_139 = arith.constant 0 : index
    %209 = vector.load %arg16[%c0_137, %c0_138, %c0_139] : memref<4x1x8xf32, #tpu.memory_space<vmem>>, vector<1x1x8xf32>
    %210 = vector.shape_cast %209 : vector<1x1x8xf32> to vector<1x8xf32>
    %211 = vector.broadcast %210 : vector<1x8xf32> to vector<8x8xf32>
    %212 = arith.addf %208, %211 : vector<8x8xf32>
    %c0_140 = arith.constant 0 : index
    %c0_141 = arith.constant 0 : index
    %c0_142 = arith.constant 0 : index
    %213 = vector.load %arg17[%c0_140, %c0_141, %c0_142] : memref<4x32x8xbf16, #tpu.memory_space<vmem>>, vector<1x32x8xbf16>
    %214 = vector.shape_cast %213 : vector<1x32x8xbf16> to vector<32x8xbf16>
    %cst_143 = arith.constant dense<0.000000e+00> : vector<8x8xf32>
    %215 = tpu.matmul %198, %214, %cst_143 {dimension_numbers = #tpu.dot_dimension_numbers<[1], [0], [0], [1], [0, 0, 1, 1], [], []>} : vector<8x32xbf16>, vector<32x8xbf16>, vector<8x8xf32> -> vector<8x8xf32>
    %c0_144 = arith.constant 0 : index
    %c0_145 = arith.constant 0 : index
    %c0_146 = arith.constant 0 : index
    %216 = vector.load %arg18[%c0_144, %c0_145, %c0_146] : memref<4x1x8xf32, #tpu.memory_space<vmem>>, vector<1x1x8xf32>
    %217 = vector.shape_cast %216 : vector<1x1x8xf32> to vector<1x8xf32>
    %218 = vector.broadcast %217 : vector<1x8xf32> to vector<8x8xf32>
    %219 = arith.addf %215, %218 : vector<8x8xf32>
    %220 = arith.truncf %205 : vector<8x8xf32> to vector<8x8xbf16>
    %221 = arith.truncf %212 : vector<8x8xf32> to vector<8x8xbf16>
    %cst_147 = arith.constant dense<0.000000e+00> : vector<8x8xf32>
    %222 = tpu.matmul %220, %221, %cst_147 {dimension_numbers = #tpu.dot_dimension_numbers<[1], [1], [0], [0], [0, 0, 1, 0], [], []>} : vector<8x8xbf16>, vector<8x8xbf16>, vector<8x8xf32> -> vector<8x8xf32>
    %cst_148 = arith.constant dense<0xFF800000> : vector<8xf32>
    %223 = vector.multi_reduction <maximumf>, %222, %cst_148 [1] : vector<8x8xf32> to vector<8xf32>
    %224 = vector.shape_cast %223 : vector<8xf32> to vector<8x1xf32>
    %225 = vector.broadcast %224 : vector<8x1xf32> to vector<8x8xf32>
    %226 = arith.subf %222, %225 : vector<8x8xf32>
    %227 = math.exp %226 : vector<8x8xf32>
    %cst_149 = arith.constant dense<0.000000e+00> : vector<8xf32>
    %228 = vector.multi_reduction <add>, %227, %cst_149 [1] : vector<8x8xf32> to vector<8xf32>
    %229 = vector.shape_cast %228 : vector<8xf32> to vector<8x1xf32>
    %230 = tpu.reciprocal %229 {approx = true} : vector<8x1xf32> -> vector<8x1xf32>
    %231 = vector.broadcast %230 : vector<8x1xf32> to vector<8x8xf32>
    %232 = arith.mulf %227, %231 : vector<8x8xf32>
    %233 = arith.truncf %232 : vector<8x8xf32> to vector<8x8xbf16>
    %234 = arith.truncf %219 : vector<8x8xf32> to vector<8x8xbf16>
    %cst_150 = arith.constant dense<0.000000e+00> : vector<8x8xf32>
    %235 = tpu.matmul %233, %234, %cst_150 {dimension_numbers = #tpu.dot_dimension_numbers<[1], [0], [0], [1], [0, 0, 1, 1], [], []>} : vector<8x8xbf16>, vector<8x8xbf16>, vector<8x8xf32> -> vector<8x8xf32>
    %236 = arith.truncf %235 : vector<8x8xf32> to vector<8x8xbf16>
    %c0_151 = arith.constant 0 : index
    %c0_152 = arith.constant 0 : index
    %c0_153 = arith.constant 0 : index
    %237 = vector.load %arg19[%c0_151, %c0_152, %c0_153] : memref<4x8x32xbf16, #tpu.memory_space<vmem>>, vector<1x8x32xbf16>
    %238 = vector.shape_cast %237 : vector<1x8x32xbf16> to vector<8x32xbf16>
    %cst_154 = arith.constant dense<0.000000e+00> : vector<8x32xf32>
    %239 = tpu.matmul %236, %238, %cst_154 {dimension_numbers = #tpu.dot_dimension_numbers<[1], [0], [0], [1], [0, 0, 1, 1], [], []>} : vector<8x8xbf16>, vector<8x32xbf16>, vector<8x32xf32> -> vector<8x32xf32>
    %c1_155 = arith.constant 1 : index
    %c0_156 = arith.constant 0 : index
    %c0_157 = arith.constant 0 : index
    %240 = vector.load %arg13[%c1_155, %c0_156, %c0_157] : memref<4x32x8xbf16, #tpu.memory_space<vmem>>, vector<1x32x8xbf16>
    %241 = vector.shape_cast %240 : vector<1x32x8xbf16> to vector<32x8xbf16>
    %cst_158 = arith.constant dense<0.000000e+00> : vector<8x8xf32>
    %242 = tpu.matmul %197, %241, %cst_158 {dimension_numbers = #tpu.dot_dimension_numbers<[1], [0], [0], [1], [0, 0, 1, 1], [], []>} : vector<8x32xbf16>, vector<32x8xbf16>, vector<8x8xf32> -> vector<8x8xf32>
    %c1_159 = arith.constant 1 : index
    %c0_160 = arith.constant 0 : index
    %c0_161 = arith.constant 0 : index
    %243 = vector.load %arg14[%c1_159, %c0_160, %c0_161] : memref<4x1x8xf32, #tpu.memory_space<vmem>>, vector<1x1x8xf32>
    %244 = vector.shape_cast %243 : vector<1x1x8xf32> to vector<1x8xf32>
    %245 = vector.broadcast %244 : vector<1x8xf32> to vector<8x8xf32>
    %246 = arith.addf %242, %245 : vector<8x8xf32>
    %c1_162 = arith.constant 1 : index
    %c0_163 = arith.constant 0 : index
    %c0_164 = arith.constant 0 : index
    %247 = vector.load %arg15[%c1_162, %c0_163, %c0_164] : memref<4x32x8xbf16, #tpu.memory_space<vmem>>, vector<1x32x8xbf16>
    %248 = vector.shape_cast %247 : vector<1x32x8xbf16> to vector<32x8xbf16>
    %cst_165 = arith.constant dense<0.000000e+00> : vector<8x8xf32>
    %249 = tpu.matmul %198, %248, %cst_165 {dimension_numbers = #tpu.dot_dimension_numbers<[1], [0], [0], [1], [0, 0, 1, 1], [], []>} : vector<8x32xbf16>, vector<32x8xbf16>, vector<8x8xf32> -> vector<8x8xf32>
    %c1_166 = arith.constant 1 : index
    %c0_167 = arith.constant 0 : index
    %c0_168 = arith.constant 0 : index
    %250 = vector.load %arg16[%c1_166, %c0_167, %c0_168] : memref<4x1x8xf32, #tpu.memory_space<vmem>>, vector<1x1x8xf32>
    %251 = vector.shape_cast %250 : vector<1x1x8xf32> to vector<1x8xf32>
    %252 = vector.broadcast %251 : vector<1x8xf32> to vector<8x8xf32>
    %253 = arith.addf %249, %252 : vector<8x8xf32>
    %c1_169 = arith.constant 1 : index
    %c0_170 = arith.constant 0 : index
    %c0_171 = arith.constant 0 : index
    %254 = vector.load %arg17[%c1_169, %c0_170, %c0_171] : memref<4x32x8xbf16, #tpu.memory_space<vmem>>, vector<1x32x8xbf16>
    %255 = vector.shape_cast %254 : vector<1x32x8xbf16> to vector<32x8xbf16>
    %cst_172 = arith.constant dense<0.000000e+00> : vector<8x8xf32>
    %256 = tpu.matmul %198, %255, %cst_172 {dimension_numbers = #tpu.dot_dimension_numbers<[1], [0], [0], [1], [0, 0, 1, 1], [], []>} : vector<8x32xbf16>, vector<32x8xbf16>, vector<8x8xf32> -> vector<8x8xf32>
    %c1_173 = arith.constant 1 : index
    %c0_174 = arith.constant 0 : index
    %c0_175 = arith.constant 0 : index
    %257 = vector.load %arg18[%c1_173, %c0_174, %c0_175] : memref<4x1x8xf32, #tpu.memory_space<vmem>>, vector<1x1x8xf32>
    %258 = vector.shape_cast %257 : vector<1x1x8xf32> to vector<1x8xf32>
    %259 = vector.broadcast %258 : vector<1x8xf32> to vector<8x8xf32>
    %260 = arith.addf %256, %259 : vector<8x8xf32>
    %261 = arith.truncf %246 : vector<8x8xf32> to vector<8x8xbf16>
    %262 = arith.truncf %253 : vector<8x8xf32> to vector<8x8xbf16>
    %cst_176 = arith.constant dense<0.000000e+00> : vector<8x8xf32>
    %263 = tpu.matmul %261, %262, %cst_176 {dimension_numbers = #tpu.dot_dimension_numbers<[1], [1], [0], [0], [0, 0, 1, 0], [], []>} : vector<8x8xbf16>, vector<8x8xbf16>, vector<8x8xf32> -> vector<8x8xf32>
    %cst_177 = arith.constant dense<0xFF800000> : vector<8xf32>
    %264 = vector.multi_reduction <maximumf>, %263, %cst_177 [1] : vector<8x8xf32> to vector<8xf32>
    %265 = vector.shape_cast %264 : vector<8xf32> to vector<8x1xf32>
    %266 = vector.broadcast %265 : vector<8x1xf32> to vector<8x8xf32>
    %267 = arith.subf %263, %266 : vector<8x8xf32>
    %268 = math.exp %267 : vector<8x8xf32>
    %cst_178 = arith.constant dense<0.000000e+00> : vector<8xf32>
    %269 = vector.multi_reduction <add>, %268, %cst_178 [1] : vector<8x8xf32> to vector<8xf32>
    %270 = vector.shape_cast %269 : vector<8xf32> to vector<8x1xf32>
    %271 = tpu.reciprocal %270 {approx = true} : vector<8x1xf32> -> vector<8x1xf32>
    %272 = vector.broadcast %271 : vector<8x1xf32> to vector<8x8xf32>
    %273 = arith.mulf %268, %272 : vector<8x8xf32>
    %274 = arith.truncf %273 : vector<8x8xf32> to vector<8x8xbf16>
    %275 = arith.truncf %260 : vector<8x8xf32> to vector<8x8xbf16>
    %cst_179 = arith.constant dense<0.000000e+00> : vector<8x8xf32>
    %276 = tpu.matmul %274, %275, %cst_179 {dimension_numbers = #tpu.dot_dimension_numbers<[1], [0], [0], [1], [0, 0, 1, 1], [], []>} : vector<8x8xbf16>, vector<8x8xbf16>, vector<8x8xf32> -> vector<8x8xf32>
    %277 = arith.truncf %276 : vector<8x8xf32> to vector<8x8xbf16>
    %c1_180 = arith.constant 1 : index
    %c0_181 = arith.constant 0 : index
    %c0_182 = arith.constant 0 : index
    %278 = vector.load %arg19[%c1_180, %c0_181, %c0_182] : memref<4x8x32xbf16, #tpu.memory_space<vmem>>, vector<1x8x32xbf16>
    %279 = vector.shape_cast %278 : vector<1x8x32xbf16> to vector<8x32xbf16>
    %cst_183 = arith.constant dense<0.000000e+00> : vector<8x32xf32>
    %280 = tpu.matmul %277, %279, %cst_183 {dimension_numbers = #tpu.dot_dimension_numbers<[1], [0], [0], [1], [0, 0, 1, 1], [], []>} : vector<8x8xbf16>, vector<8x32xbf16>, vector<8x32xf32> -> vector<8x32xf32>
    %281 = arith.addf %239, %280 : vector<8x32xf32>
    %c2_184 = arith.constant 2 : index
    %c0_185 = arith.constant 0 : index
    %c0_186 = arith.constant 0 : index
    %282 = vector.load %arg13[%c2_184, %c0_185, %c0_186] : memref<4x32x8xbf16, #tpu.memory_space<vmem>>, vector<1x32x8xbf16>
    %283 = vector.shape_cast %282 : vector<1x32x8xbf16> to vector<32x8xbf16>
    %cst_187 = arith.constant dense<0.000000e+00> : vector<8x8xf32>
    %284 = tpu.matmul %197, %283, %cst_187 {dimension_numbers = #tpu.dot_dimension_numbers<[1], [0], [0], [1], [0, 0, 1, 1], [], []>} : vector<8x32xbf16>, vector<32x8xbf16>, vector<8x8xf32> -> vector<8x8xf32>
    %c2_188 = arith.constant 2 : index
    %c0_189 = arith.constant 0 : index
    %c0_190 = arith.constant 0 : index
    %285 = vector.load %arg14[%c2_188, %c0_189, %c0_190] : memref<4x1x8xf32, #tpu.memory_space<vmem>>, vector<1x1x8xf32>
    %286 = vector.shape_cast %285 : vector<1x1x8xf32> to vector<1x8xf32>
    %287 = vector.broadcast %286 : vector<1x8xf32> to vector<8x8xf32>
    %288 = arith.addf %284, %287 : vector<8x8xf32>
    %c2_191 = arith.constant 2 : index
    %c0_192 = arith.constant 0 : index
    %c0_193 = arith.constant 0 : index
    %289 = vector.load %arg15[%c2_191, %c0_192, %c0_193] : memref<4x32x8xbf16, #tpu.memory_space<vmem>>, vector<1x32x8xbf16>
    %290 = vector.shape_cast %289 : vector<1x32x8xbf16> to vector<32x8xbf16>
    %cst_194 = arith.constant dense<0.000000e+00> : vector<8x8xf32>
    %291 = tpu.matmul %198, %290, %cst_194 {dimension_numbers = #tpu.dot_dimension_numbers<[1], [0], [0], [1], [0, 0, 1, 1], [], []>} : vector<8x32xbf16>, vector<32x8xbf16>, vector<8x8xf32> -> vector<8x8xf32>
    %c2_195 = arith.constant 2 : index
    %c0_196 = arith.constant 0 : index
    %c0_197 = arith.constant 0 : index
    %292 = vector.load %arg16[%c2_195, %c0_196, %c0_197] : memref<4x1x8xf32, #tpu.memory_space<vmem>>, vector<1x1x8xf32>
    %293 = vector.shape_cast %292 : vector<1x1x8xf32> to vector<1x8xf32>
    %294 = vector.broadcast %293 : vector<1x8xf32> to vector<8x8xf32>
    %295 = arith.addf %291, %294 : vector<8x8xf32>
    %c2_198 = arith.constant 2 : index
    %c0_199 = arith.constant 0 : index
    %c0_200 = arith.constant 0 : index
    %296 = vector.load %arg17[%c2_198, %c0_199, %c0_200] : memref<4x32x8xbf16, #tpu.memory_space<vmem>>, vector<1x32x8xbf16>
    %297 = vector.shape_cast %296 : vector<1x32x8xbf16> to vector<32x8xbf16>
    %cst_201 = arith.constant dense<0.000000e+00> : vector<8x8xf32>
    %298 = tpu.matmul %198, %297, %cst_201 {dimension_numbers = #tpu.dot_dimension_numbers<[1], [0], [0], [1], [0, 0, 1, 1], [], []>} : vector<8x32xbf16>, vector<32x8xbf16>, vector<8x8xf32> -> vector<8x8xf32>
    %c2_202 = arith.constant 2 : index
    %c0_203 = arith.constant 0 : index
    %c0_204 = arith.constant 0 : index
    %299 = vector.load %arg18[%c2_202, %c0_203, %c0_204] : memref<4x1x8xf32, #tpu.memory_space<vmem>>, vector<1x1x8xf32>
    %300 = vector.shape_cast %299 : vector<1x1x8xf32> to vector<1x8xf32>
    %301 = vector.broadcast %300 : vector<1x8xf32> to vector<8x8xf32>
    %302 = arith.addf %298, %301 : vector<8x8xf32>
    %303 = arith.truncf %288 : vector<8x8xf32> to vector<8x8xbf16>
    %304 = arith.truncf %295 : vector<8x8xf32> to vector<8x8xbf16>
    %cst_205 = arith.constant dense<0.000000e+00> : vector<8x8xf32>
    %305 = tpu.matmul %303, %304, %cst_205 {dimension_numbers = #tpu.dot_dimension_numbers<[1], [1], [0], [0], [0, 0, 1, 0], [], []>} : vector<8x8xbf16>, vector<8x8xbf16>, vector<8x8xf32> -> vector<8x8xf32>
    %cst_206 = arith.constant dense<0xFF800000> : vector<8xf32>
    %306 = vector.multi_reduction <maximumf>, %305, %cst_206 [1] : vector<8x8xf32> to vector<8xf32>
    %307 = vector.shape_cast %306 : vector<8xf32> to vector<8x1xf32>
    %308 = vector.broadcast %307 : vector<8x1xf32> to vector<8x8xf32>
    %309 = arith.subf %305, %308 : vector<8x8xf32>
    %310 = math.exp %309 : vector<8x8xf32>
    %cst_207 = arith.constant dense<0.000000e+00> : vector<8xf32>
    %311 = vector.multi_reduction <add>, %310, %cst_207 [1] : vector<8x8xf32> to vector<8xf32>
    %312 = vector.shape_cast %311 : vector<8xf32> to vector<8x1xf32>
    %313 = tpu.reciprocal %312 {approx = true} : vector<8x1xf32> -> vector<8x1xf32>
    %314 = vector.broadcast %313 : vector<8x1xf32> to vector<8x8xf32>
    %315 = arith.mulf %310, %314 : vector<8x8xf32>
    %316 = arith.truncf %315 : vector<8x8xf32> to vector<8x8xbf16>
    %317 = arith.truncf %302 : vector<8x8xf32> to vector<8x8xbf16>
    %cst_208 = arith.constant dense<0.000000e+00> : vector<8x8xf32>
    %318 = tpu.matmul %316, %317, %cst_208 {dimension_numbers = #tpu.dot_dimension_numbers<[1], [0], [0], [1], [0, 0, 1, 1], [], []>} : vector<8x8xbf16>, vector<8x8xbf16>, vector<8x8xf32> -> vector<8x8xf32>
    %319 = arith.truncf %318 : vector<8x8xf32> to vector<8x8xbf16>
    %c2_209 = arith.constant 2 : index
    %c0_210 = arith.constant 0 : index
    %c0_211 = arith.constant 0 : index
    %320 = vector.load %arg19[%c2_209, %c0_210, %c0_211] : memref<4x8x32xbf16, #tpu.memory_space<vmem>>, vector<1x8x32xbf16>
    %321 = vector.shape_cast %320 : vector<1x8x32xbf16> to vector<8x32xbf16>
    %cst_212 = arith.constant dense<0.000000e+00> : vector<8x32xf32>
    %322 = tpu.matmul %319, %321, %cst_212 {dimension_numbers = #tpu.dot_dimension_numbers<[1], [0], [0], [1], [0, 0, 1, 1], [], []>} : vector<8x8xbf16>, vector<8x32xbf16>, vector<8x32xf32> -> vector<8x32xf32>
    %323 = arith.addf %281, %322 : vector<8x32xf32>
    %c3_213 = arith.constant 3 : index
    %c0_214 = arith.constant 0 : index
    %c0_215 = arith.constant 0 : index
    %324 = vector.load %arg13[%c3_213, %c0_214, %c0_215] : memref<4x32x8xbf16, #tpu.memory_space<vmem>>, vector<1x32x8xbf16>
    %325 = vector.shape_cast %324 : vector<1x32x8xbf16> to vector<32x8xbf16>
    %cst_216 = arith.constant dense<0.000000e+00> : vector<8x8xf32>
    %326 = tpu.matmul %197, %325, %cst_216 {dimension_numbers = #tpu.dot_dimension_numbers<[1], [0], [0], [1], [0, 0, 1, 1], [], []>} : vector<8x32xbf16>, vector<32x8xbf16>, vector<8x8xf32> -> vector<8x8xf32>
    %c3_217 = arith.constant 3 : index
    %c0_218 = arith.constant 0 : index
    %c0_219 = arith.constant 0 : index
    %327 = vector.load %arg14[%c3_217, %c0_218, %c0_219] : memref<4x1x8xf32, #tpu.memory_space<vmem>>, vector<1x1x8xf32>
    %328 = vector.shape_cast %327 : vector<1x1x8xf32> to vector<1x8xf32>
    %329 = vector.broadcast %328 : vector<1x8xf32> to vector<8x8xf32>
    %330 = arith.addf %326, %329 : vector<8x8xf32>
    %c3_220 = arith.constant 3 : index
    %c0_221 = arith.constant 0 : index
    %c0_222 = arith.constant 0 : index
    %331 = vector.load %arg15[%c3_220, %c0_221, %c0_222] : memref<4x32x8xbf16, #tpu.memory_space<vmem>>, vector<1x32x8xbf16>
    %332 = vector.shape_cast %331 : vector<1x32x8xbf16> to vector<32x8xbf16>
    %cst_223 = arith.constant dense<0.000000e+00> : vector<8x8xf32>
    %333 = tpu.matmul %198, %332, %cst_223 {dimension_numbers = #tpu.dot_dimension_numbers<[1], [0], [0], [1], [0, 0, 1, 1], [], []>} : vector<8x32xbf16>, vector<32x8xbf16>, vector<8x8xf32> -> vector<8x8xf32>
    %c3_224 = arith.constant 3 : index
    %c0_225 = arith.constant 0 : index
    %c0_226 = arith.constant 0 : index
    %334 = vector.load %arg16[%c3_224, %c0_225, %c0_226] : memref<4x1x8xf32, #tpu.memory_space<vmem>>, vector<1x1x8xf32>
    %335 = vector.shape_cast %334 : vector<1x1x8xf32> to vector<1x8xf32>
    %336 = vector.broadcast %335 : vector<1x8xf32> to vector<8x8xf32>
    %337 = arith.addf %333, %336 : vector<8x8xf32>
    %c3_227 = arith.constant 3 : index
    %c0_228 = arith.constant 0 : index
    %c0_229 = arith.constant 0 : index
    %338 = vector.load %arg17[%c3_227, %c0_228, %c0_229] : memref<4x32x8xbf16, #tpu.memory_space<vmem>>, vector<1x32x8xbf16>
    %339 = vector.shape_cast %338 : vector<1x32x8xbf16> to vector<32x8xbf16>
    %cst_230 = arith.constant dense<0.000000e+00> : vector<8x8xf32>
    %340 = tpu.matmul %198, %339, %cst_230 {dimension_numbers = #tpu.dot_dimension_numbers<[1], [0], [0], [1], [0, 0, 1, 1], [], []>} : vector<8x32xbf16>, vector<32x8xbf16>, vector<8x8xf32> -> vector<8x8xf32>
    %c3_231 = arith.constant 3 : index
    %c0_232 = arith.constant 0 : index
    %c0_233 = arith.constant 0 : index
    %341 = vector.load %arg18[%c3_231, %c0_232, %c0_233] : memref<4x1x8xf32, #tpu.memory_space<vmem>>, vector<1x1x8xf32>
    %342 = vector.shape_cast %341 : vector<1x1x8xf32> to vector<1x8xf32>
    %343 = vector.broadcast %342 : vector<1x8xf32> to vector<8x8xf32>
    %344 = arith.addf %340, %343 : vector<8x8xf32>
    %345 = arith.truncf %330 : vector<8x8xf32> to vector<8x8xbf16>
    %346 = arith.truncf %337 : vector<8x8xf32> to vector<8x8xbf16>
    %cst_234 = arith.constant dense<0.000000e+00> : vector<8x8xf32>
    %347 = tpu.matmul %345, %346, %cst_234 {dimension_numbers = #tpu.dot_dimension_numbers<[1], [1], [0], [0], [0, 0, 1, 0], [], []>} : vector<8x8xbf16>, vector<8x8xbf16>, vector<8x8xf32> -> vector<8x8xf32>
    %cst_235 = arith.constant dense<0xFF800000> : vector<8xf32>
    %348 = vector.multi_reduction <maximumf>, %347, %cst_235 [1] : vector<8x8xf32> to vector<8xf32>
    %349 = vector.shape_cast %348 : vector<8xf32> to vector<8x1xf32>
    %350 = vector.broadcast %349 : vector<8x1xf32> to vector<8x8xf32>
    %351 = arith.subf %347, %350 : vector<8x8xf32>
    %352 = math.exp %351 : vector<8x8xf32>
    %cst_236 = arith.constant dense<0.000000e+00> : vector<8xf32>
    %353 = vector.multi_reduction <add>, %352, %cst_236 [1] : vector<8x8xf32> to vector<8xf32>
    %354 = vector.shape_cast %353 : vector<8xf32> to vector<8x1xf32>
    %355 = tpu.reciprocal %354 {approx = true} : vector<8x1xf32> -> vector<8x1xf32>
    %356 = vector.broadcast %355 : vector<8x1xf32> to vector<8x8xf32>
    %357 = arith.mulf %352, %356 : vector<8x8xf32>
    %358 = arith.truncf %357 : vector<8x8xf32> to vector<8x8xbf16>
    %359 = arith.truncf %344 : vector<8x8xf32> to vector<8x8xbf16>
    %cst_237 = arith.constant dense<0.000000e+00> : vector<8x8xf32>
    %360 = tpu.matmul %358, %359, %cst_237 {dimension_numbers = #tpu.dot_dimension_numbers<[1], [0], [0], [1], [0, 0, 1, 1], [], []>} : vector<8x8xbf16>, vector<8x8xbf16>, vector<8x8xf32> -> vector<8x8xf32>
    %361 = arith.truncf %360 : vector<8x8xf32> to vector<8x8xbf16>
    %c3_238 = arith.constant 3 : index
    %c0_239 = arith.constant 0 : index
    %c0_240 = arith.constant 0 : index
    %362 = vector.load %arg19[%c3_238, %c0_239, %c0_240] : memref<4x8x32xbf16, #tpu.memory_space<vmem>>, vector<1x8x32xbf16>
    %363 = vector.shape_cast %362 : vector<1x8x32xbf16> to vector<8x32xbf16>
    %cst_241 = arith.constant dense<0.000000e+00> : vector<8x32xf32>
    %364 = tpu.matmul %361, %363, %cst_241 {dimension_numbers = #tpu.dot_dimension_numbers<[1], [0], [0], [1], [0, 0, 1, 1], [], []>} : vector<8x8xbf16>, vector<8x32xbf16>, vector<8x32xf32> -> vector<8x32xf32>
    %365 = arith.addf %323, %364 : vector<8x32xf32>
    %c0_242 = arith.constant 0 : index
    %c0_243 = arith.constant 0 : index
    %366 = vector.load %arg20[%c0_242, %c0_243] : memref<1x32xf32, #tpu.memory_space<vmem>>, vector<1x32xf32>
    %367 = vector.broadcast %366 : vector<1x32xf32> to vector<8x32xf32>
    %368 = arith.addf %365, %367 : vector<8x32xf32>
    %369 = arith.addf %196, %368 : vector<8x32xf32>
    %cst_244 = arith.constant dense<0.000000e+00> : vector<8xf32>
    %370 = vector.multi_reduction <add>, %369, %cst_244 [1] : vector<8x32xf32> to vector<8xf32>
    %371 = vector.shape_cast %370 : vector<8xf32> to vector<8x1xf32>
    %cst_245 = arith.constant 3.200000e+01 : f32
    %372 = vector.broadcast %cst_245 : f32 to vector<8x1xf32>
    %373 = arith.divf %371, %372 : vector<8x1xf32>
    %374 = vector.broadcast %373 : vector<8x1xf32> to vector<8x32xf32>
    %375 = arith.subf %369, %374 : vector<8x32xf32>
    %376 = arith.mulf %375, %375 : vector<8x32xf32>
    %cst_246 = arith.constant dense<0.000000e+00> : vector<8xf32>
    %377 = vector.multi_reduction <add>, %376, %cst_246 [1] : vector<8x32xf32> to vector<8xf32>
    %378 = vector.shape_cast %377 : vector<8xf32> to vector<8x1xf32>
    %cst_247 = arith.constant 3.200000e+01 : f32
    %379 = vector.broadcast %cst_247 : f32 to vector<8x1xf32>
    %380 = arith.divf %378, %379 : vector<8x1xf32>
    %cst_248 = arith.constant 9.99999974E-6 : f32
    %381 = vector.broadcast %cst_248 : f32 to vector<8x1xf32>
    %382 = arith.addf %380, %381 : vector<8x1xf32>
    %383 = math.rsqrt %382 : vector<8x1xf32>
    %384 = vector.broadcast %383 : vector<8x1xf32> to vector<8x32xf32>
    %385 = arith.mulf %375, %384 : vector<8x32xf32>
    %c0_249 = arith.constant 0 : index
    %c0_250 = arith.constant 0 : index
    %386 = vector.load %arg21[%c0_249, %c0_250] : memref<1x32xf32, #tpu.memory_space<vmem>>, vector<1x32xf32>
    %387 = vector.broadcast %386 : vector<1x32xf32> to vector<8x32xf32>
    %388 = arith.mulf %385, %387 : vector<8x32xf32>
    %c0_251 = arith.constant 0 : index
    %c0_252 = arith.constant 0 : index
    %389 = vector.load %arg22[%c0_251, %c0_252] : memref<1x32xf32, #tpu.memory_space<vmem>>, vector<1x32xf32>
    %390 = vector.broadcast %389 : vector<1x32xf32> to vector<8x32xf32>
    %391 = arith.addf %388, %390 : vector<8x32xf32>
    %392 = arith.truncf %391 : vector<8x32xf32> to vector<8x32xbf16>
    %c0_253 = arith.constant 0 : index
    %c0_254 = arith.constant 0 : index
    %393 = vector.load %arg23[%c0_253, %c0_254] : memref<32x2048xbf16, #tpu.memory_space<vmem>>, vector<32x2048xbf16>
    %cst_255 = arith.constant dense<0.000000e+00> : vector<8x2048xf32>
    %394 = tpu.matmul %392, %393, %cst_255 {dimension_numbers = #tpu.dot_dimension_numbers<[1], [0], [0], [1], [0, 0, 1, 1], [], []>} : vector<8x32xbf16>, vector<32x2048xbf16>, vector<8x2048xf32> -> vector<8x2048xf32>
    %c0_256 = arith.constant 0 : index
    %c0_257 = arith.constant 0 : index
    %395 = vector.load %arg24[%c0_256, %c0_257] : memref<1x2048xf32, #tpu.memory_space<vmem>>, vector<1x2048xf32>
    %396 = vector.broadcast %395 : vector<1x2048xf32> to vector<8x2048xf32>
    %397 = arith.addf %394, %396 : vector<8x2048xf32>
    %cst_258 = arith.constant 0.000000e+00 : f32
    %398 = vector.broadcast %cst_258 : f32 to vector<8x2048xf32>
    %399 = arith.maximumf %397, %398 : vector<8x2048xf32>
    %400 = arith.truncf %399 : vector<8x2048xf32> to vector<8x2048xbf16>
    %c0_259 = arith.constant 0 : index
    %c0_260 = arith.constant 0 : index
    %401 = vector.load %arg25[%c0_259, %c0_260] : memref<2048x32xbf16, #tpu.memory_space<vmem>>, vector<2048x32xbf16>
    %cst_261 = arith.constant dense<0.000000e+00> : vector<8x32xf32>
    %402 = tpu.matmul %400, %401, %cst_261 {dimension_numbers = #tpu.dot_dimension_numbers<[1], [0], [0], [1], [0, 0, 1, 1], [], []>} : vector<8x2048xbf16>, vector<2048x32xbf16>, vector<8x32xf32> -> vector<8x32xf32>
    %c0_262 = arith.constant 0 : index
    %c0_263 = arith.constant 0 : index
    %403 = vector.load %arg26[%c0_262, %c0_263] : memref<1x32xf32, #tpu.memory_space<vmem>>, vector<1x32xf32>
    %404 = vector.broadcast %403 : vector<1x32xf32> to vector<8x32xf32>
    %405 = arith.addf %402, %404 : vector<8x32xf32>
    %406 = arith.addf %391, %405 : vector<8x32xf32>
    %cst_264 = arith.constant dense<0.000000e+00> : vector<8xf32>
    %407 = vector.multi_reduction <add>, %406, %cst_264 [1] : vector<8x32xf32> to vector<8xf32>
    %408 = vector.shape_cast %407 : vector<8xf32> to vector<8x1xf32>
    %cst_265 = arith.constant 3.200000e+01 : f32
    %409 = vector.broadcast %cst_265 : f32 to vector<8x1xf32>
    %410 = arith.divf %408, %409 : vector<8x1xf32>
    %411 = vector.broadcast %410 : vector<8x1xf32> to vector<8x32xf32>
    %412 = arith.subf %406, %411 : vector<8x32xf32>
    %413 = arith.mulf %412, %412 : vector<8x32xf32>
    %cst_266 = arith.constant dense<0.000000e+00> : vector<8xf32>
    %414 = vector.multi_reduction <add>, %413, %cst_266 [1] : vector<8x32xf32> to vector<8xf32>
    %415 = vector.shape_cast %414 : vector<8xf32> to vector<8x1xf32>
    %cst_267 = arith.constant 3.200000e+01 : f32
    %416 = vector.broadcast %cst_267 : f32 to vector<8x1xf32>
    %417 = arith.divf %415, %416 : vector<8x1xf32>
    %cst_268 = arith.constant 9.99999974E-6 : f32
    %418 = vector.broadcast %cst_268 : f32 to vector<8x1xf32>
    %419 = arith.addf %417, %418 : vector<8x1xf32>
    %420 = math.rsqrt %419 : vector<8x1xf32>
    %421 = vector.broadcast %420 : vector<8x1xf32> to vector<8x32xf32>
    %422 = arith.mulf %412, %421 : vector<8x32xf32>
    %c0_269 = arith.constant 0 : index
    %c0_270 = arith.constant 0 : index
    %423 = vector.load %arg27[%c0_269, %c0_270] : memref<1x32xf32, #tpu.memory_space<vmem>>, vector<1x32xf32>
    %424 = vector.broadcast %423 : vector<1x32xf32> to vector<8x32xf32>
    %425 = arith.mulf %422, %424 : vector<8x32xf32>
    %c0_271 = arith.constant 0 : index
    %c0_272 = arith.constant 0 : index
    %426 = vector.load %arg28[%c0_271, %c0_272] : memref<1x32xf32, #tpu.memory_space<vmem>>, vector<1x32xf32>
    %427 = vector.broadcast %426 : vector<1x32xf32> to vector<8x32xf32>
    %428 = arith.addf %425, %427 : vector<8x32xf32>
    %c0_273 = arith.constant 0 : index
    %c0_274 = arith.constant 0 : index
    %429 = vector.load %arg29[%c0_273, %c0_274] : memref<8x32xf32, #tpu.memory_space<vmem>>, vector<8x32xf32>
    tpu.vector_store %arg29[%c0_273, %c0_274], %428 {strides = array<i32>} : memref<8x32xf32, #tpu.memory_space<vmem>>, vector<8x32xf32>,
    return
  }
  func.func @transform_0(%arg0: i32) -> (i32, i32) {
    %c0_i32 = arith.constant 0 : i32
    %c0_i32_0 = arith.constant 0 : i32
    return %arg0, %c0_i32 : i32, i32
  }
  func.func @transform_1(%arg0: i32) -> (i32, i32) {
    %c0_i32 = arith.constant 0 : i32
    %c0_i32_0 = arith.constant 0 : i32
    return %arg0, %c0_i32 : i32, i32
  }
  func.func @transform_2(%arg0: i32) -> (i32, i32, i32) {
    %c0_i32 = arith.constant 0 : i32
    %c0_i32_0 = arith.constant 0 : i32
    %c0_i32_1 = arith.constant 0 : i32
    %c0_i32_2 = arith.constant 0 : i32
    return %c0_i32, %c0_i32_0, %c0_i32_1 : i32, i32, i32
  }
  func.func @transform_3(%arg0: i32) -> (i32, i32, i32) {
    %c0_i32 = arith.constant 0 : i32
    %c0_i32_0 = arith.constant 0 : i32
    %c0_i32_1 = arith.constant 0 : i32
    %c0_i32_2 = arith.constant 0 : i32
    return %c0_i32, %c0_i32_0, %c0_i32_1 : i32, i32, i32
  }
  func.func @transform_4(%arg0: i32) -> (i32, i32, i32) {
    %c0_i32 = arith.constant 0 : i32
    %c0_i32_0 = arith.constant 0 : i32
    %c0_i32_1 = arith.constant 0 : i32
    %c0_i32_2 = arith.constant 0 : i32
    return %c0_i32, %c0_i32_0, %c0_i32_1 : i32, i32, i32
  }
  func.func @transform_5(%arg0: i32) -> (i32, i32, i32) {
    %c0_i32 = arith.constant 0 : i32
    %c0_i32_0 = arith.constant 0 : i32
    %c0_i32_1 = arith.constant 0 : i32
    %c0_i32_2 = arith.constant 0 : i32
    return %c0_i32, %c0_i32_0, %c0_i32_1 : i32, i32, i32
  }
  func.func @transform_6(%arg0: i32) -> (i32, i32, i32) {
    %c0_i32 = arith.constant 0 : i32
    %c0_i32_0 = arith.constant 0 : i32
    %c0_i32_1 = arith.constant 0 : i32
    %c0_i32_2 = arith.constant 0 : i32
    return %c0_i32, %c0_i32_0, %c0_i32_1 : i32, i32, i32
  }
  func.func @transform_7(%arg0: i32) -> (i32, i32, i32) {
    %c0_i32 = arith.constant 0 : i32
    %c0_i32_0 = arith.constant 0 : i32
    %c0_i32_1 = arith.constant 0 : i32
    %c0_i32_2 = arith.constant 0 : i32
    return %c0_i32, %c0_i32_0, %c0_i32_1 : i32, i32, i32
  }
  func.func @transform_8(%arg0: i32) -> (i32, i32, i32) {
    %c0_i32 = arith.constant 0 : i32
    %c0_i32_0 = arith.constant 0 : i32
    %c0_i32_1 = arith.constant 0 : i32
    %c0_i32_2 = arith.constant 0 : i32
    return %c0_i32, %c0_i32_0, %c0_i32_1 : i32, i32, i32
  }
  func.func @transform_9(%arg0: i32) -> (i32, i32) {
    %c0_i32 = arith.constant 0 : i32
    %c0_i32_0 = arith.constant 0 : i32
    %c0_i32_1 = arith.constant 0 : i32
    return %c0_i32, %c0_i32_0 : i32, i32
  }
  func.func @transform_10(%arg0: i32) -> (i32, i32) {
    %c0_i32 = arith.constant 0 : i32
    %c0_i32_0 = arith.constant 0 : i32
    %c0_i32_1 = arith.constant 0 : i32
    return %c0_i32, %c0_i32_0 : i32, i32
  }
  func.func @transform_11(%arg0: i32) -> (i32, i32) {
    %c0_i32 = arith.constant 0 : i32
    %c0_i32_0 = arith.constant 0 : i32
    %c0_i32_1 = arith.constant 0 : i32
    return %c0_i32, %c0_i32_0 : i32, i32
  }
  func.func @transform_12(%arg0: i32) -> (i32, i32, i32) {
    %c0_i32 = arith.constant 0 : i32
    %c0_i32_0 = arith.constant 0 : i32
    %c0_i32_1 = arith.constant 0 : i32
    %c0_i32_2 = arith.constant 0 : i32
    return %c0_i32, %c0_i32_0, %c0_i32_1 : i32, i32, i32
  }
  func.func @transform_13(%arg0: i32) -> (i32, i32, i32) {
    %c0_i32 = arith.constant 0 : i32
    %c0_i32_0 = arith.constant 0 : i32
    %c0_i32_1 = arith.constant 0 : i32
    %c0_i32_2 = arith.constant 0 : i32
    return %c0_i32, %c0_i32_0, %c0_i32_1 : i32, i32, i32
  }
  func.func @transform_14(%arg0: i32) -> (i32, i32, i32) {
    %c0_i32 = arith.constant 0 : i32
    %c0_i32_0 = arith.constant 0 : i32
    %c0_i32_1 = arith.constant 0 : i32
    %c0_i32_2 = arith.constant 0 : i32
    return %c0_i32, %c0_i32_0, %c0_i32_1 : i32, i32, i32
  }
  func.func @transform_15(%arg0: i32) -> (i32, i32, i32) {
    %c0_i32 = arith.constant 0 : i32
    %c0_i32_0 = arith.constant 0 : i32
    %c0_i32_1 = arith.constant 0 : i32
    %c0_i32_2 = arith.constant 0 : i32
    return %c0_i32, %c0_i32_0, %c0_i32_1 : i32, i32, i32
  }
  func.func @transform_16(%arg0: i32) -> (i32, i32, i32) {
    %c0_i32 = arith.constant 0 : i32
    %c0_i32_0 = arith.constant 0 : i32
    %c0_i32_1 = arith.constant 0 : i32
    %c0_i32_2 = arith.constant 0 : i32
    return %c0_i32, %c0_i32_0, %c0_i32_1 : i32, i32, i32
  }
  func.func @transform_17(%arg0: i32) -> (i32, i32, i32) {
    %c0_i32 = arith.constant 0 : i32
    %c0_i32_0 = arith.constant 0 : i32
    %c0_i32_1 = arith.constant 0 : i32
    %c0_i32_2 = arith.constant 0 : i32
    return %c0_i32, %c0_i32_0, %c0_i32_1 : i32, i32, i32
  }
  func.func @transform_18(%arg0: i32) -> (i32, i32, i32) {
    %c0_i32 = arith.constant 0 : i32
    %c0_i32_0 = arith.constant 0 : i32
    %c0_i32_1 = arith.constant 0 : i32
    %c0_i32_2 = arith.constant 0 : i32
    return %c0_i32, %c0_i32_0, %c0_i32_1 : i32, i32, i32
  }
  func.func @transform_19(%arg0: i32) -> (i32, i32) {
    %c0_i32 = arith.constant 0 : i32
    %c0_i32_0 = arith.constant 0 : i32
    %c0_i32_1 = arith.constant 0 : i32
    return %c0_i32, %c0_i32_0 : i32, i32
  }
  func.func @transform_20(%arg0: i32) -> (i32, i32) {
    %c0_i32 = arith.constant 0 : i32
    %c0_i32_0 = arith.constant 0 : i32
    %c0_i32_1 = arith.constant 0 : i32
    return %c0_i32, %c0_i32_0 : i32, i32
  }
  func.func @transform_21(%arg0: i32) -> (i32, i32) {
    %c0_i32 = arith.constant 0 : i32
    %c0_i32_0 = arith.constant 0 : i32
    %c0_i32_1 = arith.constant 0 : i32
    return %c0_i32, %c0_i32_0 : i32, i32
  }
  func.func @transform_22(%arg0: i32) -> (i32, i32) {
    %c0_i32 = arith.constant 0 : i32
    %c0_i32_0 = arith.constant 0 : i32
    %c0_i32_1 = arith.constant 0 : i32
    return %c0_i32, %c0_i32_0 : i32, i32
  }
  func.func @transform_23(%arg0: i32) -> (i32, i32) {
    %c0_i32 = arith.constant 0 : i32
    %c0_i32_0 = arith.constant 0 : i32
    %c0_i32_1 = arith.constant 0 : i32
    return %c0_i32, %c0_i32_0 : i32, i32
  }
  func.func @transform_24(%arg0: i32) -> (i32, i32) {
    %c0_i32 = arith.constant 0 : i32
    %c0_i32_0 = arith.constant 0 : i32
    %c0_i32_1 = arith.constant 0 : i32
    return %c0_i32, %c0_i32_0 : i32, i32
  }
  func.func @transform_25(%arg0: i32) -> (i32, i32) {
    %c0_i32 = arith.constant 0 : i32
    %c0_i32_0 = arith.constant 0 : i32
    %c0_i32_1 = arith.constant 0 : i32
    return %c0_i32, %c0_i32_0 : i32, i32
  }
  func.func @transform_26(%arg0: i32) -> (i32, i32) {
    %c0_i32 = arith.constant 0 : i32
    %c0_i32_0 = arith.constant 0 : i32
    %c0_i32_1 = arith.constant 0 : i32
    return %c0_i32, %c0_i32_0 : i32, i32
  }
  func.func @transform_27(%arg0: i32) -> (i32, i32) {
    %c0_i32 = arith.constant 0 : i32
    %c0_i32_0 = arith.constant 0 : i32
    %c0_i32_1 = arith.constant 0 : i32
    return %c0_i32, %c0_i32_0 : i32, i32
  }
  func.func @transform_28(%arg0: i32) -> (i32, i32) {
    %c0_i32 = arith.constant 0 : i32
    %c0_i32_0 = arith.constant 0 : i32
    return %arg0, %c0_i32 : i32, i32
  }
}

</mosaic_0001>

<bundles_post_ra>
// kernel: a_call__.5
= control target key start
LH: loop header
LB: loop body
LE: loop exit
PB: predicated region body
PF: predicated region fallthrough
CT: control target
= control target key end

     0   :  { %8 = vsyncpa [#allocation3], 0  ;;  %s319_s0 = inlined_call_operand.hbm [shape: f32[16,32], index: 0, kind: input, shape index: {}]   ;;  %s320_s1 = inlined_call_operand.hbm [shape: f32[1,32], index: 1, kind: input, shape index: {}]   ;;  %s321_s2 = inlined_call_operand.hbm [shape: f32[1,32], index: 2, kind: input, shape index: {}]   ;;  %s322_s3 = inlined_call_operand.hbm [shape: f32[16,32], index: 3, kind: output, shape index: {}]  }
   0x1   :  { %9 = vsyncpa [#allocation6], 0 }
   0x2   :  { %10 = vsyncpa [#allocation4], 0  ;;  %s226_s12 = smov [#allocation5]   ;;  %s227_s14 = smov [#allocation2]  }
   0x3   :  { %s29_s13 = sshll.u32 %s226_s12, 4  ;;  %s16_s15 = sshll.u32 %s227_s14, 4  ;;  %s30_s13 = int_to_ptr.vmem [resolvable:$true] %s29_s13  ;;  %s252_s15 = int_to_ptr.vmem [resolvable:$true] %s16_s15 }
   0x4   :  { %s132_s18 = scalar_lea.hbm %s320_s1, 16 }
   0x5   :  { %p133_p0 = scmp.ne.s32.totalorder %s320_s1, %s132_s18  ;;  %p136_p1 = scmp.lt.u32.totalorder %s132_s18, %s320_s1 }
   0x7   :  { %p138_p2 = pnand %p136_p1, %p133_p0 }
   0x9   :  { %141 = shalt.err (!%p138_p2)
}
   0xa   :  { %s142_s23 = scalar_lea.vmem %s30_s13, 16  ;;  %s146_s24 = scalar_lea.vmem %s30_s13, 32 }
   0xb   :  { %p143_p3 = scmp.ne.s32.totalorder %s30_s13, %s142_s23  ;;  %p147_p4 = scmp.lt.s32.totalorder %s30_s13, %s30_s13 }
   0xc   :  { %p148_p5 = scmp.lt.s32.totalorder %s146_s24, %s142_s23 }
   0xe   :  { %p149_p6 = por %p148_p5, %p147_p4 }
  0x10   :  { %p150_p7 = pnand %p149_p6, %p143_p3 }
  0x12   :  { %153 = shalt.err (!%p150_p7)
}
  0x13   :  { %32 = dma.hbm_to_vmem [thread:$0]  %s320_s1, 16, %s30_s13, [#allocation6]  }
  0x14   :  { %s154_s29 = scalar_lea.hbm %s319_s0, 256 }
  0x15   :  { %p155_p8 = scmp.ne.s32.totalorder %s319_s0, %s154_s29  ;;  %p158_p9 = scmp.lt.u32.totalorder %s154_s29, %s319_s0 }
  0x17   :  { %p160_p10 = pnand %p158_p9, %p155_p8 }
  0x19   :  { %163 = shalt.err (!%p160_p10)
}
  0x1a   :  { %s164_s7 = scalar_lea.vmem %s252_s15, 256  ;;  %p169_p12 = scmp.lt.s32.totalorder %s252_s15, %s252_s15 }
  0x1b   :  { %p165_p11 = scmp.ne.s32.totalorder %s252_s15, %s164_s7  ;;  %p170_p13 = scmp.lt.s32.totalorder %s164_s7, %s164_s7 }
  0x1d   :  { %p171_p0 = por %p170_p13, %p169_p12 }
  0x1f   :  { %p172_p1 = pnand %p171_p0, %p165_p11 }
  0x21   :  { %175 = shalt.err (!%p172_p1)
}
  0x22   :  { %s228_s1 = smov 128   ;;  %s229_s8 = smov 8  }
  0x23   :  { %22 = dma.hbm_to_vmem [thread:$0]  %s319_s0, 256, %s252_s15, [#allocation3], %s228_s1, %s228_s1, %s229_s8  }
  0x24   :  { %s230_s11 = smov [#allocation7]   ;;  %s176_s16 = scalar_lea.hbm %s321_s2, 16 }
  0x25   :  { %s39_s12 = sshll.u32 %s230_s11, 4  ;;  %p177_p2 = scmp.ne.s32.totalorder %s321_s2, %s176_s16  ;;  %s40_s12 = int_to_ptr.vmem [resolvable:$true] %s39_s12 }
  0x26   :  { %p180_p3 = scmp.lt.u32.totalorder %s176_s16, %s321_s2 }
  0x28   :  { %p182_p4 = pnand %p180_p3, %p177_p2 }
  0x2a   :  { %185 = shalt.err (!%p182_p4)
}
  0x2b   :  { %s186_s21 = scalar_lea.vmem %s40_s12, 16  ;;  %s190_s0 = scalar_lea.vmem %s40_s12, 32 }
  0x2c   :  { %p187_p5 = scmp.ne.s32.totalorder %s40_s12, %s186_s21  ;;  %p191_p6 = scmp.lt.s32.totalorder %s40_s12, %s40_s12 }
  0x2d   :  { %p192_p7 = scmp.lt.s32.totalorder %s190_s0, %s186_s21 }
  0x2f   :  { %p193_p8 = por %p192_p7, %p191_p6 }
  0x31   :  { %p194_p9 = pnand %p193_p8, %p187_p5 }
  0x33   :  { %197 = shalt.err (!%p194_p9)
}
  0x34   :  { %42 = dma.hbm_to_vmem [thread:$0]  %s321_s2, 16, %s40_s12, [#allocation6]  }
  0x35   :  { %220 = dma.done.wait [#allocation3], 256  }
  0x36   :  { %221 = vsyncadd [#allocation3], 4294967040 }
  0x37   :  { %222 = dma.done.wait [#allocation6], 32  }
  0x38   :  { %223 = vsyncadd [#allocation6], 4294967264  ;;  %vm54_vm0 = vcmask 261120   ;;  %v52_v0 = vld [vmem:[#allocation2] sm:$0xff]  ;;  %v53_v1 = vld [vmem:[#allocation2 + $0x8] sm:$0xff]  ;;  %s231_s2 = smov [#allocation8]  }
  0x39   :  { %v55_v2 = vsel %vm54_vm0, %v52_v0, 0.0  ;;  %v58_v3 = vsel %vm54_vm0, %v53_v1, 0.0  ;;  %v120_v21 = vld [vmem:[#allocation5] ss:$0 sm:$0xff]  ;;  %v121_v23 = vld [vmem:[#allocation7] ss:$0 sm:$0xff] }
  0x3a   :  { %56 = vadd.xlane.f32.xlu0 %v55_v2  ;;  %s107_s23 = sshll.u32 %s231_s2, 4  ;;  %s108_s23 = int_to_ptr.vmem [resolvable:$true] %s107_s23 }
  0x3b   :  { %s198_s24 = scalar_lea.vmem %s108_s23, 256  ;;  %p203_p11 = scmp.lt.s32.totalorder %s108_s23, %s108_s23 }
  0x3c   :  { %p199_p10 = scmp.ne.s32.totalorder %s108_s23, %s198_s24  ;;  %p204_p12 = scmp.lt.s32.totalorder %s198_s24, %s198_s24 }
  0x3e   :  { %59 = vadd.xlane.f32.xlu0 %v58_v3  ;;  %p205_p13 = por %p204_p12, %p203_p11 }
  0x40   :  { %p206_p0 = pnand %p205_p13, %p199_p10 }
  0xc7   :  { %v57_v4 = vpop.xlane.xlu0 %56 }
  0xc8   :  { %v62_v5 = vmul.f32 0.03125, %v57_v4 }
  0xca   :  { %v64_v6 = vsub.f32 %v52_v0, %v62_v5 }
  0xcb   :  { %v60_v7 = vpop.xlane.xlu0 %59 }
  0xcc   :  { %v63_v8 = vmul.f32 0.03125, %v60_v7  ;;  %v66_v9 = vmul.f32 %v64_v6, %v64_v6 }
  0xce   :  { %v65_v10 = vsub.f32 %v53_v1, %v63_v8  ;;  %v68_v11 = vsel %vm54_vm0, %v66_v9, 0.0 }
  0xcf   :  { %69 = vadd.xlane.f32.xlu1 %v68_v11 }
  0xd0   :  { %v67_v12 = vmul.f32 %v65_v10, %v65_v10 }
  0xd2   :  { %v71_v13 = vsel %vm54_vm0, %v67_v12, 0.0 }
  0xd3   :  { %72 = vadd.xlane.f32.xlu1 %v71_v13 }
 0x15c   :  { %v70_v14 = vpop.xlane.xlu1 %69 }
 0x15d   :  { %v74_v15 = vmul.f32 0.03125, %v70_v14 }
 0x15f   :  { %v76_v16 = vadd.f32 1e-05, %v74_v15 }
 0x160   :  { %v73_v17 = vpop.xlane.xlu1 %72 }
 0x161   :  { %128 = vrsqrt.f32 %v76_v16  ;;  %v75_v18 = vmul.f32 0.03125, %v73_v17 }
 0x163   :  { %v77_v19 = vadd.f32 1e-05, %v75_v18 }
 0x165   :  { %130 = vrsqrt.f32 %v77_v19 }
 0x16b   :  { %v129_v20 = vpop.eup %128 }
 0x16c   :  { %v80_v22 = vmul.f32 %v129_v20, %v64_v6 }
 0x16e   :  { %v89_v24 = vmul.f32 %v120_v21, %v80_v22 }
 0x16f   :  { %v131_v25 = vpop.eup %130 }
 0x170   :  { %v81_v26 = vmul.f32 %v131_v25, %v65_v10  ;;  %v98_v27 = vadd.f32 %v121_v23, %v89_v24 }
 0x172   :  { %v90_v28 = vmul.f32 %v120_v21, %v81_v26  ;;  %100 = vst.msk [vmem:[#allocation8] sm:$0xff] %vm54_vm0, %v98_v27 }
 0x174   :  { %v99_v29 = vadd.f32 %v121_v23, %v90_v28 }
 0x176   :  { %101 = vst.msk [vmem:[#allocation8 + $0x8] sm:$0xff] %vm54_vm0, %v99_v29 }
 0x177   :  { %209 = shalt.err (!%p206_p0)
}
 0x178   :  { %s210_s27 = scalar_lea.hbm %s322_s3, 256 }
 0x179   :  { %p211_p1 = scmp.ne.s32.totalorder %s322_s3, %s210_s27  ;;  %p214_p2 = scmp.lt.u32.totalorder %s210_s27, %s322_s3 }
 0x17b   :  { %p216_p3 = pnand %p214_p2, %p211_p1 }
 0x17d   :  { %219 = shalt.err (!%p216_p3)
}
 0x17e   :  { %113 = dma.vmem_to_hbm [thread:$0]  %s108_s23, 256, %s322_s3, [#allocation4], %s228_s1, %s228_s1, %s229_s8  }
 0x17f   :  { %224 = dma.done.wait [#allocation4], 256  }
 0x180   :  { %225 = vsyncadd [#allocation4], 4294967040 }
 0x181   :  { %117 = vsyncpa [#allocation3], 1 }
 0x182   :  { %118 = vsyncpa [#allocation6], 1 }
 0x183   :  { %119 = vsyncpa [#allocation4], 1 }

// kernel: a_call__.7
= control target key start
LH: loop header
LB: loop body
LE: loop exit
PB: predicated region body
PF: predicated region fallthrough
CT: control target
= control target key end

     0   :  { %10 = vsyncpa [#allocation3], 0  ;;  %s493_s0 = inlined_call_operand.hbm [shape: f32[2,32], index: 0, kind: input, shape index: {}]   ;;  %s494_s1 = inlined_call_operand.hbm [shape: f32[1,32], index: 1, kind: input, shape index: {}]   ;;  %s495_s2 = inlined_call_operand.hbm [shape: f32[1,32], index: 2, kind: input, shape index: {}]   ;;  %s496_s3 = inlined_call_operand.hbm [shape: bf16[32,32], index: 3, kind: input, shape index: {}]   ;;  %s497_s4 = inlined_call_operand.hbm [shape: f32[1,32], index: 4, kind: input, shape index: {}]   ;;  %s498_s5 = inlined_call_operand.hbm [shape: f32[2,32], index: 5, kind: output, shape index: {}]  }
   0x1   :  { %11 = vsyncpa [#allocation6], 0 }
   0x2   :  { %12 = vsyncpa [#allocation9], 0 }
   0x3   :  { %13 = vsyncpa [#allocation4], 0  ;;  %s371_s18 = smov [#allocation5]   ;;  %s372_s20 = smov [#allocation8]  }
   0x4   :  { %s30_s19 = sshll.u32 %s371_s18, 4  ;;  %s49_s21 = sshll.u32 %s372_s20, 4  ;;  %s31_s19 = int_to_ptr.vmem [resolvable:$true] %s30_s19  ;;  %s411_s21 = int_to_ptr.vmem [resolvable:$true] %s49_s21 }
   0x5   :  { %s231_s24 = scalar_lea.hbm %s494_s1, 16 }
   0x6   :  { %p232_p0 = scmp.ne.s32.totalorder %s494_s1, %s231_s24  ;;  %p235_p1 = scmp.lt.u32.totalorder %s231_s24, %s494_s1 }
   0x8   :  { %p237_p2 = pnand %p235_p1, %p232_p0 }
   0xa   :  { %240 = shalt.err (!%p237_p2)
}
   0xb   :  { %s241_s29 = scalar_lea.vmem %s31_s19, 16  ;;  %s245_s30 = scalar_lea.vmem %s31_s19, 32 }
   0xc   :  { %p242_p3 = scmp.ne.s32.totalorder %s31_s19, %s241_s29  ;;  %p246_p4 = scmp.lt.s32.totalorder %s31_s19, %s31_s19 }
   0xd   :  { %p247_p5 = scmp.lt.s32.totalorder %s245_s30, %s241_s29 }
   0xf   :  { %p248_p6 = por %p247_p5, %p246_p4 }
  0x11   :  { %p249_p7 = pnand %p248_p6, %p242_p3 }
  0x13   :  { %252 = shalt.err (!%p249_p7)
}
  0x14   :  { %33 = dma.hbm_to_vmem [thread:$0]  %s494_s1, 16, %s31_s19, [#allocation6]  }
  0x15   :  { %s253_s10 = scalar_lea.hbm %s496_s3, 256 }
  0x16   :  { %p254_p8 = scmp.ne.s32.totalorder %s496_s3, %s253_s10  ;;  %p257_p9 = scmp.lt.u32.totalorder %s253_s10, %s496_s3 }
  0x18   :  { %p259_p10 = pnand %p257_p9, %p254_p8 }
  0x1a   :  { %262 = shalt.err (!%p259_p10)
}
  0x1b   :  { %s263_s15 = scalar_lea.vmem %s411_s21, 256  ;;  %p268_p12 = scmp.lt.s32.totalorder %s411_s21, %s411_s21 }
  0x1c   :  { %p264_p11 = scmp.ne.s32.totalorder %s411_s21, %s263_s15  ;;  %p269_p13 = scmp.lt.s32.totalorder %s263_s15, %s263_s15 }
  0x1e   :  { %p270_p0 = por %p269_p13, %p268_p12 }
  0x20   :  { %p271_p1 = pnand %p270_p0, %p264_p11 }
  0x22   :  { %274 = shalt.err (!%p271_p1)
}
  0x23   :  { %s373_s1 = smov 64   ;;  %s374_s16 = smov 4  }
  0x24   :  { %55 = dma.hbm_to_vmem [thread:$0]  %s496_s3, 256, %s411_s21, [#allocation9], %s373_s1, %s373_s1, %s374_s16  }
  0x25   :  { %s375_s19 = smov [#allocation2]   ;;  %s376_s22 = smov [#allocation7]  }
  0x26   :  { %s20_s20 = sshll.u32 %s375_s19, 4  ;;  %s40_s23 = sshll.u32 %s376_s22, 4  ;;  %s21_s20 = int_to_ptr.vmem [resolvable:$true] %s20_s20  ;;  %s41_s23 = int_to_ptr.vmem [resolvable:$true] %s40_s23 }
  0x27   :  { %s275_s26 = scalar_lea.hbm %s493_s0, 32 }
  0x28   :  { %p276_p2 = scmp.ne.s32.totalorder %s493_s0, %s275_s26  ;;  %p279_p3 = scmp.lt.u32.totalorder %s275_s26, %s493_s0 }
  0x2a   :  { %p281_p4 = pnand %p279_p3, %p276_p2 }
  0x2c   :  { %284 = shalt.err (!%p281_p4)
}
  0x2d   :  { %s285_s3 = scalar_lea.vmem %s21_s20, 32  ;;  %p290_p6 = scmp.lt.s32.totalorder %s21_s20, %s21_s20 }
  0x2e   :  { %p286_p5 = scmp.ne.s32.totalorder %s21_s20, %s285_s3  ;;  %p291_p7 = scmp.lt.s32.totalorder %s285_s3, %s285_s3 }
  0x30   :  { %p292_p8 = por %p291_p7, %p290_p6 }
  0x32   :  { %p293_p9 = pnand %p292_p8, %p286_p5 }
  0x34   :  { %296 = shalt.err (!%p293_p9)
}
  0x35   :  { %23 = dma.hbm_to_vmem [thread:$0]  %s493_s0, 32, %s21_s20, [#allocation3]  }
  0x36   :  { %s297_s9 = scalar_lea.hbm %s495_s2, 16 }
  0x37   :  { %p298_p10 = scmp.ne.s32.totalorder %s495_s2, %s297_s9  ;;  %p301_p11 = scmp.lt.u32.totalorder %s297_s9, %s495_s2 }
  0x39   :  { %p303_p12 = pnand %p301_p11, %p298_p10 }
  0x3b   :  { %306 = shalt.err (!%p303_p12)
}
  0x3c   :  { %s307_s14 = scalar_lea.vmem %s41_s23, 16  ;;  %s311_s15 = scalar_lea.vmem %s41_s23, 32 }
  0x3d   :  { %p308_p13 = scmp.ne.s32.totalorder %s41_s23, %s307_s14  ;;  %p312_p0 = scmp.lt.s32.totalorder %s41_s23, %s41_s23 }
  0x3e   :  { %p313_p1 = scmp.lt.s32.totalorder %s311_s15, %s307_s14 }
  0x40   :  { %p314_p2 = por %p313_p1, %p312_p0 }
  0x42   :  { %p315_p3 = pnand %p314_p2, %p308_p13 }
  0x44   :  { %318 = shalt.err (!%p315_p3)
}
  0x45   :  { %43 = dma.hbm_to_vmem [thread:$0]  %s495_s2, 16, %s41_s23, [#allocation6]  }
  0x46   :  { %s377_s16 = smov [#allocation10]   ;;  %s319_s20 = scalar_lea.hbm %s497_s4, 16 }
  0x47   :  { %s62_s17 = sshll.u32 %s377_s16, 4  ;;  %p320_p4 = scmp.ne.s32.totalorder %s497_s4, %s319_s20  ;;  %s63_s17 = int_to_ptr.vmem [resolvable:$true] %s62_s17 }
  0x48   :  { %p323_p5 = scmp.lt.u32.totalorder %s319_s20, %s497_s4 }
  0x4a   :  { %p325_p6 = pnand %p323_p5, %p320_p4 }
  0x4c   :  { %328 = shalt.err (!%p325_p6)
}
  0x4d   :  { %s329_s27 = scalar_lea.vmem %s63_s17, 16  ;;  %s333_s2 = scalar_lea.vmem %s63_s17, 32 }
  0x4e   :  { %p330_p7 = scmp.ne.s32.totalorder %s63_s17, %s329_s27  ;;  %p334_p8 = scmp.lt.s32.totalorder %s63_s17, %s63_s17 }
  0x4f   :  { %p335_p9 = scmp.lt.s32.totalorder %s333_s2, %s329_s27 }
  0x51   :  { %p336_p10 = por %p335_p9, %p334_p8 }
  0x53   :  { %p337_p11 = pnand %p336_p10, %p330_p7 }
  0x55   :  { %340 = shalt.err (!%p337_p11)
}
  0x56   :  { %65 = dma.hbm_to_vmem [thread:$0]  %s497_s4, 16, %s63_s17, [#allocation9]  }
  0x57   :  { %363 = dma.done.wait [#allocation3], 32  }
  0x58   :  { %364 = vsyncadd [#allocation3], 4294967264 }
  0x59   :  { %365 = dma.done.wait [#allocation6], 32  }
  0x5a   :  { %366 = vsyncadd [#allocation6], 4294967264 }
  0x5b   :  { %367 = dma.done.wait [#allocation9], 272  }
  0x5c   :  { %368 = vsyncadd [#allocation9], 4294967024  ;;  %vm83_vm0 = vcmask 254976   ;;  %v82_v0 = vld [vmem:[#allocation2] sm:$0x3]  ;;  %v227_v7 = vld [vmem:[#allocation8] sm:$0xff]  }
  0x5d   :  { %v84_v1 = vsel %vm83_vm0, %v82_v0, 0.0  ;;  %v378_v8 = vmov 0.0   ;;  %v228_v9 = vld [vmem:[#allocation8 + $0x8] sm:$0xff]   ;;  %vm379_vm1 = vmmov 0   ;;  %v200_v14 = vld [vmem:[#allocation5] ss:$0 sm:$0xff] }
  0x5e   :  { %85 = vadd.xlane.f32.xlu0 %v84_v1  ;;  %209 = vmatprep.subr.bf16.mxu0 %v378_v8  ;;  %v201_v16 = vld [vmem:[#allocation7] ss:$0 sm:$0xff]  ;;  %vm138_vm2 = vcmask 261120   ;;  %v202_v20 = vld [vmem:[#allocation10] ss:$0 sm:$0xff]  ;;  %s380_s4 = smov [#allocation11]  }
  0x5f   :  { %210 = vmatpush3.bf16.msra.mxu0 %v227_v7  ;;  %213 = vmatprep.mubr.msk.bf16.mxu0 %vm379_vm1, %v378_v8  ;;  %s189_s29 = sshll.u32 %s380_s4, 4  ;;  %s190_s29 = int_to_ptr.vmem [resolvable:$true] %s189_s29 }
  0x60   :  { %211 = vmatprep.subr.bf16.mxu0 %v378_v8  ;;  %s341_s30 = scalar_lea.vmem %s190_s29, 32  ;;  %p346_p13 = scmp.lt.s32.totalorder %s190_s29, %s190_s29 }
  0x61   :  { %p342_p12 = scmp.ne.s32.totalorder %s190_s29, %s341_s30  ;;  %p347_p0 = scmp.lt.s32.totalorder %s341_s30, %s341_s30 }
  0x63   :  { %212 = vmatpush3.bf16.msra.mxu0 %v228_v9  ;;  %p348_p1 = por %p347_p0, %p346_p13 }
  0x65   :  { %p349_p2 = pnand %p348_p1, %p342_p12 }
  0xeb   :  { %v86_v2 = vpop.xlane.xlu0 %85 }
  0xec   :  { %v88_v3 = vmul.f32 0.03125, %v86_v2 }
  0xee   :  { %v89_v4 = vsub.f32 %v82_v0, %v88_v3 }
  0xf0   :  { %v90_v5 = vmul.f32 %v89_v4, %v89_v4 }
  0xf2   :  { %v91_v6 = vsel %vm83_vm0, %v90_v5, 0.0 }
  0xf3   :  { %92 = vadd.xlane.f32.xlu0 %v91_v6 }
 0x180   :  { %v93_v10 = vpop.xlane.xlu0 %92 }
 0x181   :  { %v94_v11 = vmul.f32 0.03125, %v93_v10 }
 0x183   :  { %v95_v12 = vadd.f32 1e-05, %v94_v11 }
 0x185   :  { %229 = vrsqrt.f32 %v95_v12 }
 0x18f   :  { %v230_v13 = vpop.eup %229 }
 0x190   :  { %v97_v15 = vmul.f32 %v230_v13, %v89_v4 }
 0x192   :  { %v105_v17 = vmul.f32 %v200_v14, %v97_v15 }
 0x194   :  { %v113_v18 = vadd.f32 %v201_v16, %v105_v17 }
 0x196   :  { %v114_v19 = vpack.c.bf16 %v113_v18, %v113_v18 }
 0x198   :  { %214 = vmatmul.mubr.msk.bf16.vlgmr.msra.gmra.mrb[0].mxu0 %vm138_vm2, %v114_v19 }
 0x26b   :  { %v176_v21 = vpop.f32.mrb[0].mxu0 }
 0x26c   :  { %v177_v22 = vadd.f32 %v202_v20, %v176_v21  ;;  %v215_v23 = vpop.f32.mrb[1].mxu0 }
 0x26d   :  { %v179_v24 = vpop.f32.mrb[2].mxu0 }
 0x26e   :  { %182 = vst.msk [vmem:[#allocation11] sm:$0x3] %vm83_vm0, %v177_v22  ;;  %v216_v25 = vpop.f32.mrb[3].mxu0 }
 0x26f   :  { %352 = shalt.err (!%p349_p2)
}
 0x270   :  { %s353_s6 = scalar_lea.hbm %s498_s5, 32 }
 0x271   :  { %p354_p3 = scmp.ne.s32.totalorder %s498_s5, %s353_s6  ;;  %p357_p4 = scmp.lt.u32.totalorder %s353_s6, %s498_s5 }
 0x273   :  { %p359_p5 = pnand %p357_p4, %p354_p3 }
 0x275   :  { %362 = shalt.err (!%p359_p5)
}
 0x276   :  { %192 = dma.vmem_to_hbm [thread:$0]  %s190_s29, 32, %s498_s5, [#allocation4]  }
 0x277   :  { %369 = dma.done.wait [#allocation4], 32  }
 0x278   :  { %370 = vsyncadd [#allocation4], 4294967264 }
 0x279   :  { %196 = vsyncpa [#allocation3], 1 }
 0x27a   :  { %197 = vsyncpa [#allocation6], 1 }
 0x27b   :  { %198 = vsyncpa [#allocation9], 1 }
 0x27c   :  { %199 = vsyncpa [#allocation4], 1 }

// kernel: a_call__.4
= control target key start
LH: loop header
LB: loop body
LE: loop exit
PB: predicated region body
PF: predicated region fallthrough
CT: control target
= control target key end

     0   :  { %s7086_s0 = inlined_call_operand.hbm [shape: f32[16,32], index: 0, kind: input, shape index: {}]   ;;  %s7087_s1 = inlined_call_operand.hbm [shape: bf16[4,32,8], index: 1, kind: input, shape index: {}]   ;;  %s7088_s2 = inlined_call_operand.hbm [shape: f32[4,1,8], index: 2, kind: input, shape index: {}]   ;;  %s7089_s3 = inlined_call_operand.hbm [shape: bf16[4,32,8], index: 3, kind: input, shape index: {}]   ;;  %s7090_s4 = inlined_call_operand.hbm [shape: f32[4,1,8], index: 4, kind: input, shape index: {}]   ;;  %s7091_s5 = inlined_call_operand.hbm [shape: bf16[4,32,8], index: 5, kind: input, shape index: {}]   ;;  %s7092_s6 = inlined_call_operand.hbm [shape: f32[4,1,8], index: 6, kind: input, shape index: {}]   ;;  %s7093_s7 = inlined_call_operand.hbm [shape: bf16[4,8,32], index: 7, kind: input, shape index: {}]   ;;  %s7094_s8 = inlined_call_operand.hbm [shape: f32[1,32], index: 8, kind: input, shape index: {}]   ;;  %s7095_s9 = inlined_call_operand.hbm [shape: f32[1,32], index: 9, kind: input, shape index: {}, may-alias: {9,15}]   ;;  %s7096_s10 = inlined_call_operand.hbm [shape: f32[1,32], index: 10, kind: input, shape index: {}, may-alias: {10,16}]   ;;  %s7097_s11 = inlined_call_operand.hbm [shape: bf16[32,2048], index: 11, kind: input, shape index: {}]   ;;  %s7098_s12 = inlined_call_operand.hbm [shape: f32[1,2048], index: 12, kind: input, shape index: {}]   ;;  %s7099_s13 = inlined_call_operand.hbm [shape: bf16[2048,32], index: 13, kind: input, shape index: {}]   ;;  %s7100_s14 = inlined_call_operand.hbm [shape: f32[1,32], index: 14, kind: input, shape index: {}]   ;;  %s7101_s15 = inlined_call_operand.hbm [shape: f32[1,32], index: 15, kind: input, shape index: {}, may-alias: {9,15}]   ;;  %s7102_s16 = inlined_call_operand.hbm [shape: f32[1,32], index: 16, kind: input, shape index: {}, may-alias: {10,16}]   ;;  %s7103_s17 = inlined_call_operand.hbm [shape: f32[16,32], index: 17, kind: output, shape index: {}]  }
   0x1   :  { %7120 = sst [smem:[#allocation46_spill]] %s7086_s0 }
   0x2   :  { %7121 = sst [smem:[#allocation47_spill]] %s7087_s1 }
   0x3   :  { %7122 = sst [smem:[#allocation48_spill]] %s7088_s2 }
   0x4   :  { %7123 = sst [smem:[#allocation49_spill]] %s7089_s3 }
   0x5   :  { %7124 = sst [smem:[#allocation50_spill]] %s7090_s4 }
   0x6   :  { %7125 = sst [smem:[#allocation51_spill]] %s7091_s5 }
   0x7   :  { %7126 = sst [smem:[#allocation52_spill]] %s7102_s16 }
   0x8   :  { %7127 = sst [smem:[#allocation53_spill]] %s7103_s17 }
   0x9   :  { %22 = vsyncpa [#allocation3], 0 }
   0xa   :  { %24 = vsyncpa [#allocation3 + $0x1], 0 }
   0xb   :  { %25 = vsyncpa [#allocation6], 0 }
   0xc   :  { %26 = vsyncpa [#allocation9], 0 }
   0xd   :  { %27 = vsyncpa [#allocation12], 0 }
   0xe   :  { %28 = vsyncpa [#allocation15], 0 }
   0xf   :  { %29 = vsyncpa [#allocation18], 0 }
  0x10   :  { %30 = vsyncpa [#allocation21], 0 }
  0x11   :  { %31 = vsyncpa [#allocation24], 0 }
  0x12   :  { %32 = vsyncpa [#allocation27], 0 }
  0x13   :  { %33 = vsyncpa [#allocation4], 0 }
  0x14   :  { %35 = vsyncpa [#allocation4 + $0x1], 0  ;;  %s6251_s24 = smov 0   ;;  %s6253_s25 = smov 0  }
  0x15   :  { %s6255_s26 = smov 0   ;;  %s6257_s27 = smov 0  }
  0x16 LB: > { %7128 = sst [smem:[#allocation40_spill]] %s6121_s24  ;;  %s6135_s28 = smov [#allocation5]   ;;  %s6133_s27 = sphi %s6257_s27, %s6655_s27   ;;  %s6129_s26 = sphi %s6255_s26, %s7184_s26   ;;  %s6125_s25 = sphi %s6253_s25, %s7183_s25   ;;  %s6121_s24 = sphi %s6251_s24, %s7182_s24  }
  0x17   : > { %7129 = sst [smem:[#allocation41_spill]] %s6125_s25  ;;  %s446_s29 = sshll.u32 %s6135_s28, 4  ;;  %s6277_s29 = int_to_ptr.vmem [resolvable:$true] %s446_s29 }
  0x18   : > { %7130 = sst [smem:[#allocation42_spill]] %s6129_s26  ;;  %s6272_s0 = sadd.s32 4294967295, %s6133_s27  }
  0x19   : > { %7131 = sst [smem:[#allocation43_spill]] %s6133_s27  ;;  %p4488_p0 = scmp.ge.s32.totalorder %s6133_s27, 1 }
  0x1a   : > { %7132 = sst [smem:[#allocation44_spill]] %s6272_s0  ;;  %p7116_p1 = scmp.eq.s32.totalorder %s6272_s0, 0 }
  0x1b   : > { %p434_p2 = scmp.lt.s32.totalorder %s6133_s27, 3  ;;  %s6136_s18 = smov [#allocation8]  }
  0x1c   : > { %s472_s19 = sshll.u32 %s6136_s18, 4  ;;  %s6137_s20 = smov [#allocation11]   ;;  %s6292_s19 = int_to_ptr.vmem [resolvable:$true] %s472_s19 }
  0x1d   : > { %p6279_p3 = pnand %p4488_p0, %p434_p2  ;;  %s498_s21 = sshll.u32 %s6137_s20, 4  ;;  %s6294_s21 = int_to_ptr.vmem [resolvable:$true] %s498_s21 }
  0x1e   : > { %s7136_s28 = sld [smem:[#allocation47_spill]] }
  0x1f   : > { %s7133_s30 = scalar_select %p6279_p3, 1, 0 }
  0x20   : > { %p5237_p5 = pneg %p6279_p3 }
  0x21   : > { %7134 = sst [smem:[#allocation45_spill]] %s7133_s30 }
  0x22   : > { %p6288_p6 = pnand %p5237_p5, %p7116_p1 }
  0x24   : > { %s5557_s17 = scalar_lea.hbm %s7136_s28, 1024  ;;  %p6304_p8 = pneg %p6288_p6 }
  0x25   : > { %p5558_p7 = scmp.ne.s32.totalorder %s7136_s28, %s5557_s17  ;;  %p5564_p11 = scmp.lt.u32.totalorder %s5557_s17, %s7136_s28 }
  0x27   : > { %p5560_p9 = pnand %p6304_p8, %p5558_p7 }
  0x29   : > { %p5561_p10 = pneg %p5560_p9 }
  0x2b   : > { %p5566_p12 = pnand %p5564_p11, %p5561_p10 }
  0x2d   : > { %5569 = shalt.err (!%p5566_p12)
}
  0x2e   : > { %s5570_s24 = scalar_lea.vmem %s6277_s29, 1024  ;;  %p5578_p5 = scmp.lt.s32.totalorder %s6277_s29, %s6277_s29 }
  0x2f   : > { %p5571_p13 = scmp.ne.s32.totalorder %s6277_s29, %s5570_s24  ;;  %p5579_p4 = scmp.lt.s32.totalorder %s5570_s24, %s5570_s24 }
  0x31   : > { %p5573_p0 = pnand %p5571_p13, %p6304_p8  ;;  %p5580_p7 = por %p5579_p4, %p5578_p5 }
  0x33   : > { %p5574_p2 = pneg %p5573_p0 }
  0x35   : > { %p5581_p9 = pnand %p5580_p7, %p5574_p2 }
  0x37   : > { %5584 = shalt.err (!%p5581_p9)
}
  0x38   : > { %s6138_s30 = smov 64   ;;  %s7118_s17 = smov 4  }
  0x39   : > { %5240 = dma.hbm_to_vmem [thread:$0]  (!%p6288_p6), %s7136_s28, 1024, %s6277_s29, [#allocation6], %s6138_s30, %s6138_s30, %s7118_s17  }
  0x3a   : > { %s7138_s3 = sld [smem:[#allocation49_spill]] }
  0x40   : > { %s5585_s24 = scalar_lea.hbm %s7138_s3, 1024 }
  0x41   : > { %p5586_p4 = scmp.ne.s32.totalorder %s7138_s3, %s5585_s24  ;;  %p5592_p12 = scmp.lt.u32.totalorder %s5585_s24, %s7138_s3 }
  0x43   : > { %p5588_p10 = pnand %p5586_p4, %p6304_p8 }
  0x45   : > { %p5589_p11 = pneg %p5588_p10 }
  0x47   : > { %p5594_p13 = pnand %p5592_p12, %p5589_p11 }
  0x49   : > { %5597 = shalt.err (!%p5594_p13)
}
  0x4a   : > { %s5598_s29 = scalar_lea.vmem %s6292_s19, 1024  ;;  %p5606_p7 = scmp.lt.s32.totalorder %s6292_s19, %s6292_s19 }
  0x4b   : > { %p5599_p0 = scmp.ne.s32.totalorder %s6292_s19, %s5598_s29  ;;  %p5607_p9 = scmp.lt.s32.totalorder %s5598_s29, %s5598_s29 }
  0x4d   : > { %p5601_p2 = pnand %p5599_p0, %p6304_p8  ;;  %p5608_p4 = por %p5607_p9, %p5606_p7 }
  0x4f   : > { %p5602_p5 = pneg %p5601_p2 }
  0x51   : > { %p5609_p10 = pnand %p5608_p4, %p5602_p5 }
  0x53   : > { %5612 = shalt.err (!%p5609_p10)
}
  0x54   : > { %5246 = dma.hbm_to_vmem [thread:$0]  (!%p6288_p6), %s7138_s3, 1024, %s6292_s19, [#allocation9], %s6138_s30, %s6138_s30, %s7118_s17  }
  0x55   : > { %s7139_s5 = sld [smem:[#allocation51_spill]] }
  0x5b   : > { %s5613_s0 = scalar_lea.hbm %s7139_s5, 1024 }
  0x5c   : > { %p5614_p11 = scmp.ne.s32.totalorder %s7139_s5, %s5613_s0  ;;  %p5620_p0 = scmp.lt.u32.totalorder %s5613_s0, %s7139_s5 }
  0x5e   : > { %p5616_p12 = pnand %p5614_p11, %p6304_p8 }
  0x60   : > { %p5617_p13 = pneg %p5616_p12 }
  0x62   : > { %p5622_p2 = pnand %p5620_p0, %p5617_p13 }
  0x64   : > { %5625 = shalt.err (!%p5622_p2)
}
  0x65   : > { %s5626_s19 = scalar_lea.vmem %s6294_s21, 1024  ;;  %p5634_p4 = scmp.lt.s32.totalorder %s6294_s21, %s6294_s21 }
  0x66   : > { %p5627_p5 = scmp.ne.s32.totalorder %s6294_s21, %s5626_s19  ;;  %p5635_p10 = scmp.lt.s32.totalorder %s5626_s19, %s5626_s19 }
  0x68   : > { %p5629_p7 = pnand %p5627_p5, %p6304_p8  ;;  %p5636_p11 = por %p5635_p10, %p5634_p4 }
  0x6a   : > { %p5630_p9 = pneg %p5629_p7 }
  0x6c   : > { %p5637_p12 = pnand %p5636_p11, %p5630_p9 }
  0x6e   : > { %5640 = shalt.err (!%p5637_p12)
}
  0x6f   : > { %5252 = dma.hbm_to_vmem [thread:$0]  (!%p6288_p6), %s7139_s5, 1024, %s6294_s21, [#allocation12], %s6138_s30, %s6138_s30, %s7118_s17  }
  0x70   : > { %s6140_s25 = smov [#allocation14]   ;;  %s6141_s27 = smov [#allocation17]  }
  0x71   : > { %s524_s26 = sshll.u32 %s6140_s25, 4  ;;  %s549_s0 = sshll.u32 %s6141_s27, 4  ;;  %s525_s26 = int_to_ptr.vmem [resolvable:$true] %s524_s26  ;;  %s550_s0 = int_to_ptr.vmem [resolvable:$true] %s549_s0 }
  0x72   : > { %s5641_s20 = scalar_lea.hbm %s7093_s7, 256 }
  0x73   : > { %p5642_p13 = scmp.ne.s32.totalorder %s7093_s7, %s5641_s20  ;;  %p5648_p5 = scmp.lt.u32.totalorder %s5641_s20, %s7093_s7 }
  0x75   : > { %p5644_p0 = pnand %p5642_p13, %p6304_p8 }
  0x77   : > { %p5645_p2 = pneg %p5644_p0 }
  0x79   : > { %p5650_p7 = pnand %p5648_p5, %p5645_p2 }
  0x7b   : > { %5653 = shalt.err (!%p5650_p7)
}
  0x7c   : > { %s5654_s21 = scalar_lea.vmem %s525_s26, 256  ;;  %p5662_p11 = scmp.lt.s32.totalorder %s525_s26, %s525_s26 }
  0x7d   : > { %p5655_p9 = scmp.ne.s32.totalorder %s525_s26, %s5654_s21  ;;  %p5663_p12 = scmp.lt.s32.totalorder %s5654_s21, %s5654_s21 }
  0x7f   : > { %p5657_p4 = pnand %p5655_p9, %p6304_p8  ;;  %p5664_p1 = por %p5663_p12, %p5662_p11 }
  0x81   : > { %p5658_p10 = pneg %p5657_p4 }
  0x83   : > { %p5665_p3 = pnand %p5664_p1, %p5658_p10 }
  0x85   : > { %5668 = shalt.err (!%p5665_p3)
}
  0x86   : > { %5258 = dma.hbm_to_vmem [thread:$0]  (!%p6288_p6), %s7093_s7, 256, %s525_s26, [#allocation15], %s6138_s30, %s6138_s30, %s7118_s17  }
  0x87   : > { %s5669_s22 = scalar_lea.hbm %s7095_s9, 16 }
  0x88   : > { %p5670_p1 = scmp.ne.s32.totalorder %s7095_s9, %s5669_s22  ;;  %p5676_p0 = scmp.lt.u32.totalorder %s5669_s22, %s7095_s9 }
  0x8a   : > { %p5672_p3 = pnand %p5670_p1, %p6304_p8 }
  0x8c   : > { %p5673_p13 = pneg %p5672_p3 }
  0x8e   : > { %p5678_p2 = pnand %p5676_p0, %p5673_p13 }
  0x90   : > { %5681 = shalt.err (!%p5678_p2)
}
  0x91   : > { %s5682_s29 = scalar_lea.vmem %s550_s0, 16  ;;  %s5689_s26 = scalar_lea.vmem %s550_s0, 32 }
  0x92   : > { %p5683_p5 = scmp.ne.s32.totalorder %s550_s0, %s5682_s29  ;;  %p5690_p4 = scmp.lt.s32.totalorder %s550_s0, %s550_s0 }
  0x93   : > { %p5691_p10 = scmp.lt.s32.totalorder %s5689_s26, %s5682_s29 }
  0x94   : > { %p5685_p7 = pnand %p5683_p5, %p6304_p8 }
  0x95   : > { %p5692_p11 = por %p5691_p10, %p5690_p4 }
  0x96   : > { %p5686_p9 = pneg %p5685_p7 }
  0x98   : > { %p5693_p12 = pnand %p5692_p11, %p5686_p9 }
  0x9a   : > { %5696 = shalt.err (!%p5693_p12)
}
  0x9b   : > { %5264 = dma.hbm_to_vmem [thread:$0]  (!%p6288_p6), %s7095_s9, 16, %s550_s0, [#allocation18]  }
  0x9c   : > { %s6142_s16 = smov [#allocation20]   ;;  %s5697_s23 = scalar_lea.hbm %s7097_s11, 4096 }
  0x9d   : > { %s570_s25 = sshll.u32 %s6142_s16, 4  ;;  %p5698_p1 = scmp.ne.s32.totalorder %s7097_s11, %s5697_s23  ;;  %s571_s25 = int_to_ptr.vmem [resolvable:$true] %s570_s25 }
  0x9e   : > { %p5704_p0 = scmp.lt.u32.totalorder %s5697_s23, %s7097_s11 }
  0x9f   : > { %p5700_p3 = pnand %p5698_p1, %p6304_p8 }
  0xa1   : > { %p5701_p13 = pneg %p5700_p3 }
  0xa3   : > { %p5706_p2 = pnand %p5704_p0, %p5701_p13 }
  0xa5   : > { %5709 = shalt.err (!%p5706_p2)
}
  0xa6   : > { %s5710_s0 = scalar_lea.vmem %s571_s25, 4096  ;;  %p5718_p4 = scmp.lt.s32.totalorder %s571_s25, %s571_s25 }
  0xa7   : > { %p5711_p5 = scmp.ne.s32.totalorder %s571_s25, %s5710_s0  ;;  %p5719_p10 = scmp.lt.s32.totalorder %s5710_s0, %s5710_s0 }
  0xa9   : > { %p5713_p7 = pnand %p5711_p5, %p6304_p8  ;;  %p5720_p11 = por %p5719_p10, %p5718_p4 }
  0xab   : > { %p5714_p9 = pneg %p5713_p7 }
  0xad   : > { %p5721_p12 = pnand %p5720_p11, %p5714_p9 }
  0xaf   : > { %5724 = shalt.err (!%p5721_p12)
}
  0xb0   : > { %s6143_s26 = smov 1024   ;;  %s6144_s16 = smov [#allocation23]  }
  0xb1   : > { %5270 = dma.hbm_to_vmem [thread:$0]  (!%p6288_p6), %s7097_s11, 4096, %s571_s25, [#allocation21], %s6143_s26, %s6143_s26, %s6138_s30  }
  0xb2   : > { %s594_s27 = sshll.u32 %s6144_s16, 4  ;;  %s6145_s22 = smov [#allocation26]   ;;  %s595_s27 = int_to_ptr.vmem [resolvable:$true] %s594_s27 }
  0xb3   : > { %s619_s23 = sshll.u32 %s6145_s22, 4  ;;  %s5725_s19 = scalar_lea.hbm %s7099_s13, 16384  ;;  %s620_s23 = int_to_ptr.vmem [resolvable:$true] %s619_s23 }
  0xb4   : > { %p5726_p1 = scmp.ne.s32.totalorder %s7099_s13, %s5725_s19  ;;  %p5732_p0 = scmp.lt.u32.totalorder %s5725_s19, %s7099_s13 }
  0xb6   : > { %p5728_p3 = pnand %p5726_p1, %p6304_p8 }
  0xb8   : > { %p5729_p13 = pneg %p5728_p3 }
  0xba   : > { %p5734_p2 = pnand %p5732_p0, %p5729_p13 }
  0xbc   : > { %5737 = shalt.err (!%p5734_p2)
}
  0xbd   : > { %s5738_s25 = scalar_lea.vmem %s595_s27, 16384  ;;  %p5746_p4 = scmp.lt.s32.totalorder %s595_s27, %s595_s27 }
  0xbe   : > { %p5739_p5 = scmp.ne.s32.totalorder %s595_s27, %s5738_s25  ;;  %p5747_p10 = scmp.lt.s32.totalorder %s5738_s25, %s5738_s25 }
  0xc0   : > { %p5741_p7 = pnand %p5739_p5, %p6304_p8  ;;  %p5748_p11 = por %p5747_p10, %p5746_p4 }
  0xc2   : > { %p5742_p9 = pneg %p5741_p7 }
  0xc4   : > { %p5749_p12 = pnand %p5748_p11, %p5742_p9 }
  0xc6   : > { %5752 = shalt.err (!%p5749_p12)
}
  0xc7   : > { %s7140_s26 = smov 4   ;;  %s5753_s20 = scalar_lea.hbm %s7101_s15, 16 }
  0xc8   : > { %5276 = dma.hbm_to_vmem [thread:$0]  (!%p6288_p6), %s7099_s13, 16384, %s595_s27, [#allocation24], %s6138_s30, %s6138_s30, %s7140_s26  }
  0xc9   : > { %p5754_p1 = scmp.ne.s32.totalorder %s7101_s15, %s5753_s20  ;;  %p5760_p0 = scmp.lt.u32.totalorder %s5753_s20, %s7101_s15 }
  0xcb   : > { %p5756_p3 = pnand %p5754_p1, %p6304_p8 }
  0xcd   : > { %p5757_p13 = pneg %p5756_p3 }
  0xcf   : > { %p5762_p2 = pnand %p5760_p0, %p5757_p13 }
  0xd1   : > { %5765 = shalt.err (!%p5762_p2)
}
  0xd2   : > { %s5766_s21 = scalar_lea.vmem %s620_s23, 16  ;;  %s5773_s30 = scalar_lea.vmem %s620_s23, 32 }
  0xd3   : > { %p5767_p5 = scmp.ne.s32.totalorder %s620_s23, %s5766_s21  ;;  %p5774_p4 = scmp.lt.s32.totalorder %s620_s23, %s620_s23 }
  0xd4   : > { %p5775_p10 = scmp.lt.s32.totalorder %s5773_s30, %s5766_s21 }
  0xd5   : > { %p5769_p7 = pnand %p5767_p5, %p6304_p8 }
  0xd6   : > { %p5776_p11 = por %p5775_p10, %p5774_p4 }
  0xd7   : > { %p5770_p9 = pneg %p5769_p7 }
  0xd9   : > { %p5777_p12 = pnand %p5776_p11, %p5770_p9 }
  0xdb   : > { %5780 = shalt.err (!%p5777_p12)
}
  0xdc   : > { %5282 = dma.hbm_to_vmem [thread:$0]  (!%p6288_p6), %s7101_s15, 16, %s620_s23, [#allocation27]  }
  0xdd   : > { %s6146_s26 = smov [#allocation7]   ;;  %s7141_s2 = sld [smem:[#allocation48_spill]] }
  0xde   : > { %s459_s17 = sshll.u32 %s6146_s26, 4  ;;  %s460_s17 = int_to_ptr.vmem [resolvable:$true] %s459_s17 }
  0xe3   : > { %s5781_s22 = scalar_lea.hbm %s7141_s2, 64 }
  0xe4   : > { %p5782_p1 = scmp.ne.s32.totalorder %s7141_s2, %s5781_s22  ;;  %p5788_p0 = scmp.lt.u32.totalorder %s5781_s22, %s7141_s2 }
  0xe6   : > { %p5784_p3 = pnand %p5782_p1, %p6304_p8 }
  0xe8   : > { %p5785_p13 = pneg %p5784_p3 }
  0xea   : > { %p5790_p2 = pnand %p5788_p0, %p5785_p13 }
  0xec   : > { %5793 = shalt.err (!%p5790_p2)
}
  0xed   : > { %s5794_s23 = scalar_lea.vmem %s460_s17, 64  ;;  %p5802_p4 = scmp.lt.s32.totalorder %s460_s17, %s460_s17 }
  0xee   : > { %p5795_p5 = scmp.ne.s32.totalorder %s460_s17, %s5794_s23  ;;  %p5803_p10 = scmp.lt.s32.totalorder %s5794_s23, %s5794_s23 }
  0xf0   : > { %p5797_p7 = pnand %p5795_p5, %p6304_p8  ;;  %p5804_p11 = por %p5803_p10, %p5802_p4 }
  0xf2   : > { %p5798_p9 = pneg %p5797_p7 }
  0xf4   : > { %p5805_p12 = pnand %p5804_p11, %p5798_p9 }
  0xf6   : > { %5808 = shalt.err (!%p5805_p12)
}
  0xf7   : > { %s6147_s0 = smov 16   ;;  %s6148_s21 = smov 1  }
  0xf8   : > { %5243 = dma.hbm_to_vmem [thread:$0]  (!%p6288_p6), %s7141_s2, 64, %s460_s17, [#allocation6], %s6147_s0, %s6147_s0, %s6148_s21  }
  0xf9   : > { %s6149_s25 = smov [#allocation10]   ;;  %s6150_s3 = smov [#allocation13]  }
  0xfa   : > { %s485_s26 = sshll.u32 %s6149_s25, 4  ;;  %s511_s16 = sshll.u32 %s6150_s3, 4  ;;  %s486_s26 = int_to_ptr.vmem [resolvable:$true] %s485_s26  ;;  %s6498_s16 = int_to_ptr.vmem [resolvable:$true] %s511_s16 }
  0xfb   : > { %s7142_s4 = sld [smem:[#allocation50_spill]] }
 0x101   : > { %s5809_s24 = scalar_lea.hbm %s7142_s4, 64 }
 0x102   : > { %p5810_p1 = scmp.ne.s32.totalorder %s7142_s4, %s5809_s24  ;;  %p5816_p0 = scmp.lt.u32.totalorder %s5809_s24, %s7142_s4 }
 0x104   : > { %p5812_p3 = pnand %p5810_p1, %p6304_p8 }
 0x106   : > { %p5813_p13 = pneg %p5812_p3 }
 0x108   : > { %p5818_p2 = pnand %p5816_p0, %p5813_p13 }
 0x10a   : > { %5821 = shalt.err (!%p5818_p2)
}
 0x10b   : > { %s5822_s30 = scalar_lea.vmem %s486_s26, 64  ;;  %p5830_p4 = scmp.lt.s32.totalorder %s486_s26, %s486_s26 }
 0x10c   : > { %p5823_p5 = scmp.ne.s32.totalorder %s486_s26, %s5822_s30  ;;  %p5831_p10 = scmp.lt.s32.totalorder %s5822_s30, %s5822_s30 }
 0x10e   : > { %p5825_p7 = pnand %p5823_p5, %p6304_p8  ;;  %p5832_p11 = por %p5831_p10, %p5830_p4 }
 0x110   : > { %p5826_p9 = pneg %p5825_p7 }
 0x112   : > { %p5833_p12 = pnand %p5832_p11, %p5826_p9 }
 0x114   : > { %5836 = shalt.err (!%p5833_p12)
}
 0x115   : > { %5249 = dma.hbm_to_vmem [thread:$0]  (!%p6288_p6), %s7142_s4, 64, %s486_s26, [#allocation9], %s6147_s0, %s6147_s0, %s6148_s21  }
 0x116   : > { %s5837_s20 = scalar_lea.hbm %s7092_s6, 64 }
 0x117   : > { %p5838_p1 = scmp.ne.s32.totalorder %s7092_s6, %s5837_s20  ;;  %p5844_p0 = scmp.lt.u32.totalorder %s5837_s20, %s7092_s6 }
 0x119   : > { %p5840_p3 = pnand %p5838_p1, %p6304_p8 }
 0x11b   : > { %p5841_p13 = pneg %p5840_p3 }
 0x11d   : > { %p5846_p2 = pnand %p5844_p0, %p5841_p13 }
 0x11f   : > { %5849 = shalt.err (!%p5846_p2)
}
 0x120   : > { %s5850_s26 = scalar_lea.vmem %s6498_s16, 64  ;;  %p5858_p4 = scmp.lt.s32.totalorder %s6498_s16, %s6498_s16 }
 0x121   : > { %p5851_p5 = scmp.ne.s32.totalorder %s6498_s16, %s5850_s26  ;;  %p5859_p10 = scmp.lt.s32.totalorder %s5850_s26, %s5850_s26 }
 0x123   : > { %p5853_p7 = pnand %p5851_p5, %p6304_p8  ;;  %p5860_p11 = por %p5859_p10, %p5858_p4 }
 0x125   : > { %p5854_p9 = pneg %p5853_p7 }
 0x127   : > { %p5861_p12 = pnand %p5860_p11, %p5854_p9 }
 0x129   : > { %5864 = shalt.err (!%p5861_p12)
}
 0x12a   : > { %5255 = dma.hbm_to_vmem [thread:$0]  (!%p6288_p6), %s7092_s6, 64, %s6498_s16, [#allocation12], %s6147_s0, %s6147_s0, %s6148_s21  }
 0x12b   : > { %s6151_s27 = smov [#allocation16]   ;;  %s6152_s3 = smov [#allocation19]  }
 0x12c   : > { %s538_s25 = sshll.u32 %s6151_s27, 4  ;;  %s560_s22 = sshll.u32 %s6152_s3, 4  ;;  %s539_s25 = int_to_ptr.vmem [resolvable:$true] %s538_s25  ;;  %s6547_s22 = int_to_ptr.vmem [resolvable:$true] %s560_s22 }
 0x12d   : > { %s5865_s19 = scalar_lea.hbm %s7094_s8, 16 }
 0x12e   : > { %p5866_p1 = scmp.ne.s32.totalorder %s7094_s8, %s5865_s19  ;;  %p5872_p0 = scmp.lt.u32.totalorder %s5865_s19, %s7094_s8 }
 0x130   : > { %p5868_p3 = pnand %p5866_p1, %p6304_p8 }
 0x132   : > { %p5869_p13 = pneg %p5868_p3 }
 0x134   : > { %p5874_p2 = pnand %p5872_p0, %p5869_p13 }
 0x136   : > { %5877 = shalt.err (!%p5874_p2)
}
 0x137   : > { %s5878_s21 = scalar_lea.vmem %s539_s25, 16  ;;  %s5885_s16 = scalar_lea.vmem %s539_s25, 32 }
 0x138   : > { %p5879_p5 = scmp.ne.s32.totalorder %s539_s25, %s5878_s21  ;;  %p5886_p4 = scmp.lt.s32.totalorder %s539_s25, %s539_s25 }
 0x139   : > { %p5887_p10 = scmp.lt.s32.totalorder %s5885_s16, %s5878_s21 }
 0x13a   : > { %p5881_p7 = pnand %p5879_p5, %p6304_p8 }
 0x13b   : > { %p5888_p11 = por %p5887_p10, %p5886_p4 }
 0x13c   : > { %p5882_p9 = pneg %p5881_p7 }
 0x13e   : > { %p5889_p12 = pnand %p5888_p11, %p5882_p9 }
 0x140   : > { %5892 = shalt.err (!%p5889_p12)
}
 0x141   : > { %5261 = dma.hbm_to_vmem [thread:$0]  (!%p6288_p6), %s7094_s8, 16, %s539_s25, [#allocation15]  }
 0x142   : > { %s5893_s20 = scalar_lea.hbm %s7096_s10, 16 }
 0x143   : > { %p5894_p1 = scmp.ne.s32.totalorder %s7096_s10, %s5893_s20  ;;  %p5900_p0 = scmp.lt.u32.totalorder %s5893_s20, %s7096_s10 }
 0x145   : > { %p5896_p3 = pnand %p5894_p1, %p6304_p8 }
 0x147   : > { %p5897_p13 = pneg %p5896_p3 }
 0x149   : > { %p5902_p2 = pnand %p5900_p0, %p5897_p13 }
 0x14b   : > { %5905 = shalt.err (!%p5902_p2)
}
 0x14c   : > { %s5906_s25 = scalar_lea.vmem %s6547_s22, 16  ;;  %s5913_s26 = scalar_lea.vmem %s6547_s22, 32 }
 0x14d   : > { %p5907_p5 = scmp.ne.s32.totalorder %s6547_s22, %s5906_s25  ;;  %p5914_p4 = scmp.lt.s32.totalorder %s6547_s22, %s6547_s22 }
 0x14e   : > { %p5915_p10 = scmp.lt.s32.totalorder %s5913_s26, %s5906_s25 }
 0x14f   : > { %p5909_p7 = pnand %p5907_p5, %p6304_p8 }
 0x150   : > { %p5916_p11 = por %p5915_p10, %p5914_p4 }
 0x151   : > { %p5910_p9 = pneg %p5909_p7 }
 0x153   : > { %p5917_p12 = pnand %p5916_p11, %p5910_p9 }
 0x155   : > { %5920 = shalt.err (!%p5917_p12)
}
 0x156   : > { %5267 = dma.hbm_to_vmem [thread:$0]  (!%p6288_p6), %s7096_s10, 16, %s6547_s22, [#allocation18]  }
 0x157   : > { %s6153_s16 = smov [#allocation22]   ;;  %s6154_s30 = smov [#allocation25]  }
 0x158   : > { %s584_s17 = sshll.u32 %s6153_s16, 4  ;;  %s608_s27 = sshll.u32 %s6154_s30, 4  ;;  %s585_s17 = int_to_ptr.vmem [resolvable:$true] %s584_s17  ;;  %s6591_s27 = int_to_ptr.vmem [resolvable:$true] %s608_s27 }
 0x159   : > { %s5921_s24 = scalar_lea.hbm %s7098_s12, 256 }
 0x15a   : > { %p5922_p1 = scmp.ne.s32.totalorder %s7098_s12, %s5921_s24  ;;  %p5928_p0 = scmp.lt.u32.totalorder %s5921_s24, %s7098_s12 }
 0x15c   : > { %p5924_p3 = pnand %p5922_p1, %p6304_p8 }
 0x15e   : > { %p5925_p13 = pneg %p5924_p3 }
 0x160   : > { %p5930_p2 = pnand %p5928_p0, %p5925_p13 }
 0x162   : > { %5933 = shalt.err (!%p5930_p2)
}
 0x163   : > { %s5934_s25 = scalar_lea.vmem %s585_s17, 256  ;;  %p5942_p4 = scmp.lt.s32.totalorder %s585_s17, %s585_s17 }
 0x164   : > { %p5935_p5 = scmp.ne.s32.totalorder %s585_s17, %s5934_s25  ;;  %p5943_p10 = scmp.lt.s32.totalorder %s5934_s25, %s5934_s25 }
 0x166   : > { %p5937_p7 = pnand %p5935_p5, %p6304_p8  ;;  %p5944_p11 = por %p5943_p10, %p5942_p4 }
 0x168   : > { %p5938_p9 = pneg %p5937_p7 }
 0x16a   : > { %p5945_p12 = pnand %p5944_p11, %p5938_p9 }
 0x16c   : > { %5948 = shalt.err (!%p5945_p12)
}
 0x16d   : > { %5273 = dma.hbm_to_vmem [thread:$0]  (!%p6288_p6), %s7098_s12, 256, %s585_s17, [#allocation21]  }
 0x16e   : > { %s5949_s30 = scalar_lea.hbm %s7100_s14, 16 }
 0x16f   : > { %p5950_p1 = scmp.ne.s32.totalorder %s7100_s14, %s5949_s30  ;;  %p5956_p0 = scmp.lt.u32.totalorder %s5949_s30, %s7100_s14 }
 0x171   : > { %p5952_p3 = pnand %p5950_p1, %p6304_p8 }
 0x173   : > { %p5953_p13 = pneg %p5952_p3 }
 0x175   : > { %p5958_p2 = pnand %p5956_p0, %p5953_p13 }
 0x177   : > { %5961 = shalt.err (!%p5958_p2)
}
 0x178   : > { %s5962_s17 = scalar_lea.vmem %s6591_s27, 16  ;;  %s5969_s29 = scalar_lea.vmem %s6591_s27, 32 }
 0x179   : > { %p5963_p5 = scmp.ne.s32.totalorder %s6591_s27, %s5962_s17  ;;  %p5970_p4 = scmp.lt.s32.totalorder %s6591_s27, %s6591_s27 }
 0x17a   : > { %p5971_p10 = scmp.lt.s32.totalorder %s5969_s29, %s5962_s17 }
 0x17b   : > { %p5965_p7 = pnand %p5963_p5, %p6304_p8 }
 0x17c   : > { %p5972_p11 = por %p5971_p10, %p5970_p4 }
 0x17d   : > { %p5966_p9 = pneg %p5965_p7 }
 0x17f   : > { %p5973_p12 = pnand %p5972_p11, %p5966_p9 }
 0x181   : > { %5976 = shalt.err (!%p5973_p12)
}
 0x182   : > { %5279 = dma.hbm_to_vmem [thread:$0]  (!%p6288_p6), %s7100_s14, 16, %s6591_s27, [#allocation24]  }
 0x183   : > { %s6155_s25 = smov [#allocation28]   ;;  %s7143_s16 = sld [smem:[#allocation52_spill]] }
 0x184   : > { %s630_s26 = sshll.u32 %s6155_s25, 4  ;;  %s631_s26 = int_to_ptr.vmem [resolvable:$true] %s630_s26 }
 0x189   : > { %s5977_s30 = scalar_lea.hbm %s7143_s16, 16 }
 0x18a   : > { %p5978_p1 = scmp.ne.s32.totalorder %s7143_s16, %s5977_s30  ;;  %p5984_p0 = scmp.lt.u32.totalorder %s5977_s30, %s7143_s16 }
 0x18c   : > { %p5980_p3 = pnand %p5978_p1, %p6304_p8 }
 0x18e   : > { %p5981_p13 = pneg %p5980_p3 }
 0x190   : > { %p5986_p2 = pnand %p5984_p0, %p5981_p13 }
 0x192   : > { %5989 = shalt.err (!%p5986_p2)
}
 0x193   : > { %s5990_s27 = scalar_lea.vmem %s631_s26, 16  ;;  %s5997_s17 = scalar_lea.vmem %s631_s26, 32 }
 0x194   : > { %p5991_p5 = scmp.ne.s32.totalorder %s631_s26, %s5990_s27  ;;  %p5998_p4 = scmp.lt.s32.totalorder %s631_s26, %s631_s26 }
 0x195   : > { %p5999_p10 = scmp.lt.s32.totalorder %s5997_s17, %s5990_s27 }
 0x196   : > { %p5993_p7 = pnand %p5991_p5, %p6304_p8 }
 0x197   : > { %p6000_p11 = por %p5999_p10, %p5998_p4 }
 0x198   : > { %p5994_p9 = pneg %p5993_p7 }
 0x19a   : > { %p6001_p12 = pnand %p6000_p11, %p5994_p9 }
 0x19c   : > { %6004 = shalt.err (!%p6001_p12)
}
 0x19d   : > { %s7144_s22 = sld [smem:[#allocation43_spill]]  ;;  %s7145_s25 = sld [smem:[#allocation42_spill]] }
 0x19e   : > { %s7146_s0 = sld [smem:[#allocation41_spill]]  ;;  %s7147_s18 = sld [smem:[#allocation40_spill]] }
 0x19f   : > { %s7148_s21 = sld [smem:[#allocation44_spill]] }
 0x1a0   : > { %5285 = dma.hbm_to_vmem [thread:$0]  (!%p6288_p6), %s7143_s16, 16, %s631_s26, [#allocation27]  }
 0x1a3   : > { %s4487_s30 = sadd.s32 4294967294, %s7144_s22   ;;  %s6655_s27 = sadd.s32 1, %s7144_s22  }
 0x1a4   : > { %s48_s1 = sadd.s32 1, %s7145_s25  ;;  %s45_s3 = ssub.s32 %s7144_s22, %s6655_s27 }
 0x1a5   : > { %p55_p8 = scmp.ne.s32.totalorder %s7145_s25, %s7146_s0  ;;  %p46_p1 = scmp.eq.s32.totalorder %s45_s3, 0 }
 0x1a6   : > { %p56_p3 = scmp.eq.s32.totalorder %s7144_s22, 0  ;;  %p61_p13 = scmp.ne.s32.totalorder %s7146_s0, %s7147_s18 }
 0x1a7   : > { %p421_p0 = scmp.eq.s32.totalorder %s7148_s21, 1  ;;  %p7149_p5 = scmp.eq.s32.totalorder %s7148_s21, 0 }
 0x1a8   : > { %s6667_s20 = scalar_select %p46_p1, %s7145_s25, %s48_s1  }
 0x1a9   : > { %p57_p2 = por %p56_p3, %p55_p8  ;;  %p6671_p7 = por %p7149_p5, %p61_p13 }
 0x1aa   : > { %p6675_p6 = por %p421_p0, %p55_p8  ;;  %p427_p9 = scmp.eq.s32.totalorder %s4487_s30, 1 }
 0x1ab   : > { %p5310_p4 = scmp.lt.s32.totalorder %s7144_s22, 2  ;;  %s641_s19 = sand.u32 1, %s7145_s25  }
 0x1ac   : > { %s7151_s26 = scalar_select %p6675_p6, 1, 0 }
 0x1ad   : > { %p6681_p10 = por %p427_p9, %p61_p13  ;;  %s4506_s29 = sshll.u32 %s641_s19, 3 }
 0x1ae   : > { %s4507_s23 = sshll.u32 %s7144_s22, 7  ;;  %s7153_s21 = sld [smem:[#allocation46_spill]] }
 0x1af   : > { %s7152_s17 = scalar_select %p6681_p10, 1, 0 }
 0x1b0   : > { %s645_s3 = scalar_lea.vmem [#allocation2], %s4506_s29  ;;  %p6691_p11 = pnand %p5310_p4, %p57_p2 }
 0x1b1   : > { %s652_s2 = sshll.u32 %s645_s3, 4  ;;  %s642_s22 = scalar_lea.sflag [#allocation3], %s641_s19  ;;  %s6695_s2 = int_to_ptr.vmem [resolvable:$true] %s652_s2 }
 0x1b2   : > { %p6007_p8 = pneg %p6691_p11 }
 0x1b4   : > { %s6689_s1 = scalar_lea.hbm %s7153_s21, %s4507_s23  ;;  %s6010_s0 = scalar_lea.hbm %s7153_s21, 256 }
 0x1b5   : > { %s6005_s25 = scalar_lea.hbm %s6689_s1, 128  ;;  %p6011_p13 = scmp.lt.u32.totalorder %s6689_s1, %s7153_s21 }
 0x1b6   : > { %p6006_p12 = scmp.ne.s32.totalorder %s6689_s1, %s6005_s25  ;;  %p6012_p0 = scmp.lt.u32.totalorder %s6010_s0, %s6005_s25 }
 0x1b7   : > { %p6014_p5 = scmp.lt.u32.totalorder %s6005_s25, %s6689_s1 }
 0x1b8   : > { %p6008_p1 = pnand %p6007_p8, %p6006_p12  ;;  %p6013_p2 = por %p6012_p0, %p6011_p13 }
 0x1ba   : > { %p6009_p3 = pneg %p6008_p1  ;;  %p6015_p9 = por %p6014_p5, %p6013_p2 }
 0x1bc   : > { %p6016_p4 = pnand %p6015_p9, %p6009_p3 }
 0x1be   : > { %6019 = shalt.err (!%p6016_p4)
}
 0x1bf   : > { %s6020_s19 = scalar_lea.vmem %s6695_s2, 128  ;;  %s6156_s23 = smov [#allocation2]  }
 0x1c0   : > { %p6021_p12 = scmp.ne.s32.totalorder %s6695_s2, %s6020_s19  ;;  %s6025_s29 = sshll.u32 %s6156_s23, 4  ;;  %s6026_s29 = int_to_ptr.vmem [resolvable:$false] %s6025_s29 }
 0x1c1   : > { %s6027_s18 = scalar_lea.vmem %s6026_s29, 256  ;;  %p6028_p6 = scmp.lt.s32.totalorder %s6695_s2, %s6026_s29 }
 0x1c2   : > { %p6023_p1 = pnand %p6021_p12, %p6007_p8  ;;  %p6029_p13 = scmp.lt.s32.totalorder %s6027_s18, %s6020_s19 }
 0x1c4   : > { %p6024_p10 = pneg %p6023_p1  ;;  %p6030_p0 = por %p6029_p13, %p6028_p6 }
 0x1c6   : > { %p6031_p2 = pnand %p6030_p0, %p6024_p10 }
 0x1c8   : > { %6034 = shalt.err (!%p6031_p2)
}
 0x1c9   : > { %5289 = dma.hbm_to_vmem [thread:$0]  (!%p6691_p11), %s6689_s1, 128, %s6695_s2, %s642_s22  }
 0x1ca   : > { %s7155_s25 = sld [smem:[#allocation45_spill]] }
 0x1d0   : > { %p7156_p3 = scmp.ne.s32.totalorder %s7155_s25, 0 }
 0x1d1   : > { %s7157_s0 = sld [smem:[#allocation41_spill]] (!%p7156_p3) }
 0x1d2   : > { %661 = sbr.rel (%p7156_p3) target bundleno = 5579 (0x15cb), region = 88 }
 0x1d7   : > { %s6725_s3 = sand.u32 (!%p7156_p3), 1, %s7157_s0  }
 0x1d8   : > { %s4509_s23 = sshll.u32 (!%p7156_p3), %s6725_s3, 3  ;;  %s664_s19 = scalar_lea.sflag (!%p7156_p3), [#allocation3], %s6725_s3 }
 0x1d9   : > { %s6731_s29 = scalar_lea.vmem [#allocation2], %s4509_s23 }
 0x1da   : > { %6080 = dma.done.wait (%p6671_p7), %s664_s19, 128  }
 0x1db   : > { %6082 = vsyncadd (%p6671_p7), %s664_s19, 4294967168  ;;  %s7158_s2 = sld [smem:[#allocation44_spill]] }
 0x1e1   : > { %p7159_p6 = scmp.eq.s32.totalorder %s7158_s2, 0 }
 0x1e3   : > { %6084 = dma.done.wait (%p7159_p6), [#allocation6], 1088   ;;  %p7160_p10 = pmov %p7159_p6 }
 0x1e4   : > { %p7161_p11 = pmov %p7159_p6 }
 0x1e5   : > { %6086 = vsyncadd (%p7160_p10), [#allocation6], 4294966208 }
 0x1e6   : > { %6088 = dma.done.wait (%p7161_p11), [#allocation9], 1088   ;;  %p7162_p8 = pmov %p7159_p6 }
 0x1e7   : > { %p7163_p5 = pmov %p7159_p6 }
 0x1e8   : > { %6090 = vsyncadd (%p7162_p8), [#allocation9], 4294966208 }
 0x1e9   : > { %6092 = dma.done.wait (%p7163_p5), [#allocation12], 1088   ;;  %p7164_p9 = pmov %p7163_p5 }
 0x1ea   : > { %p7165_p7 = pmov %p7163_p5 }
 0x1eb   : > { %6094 = vsyncadd (%p7164_p9), [#allocation12], 4294966208 }
 0x1ec   : > { %6096 = dma.done.wait (%p7165_p7), [#allocation15], 272   ;;  %p7166_p4 = pmov %p7163_p5 }
 0x1ee   : > { %6098 = vsyncadd (%p7166_p4), [#allocation15], 4294967024  ;;  %p7167_p12 = pmov %p7166_p4 }
 0x1ef   : > { %p7168_p1 = pmov %p7166_p4 }
 0x1f0   : > { %6100 = dma.done.wait (%p7167_p12), [#allocation18], 32  }
 0x1f1   : > { %6102 = vsyncadd (%p7168_p1), [#allocation18], 4294967264  ;;  %p7169_p13 = pmov %p7168_p1 }
 0x1f2   : > { %p7170_p0 = pmov %p7168_p1 }
 0x1f3   : > { %6104 = dma.done.wait (%p7169_p13), [#allocation21], 4352  }
 0x1f4   : > { %6106 = vsyncadd (%p7170_p0), [#allocation21], 4294962944  ;;  %p7171_p2 = pmov %p7170_p0 }
 0x1f5   : > { %p7172_p3 = pmov %p7170_p0 }
 0x1f6   : > { %6108 = dma.done.wait (%p7171_p2), [#allocation24], 16400  }
 0x1f7   : > { %6110 = vsyncadd (%p7172_p3), [#allocation24], 4294950896  ;;  %p7173_p6 = pmov %p7170_p0 }
 0x1f8   : > { %p7174_p10 = pmov %p7170_p0 }
 0x1f9   : > { %6112 = dma.done.wait (%p7173_p6), [#allocation27], 32  }
 0x1fa   : > { %6114 = vsyncadd (%p7174_p10), [#allocation27], 4294967264  ;;  %v6157_v0 = vmov 0.0   ;;  %vm6158_vm0 = vmmov 0   ;;  %v5384_v1 = vld [vmem:[#allocation8] sm:$0xff]   ;;  %v5385_v2 = vld [vmem:[#allocation8 + $0x8] sm:$0xff]  }
 0x1fb   : > { %5009 = vmatprep.subr.bf16.mxu1 %v6157_v0  ;;  %5001 = vmatprep.subr.bf16.mxu0 %v6157_v0  ;;  %v5386_v3 = vld [vmem:[#allocation5] sm:$0xff]   ;;  %v783_v4 = vld [vmem:[%s6731_s29] sm:$0xff]  ;;  %vm808_vm1 = vcmask 261120   ;;  %v5387_v5 = vld [vmem:[#allocation5 + $0x8] sm:$0xff]   ;;  %vm980_vm2 = vcmask 64512   ;;  %vm1043_vm3 = vcmask 1043456  }
 0x1fc   : > { %5013 = vmatprep.mubr.msk.bf16.mxu1 %vm6158_vm0, %v6157_v0  ;;  %5005 = vmatprep.mubr.msk.bf16.mxu0 %vm6158_vm0, %v6157_v0  ;;  %v6777_v6 = vpack.c.bf16 %v783_v4, %v783_v4  ;;  %v4531_v7 = vld [vmem:[#allocation10] ss:$0 sm:$0xff]  ;;  %v4527_v12 = vld [vmem:[#allocation7] ss:$0 sm:$0xff]  ;;  %v5388_v22 = vld [vmem:[#allocation11] sm:$0xff]   ;;  %s4762_s24 = sshll.u32 %s7158_s2, 7 }
 0x1fd   : > { %5010 = vmatpush3.bf16.msra.mxu1 %v5384_v1  ;;  %5002 = vmatpush3.bf16.msra.mxu0 %v5386_v3  ;;  %v5389_v23 = vld [vmem:[#allocation11 + $0x8] sm:$0xff]   ;;  %v4535_v37 = vld [vmem:[#allocation13] ss:$0 sm:$0xff]  ;;  %v5393_v43 = vld [vmem:[#allocation5 + $0x18] sm:$0xff]   ;;  %s781_s1 = scalar_lea.vmem [#allocation29], %s4509_s23  ;;  %s7175_s25 = sld [smem:[#allocation53_spill]] }
 0x1fe   : > { %5011 = vmatprep.subr.bf16.mxu1 %v6157_v0  ;;  %5003 = vmatprep.subr.bf16.mxu0 %v6157_v0  ;;  %v5392_v42 = vld [vmem:[#allocation5 + $0x10] sm:$0xff]   ;;  %v5391_v49 = vld [vmem:[#allocation8 + $0x18] sm:$0xff]   ;;  %v4545_v58 = vld [vmem:[#allocation10 + $0x1] ss:$0 sm:$0xff]  ;;  %s4265_s30 = sshll.u32 %s781_s1, 4  ;;  %p7177_p8 = scmp.ne.s32.totalorder %s7151_s26, 0  ;;  %s7043_s30 = int_to_ptr.vmem [resolvable:$true] %s4265_s30 }
 0x1ff   : > { %v5390_v47 = vld [vmem:[#allocation8 + $0x10] sm:$0xff]   ;;  %v4541_v63 = vld [vmem:[#allocation7 + $0x1] ss:$0 sm:$0xff]  ;;  %s6035_s4 = scalar_lea.vmem %s7043_s30, 128  ;;  %s6160_s23 = smov [#allocation29]  }
 0x200   : > { %p6036_p11 = scmp.ne.s32.totalorder %s7043_s30, %s6035_s4  ;;  %s6039_s2 = sshll.u32 %s6160_s23, 4  ;;  %s6040_s2 = int_to_ptr.vmem [resolvable:$false] %s6039_s2 }
 0x201   : > { %5012 = vmatpush3.bf16.msra.mxu1 %v5385_v2  ;;  %5004 = vmatpush3.bf16.msra.mxu0 %v5387_v5  ;;  %s6041_s5 = scalar_lea.vmem %s6040_s2, 256  ;;  %p6042_p7 = scmp.lt.s32.totalorder %s7043_s30, %s6040_s2 }
 0x202   : > { %5025 = vmatprep.subr.bf16.mxu1 %v6157_v0  ;;  %5017 = vmatprep.subr.bf16.mxu0 %v6157_v0  ;;  %p6037_p5 = pnand %p6036_p11, %p7177_p8  ;;  %p6043_p4 = scmp.lt.s32.totalorder %s6041_s5, %s6035_s4 }
 0x203   : > { %s7176_s0 = smov %s7175_s25  ;;  %s7041_s19 = scalar_lea.hbm %s7175_s25, %s4762_s24 }
 0x204   : > { %5014 = vmatmul.mubr.msk.bf16.vlgmr.msra.gmra.mrb[0].mxu1 %vm808_vm1, %v6777_v6  ;;  %5006 = vmatmul.mubr.msk.bf16.vlgmr.msra.gmra.mrb[0].mxu0 %vm808_vm1, %v6777_v6  ;;  %p6038_p9 = pneg %p6037_p5  ;;  %p6044_p12 = por %p6043_p4, %p6042_p7 }
 0x205   : > { %5027 = vmatprep.mubr.msk.bf16.mxu1 %vm6158_vm0, %v6157_v0  ;;  %5021 = vmatprep.mubr.msk.bf16.mxu0 %vm6158_vm0, %v6157_v0 }
 0x206   : > { %5018 = vmatpush3.bf16.msra.mxu0 %v5388_v22  ;;  %p6045_p1 = pnand %p6044_p12, %p6038_p9 }
 0x207   : > { %5019 = vmatprep.subr.bf16.mxu0 %v6157_v0 }
 0x20a   : > { %5020 = vmatpush3.bf16.msra.mxu0 %v5389_v23 }
 0x20b   : > { %5031 = vmatprep.subr.bf16.mxu0 %v6157_v0 }
 0x20d   : > { %5022 = vmatmul.mubr.msk.bf16.vlgmr.msra.gmra.mrb[4].mxu0 %vm808_vm1, %v6777_v6 }
 0x20e   : > { %5033 = vmatprep.mubr.msk.bf16.mxu0 %vm6158_vm0, %v6157_v0 }
 0x2d7   : > { %v909_v8 = vpop.f32.mrb[0].mxu1  ;;  %v846_v13 = vpop.f32.mrb[0].mxu0 }
 0x2d8   : > { %v910_v9 = vadd.f32 %v4531_v7, %v909_v8  ;;  %v5015_v10 = vpop.f32.mrb[1].mxu1  ;;  %v5007_v16 = vpop.f32.mrb[1].mxu0  ;;  %v847_v19 = vadd.f32 %v4527_v12, %v846_v13  ;;  %v5394_v7 = vld [vmem:[#allocation11 + $0x10] sm:$0xff]   ;;  %v5395_v8 = vld [vmem:[#allocation11 + $0x18] sm:$0xff]  }
 0x2d9   : > { %v912_v11 = vpop.f32.mrb[2].mxu1  ;;  %v849_v17 = vpop.f32.mrb[2].mxu0 }
 0x2da   : > { %v979_v14 = vpack.c.bf16 %v910_v9, %v910_v9  ;;  %v5016_v15 = vpop.f32.mrb[3].mxu1  ;;  %v5008_v20 = vpop.f32.mrb[3].mxu0  ;;  %v978_v21 = vpack.c.bf16 %v847_v19, %v847_v19 }
 0x2dc   : > { %v985_v18 = vsel %vm980_vm2, %v979_v14, 0  ;;  %v4549_v14 = vld [vmem:[#allocation13 + $0x1] ss:$0 sm:$0xff] }
 0x2dd   : > { %5026 = vmatpush3.bf16.xpose.msra.mxu1 %v985_v18 }
 0x2de   : > { %5037 = vmatprep.subr.bf16.mxu1 %v6157_v0 }
 0x2e0   : > { %v972_v34 = vpop.f32.mrb[4].mxu0 }
 0x2e1   : > { %v5023_v35 = vpop.f32.mrb[5].mxu0  ;;  %v973_v39 = vadd.f32 %v4535_v37, %v972_v34  ;;  %v5397_v37 = vld [vmem:[#allocation8 + $0x28] sm:$0xff]  }
 0x2e2   : > { %v975_v36 = vpop.f32.mrb[6].mxu0  ;;  %v5396_v35 = vld [vmem:[#allocation8 + $0x20] sm:$0xff]  }
 0x2e3   : > { %v5024_v38 = vpop.f32.mrb[7].mxu0  ;;  %v1039_v40 = vpack.c.bf16 %v973_v39, %v973_v39  ;;  %v5398_v39 = vld [vmem:[#allocation5 + $0x20] sm:$0xff]  }
 0x2e4   : > { %5028 = vmatmul.mubr.msk.bf16.vlgmr.msra.gmra.mrb[4].mxu1 %vm980_vm2, %v978_v21 }
 0x2e5   : > { %5041 = vmatprep.mubr.msk.bf16.mxu1 %vm6158_vm0, %v6157_v0  ;;  %v1045_v41 = vsel %vm1043_vm3, %v1039_v40, 0  ;;  %5038 = vmatpush3.bf16.msra.mxu1 %v5392_v42 }
 0x2e6   : > { %5032 = vmatpush3.bf16.msra.mxu0 %v1045_v41  ;;  %5039 = vmatprep.subr.bf16.mxu1 %v6157_v0 }
 0x2e7   : > { %5045 = vmatprep.subr.bf16.mxu0 %v6157_v0 }
 0x2e9   : > { %5040 = vmatpush3.bf16.msra.mxu1 %v5393_v43 }
 0x2ea   : > { %5053 = vmatprep.subr.bf16.mxu1 %v6157_v0 }
 0x2ec   : > { %5042 = vmatmul.mubr.msk.bf16.vlgmr.msra.gmra.mrb[8].mxu1 %vm808_vm1, %v6777_v6 }
 0x2ed   : > { %5057 = vmatprep.mubr.msk.bf16.mxu1 %vm6158_vm0, %v6157_v0  ;;  %5054 = vmatpush3.bf16.msra.mxu1 %v5394_v7  ;;  %v5400_v7 = vld [vmem:[#allocation11 + $0x20] sm:$0xff]  }
 0x2ee   : > { %5055 = vmatprep.subr.bf16.mxu1 %v6157_v0 }
 0x2f1   : > { %5056 = vmatpush3.bf16.msra.mxu1 %v5395_v8  ;;  %v5401_v8 = vld [vmem:[#allocation11 + $0x28] sm:$0xff]  }
 0x2f2   : > { %5067 = vmatprep.subr.bf16.mxu1 %v6157_v0 }
 0x2f4   : > { %5058 = vmatmul.mubr.msk.bf16.vlgmr.msra.gmra.mrb[12].mxu1 %vm808_vm1, %v6777_v6 }
 0x2f5   : > { %5069 = vmatprep.mubr.msk.bf16.mxu1 %vm6158_vm0, %v6157_v0 }
 0x3b7   : > { %v1021_v24 = vpop.f32.mrb[4].mxu1 }
 0x3b8   : > { %v5029_v25 = vpop.f32.mrb[5].mxu1  ;;  %v1027_v26 = vsel %vm980_vm2, %v1021_v24, -inf }
 0x3b9   : > { %1028 = vmax.xlane.f32.xlu0 %v1027_v26  ;;  %v1024_v27 = vpop.f32.mrb[6].mxu1 }
 0x3ba   : > { %v5030_v28 = vpop.f32.mrb[7].mxu1  ;;  %v1393_v27 = vld [vmem:[#allocation14 + $0x4] sm:$0xf] }
 0x3bb   : > { %v1398_v28 = vsel %vm1043_vm3, %v1393_v27, 0  ;;  %v1790_v27 = vld [vmem:[#allocation14 + $0x8] sm:$0xf] }
 0x3bf   : > { %v1148_v50 = vpop.f32.mrb[8].mxu1 }
 0x3c0   : > { %v5043_v51 = vpop.f32.mrb[9].mxu1  ;;  %v1149_v4 = vadd.f32 %v4541_v63, %v1148_v50 }
 0x3c1   : > { %v1151_v52 = vpop.f32.mrb[10].mxu1 }
 0x3c2   : > { %v5044_v53 = vpop.f32.mrb[11].mxu1  ;;  %v1284_v5 = vpack.c.bf16 %v1149_v4, %v1149_v4 }
 0x3c7   : > { %v1278_v15 = vpop.f32.mrb[12].mxu1 }
 0x3c8   : > { %v1279_v16 = vadd.f32 %v4549_v14, %v1278_v15  ;;  %v5059_v17 = vpop.f32.mrb[13].mxu1 }
 0x3c9   : > { %v1281_v18 = vpop.f32.mrb[14].mxu1 }
 0x3ca   : > { %v1344_v19 = vpack.c.bf16 %v1279_v16, %v1279_v16  ;;  %v5060_v20 = vpop.f32.mrb[15].mxu1 }
 0x3cc   : > { %v1349_v21 = vsel %vm1043_vm3, %v1344_v19, 0 }
 0x3cd   : > { %5068 = vmatpush3.bf16.msra.mxu1 %v1349_v21 }
 0x3ce   : > { %5079 = vmatprep.subr.bf16.mxu1 %v6157_v0 }
 0x446   : > { %v1029_v29 = vpop.xlane.xlu0 %1028 }
 0x447   : > { %v1030_v30 = vsub.f32 %v1021_v24, %v1029_v29 }
 0x449   : > { %v1031_v31 = vmul.f32 1.442695, %v1030_v30 }
 0x44b   : > { %5536 = vpow2.f32 %v1031_v31  ;;  %v1088_v31 = vld [vmem:[#allocation14] sm:$0xf] }
 0x44c   : > { %v1444_v34 = vsel %vm1043_vm3, %v1088_v31, 0 }
 0x455   : > { %v5537_v32 = vpop.eup %5536 }
 0x456   : > { %v1033_v33 = vsel %vm980_vm2, %v5537_v32, 0.0 }
 0x457   : > { %1034 = vadd.xlane.f32.xlu0 %v1033_v33 }
 0x4e4   : > { %v1035_v44 = vpop.xlane.xlu0 %1034 }
 0x4e5   : > { %5538 = vrcp.f32 %v1035_v44  ;;  %v5399_v44 = vld [vmem:[#allocation5 + $0x28] sm:$0xff]  }
 0x4ef   : > { %v5539_v45 = vpop.eup %5538 }
 0x4f0   : > { %v1037_v46 = vmul.f32 %v5539_v45, %v5537_v32 }
 0x4f2   : > { %v1038_v48 = vpack.c.bf16 %v1037_v46, %v1037_v46 }
 0x4f4   : > { %5034 = vmatmul.mubr.msk.bf16.vlgmr.msra.gmra.mrb[8].mxu0 %vm980_vm2, %v1038_v48 }
 0x4f5   : > { %5046 = vmatpush3.bf16.msra.mxu0 %v5390_v47  ;;  %5049 = vmatprep.mubr.msk.bf16.mxu0 %vm6158_vm0, %v6157_v0 }
 0x4f6   : > { %5047 = vmatprep.subr.bf16.mxu0 %v6157_v0 }
 0x4f9   : > { %5048 = vmatpush3.bf16.msra.mxu0 %v5391_v49  ;;  %v4561_v49 = vld [vmem:[#allocation10 + $0x2] ss:$0 sm:$0xff] }
 0x4fa   : > { %5061 = vmatprep.subr.bf16.mxu0 %v6157_v0 }
 0x4fc   : > { %5050 = vmatmul.mubr.msk.bf16.vlgmr.msra.gmra.mrb[12].mxu0 %vm808_vm1, %v6777_v6 }
 0x4fd   : > { %5063 = vmatprep.mubr.msk.bf16.mxu0 %vm6158_vm0, %v6157_v0 }
 0x5c7   : > { %v6820_v54 = vpop.f32.mrb[8].mxu0 }
 0x5c8   : > { %v5035_v55 = vpop.f32.mrb[9].mxu0  ;;  %v1087_v36 = vpack.c.bf16 %v6820_v54, %v6820_v54 }
 0x5c9   : > { %v1084_v56 = vpop.f32.mrb[10].mxu0 }
 0x5ca   : > { %v5036_v57 = vpop.f32.mrb[11].mxu0 }
 0x5cf   : > { %v1213_v59 = vpop.f32.mrb[12].mxu0 }
 0x5d0   : > { %v1214_v60 = vadd.f32 %v4545_v58, %v1213_v59  ;;  %v5051_v61 = vpop.f32.mrb[13].mxu0 }
 0x5d1   : > { %v1216_v62 = vpop.f32.mrb[14].mxu0 }
 0x5d2   : > { %v1285_v1 = vpack.c.bf16 %v1214_v60, %v1214_v60  ;;  %v5052_v2 = vpop.f32.mrb[15].mxu0  ;;  %v4557_v62 = vld [vmem:[#allocation7 + $0x2] ss:$0 sm:$0xff] }
 0x5d4   : > { %v1290_v3 = vsel %vm980_vm2, %v1285_v1, 0 }
 0x5d5   : > { %5062 = vmatpush3.bf16.xpose.msra.mxu0 %v1290_v3 }
 0x5d6   : > { %5073 = vmatprep.subr.bf16.mxu0 %v6157_v0 }
 0x5dc   : > { %5064 = vmatmul.mubr.msk.bf16.vlgmr.msra.gmra.mrb[16].mxu0 %vm980_vm2, %v1284_v5 }
 0x5dd   : > { %5075 = vmatprep.mubr.msk.bf16.mxu0 %vm6158_vm0, %v6157_v0  ;;  %5074 = vmatpush3.bf16.msra.mxu0 %v1398_v28  ;;  %v1795_v28 = vsel %vm1043_vm3, %v1790_v27, 0 }
 0x5de   : > { %5085 = vmatprep.subr.bf16.mxu0 %v6157_v0 }
 0x6af   : > { %v1326_v9 = vpop.f32.mrb[16].mxu0 }
 0x6b0   : > { %v5065_v10 = vpop.f32.mrb[17].mxu0  ;;  %v1332_v11 = vsel %vm980_vm2, %v1326_v9, -inf }
 0x6b1   : > { %1333 = vmax.xlane.f32.xlu1 %v1332_v11  ;;  %v1329_v12 = vpop.f32.mrb[18].mxu0 }
 0x6b2   : > { %v5066_v13 = vpop.f32.mrb[19].mxu0 }
 0x73e   : > { %v1334_v22 = vpop.xlane.xlu1 %1333 }
 0x73f   : > { %v1335_v23 = vsub.f32 %v1326_v9, %v1334_v22  ;;  %v4565_v22 = vld [vmem:[#allocation13 + $0x2] ss:$0 sm:$0xff] }
 0x741   : > { %v1336_v24 = vmul.f32 1.442695, %v1335_v23 }
 0x743   : > { %5540 = vpow2.f32 %v1336_v24 }
 0x74d   : > { %v5541_v25 = vpop.eup %5540 }
 0x74e   : > { %v1338_v26 = vsel %vm980_vm2, %v5541_v25, 0.0 }
 0x74f   : > { %1339 = vadd.xlane.f32.xlu1 %v1338_v26 }
 0x7dc   : > { %v1340_v29 = vpop.xlane.xlu1 %1339 }
 0x7dd   : > { %5542 = vrcp.f32 %v1340_v29 }
 0x7e7   : > { %v5543_v30 = vpop.eup %5542 }
 0x7e8   : > { %v1342_v32 = vmul.f32 %v5543_v30, %v5541_v25 }
 0x7ea   : > { %v1343_v33 = vpack.c.bf16 %v1342_v32, %v1342_v32 }
 0x7ec   : > { %5070 = vmatmul.mubr.msk.bf16.vlgmr.msra.gmra.mrb[16].mxu1 %vm980_vm2, %v1343_v33  ;;  %v5404_v33 = vld [vmem:[#allocation5 + $0x30] sm:$0xff]  }
 0x7ed   : > { %5080 = vmatpush3.bf16.msra.mxu1 %v1444_v34  ;;  %5081 = vmatprep.mubr.msk.bf16.mxu1 %vm6158_vm0, %v6157_v0  ;;  %v5405_v34 = vld [vmem:[#allocation5 + $0x38] sm:$0xff]  }
 0x7ee   : > { %5093 = vmatprep.subr.bf16.mxu1 %v6157_v0 }
 0x7f4   : > { %5082 = vmatmul.mubr.msk.bf16.vlgmr.msra.gmra.mrb[20].mxu1 %vm980_vm2, %v1087_v36  ;;  %v5402_v36 = vld [vmem:[#allocation8 + $0x30] sm:$0xff]  }
 0x7f5   : > { %5094 = vmatpush3.bf16.msra.mxu1 %v5396_v35  ;;  %5097 = vmatprep.mubr.msk.bf16.mxu1 %vm6158_vm0, %v6157_v0 }
 0x7f6   : > { %5095 = vmatprep.subr.bf16.mxu1 %v6157_v0 }
 0x7f9   : > { %5096 = vmatpush3.bf16.msra.mxu1 %v5397_v37 }
 0x7fa   : > { %5109 = vmatprep.subr.bf16.mxu1 %v6157_v0 }
 0x7fc   : > { %5098 = vmatmul.mubr.msk.bf16.vlgmr.msra.gmra.mrb[24].mxu1 %vm808_vm1, %v6777_v6 }
 0x7fd   : > { %5111 = vmatprep.mubr.msk.bf16.mxu1 %vm6158_vm0, %v6157_v0 }
 0x8bf   : > { %v1385_v38 = vpop.f32.mrb[16].mxu1 }
 0x8c0   : > { %v1391_v40 = vpack.c.bf16 %v1385_v38, %v1385_v38  ;;  %v5071_v41 = vpop.f32.mrb[17].mxu1 }
 0x8c1   : > { %v1388_v42 = vpop.f32.mrb[18].mxu1  ;;  %v5403_v41 = vld [vmem:[#allocation8 + $0x38] sm:$0xff]  }
 0x8c2   : > { %v5072_v43 = vpop.f32.mrb[19].mxu1  ;;  %5076 = vmatmul.mubr.msk.bf16.vlgmr.msra.gmra.mrb[20].mxu0 %vm980_vm2, %v1391_v40 }
 0x8c3   : > { %5086 = vmatpush3.bf16.msra.mxu0 %v5398_v39  ;;  %5089 = vmatprep.mubr.msk.bf16.mxu0 %vm6158_vm0, %v6157_v0 }
 0x8c4   : > { %5087 = vmatprep.subr.bf16.mxu0 %v6157_v0 }
 0x8c7   : > { %v1480_v45 = vpop.f32.mrb[20].mxu1  ;;  %5088 = vmatpush3.bf16.msra.mxu0 %v5399_v44 }
 0x8c8   : > { %v5083_v46 = vpop.f32.mrb[21].mxu1  ;;  %5101 = vmatprep.subr.bf16.mxu0 %v6157_v0 }
 0x8c9   : > { %v1483_v47 = vpop.f32.mrb[22].mxu1 }
 0x8ca   : > { %v5084_v48 = vpop.f32.mrb[23].mxu1  ;;  %5090 = vmatmul.mubr.msk.bf16.vlgmr.msra.gmra.mrb[24].mxu0 %vm808_vm1, %v6777_v6 }
 0x8cb   : > { %5105 = vmatprep.mubr.msk.bf16.mxu0 %vm6158_vm0, %v6157_v0  ;;  %5102 = vmatpush3.bf16.msra.mxu0 %v5400_v7 }
 0x8cc   : > { %5103 = vmatprep.subr.bf16.mxu0 %v6157_v0 }
 0x8cf   : > { %v1610_v50 = vpop.f32.mrb[24].mxu1  ;;  %5104 = vmatpush3.bf16.msra.mxu0 %v5401_v8 }
 0x8d0   : > { %v1611_v51 = vadd.f32 %v4561_v49, %v1610_v50  ;;  %v5099_v52 = vpop.f32.mrb[25].mxu1  ;;  %5115 = vmatprep.subr.bf16.mxu0 %v6157_v0 }
 0x8d1   : > { %v1613_v53 = vpop.f32.mrb[26].mxu1 }
 0x8d2   : > { %v1682_v54 = vpack.c.bf16 %v1611_v51, %v1611_v51  ;;  %v5100_v55 = vpop.f32.mrb[27].mxu1  ;;  %5106 = vmatmul.mubr.msk.bf16.vlgmr.msra.gmra.mrb[28].mxu0 %vm808_vm1, %v6777_v6  ;;  %v4576_v51 = vld [vmem:[#allocation10 + $0x3] ss:$0 sm:$0xff] }
 0x8d3   : > { %5117 = vmatprep.mubr.msk.bf16.mxu0 %vm6158_vm0, %v6157_v0 }
 0x8d4   : > { %v1687_v56 = vsel %vm980_vm2, %v1682_v54, 0 }
 0x8d5   : > { %5110 = vmatpush3.bf16.xpose.msra.mxu1 %v1687_v56  ;;  %v4572_v56 = vld [vmem:[#allocation7 + $0x3] ss:$0 sm:$0xff] }
 0x8d6   : > { %5121 = vmatprep.subr.bf16.mxu1 %v6157_v0 }
 0x995   : > { %v1434_v57 = vpop.f32.mrb[20].mxu0 }
 0x996   : > { %v6866_v58 = vadd.f32 %v1480_v45, %v1434_v57  ;;  %v5077_v59 = vpop.f32.mrb[21].mxu0 }
 0x997   : > { %v1437_v60 = vpop.f32.mrb[22].mxu0 }
 0x998   : > { %v5078_v61 = vpop.f32.mrb[23].mxu0 }
 0x99d   : > { %v1545_v63 = vpop.f32.mrb[24].mxu0 }
 0x99e   : > { %v1546_v1 = vadd.f32 %v4557_v62, %v1545_v63  ;;  %v5091_v2 = vpop.f32.mrb[25].mxu0  ;;  %v5407_v63 = vld [vmem:[#allocation11 + $0x38] sm:$0xff]  }
 0x99f   : > { %v1548_v3 = vpop.f32.mrb[26].mxu0 }
 0x9a0   : > { %v1681_v4 = vpack.c.bf16 %v1546_v1, %v1546_v1  ;;  %v5092_v5 = vpop.f32.mrb[27].mxu0 }
 0x9a2   : > { %5112 = vmatmul.mubr.msk.bf16.vlgmr.msra.gmra.mrb[28].mxu1 %vm980_vm2, %v1681_v4 }
 0x9a3   : > { %5123 = vmatprep.mubr.msk.bf16.mxu1 %vm6158_vm0, %v6157_v0  ;;  %5122 = vmatpush3.bf16.msra.mxu1 %v1795_v28 }
 0x9a4   : > { %5135 = vmatprep.subr.bf16.mxu1 %v6157_v0 }
 0x9a5   : > { %v1675_v19 = vpop.f32.mrb[28].mxu0 }
 0x9a6   : > { %v5107_v20 = vpop.f32.mrb[29].mxu0  ;;  %v1676_v24 = vadd.f32 %v4565_v22, %v1675_v19 }
 0x9a7   : > { %v1678_v21 = vpop.f32.mrb[30].mxu0 }
 0x9a8   : > { %v5108_v23 = vpop.f32.mrb[31].mxu0  ;;  %v1741_v25 = vpack.c.bf16 %v1676_v24, %v1676_v24 }
 0x9aa   : > { %v1746_v26 = vsel %vm1043_vm3, %v1741_v25, 0 }
 0x9ab   : > { %5116 = vmatpush3.bf16.msra.mxu0 %v1746_v26 }
 0x9ac   : > { %5127 = vmatprep.subr.bf16.mxu0 %v6157_v0 }
 0xa75   : > { %v1723_v9 = vpop.f32.mrb[28].mxu1 }
 0xa76   : > { %v5113_v10 = vpop.f32.mrb[29].mxu1  ;;  %v1729_v11 = vsel %vm980_vm2, %v1723_v9, -inf }
 0xa77   : > { %1730 = vmax.xlane.f32.xlu0 %v1729_v11  ;;  %v1726_v12 = vpop.f32.mrb[30].mxu1 }
 0xa78   : > { %v5114_v13 = vpop.f32.mrb[31].mxu1 }
 0xb04   : > { %v1731_v14 = vpop.xlane.xlu0 %1730 }
 0xb05   : > { %v1732_v15 = vsub.f32 %v1723_v9, %v1731_v14  ;;  %v4580_v14 = vld [vmem:[#allocation13 + $0x3] ss:$0 sm:$0xff] }
 0xb07   : > { %v1733_v16 = vmul.f32 1.442695, %v1732_v15 }
 0xb09   : > { %5544 = vpow2.f32 %v1733_v16 }
 0xb13   : > { %v5545_v17 = vpop.eup %5544 }
 0xb14   : > { %v1735_v18 = vsel %vm980_vm2, %v5545_v17, 0.0 }
 0xb15   : > { %1736 = vadd.xlane.f32.xlu1 %v1735_v18  ;;  %v2142_v18 = vld [vmem:[#allocation14 + $0xc] sm:$0xf] }
 0xb16   : > { %v2147_v19 = vsel %vm1043_vm3, %v2142_v18, 0 }
 0xba2   : > { %v1737_v29 = vpop.xlane.xlu1 %1736 }
 0xba3   : > { %5546 = vrcp.f32 %v1737_v29 }
 0xbad   : > { %v5547_v30 = vpop.eup %5546 }
 0xbae   : > { %v1739_v31 = vmul.f32 %v5547_v30, %v5545_v17  ;;  %v4587_v30 = vld [vmem:[#allocation16] ss:$0 sm:$0xff] }
 0xbb0   : > { %v1740_v32 = vpack.c.bf16 %v1739_v31, %v1739_v31 }
 0xbb2   : > { %5118 = vmatmul.mubr.msk.bf16.vlgmr.msra.gmra.mrb[32].mxu0 %vm980_vm2, %v1740_v32 }
 0xbb3   : > { %5131 = vmatprep.mubr.msk.bf16.mxu0 %vm6158_vm0, %v6157_v0  ;;  %5128 = vmatpush3.bf16.msra.mxu0 %v5404_v33 }
 0xbb4   : > { %5129 = vmatprep.subr.bf16.mxu0 %v6157_v0 }
 0xbb7   : > { %5130 = vmatpush3.bf16.msra.mxu0 %v5405_v34 }
 0xbb8   : > { %5143 = vmatprep.subr.bf16.mxu0 %v6157_v0 }
 0xbba   : > { %5132 = vmatmul.mubr.msk.bf16.vlgmr.msra.gmra.mrb[36].mxu0 %vm808_vm1, %v6777_v6 }
 0xbbb   : > { %5147 = vmatprep.mubr.msk.bf16.mxu0 %vm6158_vm0, %v6157_v0 }
 0xc85   : > { %v1782_v35 = vpop.f32.mrb[32].mxu0 }
 0xc86   : > { %v1788_v37 = vpack.c.bf16 %v1782_v35, %v1782_v35  ;;  %v5119_v38 = vpop.f32.mrb[33].mxu0 }
 0xc87   : > { %v1785_v39 = vpop.f32.mrb[34].mxu0 }
 0xc88   : > { %v5120_v40 = vpop.f32.mrb[35].mxu0  ;;  %5124 = vmatmul.mubr.msk.bf16.vlgmr.msra.gmra.mrb[32].mxu1 %vm980_vm2, %v1788_v37 }
 0xc89   : > { %5136 = vmatpush3.bf16.msra.mxu1 %v5402_v36  ;;  %5139 = vmatprep.mubr.msk.bf16.mxu1 %vm6158_vm0, %v6157_v0  ;;  %v5556_v36 = vld [vmem:[%s6731_s29] sm:$0xff]  ;;  %s4252_s29 = scalar_lea.sflag [#allocation4], %s6725_s3 }
 0xc8a   : > { %5137 = vmatprep.subr.bf16.mxu1 %v6157_v0 }
 0xc8d   : > { %5138 = vmatpush3.bf16.msra.mxu1 %v5403_v41  ;;  %v1897_v42 = vpop.f32.mrb[36].mxu0 }
 0xc8e   : > { %5151 = vmatprep.subr.bf16.mxu1 %v6157_v0  ;;  %v5133_v43 = vpop.f32.mrb[37].mxu0  ;;  %v1898_v61 = vadd.f32 %v4572_v56, %v1897_v42  ;;  %v2255_v56 = vld [vmem:[#allocation20 + $0xc8] sm:$0xff] }
 0xc8f   : > { %v1900_v44 = vpop.f32.mrb[38].mxu0 }
 0xc90   : > { %5140 = vmatmul.mubr.msk.bf16.vlgmr.msra.gmra.mrb[36].mxu1 %vm808_vm1, %v6777_v6  ;;  %v5134_v45 = vpop.f32.mrb[39].mxu0  ;;  %v2033_v62 = vpack.c.bf16 %v1898_v61, %v1898_v61  ;;  %v2230_v44 = vld [vmem:[#allocation20] sm:$0xff]  ;;  %v2232_v61 = vld [vmem:[#allocation20 + $0x10] sm:$0xff] }
 0xc91   : > { %5153 = vmatprep.mubr.msk.bf16.mxu1 %vm6158_vm0, %v6157_v0  ;;  %v2238_v45 = vld [vmem:[#allocation20 + $0x40] sm:$0xff] }
 0xd5b   : > { %v1831_v46 = vpop.f32.mrb[32].mxu1 }
 0xd5c   : > { %v6902_v47 = vadd.f32 %v1831_v46, %v6866_v58  ;;  %v5125_v48 = vpop.f32.mrb[33].mxu1  ;;  %v5406_v58 = vld [vmem:[#allocation11 + $0x30] sm:$0xff]   ;;  %v2231_v46 = vld [vmem:[#allocation20 + $0x8] sm:$0xff] }
 0xd5d   : > { %v1834_v49 = vpop.f32.mrb[34].mxu1  ;;  %5144 = vmatpush3.bf16.msra.mxu0 %v5406_v58  ;;  %v2239_v48 = vld [vmem:[#allocation20 + $0x48] sm:$0xff]  ;;  %v2233_v58 = vld [vmem:[#allocation20 + $0x18] sm:$0xff] }
 0xd5e   : > { %v5126_v50 = vpop.f32.mrb[35].mxu1  ;;  %5145 = vmatprep.subr.bf16.mxu0 %v6157_v0  ;;  %v4590_v49 = vcombine.low %v2230_v44, %v2238_v45 }
 0xd5f   : > { %v4592_v50 = vcombine.low %v2231_v46, %v2239_v48 }
 0xd61   : > { %5146 = vmatpush3.bf16.msra.mxu0 %v5407_v63 }
 0xd62   : > { %5157 = vmatprep.subr.bf16.mxu0 %v6157_v0 }
 0xd63   : > { %v1962_v52 = vpop.f32.mrb[36].mxu1 }
 0xd64   : > { %v1963_v53 = vadd.f32 %v4576_v51, %v1962_v52  ;;  %v5141_v54 = vpop.f32.mrb[37].mxu1  ;;  %5148 = vmatmul.mubr.msk.bf16.vlgmr.msra.gmra.mrb[40].mxu0 %vm808_vm1, %v6777_v6  ;;  %v4593_v51 = vcombine.high %v2231_v46, %v2239_v48  ;;  %v2246_v52 = vld [vmem:[#allocation20 + $0x80] sm:$0xff]  ;;  %v2260_v46 = vld [vmem:[#allocation20 + $0xf0] sm:$0xff]  ;;  %v2261_v48 = vld [vmem:[#allocation20 + $0xf8] sm:$0xff] }
 0xd65   : > { %v1965_v55 = vpop.f32.mrb[38].mxu1  ;;  %5159 = vmatprep.mubr.msk.bf16.mxu0 %vm6158_vm0, %v6157_v0  ;;  %v2247_v54 = vld [vmem:[#allocation20 + $0x88] sm:$0xff] }
 0xd66   : > { %v2034_v57 = vpack.c.bf16 %v1963_v53, %v1963_v53  ;;  %v5142_v59 = vpop.f32.mrb[39].mxu1  ;;  %v2254_v53 = vld [vmem:[#allocation20 + $0xc0] sm:$0xff] }
 0xd67   : > { %v4607_v55 = vcombine.high %v2246_v52, %v2254_v53  ;;  %v4608_v59 = vcombine.low %v2247_v54, %v2255_v56 }
 0xd68   : > { %v2039_v60 = vsel %vm980_vm2, %v2034_v57, 0  ;;  %v4606_v57 = vcombine.low %v2246_v52, %v2254_v53 }
 0xd69   : > { %5152 = vmatpush3.bf16.xpose.msra.mxu1 %v2039_v60  ;;  %v4609_v60 = vcombine.high %v2247_v54, %v2255_v56  ;;  %v5409_v56 = vld [vmem:[#allocation23 + $0xc0] sm:$0xff]  }
 0xd6a   : > { %5163 = vmatprep.subr.bf16.mxu1 %v6157_v0 }
 0xd70   : > { %5154 = vmatmul.mubr.msk.bf16.vlgmr.msra.gmra.mrb[40].mxu1 %vm980_vm2, %v2033_v62  ;;  %v2240_v62 = vld [vmem:[#allocation20 + $0x50] sm:$0xff] }
 0xd71   : > { %5165 = vmatprep.mubr.msk.bf16.mxu1 %vm6158_vm0, %v6157_v0  ;;  %5164 = vmatpush3.bf16.msra.mxu1 %v2147_v19  ;;  %v4595_v63 = vcombine.high %v2232_v61, %v2240_v62 }
 0xd72   : > { %2550 = vmatprep.subr.bf16.mxu1 %v4593_v51 }
 0xe37   : > { %v2027_v12 = vpop.f32.mrb[40].mxu0 }
 0xe38   : > { %v5149_v6 = vpop.f32.mrb[41].mxu0  ;;  %v2028_v15 = vadd.f32 %v4580_v14, %v2027_v12  ;;  %v2248_v14 = vld [vmem:[#allocation20 + $0x90] sm:$0xff] }
 0xe39   : > { %v2030_v13 = vpop.f32.mrb[42].mxu0  ;;  %v4589_v6 = vld [vmem:[#allocation19] ss:$0 sm:$0xff] }
 0xe3a   : > { %v5150_v0 = vpop.f32.mrb[43].mxu0  ;;  %v2093_v16 = vpack.c.bf16 %v2028_v15, %v2028_v15  ;;  %v2249_v15 = vld [vmem:[#allocation20 + $0x98] sm:$0xff] }
 0xe3b   : > { %v2256_v0 = vld [vmem:[#allocation20 + $0xd0] sm:$0xff] }
 0xe3c   : > { %v2098_v17 = vsel %vm1043_vm3, %v2093_v16, 0  ;;  %v2257_v16 = vld [vmem:[#allocation20 + $0xd8] sm:$0xff]  ;;  %v4611_v19 = vcombine.high %v2248_v14, %v2256_v0 }
 0xe3d   : > { %5158 = vmatpush3.bf16.msra.mxu0 %v2098_v17 }
 0xe43   : > { %v2075_v1 = vpop.f32.mrb[40].mxu1 }
 0xe44   : > { %v5155_v2 = vpop.f32.mrb[41].mxu1  ;;  %v2081_v3 = vsel %vm980_vm2, %v2075_v1, -inf }
 0xe45   : > { %2082 = vmax.xlane.f32.xlu0 %v2081_v3  ;;  %v2078_v4 = vpop.f32.mrb[42].mxu1  ;;  %v6159_v2 = vmov 0   ;;  %v4594_v3 = vcombine.low %v2232_v61, %v2240_v62  ;;  %v5413_v61 = vld [vmem:[#allocation23 + $0xc8] sm:$0xff]  }
 0xe46   : > { %v5156_v5 = vpop.f32.mrb[43].mxu1  ;;  %v5414_v62 = vld [vmem:[#allocation23 + $0x8] sm:$0xff]  }
 0xed2   : > { %v2083_v7 = vpop.xlane.xlu0 %2082 }
 0xed3   : > { %v2084_v8 = vsub.f32 %v2075_v1, %v2083_v7  ;;  %v2241_v1 = vld [vmem:[#allocation20 + $0x58] sm:$0xff] }
 0xed4   : > { %v4596_v4 = vcombine.low %v2233_v58, %v2241_v1  ;;  %v4597_v5 = vcombine.high %v2233_v58, %v2241_v1  ;;  %v5415_v58 = vld [vmem:[#allocation23 + $0x88] sm:$0xff]   ;;  %v5417_v1 = vld [vmem:[#allocation23 + $0xd0] sm:$0xff]  }
 0xed5   : > { %v2085_v9 = vmul.f32 1.442695, %v2084_v8 }
 0xed7   : > { %5548 = vpow2.f32 %v2085_v9 }
 0xee1   : > { %v5549_v10 = vpop.eup %5548 }
 0xee2   : > { %v2087_v11 = vsel %vm980_vm2, %v5549_v10, 0.0 }
 0xee3   : > { %2088 = vadd.xlane.f32.xlu1 %v2087_v11  ;;  %v4588_v11 = vld [vmem:[#allocation17] ss:$0 sm:$0xff] }
 0xf70   : > { %v2089_v20 = vpop.xlane.xlu1 %2088 }
 0xf71   : > { %5550 = vrcp.f32 %v2089_v20  ;;  %v4613_v20 = vcombine.high %v2249_v15, %v2257_v16 }
 0xf7b   : > { %v5551_v21 = vpop.eup %5550 }
 0xf7c   : > { %v2091_v22 = vmul.f32 %v5551_v21, %v5549_v10  ;;  %v2234_v21 = vld [vmem:[#allocation20 + $0x20] sm:$0xff] }
 0xf7e   : > { %v2092_v23 = vpack.c.bf16 %v2091_v22, %v2091_v22  ;;  %v2242_v22 = vld [vmem:[#allocation20 + $0x60] sm:$0xff] }
 0xf80   : > { %5160 = vmatmul.mubr.msk.bf16.vlgmr.msra.gmra.mrb[44].mxu0 %vm980_vm2, %v2092_v23  ;;  %v2235_v23 = vld [vmem:[#allocation20 + $0x28] sm:$0xff] }
 0xf81   : > { %2541 = vmatprep.mubr.bf16.mxu0 %v6159_v2 }
0x1053   : > { %v2134_v24 = vpop.f32.mrb[44].mxu0 }
0x1054   : > { %v2140_v25 = vpack.c.bf16 %v2134_v24, %v2134_v24  ;;  %v5161_v26 = vpop.f32.mrb[45].mxu0  ;;  %v2243_v24 = vld [vmem:[#allocation20 + $0x68] sm:$0xff] }
0x1055   : > { %v2137_v27 = vpop.f32.mrb[46].mxu0  ;;  %v4612_v26 = vcombine.low %v2249_v15, %v2257_v16  ;;  %v5432_v15 = vld [vmem:[#allocation23 + $0x70] sm:$0xff]  }
0x1056   : > { %v5162_v28 = vpop.f32.mrb[47].mxu0  ;;  %5166 = vmatmul.mubr.msk.bf16.vlgmr.msra.gmra.mrb[44].mxu1 %vm980_vm2, %v2140_v25  ;;  %v4610_v25 = vcombine.low %v2248_v14, %v2256_v0  ;;  %v4599_v27 = vcombine.high %v2234_v21, %v2242_v22  ;;  %v5430_v14 = vld [vmem:[#allocation23 + $0x28] sm:$0xff]   ;;  %v5433_v16 = vld [vmem:[#allocation23 + $0xf0] sm:$0xff]  }
0x1057   : > { %2551 = vmatpush1.bf16.msra.mxu1 %v4592_v50  ;;  %2582 = vmatprep.mubr.bf16.mxu1 %v6159_v2  ;;  %v4601_v28 = vcombine.high %v2235_v23, %v2243_v24  ;;  %v5431_v0 = vld [vmem:[#allocation23 + $0xa8] sm:$0xff]  }
0x1058   : > { %2552 = vmatprep.subr.bf16.mxu1 %v4609_v60  ;;  %v5412_v60 = vld [vmem:[#allocation23 + $0x48] sm:$0xff]  }
0x105b   : > { %2553 = vmatpush1.bf16.msra.mxu1 %v4608_v59  ;;  %v5411_v59 = vld [vmem:[#allocation23 + $0x80] sm:$0xff]  }
0x105c   : > { %2632 = vmatprep.subr.bf16.mxu1 %v4597_v5  ;;  %v5421_v5 = vld [vmem:[#allocation23 + $0xd8] sm:$0xff]  }
0x1129   : > { %v2183_v29 = vpop.f32.mrb[44].mxu1 }
0x112a   : > { %v2189_v31 = vadd.f32 %v2183_v29, %v6902_v47  ;;  %v5167_v32 = vpop.f32.mrb[45].mxu1  ;;  %v4591_v47 = vcombine.high %v2230_v44, %v2238_v45  ;;  %v2250_v29 = vld [vmem:[#allocation20 + $0xa0] sm:$0xff]  ;;  %v2252_v45 = vld [vmem:[#allocation20 + $0xb0] sm:$0xff] }
0x112b   : > { %v2186_v33 = vpop.f32.mrb[46].mxu1  ;;  %v2259_v32 = vld [vmem:[#allocation20 + $0xe8] sm:$0xff]  ;;  %v4619_v51 = vcombine.high %v2252_v45, %v2260_v46  ;;  %v4618_v53 = vcombine.low %v2252_v45, %v2260_v46 }
0x112c   : > { %v2197_v34 = vadd.f32 %v4587_v30, %v2189_v31  ;;  %v5168_v35 = vpop.f32.mrb[47].mxu1  ;;  %2509 = vmatprep.subr.bf16.mxu0 %v4591_v47  ;;  %v2258_v30 = vld [vmem:[#allocation20 + $0xe0] sm:$0xff]  ;;  %v2251_v31 = vld [vmem:[#allocation20 + $0xa8] sm:$0xff]  ;;  %v4598_v33 = vcombine.low %v2234_v21, %v2242_v22  ;;  %v2253_v47 = vld [vmem:[#allocation20 + $0xb8] sm:$0xff] }
0x112d   : > { %2510 = vmatpush1.bf16.msra.mxu0 %v4590_v49  ;;  %v4615_v35 = vcombine.high %v2250_v29, %v2258_v30  ;;  %v4621_v52 = vcombine.high %v2253_v47, %v2261_v48  ;;  %v4620_v54 = vcombine.low %v2253_v47, %v2261_v48  ;;  %v5437_v21 = vld [vmem:[#allocation23 + $0xf8] sm:$0xff]  }
0x112e   : > { %v2198_v37 = vadd.f32 %v5556_v36, %v2197_v34  ;;  %2511 = vmatprep.subr.bf16.mxu0 %v4607_v55  ;;  %v4600_v34 = vcombine.low %v2235_v23, %v2243_v24  ;;  %v4617_v36 = vcombine.high %v2251_v31, %v2259_v32  ;;  %v5408_v55 = vld [vmem:[#allocation23 + $0x40] sm:$0xff]   ;;  %v5438_v22 = vld [vmem:[#allocation23 + $0x38] sm:$0xff]  }
0x112f   : > { %v5439_v23 = vld [vmem:[#allocation23 + $0xb8] sm:$0xff]   ;;  %v5440_v24 = vld [vmem:[#allocation23 + $0x140] sm:$0xff]  }
0x1130   : > { %v2199_v38 = vsel %vm808_vm1, %v2198_v37, 0.0 }
0x1131   : > { %2200 = vadd.xlane.f32.xlu0 %v2199_v38  ;;  %2512 = vmatpush1.bf16.msra.mxu0 %v4606_v57  ;;  %v2244_v38 = vld [vmem:[#allocation20 + $0x70] sm:$0xff] }
0x1132   : > { %2591 = vmatprep.subr.bf16.mxu0 %v4595_v63  ;;  %v5410_v57 = vld [vmem:[#allocation23] sm:$0xff]   ;;  %v5416_v63 = vld [vmem:[#allocation23 + $0x50] sm:$0xff]  }
0x11be   : > { %v2201_v39 = vpop.xlane.xlu0 %2200 }
0x11bf   : > { %v2203_v40 = vmul.f32 0.03125, %v2201_v39  ;;  %v2237_v39 = vld [vmem:[#allocation20 + $0x38] sm:$0xff] }
0x11c1   : > { %v2204_v41 = vsub.f32 %v2198_v37, %v2203_v40  ;;  %v2236_v37 = vld [vmem:[#allocation20 + $0x30] sm:$0xff]  ;;  %v2245_v40 = vld [vmem:[#allocation20 + $0x78] sm:$0xff] }
0x11c2   : > { %v4605_v44 = vcombine.high %v2237_v39, %v2245_v40  ;;  %v4602_v49 = vcombine.low %v2236_v37, %v2244_v38  ;;  %v4604_v50 = vcombine.low %v2237_v39, %v2245_v40 }
0x11c3   : > { %v2205_v42 = vmul.f32 %v2204_v41, %v2204_v41 }
0x11c5   : > { %v2206_v43 = vsel %vm808_vm1, %v2205_v42, 0.0  ;;  %v4616_v42 = vcombine.low %v2251_v31, %v2259_v32 }
0x11c6   : > { %2207 = vadd.xlane.f32.xlu1 %v2206_v43  ;;  %v4603_v43 = vcombine.high %v2236_v37, %v2244_v38 }
0x1253   : > { %v2208_v7 = vpop.xlane.xlu1 %2207 }
0x1254   : > { %v2209_v8 = vmul.f32 0.03125, %v2208_v7  ;;  %v5422_v7 = vld [vmem:[#allocation23 + $0x18] sm:$0xff]  }
0x1256   : > { %v2210_v9 = vadd.f32 1e-05, %v2209_v8  ;;  %v5423_v8 = vld [vmem:[#allocation23 + $0x98] sm:$0xff]  }
0x1258   : > { %5552 = vrsqrt.f32 %v2210_v9  ;;  %v5424_v9 = vld [vmem:[#allocation23 + $0x60] sm:$0xff]  }
0x1262   : > { %v5553_v10 = vpop.eup %5552 }
0x1263   : > { %v2212_v12 = vmul.f32 %v5553_v10, %v2204_v41  ;;  %v4614_v41 = vcombine.low %v2250_v29, %v2258_v30  ;;  %v5425_v10 = vld [vmem:[#allocation23 + $0xe0] sm:$0xff]   ;;  %v6958_v29 = vld [vmem:[#allocation22 + $0x8] sm:$0xff] }
0x1265   : > { %v2220_v13 = vmul.f32 %v4588_v11, %v2212_v12  ;;  %v5426_v11 = vld [vmem:[#allocation23 + $0x20] sm:$0xff]  }
0x1266   : > { %v5427_v12 = vld [vmem:[#allocation23 + $0xa0] sm:$0xff]  }
0x1267   : > { %v6927_v17 = vadd.f32 %v4589_v6, %v2220_v13  ;;  %v5428_v6 = vld [vmem:[#allocation23 + $0x68] sm:$0xff]  }
0x1268   : > { %v5429_v13 = vld [vmem:[#allocation23 + $0xe8] sm:$0xff]  }
0x1269   : > { %v6931_v18 = vpack.c.bf16 %v6927_v17, %v6927_v17 }
0x126b   : > { %4622 = vmatmul.mubr.msk.bf16.vlgmr.msra.gmra.mrb[48].mxu0 %vm808_vm1, %v6931_v18  ;;  %4623 = vmatmul.mubr.msk.bf16.vlgmr.msra.gmra.mrb[48].mxu1 %vm808_vm1, %v6931_v18 }
0x126c   : > { %2592 = vmatpush1.bf16.msra.mxu0 %v4594_v3  ;;  %2633 = vmatpush1.bf16.msra.mxu1 %v4596_v4  ;;  %v5419_v3 = vld [vmem:[#allocation23 + $0x90] sm:$0xff]   ;;  %v5420_v4 = vld [vmem:[#allocation23 + $0x58] sm:$0xff]  }
0x126d   : > { %2593 = vmatprep.subr.bf16.mxu0 %v4611_v19  ;;  %2634 = vmatprep.subr.bf16.mxu1 %v4613_v20  ;;  %v5435_v19 = vld [vmem:[#allocation23 + $0xb0] sm:$0xff]   ;;  %v5436_v20 = vld [vmem:[#allocation23 + $0x78] sm:$0xff]  }
0x126e   : > { %2623 = vmatprep.mubr.bf16.mxu0 %v6159_v2  ;;  %2664 = vmatprep.mubr.bf16.mxu1 %v6159_v2 }
0x1270   : > { %2594 = vmatpush1.bf16.msra.mxu0 %v4610_v25  ;;  %2635 = vmatpush1.bf16.msra.mxu1 %v4612_v26  ;;  %v5441_v25 = vld [vmem:[#allocation23 + $0x1c0] sm:$0xff]   ;;  %v2266_v26 = vlaneseq }
0x1271   : > { %2673 = vmatprep.subr.bf16.mxu0 %v4599_v27  ;;  %2714 = vmatprep.subr.bf16.mxu1 %v4601_v28 }
0x1272   : > { %v6955_v27 = vshrl.u32 %v2266_v26, 7  ;;  %v5451_v26 = vld [vmem:[#allocation23 + $0x190] sm:$0xff]  }
0x1273   : > { %4624 = vmatmul.mubr.msk.bf16.vlgmr.msra.gmra.mrb[52].mxu0 %vm808_vm1, %v6931_v18  ;;  %4625 = vmatmul.mubr.msk.bf16.vlgmr.msra.gmra.mrb[52].mxu1 %vm808_vm1, %v6931_v18 }
0x1274   : > { %2674 = vmatpush1.bf16.msra.mxu0 %v4598_v33  ;;  %2715 = vmatpush1.bf16.msra.mxu1 %v4600_v34  ;;  %v2292_v28 = vsub.s32 6, %v6955_v27  ;;  %v2268_v31 = vsub.s32 0, %v6955_v27  ;;  %v2276_v32 = vsub.s32 2, %v6955_v27  ;;  %v6967_v33 = vld [vmem:[#allocation22] sm:$0xff]  ;;  %v2272_v34 = vsub.s32 1, %v6955_v27 }
0x1275   : > { %2675 = vmatprep.subr.bf16.mxu0 %v4615_v35  ;;  %2716 = vmatprep.subr.bf16.mxu1 %v4617_v36  ;;  %v2280_v35 = vsub.s32 3, %v6955_v27 }
0x1276   : > { %2705 = vmatprep.mubr.bf16.mxu0 %v6159_v2  ;;  %2746 = vmatprep.mubr.bf16.mxu1 %v6159_v2  ;;  %v6963_v30 = vrot.slane %v6958_v29, %v2292_v28  ;;  %v2269_v36 = vrot.slane %v6967_v33, %v2268_v31  ;;  %v2277_v37 = vrot.slane %v6967_v33, %v2276_v32 }
0x1277   : > { %v2273_v38 = vrot.slane %v6967_v33, %v2272_v34  ;;  %v2281_v39 = vrot.slane %v6967_v33, %v2280_v35 }
0x1278   : > { %2676 = vmatpush1.bf16.msra.mxu0 %v4614_v41  ;;  %2717 = vmatpush1.bf16.msra.mxu1 %v4616_v42 }
0x1279   : > { %2755 = vmatprep.subr.bf16.mxu0 %v4603_v43  ;;  %2796 = vmatprep.subr.bf16.mxu1 %v4605_v44 }
0x127b   : > { %4626 = vmatmul.mubr.msk.bf16.vlgmr.msra.gmra.mrb[56].mxu0 %vm808_vm1, %v6931_v18  ;;  %4627 = vmatmul.mubr.msk.bf16.vlgmr.msra.gmra.mrb[56].mxu1 %vm808_vm1, %v6931_v18 }
0x127c   : > { %2756 = vmatpush1.bf16.msra.mxu0 %v4602_v49  ;;  %2797 = vmatpush1.bf16.msra.mxu1 %v4604_v50  ;;  %v2288_v50 = vsub.s32 5, %v6955_v27 }
0x127d   : > { %2757 = vmatprep.subr.bf16.mxu0 %v4619_v51  ;;  %2798 = vmatprep.subr.bf16.mxu1 %v4621_v52  ;;  %v2296_v51 = vsub.s32 7, %v6955_v27 }
0x127e   : > { %2787 = vmatprep.mubr.bf16.mxu0 %v6159_v2  ;;  %2828 = vmatprep.mubr.bf16.mxu1 %v6159_v2  ;;  %v5418_v2 = vld [vmem:[#allocation23 + $0x10] sm:$0xff]  }
0x1280   : > { %2758 = vmatpush1.bf16.msra.mxu0 %v4618_v53  ;;  %2799 = vmatpush1.bf16.msra.mxu1 %v4620_v54 }
0x1281   : > { %4825 = vmatprep.subr.bf16.mxu0 %v5408_v55  ;;  %4847 = vmatprep.subr.bf16.mxu1 %v5409_v56 }
0x1283   : > { %4628 = vmatmul.mubr.msk.bf16.vlgmr.msra.gmra.mrb[60].mxu0 %vm808_vm1, %v6931_v18  ;;  %4629 = vmatmul.mubr.msk.bf16.vlgmr.msra.gmra.mrb[60].mxu1 %vm808_vm1, %v6931_v18  ;;  %v5434_v18 = vld [vmem:[#allocation23 + $0x30] sm:$0xff]  }
0x1284   : > { %4826 = vmatpush3.bf16.msra.mxu0 %v5410_v57  ;;  %4848 = vmatpush3.bf16.msra.mxu1 %v5411_v59 }
0x1285   : > { %4827 = vmatprep.subr.bf16.mxu0 %v5412_v60  ;;  %4849 = vmatprep.subr.bf16.mxu1 %v5413_v61  ;;  %v2289_v61 = vrot.slane %v6967_v33, %v2288_v50 }
0x1288   : > { %4828 = vmatpush3.bf16.msra.mxu0 %v5414_v62  ;;  %4850 = vmatpush3.bf16.msra.mxu1 %v5415_v58  ;;  %v2297_v62 = vrot.slane %v6967_v33, %v2296_v51  ;;  %v5442_v58 = vld [vmem:[#allocation23 + $0x100] sm:$0xff]  }
0x1289   : > { %4829 = vmatprep.subr.bf16.mxu0 %v5416_v63  ;;  %4851 = vmatprep.subr.bf16.mxu1 %v5417_v1  ;;  %v5443_v63 = vld [vmem:[#allocation23 + $0x180] sm:$0xff]  }
0x128c   : > { %4830 = vmatpush3.bf16.msra.mxu0 %v5418_v2  ;;  %4852 = vmatpush3.bf16.msra.mxu1 %v5419_v3  ;;  %v5444_v3 = vld [vmem:[#allocation23 + $0x148] sm:$0xff]  }
0x128d   : > { %4831 = vmatprep.subr.bf16.mxu0 %v5420_v4  ;;  %4853 = vmatprep.subr.bf16.mxu1 %v5421_v5  ;;  %v5445_v4 = vld [vmem:[#allocation23 + $0x1c8] sm:$0xff]  }
0x1290   : > { %4832 = vmatpush3.bf16.msra.mxu0 %v5422_v7  ;;  %4854 = vmatpush3.bf16.msra.mxu1 %v5423_v8 }
0x1291   : > { %4833 = vmatprep.subr.bf16.mxu0 %v5424_v9  ;;  %4855 = vmatprep.subr.bf16.mxu1 %v5425_v10 }
0x1294   : > { %4834 = vmatpush3.bf16.msra.mxu0 %v5426_v11  ;;  %4856 = vmatpush3.bf16.msra.mxu1 %v5427_v12 }
0x1295   : > { %4835 = vmatprep.subr.bf16.mxu0 %v5428_v6  ;;  %4857 = vmatprep.subr.bf16.mxu1 %v5429_v13  ;;  %v5446_v13 = vld [vmem:[#allocation23 + $0x108] sm:$0xff]  }
0x1298   : > { %4836 = vmatpush3.bf16.msra.mxu0 %v5430_v14  ;;  %4858 = vmatpush3.bf16.msra.mxu1 %v5431_v0  ;;  %v5447_v14 = vld [vmem:[#allocation23 + $0x188] sm:$0xff]  }
0x1299   : > { %4837 = vmatprep.subr.bf16.mxu0 %v5432_v15  ;;  %4859 = vmatprep.subr.bf16.mxu1 %v5433_v16  ;;  %v5448_v16 = vld [vmem:[#allocation23 + $0x150] sm:$0xff]  }
0x129c   : > { %4838 = vmatpush3.bf16.msra.mxu0 %v5434_v18  ;;  %4860 = vmatpush3.bf16.msra.mxu1 %v5435_v19  ;;  %v5449_v18 = vld [vmem:[#allocation23 + $0x1d0] sm:$0xff]  }
0x129d   : > { %4839 = vmatprep.subr.bf16.mxu0 %v5436_v20  ;;  %4861 = vmatprep.subr.bf16.mxu1 %v5437_v21  ;;  %v2301_v21 = vrot.slane %v6958_v29, %v2268_v31 }
0x12a0   : > { %4840 = vmatpush3.bf16.msra.mxu0 %v5438_v22  ;;  %4862 = vmatpush3.bf16.msra.mxu1 %v5439_v23  ;;  %v2309_v22 = vrot.slane %v6958_v29, %v2276_v32 }
0x12a1   : > { %4869 = vmatprep.subr.bf16.mxu0 %v5440_v24  ;;  %4891 = vmatprep.subr.bf16.mxu1 %v5441_v25  ;;  %v5450_v25 = vld [vmem:[#allocation23 + $0x110] sm:$0xff]  }
0x133e   : > { %v2543_v40 = vpop.f32.mrb[48].mxu0  ;;  %v2584_v41 = vpop.f32.mrb[48].mxu1 }
0x133f   : > { %v2544_v42 = vadd.f32 %v2543_v40, %v2269_v36  ;;  %v2585_v43 = vadd.f32 %v2584_v41, %v2277_v37  ;;  %v2545_v44 = vpop.f32.mrb[49].mxu0  ;;  %v2586_v45 = vpop.f32.mrb[49].mxu1  ;;  %v5452_v36 = vld [vmem:[#allocation23 + $0x158] sm:$0xff]  }
0x1340   : > { %v2546_v46 = vadd.f32 %v2545_v44, %v2273_v38  ;;  %v2587_v47 = vadd.f32 %v2586_v45, %v2281_v39  ;;  %v2547_v48 = vpop.f32.mrb[50].mxu0  ;;  %v2588_v49 = vpop.f32.mrb[50].mxu1  ;;  %v5453_v37 = vld [vmem:[#allocation23 + $0x1d8] sm:$0xff]  }
0x1341   : > { %v2837_v52 = vmax.f32 %v2544_v42, 0.0  ;;  %v2839_v53 = vmax.f32 %v2585_v43, 0.0  ;;  %v2548_v54 = vpop.f32.mrb[51].mxu0  ;;  %v2589_v55 = vpop.f32.mrb[51].mxu1  ;;  %v5454_v44 = vld [vmem:[#allocation23 + $0x118] sm:$0xff]   ;;  %v5456_v49 = vld [vmem:[#allocation23 + $0x160] sm:$0xff]  }
0x1342   : > { %v2838_v56 = vmax.f32 %v2546_v46, 0.0  ;;  %v2840_v57 = vmax.f32 %v2587_v47, 0.0  ;;  %v5455_v45 = vld [vmem:[#allocation23 + $0x198] sm:$0xff]   ;;  %v2284_v46 = vsub.s32 4, %v6955_v27  ;;  %v5458_v54 = vld [vmem:[#allocation23 + $0x120] sm:$0xff]  }
0x1343   : > { %v2853_v1 = vpack.c.bf16 %v2837_v52, %v2837_v52  ;;  %v2855_v2 = vpack.c.bf16 %v2839_v53, %v2839_v53  ;;  %v5457_v52 = vld [vmem:[#allocation23 + $0x1e0] sm:$0xff]   ;;  %v5503_v27 = vld [vmem:[#allocation23 + $0x2b8] sm:$0xff]  }
0x1344   : > { %v2854_v59 = vpack.c.bf16 %v2838_v56, %v2838_v56  ;;  %v2856_v60 = vpack.c.bf16 %v2840_v57, %v2840_v57  ;;  %v2317_v53 = vrot.slane %v6958_v29, %v2284_v46  ;;  %v5459_v55 = vld [vmem:[#allocation23 + $0x1a0] sm:$0xff]   ;;  %v5460_v56 = vld [vmem:[#allocation23 + $0x168] sm:$0xff]  }
0x1345   : > { %v5461_v57 = vld [vmem:[#allocation23 + $0x1e8] sm:$0xff]  }
0x1346   : > { %v6987_v5 = vpop.f32.mrb[52].mxu0  ;;  %v6989_v7 = vpop.f32.mrb[52].mxu1  ;;  %3932 = vmatprep.mubr.bf16.mxu0 %v2854_v59  ;;  %3972 = vmatprep.mubr.bf16.mxu1 %v2856_v60 }
0x1347   : > { %v2627_v8 = vpop.f32.mrb[53].mxu0  ;;  %v2668_v9 = vpop.f32.mrb[53].mxu1  ;;  %3933 = vmatmul.mubr.bf16.vlgmr.msra.gmra.mrb[64].mxu0 %v2853_v1  ;;  %3973 = vmatmul.mubr.bf16.vlgmr.msra.gmra.mrb[64].mxu1 %v2855_v2 }
0x1348   : > { %v2628_v10 = vadd.f32 %v2627_v8, %v2289_v61  ;;  %v2669_v11 = vadd.f32 %v2668_v9, %v2297_v62  ;;  %4870 = vmatpush3.bf16.msra.mxu0 %v5442_v58  ;;  %4892 = vmatpush3.bf16.msra.mxu1 %v5443_v63  ;;  %v2629_v12 = vpop.f32.mrb[54].mxu0  ;;  %v2670_v6 = vpop.f32.mrb[54].mxu1  ;;  %v2285_v8 = vrot.slane %v6967_v33, %v2284_v46  ;;  %v5483_v46 = vld [vmem:[#allocation23 + $0x290] sm:$0xff]  }
0x1349   : > { %v2630_v0 = vpop.f32.mrb[55].mxu0  ;;  %v2671_v15 = vpop.f32.mrb[55].mxu1  ;;  %4871 = vmatprep.subr.bf16.mxu0 %v5444_v3  ;;  %4893 = vmatprep.subr.bf16.mxu1 %v5445_v4  ;;  %v5462_v3 = vld [vmem:[#allocation23 + $0x128] sm:$0xff]   ;;  %v2293_v9 = vrot.slane %v6967_v33, %v2292_v28  ;;  %v5465_v12 = vld [vmem:[#allocation23 + $0x1f0] sm:$0xff]   ;;  %v2305_v6 = vrot.slane %v6958_v29, %v2272_v34  ;;  %v5470_v34 = vld [vmem:[#allocation23 + $0x138] sm:$0xff]  }
0x134a   : > { %v2842_v19 = vmax.f32 %v2628_v10, 0.0  ;;  %v2844_v20 = vmax.f32 %v2669_v11, 0.0  ;;  %v5463_v4 = vld [vmem:[#allocation23 + $0x1a8] sm:$0xff]   ;;  %v5467_v0 = vld [vmem:[#allocation23 + $0x1b0] sm:$0xff]   ;;  %v2626_v28 = vadd.f32 %v6987_v5, %v2285_v8  ;;  %v5468_v15 = vld [vmem:[#allocation23 + $0x178] sm:$0xff]   ;;  %v2329_v8 = vrot.slane %v6958_v29, %v2296_v51 }
0x134b   : > { %v2667_v33 = vadd.f32 %v6989_v7, %v2293_v9  ;;  %v5474_v7 = vld [vmem:[#allocation23 + $0x200] sm:$0xff]   ;;  %v5498_v9 = vld [vmem:[#allocation23 + $0x230] sm:$0xff]  }
0x134c   : > { %v2858_v23 = vpack.c.bf16 %v2842_v19, %v2842_v19  ;;  %v2860_v24 = vpack.c.bf16 %v2844_v20, %v2844_v20  ;;  %4872 = vmatpush3.bf16.msra.mxu0 %v5446_v13  ;;  %4894 = vmatpush3.bf16.msra.mxu1 %v5447_v14  ;;  %v2313_v13 = vrot.slane %v6958_v29, %v2280_v35  ;;  %v5466_v14 = vld [vmem:[#allocation23 + $0x130] sm:$0xff]   ;;  %v5471_v20 = vld [vmem:[#allocation23 + $0x1b8] sm:$0xff]  }
0x134d   : > { %4873 = vmatprep.subr.bf16.mxu0 %v5448_v16  ;;  %4895 = vmatprep.subr.bf16.mxu1 %v5449_v18  ;;  %v5469_v16 = vld [vmem:[#allocation23 + $0x1f8] sm:$0xff]   ;;  %v2843_v35 = vmax.f32 %v2667_v33, 0.0  ;;  %v5506_v33 = vld [vmem:[#allocation23 + $0x300] sm:$0xff]  }
0x134e   : > { %v2707_v38 = vpop.f32.mrb[56].mxu0  ;;  %v2748_v39 = vpop.f32.mrb[56].mxu1  ;;  %4012 = vmatprep.mubr.bf16.mxu0 %v2858_v23  ;;  %4052 = vmatprep.mubr.bf16.mxu1 %v2860_v24  ;;  %v5473_v23 = vld [vmem:[#allocation23 + $0x2c0] sm:$0xff]  }
0x134f   : > { %v6993_v40 = vadd.f32 %v2707_v38, %v2301_v21  ;;  %v6995_v41 = vadd.f32 %v2748_v39, %v2309_v22  ;;  %v2709_v31 = vpop.f32.mrb[57].mxu0  ;;  %v2750_v32 = vpop.f32.mrb[57].mxu1  ;;  %v2841_v21 = vmax.f32 %v2626_v28, 0.0  ;;  %v5472_v22 = vld [vmem:[#allocation23 + $0x240] sm:$0xff]   ;;  %v5476_v38 = vld [vmem:[#allocation23 + $0x248] sm:$0xff]  }
0x1350   : > { %4874 = vmatpush3.bf16.msra.mxu0 %v5450_v25  ;;  %4896 = vmatpush3.bf16.msra.mxu1 %v5451_v26  ;;  %v2711_v42 = vpop.f32.mrb[58].mxu0  ;;  %v2752_v43 = vpop.f32.mrb[58].mxu1  ;;  %v2710_v18 = vadd.f32 %v2709_v31, %v2305_v6  ;;  %v2751_v19 = vadd.f32 %v2750_v32, %v2313_v13  ;;  %v2859_v26 = vpack.c.bf16 %v2843_v35, %v2843_v35  ;;  %v5477_v39 = vld [vmem:[#allocation23 + $0x2c8] sm:$0xff]   ;;  %v5502_v13 = vld [vmem:[#allocation23 + $0x238] sm:$0xff]   ;;  %v5514_v35 = vld [vmem:[#allocation23 + $0x310] sm:$0xff]  }
0x1351   : > { %v2712_v47 = vpop.f32.mrb[59].mxu0  ;;  %v2753_v48 = vpop.f32.mrb[59].mxu1  ;;  %4875 = vmatprep.subr.bf16.mxu0 %v5452_v36  ;;  %4897 = vmatprep.subr.bf16.mxu1 %v5453_v37  ;;  %v2857_v25 = vpack.c.bf16 %v2841_v21, %v2841_v21  ;;  %v5475_v36 = vld [vmem:[#allocation23 + $0x280] sm:$0xff]   ;;  %v5478_v32 = vld [vmem:[#allocation23 + $0x208] sm:$0xff]   ;;  %v5480_v43 = vld [vmem:[#allocation23 + $0x250] sm:$0xff]   ;;  %v2847_v51 = vmax.f32 %v6995_v41, 0.0 }
0x1352   : > { %v2846_v24 = vmax.f32 %v2710_v18, 0.0  ;;  %v2848_v5 = vmax.f32 %v2751_v19, 0.0  ;;  %v5479_v42 = vld [vmem:[#allocation23 + $0x288] sm:$0xff]   ;;  %v5484_v47 = vld [vmem:[#allocation23 + $0x258] sm:$0xff]   ;;  %v5513_v21 = vld [vmem:[#allocation23 + $0x3d0] sm:$0xff]  }
0x1353   : > { %v5485_v48 = vld [vmem:[#allocation23 + $0x2d8] sm:$0xff]   ;;  %v5509_v18 = vld [vmem:[#allocation23 + $0x3c8] sm:$0xff]  }
0x1354   : > { %4876 = vmatpush3.bf16.msra.mxu0 %v5454_v44  ;;  %4898 = vmatpush3.bf16.msra.mxu1 %v5455_v45  ;;  %v2862_v37 = vpack.c.bf16 %v2846_v24, %v2846_v24  ;;  %v2864_v31 = vpack.c.bf16 %v2848_v5, %v2848_v5  ;;  %v5481_v44 = vld [vmem:[#allocation23 + $0x2d0] sm:$0xff]   ;;  %v5510_v41 = vld [vmem:[#allocation23 + $0x308] sm:$0xff]   ;;  %v5517_v24 = vld [vmem:[#allocation23 + $0x3d8] sm:$0xff]  }
0x1355   : > { %4877 = vmatprep.subr.bf16.mxu0 %v5456_v49  ;;  %4899 = vmatprep.subr.bf16.mxu1 %v5457_v52  ;;  %v5482_v45 = vld [vmem:[#allocation23 + $0x210] sm:$0xff]   ;;  %v5486_v49 = vld [vmem:[#allocation23 + $0x218] sm:$0xff]  }
0x1356   : > { %v2789_v59 = vpop.f32.mrb[60].mxu0  ;;  %v2830_v60 = vpop.f32.mrb[60].mxu1  ;;  %v5487_v52 = vld [vmem:[#allocation23 + $0x298] sm:$0xff]  }
0x1357   : > { %v6999_v61 = vadd.f32 %v2789_v59, %v2317_v53  ;;  %v7002_v62 = vadd.f32 %v2830_v60, %v6963_v30  ;;  %v7004_v58 = vpop.f32.mrb[61].mxu0  ;;  %v7006_v63 = vpop.f32.mrb[61].mxu1  ;;  %v5464_v30 = vld [vmem:[#allocation23 + $0x170] sm:$0xff]   ;;  %v5488_v53 = vld [vmem:[#allocation23 + $0x260] sm:$0xff]   ;;  %v5493_v59 = vld [vmem:[#allocation23 + $0x2e8] sm:$0xff]  }
0x1358   : > { %4878 = vmatpush3.bf16.msra.mxu0 %v5458_v54  ;;  %4900 = vmatpush3.bf16.msra.mxu1 %v5459_v55  ;;  %v2793_v1 = vpop.f32.mrb[62].mxu0  ;;  %v2834_v2 = vpop.f32.mrb[62].mxu1  ;;  %v5489_v54 = vld [vmem:[#allocation23 + $0x2e0] sm:$0xff]   ;;  %v5494_v60 = vld [vmem:[#allocation23 + $0x228] sm:$0xff]   ;;  %v2833_v6 = vadd.f32 %v7006_v63, %v2329_v8  ;;  %v2863_v63 = vpack.c.bf16 %v2847_v51, %v2847_v51  ;;  %v5518_v5 = vld [vmem:[#allocation23 + $0x318] sm:$0xff]  }
0x1359   : > { %v2794_v10 = vpop.f32.mrb[63].mxu0  ;;  %v2835_v11 = vpop.f32.mrb[63].mxu1  ;;  %4879 = vmatprep.subr.bf16.mxu0 %v5460_v56  ;;  %4901 = vmatprep.subr.bf16.mxu1 %v5461_v57  ;;  %v5490_v55 = vld [vmem:[#allocation23 + $0x220] sm:$0xff]   ;;  %v5492_v57 = vld [vmem:[#allocation23 + $0x268] sm:$0xff]   ;;  %v5496_v2 = vld [vmem:[#allocation23 + $0x270] sm:$0xff]  }
0x135a   : > { %v5491_v56 = vld [vmem:[#allocation23 + $0x2a0] sm:$0xff]   ;;  %v5495_v1 = vld [vmem:[#allocation23 + $0x2a8] sm:$0xff]   ;;  %v5499_v10 = vld [vmem:[#allocation23 + $0x2b0] sm:$0xff]   ;;  %v2852_v28 = vmax.f32 %v2833_v6, 0.0 }
0x135b   : > { %v5500_v11 = vld [vmem:[#allocation23 + $0x278] sm:$0xff]  }
0x135c   : > { %4880 = vmatpush3.bf16.msra.mxu0 %v5462_v3  ;;  %4902 = vmatpush3.bf16.msra.mxu1 %v5463_v4  ;;  %v5497_v3 = vld [vmem:[#allocation23 + $0x2f0] sm:$0xff]   ;;  %v2321_v4 = vrot.slane %v6958_v29, %v2288_v50  ;;  %v2845_v50 = vmax.f32 %v6993_v40, 0.0  ;;  %v5504_v29 = vld [vmem:[#allocation23 + $0x340] sm:$0xff]   ;;  %v2868_v19 = vpack.c.bf16 %v2852_v28, %v2852_v28 }
0x135d   : > { %4881 = vmatprep.subr.bf16.mxu0 %v5464_v30  ;;  %4903 = vmatprep.subr.bf16.mxu1 %v5465_v12  ;;  %v5501_v30 = vld [vmem:[#allocation23 + $0x2f8] sm:$0xff]  }
0x135e   : > { %v2792_v12 = vadd.f32 %v7004_v58, %v2321_v4  ;;  %v5507_v58 = vld [vmem:[#allocation23 + $0x380] sm:$0xff]  }
0x1360   : > { %4882 = vmatpush3.bf16.msra.mxu0 %v5466_v14  ;;  %4904 = vmatpush3.bf16.msra.mxu1 %v5467_v0  ;;  %v5505_v14 = vld [vmem:[#allocation23 + $0x3c0] sm:$0xff]   ;;  %v2850_v0 = vmax.f32 %v2792_v12, 0.0 }
0x1361   : > { %4883 = vmatprep.subr.bf16.mxu0 %v5468_v15  ;;  %4905 = vmatprep.subr.bf16.mxu1 %v5469_v16  ;;  %v2861_v15 = vpack.c.bf16 %v2845_v50, %v2845_v50  ;;  %v5508_v16 = vld [vmem:[#allocation23 + $0x348] sm:$0xff]  }
0x1362   : > { %v2866_v40 = vpack.c.bf16 %v2850_v0, %v2850_v0 }
0x1364   : > { %4884 = vmatpush3.bf16.msra.mxu0 %v5470_v34  ;;  %4906 = vmatpush3.bf16.msra.mxu1 %v5471_v20  ;;  %v5511_v34 = vld [vmem:[#allocation23 + $0x388] sm:$0xff]   ;;  %v5512_v20 = vld [vmem:[#allocation23 + $0x350] sm:$0xff]  }
0x1365   : > { %4913 = vmatprep.subr.bf16.mxu0 %v5472_v22  ;;  %4935 = vmatprep.subr.bf16.mxu1 %v5473_v23  ;;  %v5515_v22 = vld [vmem:[#allocation23 + $0x390] sm:$0xff]   ;;  %v5516_v23 = vld [vmem:[#allocation23 + $0x358] sm:$0xff]  }
0x1367   : > { %4013 = vmatmul.mubr.bf16.vlgmr.msra.gmra.mrb[68].mxu0 %v2857_v25  ;;  %4053 = vmatmul.mubr.bf16.vlgmr.msra.gmra.mrb[68].mxu1 %v2859_v26  ;;  %v5520_v25 = vld [vmem:[#allocation23 + $0x360] sm:$0xff]  }
0x1368   : > { %4914 = vmatpush3.bf16.msra.mxu0 %v5474_v7  ;;  %4092 = vmatprep.mubr.bf16.mxu0 %v2862_v37  ;;  %v5519_v7 = vld [vmem:[#allocation23 + $0x398] sm:$0xff]   ;;  %v5521_v26 = vld [vmem:[#allocation23 + $0x3e0] sm:$0xff]  }
0x1369   : > { %4936 = vmatpush3.bf16.msra.mxu1 %v5475_v36  ;;  %4132 = vmatprep.mubr.bf16.mxu1 %v2864_v31  ;;  %v5522_v36 = vld [vmem:[#allocation23 + $0x320] sm:$0xff]   ;;  %v5526_v31 = vld [vmem:[#allocation23 + $0x328] sm:$0xff]  }
0x136a   : > { %4915 = vmatprep.subr.bf16.mxu0 %v5476_v38  ;;  %4937 = vmatprep.subr.bf16.mxu1 %v5477_v39  ;;  %v5523_v37 = vld [vmem:[#allocation23 + $0x3a0] sm:$0xff]   ;;  %v5524_v38 = vld [vmem:[#allocation23 + $0x368] sm:$0xff]  }
0x136b   : > { %v5525_v39 = vld [vmem:[#allocation23 + $0x3e8] sm:$0xff]  }
0x136c   : > { %4916 = vmatpush3.bf16.msra.mxu0 %v5478_v32  ;;  %v5527_v32 = vld [vmem:[#allocation23 + $0x3a8] sm:$0xff]  }
0x136d   : > { %4938 = vmatpush3.bf16.msra.mxu1 %v5479_v42  ;;  %4917 = vmatprep.subr.bf16.mxu0 %v5480_v43  ;;  %v5528_v42 = vld [vmem:[#allocation23 + $0x370] sm:$0xff]  }
0x136e   : > { %4939 = vmatprep.subr.bf16.mxu1 %v5481_v44  ;;  %v5529_v43 = vld [vmem:[#allocation23 + $0x3f0] sm:$0xff]  }
0x136f   : > { %v5530_v44 = vld [vmem:[#allocation23 + $0x330] sm:$0xff]  }
0x1370   : > { %4918 = vmatpush3.bf16.msra.mxu0 %v5482_v45  ;;  %v5531_v45 = vld [vmem:[#allocation23 + $0x3b0] sm:$0xff]  }
0x1371   : > { %4940 = vmatpush3.bf16.msra.mxu1 %v5483_v46  ;;  %4919 = vmatprep.subr.bf16.mxu0 %v5484_v47  ;;  %v5532_v46 = vld [vmem:[#allocation23 + $0x378] sm:$0xff]  }
0x1372   : > { %4941 = vmatprep.subr.bf16.mxu1 %v5485_v48  ;;  %v5533_v47 = vld [vmem:[#allocation23 + $0x3f8] sm:$0xff]  }
0x1373   : > { %v5534_v48 = vld [vmem:[#allocation23 + $0x338] sm:$0xff]  }
0x1374   : > { %4920 = vmatpush3.bf16.msra.mxu0 %v5486_v49  ;;  %v2849_v49 = vmax.f32 %v6999_v61, 0.0 }
0x1375   : > { %4942 = vmatpush3.bf16.msra.mxu1 %v5487_v52  ;;  %4921 = vmatprep.subr.bf16.mxu0 %v5488_v53  ;;  %v5535_v52 = vld [vmem:[#allocation23 + $0x3b8] sm:$0xff]   ;;  %v2851_v53 = vmax.f32 %v7002_v62, 0.0 }
0x1376   : > { %4943 = vmatprep.subr.bf16.mxu1 %v5489_v54  ;;  %v2865_v54 = vpack.c.bf16 %v2849_v49, %v2849_v49 }
0x1378   : > { %4922 = vmatpush3.bf16.msra.mxu0 %v5490_v55  ;;  %v2867_v55 = vpack.c.bf16 %v2851_v53, %v2851_v53 }
0x1379   : > { %4944 = vmatpush3.bf16.msra.mxu1 %v5491_v56  ;;  %4923 = vmatprep.subr.bf16.mxu0 %v5492_v57 }
0x137a   : > { %4945 = vmatprep.subr.bf16.mxu1 %v5493_v59  ;;  %v4630_v59 = vld [vmem:[#allocation25] ss:$0 sm:$0xff] }
0x137c   : > { %4924 = vmatpush3.bf16.msra.mxu0 %v5494_v60 }
0x137d   : > { %4946 = vmatpush3.bf16.msra.mxu1 %v5495_v1  ;;  %4925 = vmatprep.subr.bf16.mxu0 %v5496_v2 }
0x137e   : > { %4947 = vmatprep.subr.bf16.mxu1 %v5497_v3 }
0x1380   : > { %4926 = vmatpush3.bf16.msra.mxu0 %v5498_v9 }
0x1381   : > { %4948 = vmatpush3.bf16.msra.mxu1 %v5499_v10  ;;  %4927 = vmatprep.subr.bf16.mxu0 %v5500_v11 }
0x1382   : > { %4949 = vmatprep.subr.bf16.mxu1 %v5501_v30 }
0x1384   : > { %4928 = vmatpush3.bf16.msra.mxu0 %v5502_v13 }
0x1385   : > { %4950 = vmatpush3.bf16.msra.mxu1 %v5503_v27  ;;  %4957 = vmatprep.subr.bf16.mxu0 %v5504_v29 }
0x1386   : > { %4979 = vmatprep.subr.bf16.mxu1 %v5505_v14 }
0x1387   : > { %4093 = vmatmul.mubr.bf16.vlgmr.msra.gmra.mrb[72].mxu0 %v2861_v15 }
0x1388   : > { %4133 = vmatmul.mubr.bf16.vlgmr.msra.gmra.mrb[72].mxu1 %v2863_v63  ;;  %4958 = vmatpush3.bf16.msra.mxu0 %v5506_v33 }
0x1389   : > { %4172 = vmatprep.mubr.bf16.mxu0 %v2866_v40  ;;  %4980 = vmatpush3.bf16.msra.mxu1 %v5507_v58 }
0x138a   : > { %4212 = vmatprep.mubr.bf16.mxu1 %v2868_v19  ;;  %4959 = vmatprep.subr.bf16.mxu0 %v5508_v16 }
0x138b   : > { %4981 = vmatprep.subr.bf16.mxu1 %v5509_v18 }
0x138c   : > { %4960 = vmatpush3.bf16.msra.mxu0 %v5510_v41 }
0x138d   : > { %4982 = vmatpush3.bf16.msra.mxu1 %v5511_v34  ;;  %4961 = vmatprep.subr.bf16.mxu0 %v5512_v20 }
0x138e   : > { %4983 = vmatprep.subr.bf16.mxu1 %v5513_v21 }
0x1390   : > { %4962 = vmatpush3.bf16.msra.mxu0 %v5514_v35 }
0x1391   : > { %4984 = vmatpush3.bf16.msra.mxu1 %v5515_v22  ;;  %4963 = vmatprep.subr.bf16.mxu0 %v5516_v23 }
0x1392   : > { %4985 = vmatprep.subr.bf16.mxu1 %v5517_v24 }
0x1394   : > { %4964 = vmatpush3.bf16.msra.mxu0 %v5518_v5 }
0x1395   : > { %4986 = vmatpush3.bf16.msra.mxu1 %v5519_v7  ;;  %4965 = vmatprep.subr.bf16.mxu0 %v5520_v25 }
0x1396   : > { %4987 = vmatprep.subr.bf16.mxu1 %v5521_v26 }
0x1398   : > { %4966 = vmatpush3.bf16.msra.mxu0 %v5522_v36 }
0x1399   : > { %4988 = vmatpush3.bf16.msra.mxu1 %v5523_v37  ;;  %4967 = vmatprep.subr.bf16.mxu0 %v5524_v38 }
0x139a   : > { %4989 = vmatprep.subr.bf16.mxu1 %v5525_v39 }
0x139c   : > { %4968 = vmatpush3.bf16.msra.mxu0 %v5526_v31 }
0x139d   : > { %4990 = vmatpush3.bf16.msra.mxu1 %v5527_v32  ;;  %4969 = vmatprep.subr.bf16.mxu0 %v5528_v42 }
0x139e   : > { %4991 = vmatprep.subr.bf16.mxu1 %v5529_v43 }
0x13a0   : > { %4970 = vmatpush3.bf16.msra.mxu0 %v5530_v44 }
0x13a1   : > { %4992 = vmatpush3.bf16.msra.mxu1 %v5531_v45  ;;  %4971 = vmatprep.subr.bf16.mxu0 %v5532_v46 }
0x13a2   : > { %4993 = vmatprep.subr.bf16.mxu1 %v5533_v47 }
0x13a4   : > { %4972 = vmatpush3.bf16.msra.mxu0 %v5534_v48 }
0x13a5   : > { %4994 = vmatpush3.bf16.msra.mxu1 %v5535_v52 }
0x13a7   : > { %4173 = vmatmul.mubr.bf16.vlgmr.msra.gmra.mrb[76].mxu0 %v2865_v54  ;;  %v4760_v54 = vld [vmem:[#allocation28] ss:$0 sm:$0xff] }
0x13a8   : > { %4213 = vmatmul.mubr.bf16.vlgmr.msra.gmra.mrb[76].mxu1 %v2867_v55 }
0x141a   : > { %v4841_v56 = vpop.f32.mrb[64].mxu0  ;;  %v4863_v57 = vpop.f32.mrb[64].mxu1 }
0x141b   : > { %v4842_v60 = vpop.f32.mrb[65].mxu0  ;;  %v4864_v1 = vpop.f32.mrb[65].mxu1 }
0x141c   : > { %v4843_v2 = vadd.f32 %v4842_v60, %v4841_v56  ;;  %v4865_v3 = vadd.f32 %v4864_v1, %v4863_v57  ;;  %v4844_v61 = vpop.f32.mrb[66].mxu0  ;;  %v4866_v4 = vpop.f32.mrb[66].mxu1 }
0x141d   : > { %v4845_v8 = vpop.f32.mrb[67].mxu0  ;;  %v4867_v9 = vpop.f32.mrb[67].mxu1 }
0x141e   : > { %v3935_v10 = vadd.f32 %v4843_v2, %v4630_v59 }
0x1420   : > { %v3975_v62 = vadd.f32 %v4865_v3, %v3935_v10 }
0x143a   : > { %v4885_v11 = vpop.f32.mrb[68].mxu0  ;;  %v4907_v30 = vpop.f32.mrb[68].mxu1 }
0x143b   : > { %v4886_v12 = vpop.f32.mrb[69].mxu0  ;;  %v4908_v6 = vpop.f32.mrb[69].mxu1 }
0x143c   : > { %v4887_v13 = vadd.f32 %v4886_v12, %v4885_v11  ;;  %v4909_v50 = vadd.f32 %v4908_v6, %v4907_v30  ;;  %v4888_v27 = vpop.f32.mrb[70].mxu0  ;;  %v4910_v29 = vpop.f32.mrb[70].mxu1 }
0x143d   : > { %v4889_v51 = vpop.f32.mrb[71].mxu0  ;;  %v4911_v14 = vpop.f32.mrb[71].mxu1 }
0x143e   : > { %v4015_v0 = vadd.f32 %v4887_v13, %v3975_v62 }
0x1440   : > { %v4055_v28 = vadd.f32 %v4909_v50, %v4015_v0 }
0x145a   : > { %v4929_v33 = vpop.f32.mrb[72].mxu0 }
0x145b   : > { %v4951_v15 = vpop.f32.mrb[72].mxu1  ;;  %v4930_v58 = vpop.f32.mrb[73].mxu0 }
0x145c   : > { %v4931_v63 = vadd.f32 %v4930_v58, %v4929_v33  ;;  %v4952_v16 = vpop.f32.mrb[73].mxu1  ;;  %v4932_v40 = vpop.f32.mrb[74].mxu0 }
0x145d   : > { %v4953_v18 = vadd.f32 %v4952_v16, %v4951_v15  ;;  %v4954_v19 = vpop.f32.mrb[74].mxu1  ;;  %v4933_v41 = vpop.f32.mrb[75].mxu0 }
0x145e   : > { %v4095_v34 = vadd.f32 %v4931_v63, %v4055_v28  ;;  %v4955_v20 = vpop.f32.mrb[75].mxu1 }
0x1460   : > { %v4135_v21 = vadd.f32 %v4953_v18, %v4095_v34 }
0x147a   : > { %v4973_v35 = vpop.f32.mrb[76].mxu0 }
0x147b   : > { %v4995_v22 = vpop.f32.mrb[76].mxu1  ;;  %v4974_v23 = vpop.f32.mrb[77].mxu0 }
0x147c   : > { %v4975_v24 = vadd.f32 %v4974_v23, %v4973_v35  ;;  %v4996_v5 = vpop.f32.mrb[77].mxu1  ;;  %v4976_v7 = vpop.f32.mrb[78].mxu0 }
0x147d   : > { %v4997_v25 = vadd.f32 %v4996_v5, %v4995_v22  ;;  %v4998_v26 = vpop.f32.mrb[78].mxu1  ;;  %v4977_v36 = vpop.f32.mrb[79].mxu0 }
0x147e   : > { %v4175_v37 = vadd.f32 %v4975_v24, %v4135_v21  ;;  %v4999_v38 = vpop.f32.mrb[79].mxu1 }
0x1480   : > { %v4215_v39 = vadd.f32 %v4997_v25, %v4175_v37 }
0x1482   : > { %v4220_v31 = vadd.f32 %v4215_v39, %v6927_v17  ;;  %v4759_v17 = vld [vmem:[#allocation26] ss:$0 sm:$0xff] }
0x1484   : > { %v4221_v32 = vsel %vm808_vm1, %v4220_v31, 0.0 }
0x1485   : > { %4222 = vadd.xlane.f32.xlu0 %v4221_v32 }
0x1512   : > { %v4223_v42 = vpop.xlane.xlu0 %4222 }
0x1513   : > { %v4224_v43 = vmul.f32 0.03125, %v4223_v42 }
0x1515   : > { %v4225_v44 = vsub.f32 %v4220_v31, %v4224_v43 }
0x1517   : > { %v4226_v45 = vmul.f32 %v4225_v44, %v4225_v44 }
0x1519   : > { %v4227_v46 = vsel %vm808_vm1, %v4226_v45, 0.0 }
0x151a   : > { %4228 = vadd.xlane.f32.xlu1 %v4227_v46 }
0x15a7   : > { %v4229_v47 = vpop.xlane.xlu1 %4228 }
0x15a8   : > { %v4230_v48 = vmul.f32 0.03125, %v4229_v47 }
0x15aa   : > { %v4231_v49 = vadd.f32 1e-05, %v4230_v48 }
0x15ac   : > { %5554 = vrsqrt.f32 %v4231_v49 }
0x15b6   : > { %v5555_v52 = vpop.eup %5554 }
0x15b7   : > { %v4233_v53 = vmul.f32 %v5555_v52, %v4225_v44 }
0x15b9   : > { %v4241_v55 = vmul.f32 %v4759_v17, %v4233_v53 }
0x15bb   : > { %v4249_v56 = vadd.f32 %v4760_v54, %v4241_v55 }
0x15bd   : > { %4250 = vst.msk [vmem:[%s781_s1] sm:$0xff] %vm808_vm1, %v4249_v56 }
0x15be   : > { %6048 = shalt.err (!%p6045_p1)
}
0x15bf   : > { %s6049_s3 = scalar_lea.hbm %s7041_s19, 128  ;;  %s6053_s22 = scalar_lea.hbm %s7176_s0, 256 }
0x15c0   : > { %p6050_p13 = scmp.ne.s32.totalorder %s7041_s19, %s6049_s3  ;;  %p6054_p3 = scmp.lt.u32.totalorder %s7041_s19, %s7176_s0 }
0x15c1   : > { %p6055_p6 = scmp.lt.u32.totalorder %s6053_s22, %s6049_s3  ;;  %p6057_p11 = scmp.lt.u32.totalorder %s6049_s3, %s7041_s19 }
0x15c2   : > { %p6051_p0 = pnand %p6050_p13, %p7177_p8 }
0x15c3   : > { %p6056_p10 = por %p6055_p6, %p6054_p3 }
0x15c4   : > { %p6052_p2 = pneg %p6051_p0 }
0x15c5   : > { %p6058_p5 = por %p6057_p11, %p6056_p10 }
0x15c7   : > { %p6059_p9 = pnand %p6058_p5, %p6052_p2 }
0x15c9   : > { %6062 = shalt.err (!%p6059_p9)
}
0x15ca   : > { %5235 = dma.vmem_to_hbm [thread:$0]  (%p7177_p8), %s7043_s30, 128, %s7041_s19, %s4252_s29  }
0x15cb PF: > { %s7178_s4 = sld [smem:[#allocation40_spill]]  ;;  %s7179_s5 = sld [smem:[#allocation43_spill]] }
0x15cc   : > { %p7180_p7 = scmp.ne.s32.totalorder %s7152_s17, 0 }
0x15d1   : > { %s4277_s23 = sand.u32 1, %s7178_s4   ;;  %p7181_p4 = scmp.ge.s32.totalorder %s7179_s5, 2 }
0x15d2   : > { %s4278_s2 = scalar_lea.sflag [#allocation4], %s4277_s23 }
0x15d3   : > { %p5291_p12 = pnand %p7181_p4, %p7180_p7 }
0x15d5   : > { %6116 = dma.done.wait (!%p5291_p12), %s4278_s2, 128  }
0x15d6   : > { %6118 = vsyncadd (!%p5291_p12), %s4278_s2, 4294967168  ;;  %s7182_s24 = sld [smem:[#allocation41_spill]]  ;;  %s7183_s25 = sld [smem:[#allocation42_spill]] }
0x15d7   : > { %p38_p1 = scmp.ge.s32.totalorder %s6655_s27, 4   ;;  %s7184_s26 = smov %s6667_s20 }
0x15d9   :  { %40 = sbr.rel (!%p38_p1) target bundleno = 22 (0x16), region = 218 }
0x15e0   :  { %4283 = vsyncpa [#allocation3], 1 }
0x15e1   :  { %4285 = vsyncpa [#allocation3 + $0x1], 1 }
0x15e2   :  { %4286 = vsyncpa [#allocation6], 1 }
0x15e3   :  { %4287 = vsyncpa [#allocation9], 1 }
0x15e4   :  { %4288 = vsyncpa [#allocation12], 1 }
0x15e5   :  { %4289 = vsyncpa [#allocation15], 1 }
0x15e6   :  { %4290 = vsyncpa [#allocation18], 1 }
0x15e7   :  { %4291 = vsyncpa [#allocation21], 1 }
0x15e8   :  { %4292 = vsyncpa [#allocation24], 1 }
0x15e9   :  { %4293 = vsyncpa [#allocation27], 1 }
0x15ea   :  { %4294 = vsyncpa [#allocation4], 1 }
0x15eb   :  { %4296 = vsyncpa [#allocation4 + $0x1], 1 }

// kernel: a_call__.6
= control target key start
LH: loop header
LB: loop body
LE: loop exit
PB: predicated region body
PF: predicated region fallthrough
CT: control target
= control target key end

     0   :  { %s10392_s0 = inlined_call_operand.hbm [shape: f32[16,32], index: 0, kind: input, shape index: {}]   ;;  %s10393_s1 = inlined_call_operand.hbm [shape: f32[16,32], index: 1, kind: input, shape index: {}]   ;;  %s10394_s2 = inlined_call_operand.hbm [shape: bf16[4,32,8], index: 2, kind: input, shape index: {}]   ;;  %s10395_s3 = inlined_call_operand.hbm [shape: f32[4,1,8], index: 3, kind: input, shape index: {}]   ;;  %s10396_s4 = inlined_call_operand.hbm [shape: bf16[4,32,8], index: 4, kind: input, shape index: {}]   ;;  %s10397_s5 = inlined_call_operand.hbm [shape: f32[4,1,8], index: 5, kind: input, shape index: {}]   ;;  %s10398_s6 = inlined_call_operand.hbm [shape: bf16[4,32,8], index: 6, kind: input, shape index: {}]   ;;  %s10399_s7 = inlined_call_operand.hbm [shape: f32[4,1,8], index: 7, kind: input, shape index: {}]   ;;  %s10400_s8 = inlined_call_operand.hbm [shape: bf16[4,8,32], index: 8, kind: input, shape index: {}]   ;;  %s10401_s9 = inlined_call_operand.hbm [shape: f32[1,32], index: 9, kind: input, shape index: {}]   ;;  %s10402_s10 = inlined_call_operand.hbm [shape: f32[1,32], index: 10, kind: input, shape index: {}, may-alias: {10,20,26}]   ;;  %s10403_s11 = inlined_call_operand.hbm [shape: f32[1,32], index: 11, kind: input, shape index: {}, may-alias: {11,21,27}]   ;;  %s10404_s12 = inlined_call_operand.hbm [shape: bf16[4,32,8], index: 12, kind: input, shape index: {}]   ;;  %s10405_s13 = inlined_call_operand.hbm [shape: f32[4,1,8], index: 13, kind: input, shape index: {}]   ;;  %s10406_s14 = inlined_call_operand.hbm [shape: bf16[4,32,8], index: 14, kind: input, shape index: {}]   ;;  %s10407_s15 = inlined_call_operand.hbm [shape: f32[4,1,8], index: 15, kind: input, shape index: {}]   ;;  %s10408_s16 = inlined_call_operand.hbm [shape: bf16[4,32,8], index: 16, kind: input, shape index: {}]   ;;  %s10409_s17 = inlined_call_operand.hbm [shape: f32[4,1,8], index: 17, kind: input, shape index: {}]   ;;  %s10410_s18 = inlined_call_operand.hbm [shape: bf16[4,8,32], index: 18, kind: input, shape index: {}]   ;;  %s10411_s19 = inlined_call_operand.hbm [shape: f32[1,32], index: 19, kind: input, shape index: {}]   ;;  %s10412_s20 = inlined_call_operand.hbm [shape: f32[1,32], index: 20, kind: input, shape index: {}, may-alias: {10,20,26}]   ;;  %s10413_s21 = inlined_call_operand.hbm [shape: f32[1,32], index: 21, kind: input, shape index: {}, may-alias: {11,21,27}]   ;;  %s10414_s22 = inlined_call_operand.hbm [shape: bf16[32,2048], index: 22, kind: input, shape index: {}]   ;;  %s10415_s23 = inlined_call_operand.hbm [shape: f32[1,2048], index: 23, kind: input, shape index: {}]   ;;  %s10416_s24 = inlined_call_operand.hbm [shape: bf16[2048,32], index: 24, kind: input, shape index: {}]   ;;  %s10417_s25 = inlined_call_operand.hbm [shape: f32[1,32], index: 25, kind: input, shape index: {}]   ;;  %s10418_s26 = inlined_call_operand.hbm [shape: f32[1,32], index: 26, kind: input, shape index: {}, may-alias: {10,20,26}]   ;;  %s10419_s27 = inlined_call_operand.hbm [shape: f32[1,32], index: 27, kind: input, shape index: {}, may-alias: {11,21,27}]   ;;  %s10420_s28 = inlined_call_operand.hbm [shape: f32[16,32], index: 28, kind: output, shape index: {}]  }
   0x1   :  { %10469 = sst [smem:[#allocation70_spill]] %s10392_s0 }
   0x2   :  { %10470 = sst [smem:[#allocation71_spill]] %s10393_s1 }
   0x3   :  { %10471 = sst [smem:[#allocation72_spill]] %s10394_s2 }
   0x4   :  { %10472 = sst [smem:[#allocation73_spill]] %s10395_s3 }
   0x5   :  { %10473 = sst [smem:[#allocation74_spill]] %s10396_s4 }
   0x6   :  { %10474 = sst [smem:[#allocation75_spill]] %s10397_s5 }
   0x7   :  { %10475 = sst [smem:[#allocation76_spill]] %s10398_s6 }
   0x8   :  { %10476 = sst [smem:[#allocation77_spill]] %s10399_s7 }
   0x9   :  { %10477 = sst [smem:[#allocation78_spill]] %s10400_s8 }
   0xa   :  { %10478 = sst [smem:[#allocation79_spill]] %s10401_s9 }
   0xb   :  { %10479 = sst [smem:[#allocation80_spill]] %s10402_s10 }
   0xc   :  { %10480 = sst [smem:[#allocation81_spill]] %s10403_s11 }
   0xd   :  { %10481 = sst [smem:[#allocation82_spill]] %s10404_s12 }
   0xe   :  { %10482 = sst [smem:[#allocation83_spill]] %s10405_s13 }
   0xf   :  { %10483 = sst [smem:[#allocation84_spill]] %s10406_s14 }
  0x10   :  { %10484 = sst [smem:[#allocation85_spill]] %s10407_s15 }
  0x11   :  { %10485 = sst [smem:[#allocation86_spill]] %s10408_s16 }
  0x12   :  { %10486 = sst [smem:[#allocation87_spill]] %s10409_s17 }
  0x13   :  { %10487 = sst [smem:[#allocation88_spill]] %s10410_s18 }
  0x14   :  { %10488 = sst [smem:[#allocation89_spill]] %s10411_s19 }
  0x15   :  { %10489 = sst [smem:[#allocation90_spill]] %s10412_s20 }
  0x16   :  { %10490 = sst [smem:[#allocation91_spill]] %s10416_s24 }
  0x17   :  { %10491 = sst [smem:[#allocation92_spill]] %s10418_s26 }
  0x18   :  { %10492 = sst [smem:[#allocation93_spill]] %s10419_s27 }
  0x19   :  { %10493 = sst [smem:[#allocation94_spill]] %s10420_s28 }
  0x1a   :  { %33 = vsyncpa [#allocation3], 0 }
  0x1b   :  { %35 = vsyncpa [#allocation3 + $0x1], 0 }
  0x1c   :  { %36 = vsyncpa [#allocation6], 0 }
  0x1d   :  { %38 = vsyncpa [#allocation6 + $0x1], 0 }
  0x1e   :  { %39 = vsyncpa [#allocation9], 0 }
  0x1f   :  { %40 = vsyncpa [#allocation12], 0 }
  0x20   :  { %41 = vsyncpa [#allocation15], 0 }
  0x21   :  { %42 = vsyncpa [#allocation18], 0 }
  0x22   :  { %43 = vsyncpa [#allocation21], 0 }
  0x23   :  { %44 = vsyncpa [#allocation24], 0 }
  0x24   :  { %45 = vsyncpa [#allocation27], 0 }
  0x25   :  { %46 = vsyncpa [#allocation30], 0 }
  0x26   :  { %47 = vsyncpa [#allocation33], 0 }
  0x27   :  { %48 = vsyncpa [#allocation36], 0 }
  0x28   :  { %49 = vsyncpa [#allocation39], 0 }
  0x29   :  { %50 = vsyncpa [#allocation42], 0 }
  0x2a   :  { %51 = vsyncpa [#allocation45], 0 }
  0x2b   :  { %52 = vsyncpa [#allocation4], 0 }
  0x2c   :  { %54 = vsyncpa [#allocation4 + $0x1], 0  ;;  %s9153_s8 = smov 0   ;;  %s9155_s5 = smov 0  }
  0x2d   :  { %s9157_s9 = smov 0   ;;  %s9159_s30 = smov 0  }
  0x2e LB: > { %10494 = sst [smem:[#allocation64_spill]] %s8957_s8  ;;  %s8971_s3 = smov [#allocation7]   ;;  %s8969_s30 = sphi %s9159_s30, %s10586_s30   ;;  %s8965_s9 = sphi %s9157_s9, %s10585_s9   ;;  %s8961_s5 = sphi %s9155_s5, %s10584_s5   ;;  %s8957_s8 = sphi %s9153_s8, %s10583_s8  }
  0x2f   : > { %10495 = sst [smem:[#allocation65_spill]] %s8961_s5  ;;  %s701_s6 = sshll.u32 %s8971_s3, 4  ;;  %s9179_s6 = int_to_ptr.vmem [resolvable:$true] %s701_s6 }
  0x30   : > { %10496 = sst [smem:[#allocation66_spill]] %s8965_s9  ;;  %s9174_s10 = sadd.s32 4294967295, %s8969_s30  }
  0x31   : > { %10497 = sst [smem:[#allocation67_spill]] %s8969_s30  ;;  %p6525_p0 = scmp.ge.s32.totalorder %s8969_s30, 1 }
  0x32   : > { %10498 = sst [smem:[#allocation68_spill]] %s9174_s10  ;;  %p10448_p1 = scmp.eq.s32.totalorder %s9174_s10, 0 }
  0x33   : > { %p689_p2 = scmp.lt.s32.totalorder %s8969_s30, 3  ;;  %s8972_s11 = smov [#allocation8]  }
  0x34   : > { %s714_s29 = sshll.u32 %s8972_s11, 4  ;;  %s8973_s7 = smov [#allocation11]   ;;  %s9194_s29 = int_to_ptr.vmem [resolvable:$true] %s714_s29 }
  0x35   : > { %p9181_p3 = pnand %p6525_p0, %p689_p2  ;;  %s9196_s12 = sshll.u32 %s8973_s7, 4  ;;  %s741_s12 = int_to_ptr.vmem [resolvable:$true] %s9196_s12 }
  0x36   : > { %s10502_s3 = sld [smem:[#allocation72_spill]] }
  0x37   : > { %s10499_s0 = scalar_select %p9181_p3, 1, 0 }
  0x38   : > { %p7630_p5 = pneg %p9181_p3 }
  0x39   : > { %10500 = sst [smem:[#allocation69_spill]] %s10499_s0 }
  0x3a   : > { %p9190_p6 = pnand %p7630_p5, %p10448_p1 }
  0x3c   : > { %s8055_s28 = scalar_lea.hbm %s10502_s3, 1024  ;;  %p9206_p8 = pneg %p9190_p6 }
  0x3d   : > { %p8056_p7 = scmp.ne.s32.totalorder %s10502_s3, %s8055_s28  ;;  %p8062_p11 = scmp.lt.u32.totalorder %s8055_s28, %s10502_s3 }
  0x3f   : > { %p8058_p9 = pnand %p9206_p8, %p8056_p7 }
  0x41   : > { %p8059_p10 = pneg %p8058_p9 }
  0x43   : > { %p8064_p12 = pnand %p8062_p11, %p8059_p10 }
  0x45   : > { %8067 = shalt.err (!%p8064_p12)
}
  0x46   : > { %s8068_s8 = scalar_lea.vmem %s9179_s6, 1024  ;;  %p8076_p5 = scmp.lt.s32.totalorder %s9179_s6, %s9179_s6 }
  0x47   : > { %p8069_p13 = scmp.ne.s32.totalorder %s9179_s6, %s8068_s8  ;;  %p8077_p4 = scmp.lt.s32.totalorder %s8068_s8, %s8068_s8 }
  0x49   : > { %p8071_p0 = pnand %p8069_p13, %p9206_p8  ;;  %p8078_p7 = por %p8077_p4, %p8076_p5 }
  0x4b   : > { %p8072_p2 = pneg %p8071_p0 }
  0x4d   : > { %p8079_p9 = pnand %p8078_p7, %p8072_p2 }
  0x4f   : > { %8082 = shalt.err (!%p8079_p9)
}
  0x50   : > { %s10446_s0 = smov 64   ;;  %s10450_s28 = smov 4  }
  0x51   : > { %7633 = dma.hbm_to_vmem [thread:$0]  (!%p9190_p6), %s10502_s3, 1024, %s9179_s6, [#allocation6], %s10446_s0, %s10446_s0, %s10450_s28  }
  0x52   : > { %s10504_s5 = sld [smem:[#allocation73_spill]] }
  0x58   : > { %s10505_s27 = smov %s10504_s5  ;;  %s8083_s8 = scalar_lea.hbm %s10504_s5, 64 }
  0x59   : > { %p8084_p4 = scmp.ne.s32.totalorder %s10505_s27, %s8083_s8  ;;  %p8090_p12 = scmp.lt.u32.totalorder %s8083_s8, %s10505_s27 }
  0x5b   : > { %p8086_p10 = pnand %p8084_p4, %p9206_p8 }
  0x5d   : > { %p8087_p11 = pneg %p8086_p10 }
  0x5f   : > { %p8092_p13 = pnand %p8090_p12, %p8087_p11 }
  0x61   : > { %8095 = shalt.err (!%p8092_p13)
}
  0x62   : > { %s8096_s6 = scalar_lea.vmem %s9194_s29, 64  ;;  %p8104_p7 = scmp.lt.s32.totalorder %s9194_s29, %s9194_s29 }
  0x63   : > { %p8097_p0 = scmp.ne.s32.totalorder %s9194_s29, %s8096_s6  ;;  %p8105_p9 = scmp.lt.s32.totalorder %s8096_s6, %s8096_s6 }
  0x65   : > { %p8099_p2 = pnand %p8097_p0, %p9206_p8  ;;  %p8106_p4 = por %p8105_p9, %p8104_p7 }
  0x67   : > { %p8100_p5 = pneg %p8099_p2 }
  0x69   : > { %p8107_p10 = pnand %p8106_p4, %p8100_p5 }
  0x6b   : > { %8110 = shalt.err (!%p8107_p10)
}
  0x6c   : > { %s10454_s5 = smov 16   ;;  %s10456_s24 = smov 1  }
  0x6d   : > { %7636 = dma.hbm_to_vmem [thread:$0]  (!%p9190_p6), %s10505_s27, 64, %s9194_s29, [#allocation9], %s10454_s5, %s10454_s5, %s10456_s24  }
  0x6e   : > { %s10506_s1 = sld [smem:[#allocation75_spill]] }
  0x74   : > { %s8111_s4 = scalar_lea.hbm %s10506_s1, 64 }
  0x75   : > { %p8112_p11 = scmp.ne.s32.totalorder %s10506_s1, %s8111_s4  ;;  %p8118_p0 = scmp.lt.u32.totalorder %s8111_s4, %s10506_s1 }
  0x77   : > { %p8114_p12 = pnand %p8112_p11, %p9206_p8 }
  0x79   : > { %p8115_p13 = pneg %p8114_p12 }
  0x7b   : > { %p8120_p2 = pnand %p8118_p0, %p8115_p13 }
  0x7d   : > { %8123 = shalt.err (!%p8120_p2)
}
  0x7e   : > { %s8124_s26 = scalar_lea.vmem %s741_s12, 64  ;;  %p8132_p4 = scmp.lt.s32.totalorder %s741_s12, %s741_s12 }
  0x7f   : > { %p8125_p5 = scmp.ne.s32.totalorder %s741_s12, %s8124_s26  ;;  %p8133_p10 = scmp.lt.s32.totalorder %s8124_s26, %s8124_s26 }
  0x81   : > { %p8127_p7 = pnand %p8125_p5, %p9206_p8  ;;  %p8134_p1 = por %p8133_p10, %p8132_p4 }
  0x83   : > { %p8128_p9 = pneg %p8127_p7 }
  0x85   : > { %p8135_p3 = pnand %p8134_p1, %p8128_p9 }
  0x87   : > { %8138 = shalt.err (!%p8135_p3)
}
  0x88   : > { %7642 = dma.hbm_to_vmem [thread:$0]  (!%p9190_p6), %s10506_s1, 64, %s741_s12, [#allocation12], %s10454_s5, %s10454_s5, %s10456_s24  }
  0x89   : > { %s8978_s9 = smov [#allocation14]   ;;  %s8979_s10 = smov [#allocation17]  }
  0x8a   : > { %s766_s30 = sshll.u32 %s8978_s9, 4  ;;  %s793_s4 = sshll.u32 %s8979_s10, 4  ;;  %s767_s30 = int_to_ptr.vmem [resolvable:$true] %s766_s30  ;;  %s794_s4 = int_to_ptr.vmem [resolvable:$true] %s793_s4 }
  0x8b   : > { %s10507_s6 = sld [smem:[#allocation77_spill]] }
  0x91   : > { %s8139_s26 = scalar_lea.hbm %s10507_s6, 64 }
  0x92   : > { %p8140_p1 = scmp.ne.s32.totalorder %s10507_s6, %s8139_s26  ;;  %p8146_p12 = scmp.lt.u32.totalorder %s8139_s26, %s10507_s6 }
  0x94   : > { %p8142_p3 = pnand %p8140_p1, %p9206_p8 }
  0x96   : > { %p8143_p11 = pneg %p8142_p3 }
  0x98   : > { %p8148_p13 = pnand %p8146_p12, %p8143_p11 }
  0x9a   : > { %8151 = shalt.err (!%p8148_p13)
}
  0x9b   : > { %s8152_s12 = scalar_lea.vmem %s767_s30, 64  ;;  %p8160_p7 = scmp.lt.s32.totalorder %s767_s30, %s767_s30 }
  0x9c   : > { %p8153_p0 = scmp.ne.s32.totalorder %s767_s30, %s8152_s12  ;;  %p8161_p9 = scmp.lt.s32.totalorder %s8152_s12, %s8152_s12 }
  0x9e   : > { %p8155_p2 = pnand %p8153_p0, %p9206_p8  ;;  %p8162_p4 = por %p8161_p9, %p8160_p7 }
  0xa0   : > { %p8156_p5 = pneg %p8155_p2 }
  0xa2   : > { %p8163_p10 = pnand %p8162_p4, %p8156_p5 }
  0xa4   : > { %8166 = shalt.err (!%p8163_p10)
}
  0xa5   : > { %7648 = dma.hbm_to_vmem [thread:$0]  (!%p9190_p6), %s10507_s6, 64, %s767_s30, [#allocation15], %s10454_s5, %s10454_s5, %s10456_s24  }
  0xa6   : > { %s10508_s9 = sld [smem:[#allocation79_spill]] }
  0xac   : > { %s10509_s10 = smov %s10508_s9  ;;  %s8167_s7 = scalar_lea.hbm %s10508_s9, 16 }
  0xad   : > { %p8168_p1 = scmp.ne.s32.totalorder %s10509_s10, %s8167_s7  ;;  %p8174_p12 = scmp.lt.u32.totalorder %s8167_s7, %s10509_s10 }
  0xaf   : > { %p8170_p3 = pnand %p8168_p1, %p9206_p8 }
  0xb1   : > { %p8171_p11 = pneg %p8170_p3 }
  0xb3   : > { %p8176_p13 = pnand %p8174_p12, %p8171_p11 }
  0xb5   : > { %8179 = shalt.err (!%p8176_p13)
}
  0xb6   : > { %s8180_s27 = scalar_lea.vmem %s794_s4, 16  ;;  %s8187_s30 = scalar_lea.vmem %s794_s4, 32 }
  0xb7   : > { %p8181_p0 = scmp.ne.s32.totalorder %s794_s4, %s8180_s27  ;;  %p8188_p7 = scmp.lt.s32.totalorder %s794_s4, %s794_s4 }
  0xb8   : > { %p8189_p9 = scmp.lt.s32.totalorder %s8187_s30, %s8180_s27 }
  0xb9   : > { %p8183_p2 = pnand %p8181_p0, %p9206_p8 }
  0xba   : > { %p8190_p4 = por %p8189_p9, %p8188_p7 }
  0xbb   : > { %p8184_p5 = pneg %p8183_p2 }
  0xbd   : > { %p8191_p10 = pnand %p8190_p4, %p8184_p5 }
  0xbf   : > { %8194 = shalt.err (!%p8191_p10)
}
  0xc0   : > { %7654 = dma.hbm_to_vmem [thread:$0]  (!%p9190_p6), %s10509_s10, 16, %s794_s4, [#allocation18]  }
  0xc1   : > { %s8980_s0 = smov [#allocation20]   ;;  %s8981_s7 = smov [#allocation23]  }
  0xc2   : > { %s815_s9 = sshll.u32 %s8980_s0, 4  ;;  %s838_s8 = sshll.u32 %s8981_s7, 4  ;;  %s816_s9 = int_to_ptr.vmem [resolvable:$true] %s815_s9  ;;  %s839_s8 = int_to_ptr.vmem [resolvable:$true] %s838_s8 }
  0xc3   : > { %s10510_s12 = sld [smem:[#allocation81_spill]] }
  0xc9   : > { %s8195_s5 = scalar_lea.hbm %s10510_s12, 16 }
  0xca   : > { %p8196_p1 = scmp.ne.s32.totalorder %s10510_s12, %s8195_s5  ;;  %p8202_p12 = scmp.lt.u32.totalorder %s8195_s5, %s10510_s12 }
  0xcc   : > { %p8198_p3 = pnand %p8196_p1, %p9206_p8 }
  0xce   : > { %p8199_p11 = pneg %p8198_p3 }
  0xd0   : > { %p8204_p13 = pnand %p8202_p12, %p8199_p11 }
  0xd2   : > { %8207 = shalt.err (!%p8204_p13)
}
  0xd3   : > { %s8208_s4 = scalar_lea.vmem %s816_s9, 16  ;;  %s8215_s28 = scalar_lea.vmem %s816_s9, 32 }
  0xd4   : > { %p8209_p0 = scmp.ne.s32.totalorder %s816_s9, %s8208_s4  ;;  %p8216_p7 = scmp.lt.s32.totalorder %s816_s9, %s816_s9 }
  0xd5   : > { %p8217_p9 = scmp.lt.s32.totalorder %s8215_s28, %s8208_s4 }
  0xd6   : > { %p8211_p2 = pnand %p8209_p0, %p9206_p8 }
  0xd7   : > { %p8218_p4 = por %p8217_p9, %p8216_p7 }
  0xd8   : > { %p8212_p5 = pneg %p8211_p2 }
  0xda   : > { %p8219_p10 = pnand %p8218_p4, %p8212_p5 }
  0xdc   : > { %8222 = shalt.err (!%p8219_p10)
}
  0xdd   : > { %7660 = dma.hbm_to_vmem [thread:$0]  (!%p9190_p6), %s10510_s12, 16, %s816_s9, [#allocation21]  }
  0xde   : > { %s10511_s13 = sld [smem:[#allocation83_spill]] }
  0xe4   : > { %s8223_s26 = scalar_lea.hbm %s10511_s13, 64 }
  0xe5   : > { %p8224_p1 = scmp.ne.s32.totalorder %s10511_s13, %s8223_s26  ;;  %p8230_p12 = scmp.lt.u32.totalorder %s8223_s26, %s10511_s13 }
  0xe7   : > { %p8226_p3 = pnand %p8224_p1, %p9206_p8 }
  0xe9   : > { %p8227_p11 = pneg %p8226_p3 }
  0xeb   : > { %p8232_p13 = pnand %p8230_p12, %p8227_p11 }
  0xed   : > { %8235 = shalt.err (!%p8232_p13)
}
  0xee   : > { %s8236_s4 = scalar_lea.vmem %s839_s8, 64  ;;  %p8244_p7 = scmp.lt.s32.totalorder %s839_s8, %s839_s8 }
  0xef   : > { %p8237_p0 = scmp.ne.s32.totalorder %s839_s8, %s8236_s4  ;;  %p8245_p9 = scmp.lt.s32.totalorder %s8236_s4, %s8236_s4 }
  0xf1   : > { %p8239_p2 = pnand %p8237_p0, %p9206_p8  ;;  %p8246_p4 = por %p8245_p9, %p8244_p7 }
  0xf3   : > { %p8240_p5 = pneg %p8239_p2 }
  0xf5   : > { %p8247_p10 = pnand %p8246_p4, %p8240_p5 }
  0xf7   : > { %8250 = shalt.err (!%p8247_p10)
}
  0xf8   : > { %s10512_s9 = smov 1   ;;  %s10513_s28 = smov 16  }
  0xf9   : > { %7666 = dma.hbm_to_vmem [thread:$0]  (!%p9190_p6), %s10511_s13, 64, %s839_s8, [#allocation24], %s10513_s28, %s10513_s28, %s10512_s9  }
  0xfa   : > { %s8982_s5 = smov [#allocation26]   ;;  %s8983_s26 = smov [#allocation29]  }
  0xfb   : > { %s864_s24 = sshll.u32 %s8982_s5, 4  ;;  %s890_s29 = sshll.u32 %s8983_s26, 4  ;;  %s865_s24 = int_to_ptr.vmem [resolvable:$true] %s864_s24  ;;  %s891_s29 = int_to_ptr.vmem [resolvable:$true] %s890_s29 }
  0xfc   : > { %s10514_s15 = sld [smem:[#allocation85_spill]] }
 0x102   : > { %s8251_s3 = scalar_lea.hbm %s10514_s15, 64 }
 0x103   : > { %p8252_p1 = scmp.ne.s32.totalorder %s10514_s15, %s8251_s3  ;;  %p8258_p12 = scmp.lt.u32.totalorder %s8251_s3, %s10514_s15 }
 0x105   : > { %p8254_p3 = pnand %p8252_p1, %p9206_p8 }
 0x107   : > { %p8255_p11 = pneg %p8254_p3 }
 0x109   : > { %p8260_p13 = pnand %p8258_p12, %p8255_p11 }
 0x10b   : > { %8263 = shalt.err (!%p8260_p13)
}
 0x10c   : > { %s8264_s8 = scalar_lea.vmem %s865_s24, 64  ;;  %p8272_p7 = scmp.lt.s32.totalorder %s865_s24, %s865_s24 }
 0x10d   : > { %p8265_p0 = scmp.ne.s32.totalorder %s865_s24, %s8264_s8  ;;  %p8273_p9 = scmp.lt.s32.totalorder %s8264_s8, %s8264_s8 }
 0x10f   : > { %p8267_p2 = pnand %p8265_p0, %p9206_p8  ;;  %p8274_p4 = por %p8273_p9, %p8272_p7 }
 0x111   : > { %p8268_p5 = pneg %p8267_p2 }
 0x113   : > { %p8275_p10 = pnand %p8274_p4, %p8268_p5 }
 0x115   : > { %8278 = shalt.err (!%p8275_p10)
}
 0x116   : > { %7672 = dma.hbm_to_vmem [thread:$0]  (!%p9190_p6), %s10514_s15, 64, %s865_s24, [#allocation27], %s10513_s28, %s10513_s28, %s10512_s9  }
 0x117   : > { %s10515_s17 = sld [smem:[#allocation87_spill]] }
 0x11d   : > { %s8279_s26 = scalar_lea.hbm %s10515_s17, 64 }
 0x11e   : > { %p8280_p1 = scmp.ne.s32.totalorder %s10515_s17, %s8279_s26  ;;  %p8286_p12 = scmp.lt.u32.totalorder %s8279_s26, %s10515_s17 }
 0x120   : > { %p8282_p3 = pnand %p8280_p1, %p9206_p8 }
 0x122   : > { %p8283_p11 = pneg %p8282_p3 }
 0x124   : > { %p8288_p13 = pnand %p8286_p12, %p8283_p11 }
 0x126   : > { %8291 = shalt.err (!%p8288_p13)
}
 0x127   : > { %s8292_s0 = scalar_lea.vmem %s891_s29, 64  ;;  %p8300_p7 = scmp.lt.s32.totalorder %s891_s29, %s891_s29 }
 0x128   : > { %p8293_p0 = scmp.ne.s32.totalorder %s891_s29, %s8292_s0  ;;  %p8301_p9 = scmp.lt.s32.totalorder %s8292_s0, %s8292_s0 }
 0x12a   : > { %p8295_p2 = pnand %p8293_p0, %p9206_p8  ;;  %p8302_p4 = por %p8301_p9, %p8300_p7 }
 0x12c   : > { %p8296_p5 = pneg %p8295_p2 }
 0x12e   : > { %p8303_p10 = pnand %p8302_p4, %p8296_p5 }
 0x130   : > { %8306 = shalt.err (!%p8303_p10)
}
 0x131   : > { %7678 = dma.hbm_to_vmem [thread:$0]  (!%p9190_p6), %s10515_s17, 64, %s891_s29, [#allocation30], %s10513_s28, %s10513_s28, %s10512_s9  }
 0x132   : > { %s8984_s1 = smov [#allocation32]   ;;  %s8985_s7 = smov [#allocation35]  }
 0x133   : > { %s917_s6 = sshll.u32 %s8984_s1, 4  ;;  %s939_s5 = sshll.u32 %s8985_s7, 4  ;;  %s918_s6 = int_to_ptr.vmem [resolvable:$true] %s917_s6  ;;  %s940_s5 = int_to_ptr.vmem [resolvable:$true] %s939_s5 }
 0x134   : > { %s10516_s19 = sld [smem:[#allocation89_spill]] }
 0x13a   : > { %s8307_s30 = scalar_lea.hbm %s10516_s19, 16 }
 0x13b   : > { %p8308_p1 = scmp.ne.s32.totalorder %s10516_s19, %s8307_s30  ;;  %p8314_p12 = scmp.lt.u32.totalorder %s8307_s30, %s10516_s19 }
 0x13d   : > { %p8310_p3 = pnand %p8308_p1, %p9206_p8 }
 0x13f   : > { %p8311_p11 = pneg %p8310_p3 }
 0x141   : > { %p8316_p13 = pnand %p8314_p12, %p8311_p11 }
 0x143   : > { %8319 = shalt.err (!%p8316_p13)
}
 0x144   : > { %s8320_s9 = scalar_lea.vmem %s918_s6, 16  ;;  %s8327_s28 = scalar_lea.vmem %s918_s6, 32 }
 0x145   : > { %p8321_p0 = scmp.ne.s32.totalorder %s918_s6, %s8320_s9  ;;  %p8328_p7 = scmp.lt.s32.totalorder %s918_s6, %s918_s6 }
 0x146   : > { %p8329_p9 = scmp.lt.s32.totalorder %s8327_s28, %s8320_s9 }
 0x147   : > { %p8323_p2 = pnand %p8321_p0, %p9206_p8 }
 0x148   : > { %p8330_p4 = por %p8329_p9, %p8328_p7 }
 0x149   : > { %p8324_p5 = pneg %p8323_p2 }
 0x14b   : > { %p8331_p10 = pnand %p8330_p4, %p8324_p5 }
 0x14d   : > { %8334 = shalt.err (!%p8331_p10)
}
 0x14e   : > { %7684 = dma.hbm_to_vmem [thread:$0]  (!%p9190_p6), %s10516_s19, 16, %s918_s6, [#allocation33]  }
 0x14f   : > { %s8335_s26 = scalar_lea.hbm %s10413_s21, 16 }
 0x150   : > { %p8336_p1 = scmp.ne.s32.totalorder %s10413_s21, %s8335_s26  ;;  %p8342_p12 = scmp.lt.u32.totalorder %s8335_s26, %s10413_s21 }
 0x152   : > { %p8338_p3 = pnand %p8336_p1, %p9206_p8 }
 0x154   : > { %p8339_p11 = pneg %p8338_p3 }
 0x156   : > { %p8344_p13 = pnand %p8342_p12, %p8339_p11 }
 0x158   : > { %8347 = shalt.err (!%p8344_p13)
}
 0x159   : > { %s8348_s0 = scalar_lea.vmem %s940_s5, 16  ;;  %s8355_s6 = scalar_lea.vmem %s940_s5, 32 }
 0x15a   : > { %p8349_p0 = scmp.ne.s32.totalorder %s940_s5, %s8348_s0  ;;  %p8356_p7 = scmp.lt.s32.totalorder %s940_s5, %s940_s5 }
 0x15b   : > { %p8357_p9 = scmp.lt.s32.totalorder %s8355_s6, %s8348_s0 }
 0x15c   : > { %p8351_p2 = pnand %p8349_p0, %p9206_p8 }
 0x15d   : > { %p8358_p4 = por %p8357_p9, %p8356_p7 }
 0x15e   : > { %p8352_p5 = pneg %p8351_p2 }
 0x160   : > { %p8359_p10 = pnand %p8358_p4, %p8352_p5 }
 0x162   : > { %8362 = shalt.err (!%p8359_p10)
}
 0x163   : > { %7690 = dma.hbm_to_vmem [thread:$0]  (!%p9190_p6), %s10413_s21, 16, %s940_s5, [#allocation36]  }
 0x164   : > { %s8986_s28 = smov [#allocation38]   ;;  %s8987_s8 = smov [#allocation41]  }
 0x165   : > { %s963_s29 = sshll.u32 %s8986_s28, 4  ;;  %s987_s1 = sshll.u32 %s8987_s8, 4  ;;  %s964_s29 = int_to_ptr.vmem [resolvable:$true] %s963_s29  ;;  %s988_s1 = int_to_ptr.vmem [resolvable:$true] %s987_s1 }
 0x166   : > { %s8363_s27 = scalar_lea.hbm %s10415_s23, 256 }
 0x167   : > { %p8364_p1 = scmp.ne.s32.totalorder %s10415_s23, %s8363_s27  ;;  %p8370_p12 = scmp.lt.u32.totalorder %s8363_s27, %s10415_s23 }
 0x169   : > { %p8366_p3 = pnand %p8364_p1, %p9206_p8 }
 0x16b   : > { %p8367_p11 = pneg %p8366_p3 }
 0x16d   : > { %p8372_p13 = pnand %p8370_p12, %p8367_p11 }
 0x16f   : > { %8375 = shalt.err (!%p8372_p13)
}
 0x170   : > { %s8376_s5 = scalar_lea.vmem %s964_s29, 256  ;;  %p8384_p7 = scmp.lt.s32.totalorder %s964_s29, %s964_s29 }
 0x171   : > { %p8377_p0 = scmp.ne.s32.totalorder %s964_s29, %s8376_s5  ;;  %p8385_p9 = scmp.lt.s32.totalorder %s8376_s5, %s8376_s5 }
 0x173   : > { %p8379_p2 = pnand %p8377_p0, %p9206_p8  ;;  %p8386_p4 = por %p8385_p9, %p8384_p7 }
 0x175   : > { %p8380_p5 = pneg %p8379_p2 }
 0x177   : > { %p8387_p10 = pnand %p8386_p4, %p8380_p5 }
 0x179   : > { %8390 = shalt.err (!%p8387_p10)
}
 0x17a   : > { %7696 = dma.hbm_to_vmem [thread:$0]  (!%p9190_p6), %s10415_s23, 256, %s964_s29, [#allocation39]  }
 0x17b   : > { %s8391_s8 = scalar_lea.hbm %s10417_s25, 16 }
 0x17c   : > { %p8392_p1 = scmp.ne.s32.totalorder %s10417_s25, %s8391_s8  ;;  %p8398_p12 = scmp.lt.u32.totalorder %s8391_s8, %s10417_s25 }
 0x17e   : > { %p8394_p3 = pnand %p8392_p1, %p9206_p8 }
 0x180   : > { %p8395_p11 = pneg %p8394_p3 }
 0x182   : > { %p8400_p13 = pnand %p8398_p12, %p8395_p11 }
 0x184   : > { %8403 = shalt.err (!%p8400_p13)
}
 0x185   : > { %s8404_s3 = scalar_lea.vmem %s988_s1, 16  ;;  %s8411_s29 = scalar_lea.vmem %s988_s1, 32 }
 0x186   : > { %p8405_p0 = scmp.ne.s32.totalorder %s988_s1, %s8404_s3  ;;  %p8412_p7 = scmp.lt.s32.totalorder %s988_s1, %s988_s1 }
 0x187   : > { %p8413_p9 = scmp.lt.s32.totalorder %s8411_s29, %s8404_s3 }
 0x188   : > { %p8407_p2 = pnand %p8405_p0, %p9206_p8 }
 0x189   : > { %p8414_p4 = por %p8413_p9, %p8412_p7 }
 0x18a   : > { %p8408_p5 = pneg %p8407_p2 }
 0x18c   : > { %p8415_p10 = pnand %p8414_p4, %p8408_p5 }
 0x18e   : > { %8418 = shalt.err (!%p8415_p10)
}
 0x18f   : > { %7702 = dma.hbm_to_vmem [thread:$0]  (!%p9190_p6), %s10417_s25, 16, %s988_s1, [#allocation42]  }
 0x190   : > { %s8988_s5 = smov [#allocation10]   ;;  %s8989_s24 = smov [#allocation13]  }
 0x191   : > { %s727_s6 = sshll.u32 %s8988_s5, 4  ;;  %s753_s9 = sshll.u32 %s8989_s24, 4  ;;  %s728_s6 = int_to_ptr.vmem [resolvable:$true] %s727_s6  ;;  %s754_s9 = int_to_ptr.vmem [resolvable:$true] %s753_s9 }
 0x192   : > { %s10517_s7 = sld [smem:[#allocation74_spill]] }
 0x198   : > { %s8419_s26 = scalar_lea.hbm %s10517_s7, 1024 }
 0x199   : > { %p8420_p1 = scmp.ne.s32.totalorder %s10517_s7, %s8419_s26  ;;  %p8426_p12 = scmp.lt.u32.totalorder %s8419_s26, %s10517_s7 }
 0x19b   : > { %p8422_p3 = pnand %p8420_p1, %p9206_p8 }
 0x19d   : > { %p8423_p11 = pneg %p8422_p3 }
 0x19f   : > { %p8428_p13 = pnand %p8426_p12, %p8423_p11 }
 0x1a1   : > { %8431 = shalt.err (!%p8428_p13)
}
 0x1a2   : > { %s8432_s1 = scalar_lea.vmem %s728_s6, 1024  ;;  %p8440_p7 = scmp.lt.s32.totalorder %s728_s6, %s728_s6 }
 0x1a3   : > { %p8433_p0 = scmp.ne.s32.totalorder %s728_s6, %s8432_s1  ;;  %p8441_p9 = scmp.lt.s32.totalorder %s8432_s1, %s8432_s1 }
 0x1a5   : > { %p8435_p2 = pnand %p8433_p0, %p9206_p8  ;;  %p8442_p4 = por %p8441_p9, %p8440_p7 }
 0x1a7   : > { %p8436_p5 = pneg %p8435_p2 }
 0x1a9   : > { %p8443_p10 = pnand %p8442_p4, %p8436_p5 }
 0x1ab   : > { %8446 = shalt.err (!%p8443_p10)
}
 0x1ac   : > { %s10518_s4 = smov 4   ;;  %s10519_s0 = smov 64  }
 0x1ad   : > { %7639 = dma.hbm_to_vmem [thread:$0]  (!%p9190_p6), %s10517_s7, 1024, %s728_s6, [#allocation9], %s10519_s0, %s10519_s0, %s10518_s4  }
 0x1ae   : > { %s10520_s26 = sld [smem:[#allocation76_spill]] }
 0x1b4   : > { %s8447_s27 = scalar_lea.hbm %s10520_s26, 1024 }
 0x1b5   : > { %p8448_p1 = scmp.ne.s32.totalorder %s10520_s26, %s8447_s27  ;;  %p8454_p12 = scmp.lt.u32.totalorder %s8447_s27, %s10520_s26 }
 0x1b7   : > { %p8450_p3 = pnand %p8448_p1, %p9206_p8 }
 0x1b9   : > { %p8451_p11 = pneg %p8450_p3 }
 0x1bb   : > { %p8456_p13 = pnand %p8454_p12, %p8451_p11 }
 0x1bd   : > { %8459 = shalt.err (!%p8456_p13)
}
 0x1be   : > { %s8460_s5 = scalar_lea.vmem %s754_s9, 1024  ;;  %p8468_p7 = scmp.lt.s32.totalorder %s754_s9, %s754_s9 }
 0x1bf   : > { %p8461_p0 = scmp.ne.s32.totalorder %s754_s9, %s8460_s5  ;;  %p8469_p9 = scmp.lt.s32.totalorder %s8460_s5, %s8460_s5 }
 0x1c1   : > { %p8463_p2 = pnand %p8461_p0, %p9206_p8  ;;  %p8470_p4 = por %p8469_p9, %p8468_p7 }
 0x1c3   : > { %p8464_p5 = pneg %p8463_p2 }
 0x1c5   : > { %p8471_p10 = pnand %p8470_p4, %p8464_p5 }
 0x1c7   : > { %8474 = shalt.err (!%p8471_p10)
}
 0x1c8   : > { %7645 = dma.hbm_to_vmem [thread:$0]  (!%p9190_p6), %s10520_s26, 1024, %s754_s9, [#allocation12], %s10519_s0, %s10519_s0, %s10518_s4  }
 0x1c9   : > { %s8990_s28 = smov [#allocation16]   ;;  %s8991_s27 = smov [#allocation19]  }
 0x1ca   : > { %s779_s8 = sshll.u32 %s8990_s28, 4  ;;  %s804_s30 = sshll.u32 %s8991_s27, 4  ;;  %s780_s8 = int_to_ptr.vmem [resolvable:$true] %s779_s8  ;;  %s805_s30 = int_to_ptr.vmem [resolvable:$true] %s804_s30 }
 0x1cb   : > { %s10521_s1 = sld [smem:[#allocation78_spill]] }
 0x1d1   : > { %s8475_s5 = scalar_lea.hbm %s10521_s1, 256 }
 0x1d2   : > { %p8476_p1 = scmp.ne.s32.totalorder %s10521_s1, %s8475_s5  ;;  %p8482_p12 = scmp.lt.u32.totalorder %s8475_s5, %s10521_s1 }
 0x1d4   : > { %p8478_p3 = pnand %p8476_p1, %p9206_p8 }
 0x1d6   : > { %p8479_p11 = pneg %p8478_p3 }
 0x1d8   : > { %p8484_p13 = pnand %p8482_p12, %p8479_p11 }
 0x1da   : > { %8487 = shalt.err (!%p8484_p13)
}
 0x1db   : > { %s8488_s9 = scalar_lea.vmem %s780_s8, 256  ;;  %p8496_p7 = scmp.lt.s32.totalorder %s780_s8, %s780_s8 }
 0x1dc   : > { %p8489_p0 = scmp.ne.s32.totalorder %s780_s8, %s8488_s9  ;;  %p8497_p9 = scmp.lt.s32.totalorder %s8488_s9, %s8488_s9 }
 0x1de   : > { %p8491_p2 = pnand %p8489_p0, %p9206_p8  ;;  %p8498_p4 = por %p8497_p9, %p8496_p7 }
 0x1e0   : > { %p8492_p5 = pneg %p8491_p2 }
 0x1e2   : > { %p8499_p10 = pnand %p8498_p4, %p8492_p5 }
 0x1e4   : > { %8502 = shalt.err (!%p8499_p10)
}
 0x1e5   : > { %7651 = dma.hbm_to_vmem [thread:$0]  (!%p9190_p6), %s10521_s1, 256, %s780_s8, [#allocation15], %s10519_s0, %s10519_s0, %s10518_s4  }
 0x1e6   : > { %s10522_s28 = sld [smem:[#allocation80_spill]] }
 0x1ec   : > { %s8503_s27 = scalar_lea.hbm %s10522_s28, 16 }
 0x1ed   : > { %p8504_p1 = scmp.ne.s32.totalorder %s10522_s28, %s8503_s27  ;;  %p8510_p12 = scmp.lt.u32.totalorder %s8503_s27, %s10522_s28 }
 0x1ef   : > { %p8506_p3 = pnand %p8504_p1, %p9206_p8 }
 0x1f1   : > { %p8507_p11 = pneg %p8506_p3 }
 0x1f3   : > { %p8512_p13 = pnand %p8510_p12, %p8507_p11 }
 0x1f5   : > { %8515 = shalt.err (!%p8512_p13)
}
 0x1f6   : > { %s8516_s9 = scalar_lea.vmem %s805_s30, 16  ;;  %s8523_s8 = scalar_lea.vmem %s805_s30, 32 }
 0x1f7   : > { %p8517_p0 = scmp.ne.s32.totalorder %s805_s30, %s8516_s9  ;;  %p8524_p7 = scmp.lt.s32.totalorder %s805_s30, %s805_s30 }
 0x1f8   : > { %p8525_p9 = scmp.lt.s32.totalorder %s8523_s8, %s8516_s9 }
 0x1f9   : > { %p8519_p2 = pnand %p8517_p0, %p9206_p8 }
 0x1fa   : > { %p8526_p4 = por %p8525_p9, %p8524_p7 }
 0x1fb   : > { %p8520_p5 = pneg %p8519_p2 }
 0x1fd   : > { %p8527_p10 = pnand %p8526_p4, %p8520_p5 }
 0x1ff   : > { %8530 = shalt.err (!%p8527_p10)
}
 0x200   : > { %7657 = dma.hbm_to_vmem [thread:$0]  (!%p9190_p6), %s10522_s28, 16, %s805_s30, [#allocation18]  }
 0x201   : > { %s8992_s7 = smov [#allocation22]   ;;  %s8993_s27 = smov [#allocation25]  }
 0x202   : > { %s825_s24 = sshll.u32 %s8992_s7, 4  ;;  %s851_s3 = sshll.u32 %s8993_s27, 4  ;;  %s826_s24 = int_to_ptr.vmem [resolvable:$true] %s825_s24  ;;  %s852_s3 = int_to_ptr.vmem [resolvable:$true] %s851_s3 }
 0x203   : > { %s10523_s6 = sld [smem:[#allocation82_spill]] }
 0x209   : > { %s8531_s1 = scalar_lea.hbm %s10523_s6, 1024 }
 0x20a   : > { %p8532_p1 = scmp.ne.s32.totalorder %s10523_s6, %s8531_s1  ;;  %p8538_p12 = scmp.lt.u32.totalorder %s8531_s1, %s10523_s6 }
 0x20c   : > { %p8534_p3 = pnand %p8532_p1, %p9206_p8 }
 0x20e   : > { %p8535_p11 = pneg %p8534_p3 }
 0x210   : > { %p8540_p13 = pnand %p8538_p12, %p8535_p11 }
 0x212   : > { %8543 = shalt.err (!%p8540_p13)
}
 0x213   : > { %s8544_s30 = scalar_lea.vmem %s826_s24, 1024  ;;  %p8552_p7 = scmp.lt.s32.totalorder %s826_s24, %s826_s24 }
 0x214   : > { %p8545_p0 = scmp.ne.s32.totalorder %s826_s24, %s8544_s30  ;;  %p8553_p9 = scmp.lt.s32.totalorder %s8544_s30, %s8544_s30 }
 0x216   : > { %p8547_p2 = pnand %p8545_p0, %p9206_p8  ;;  %p8554_p4 = por %p8553_p9, %p8552_p7 }
 0x218   : > { %p8548_p5 = pneg %p8547_p2 }
 0x21a   : > { %p8555_p10 = pnand %p8554_p4, %p8548_p5 }
 0x21c   : > { %8558 = shalt.err (!%p8555_p10)
}
 0x21d   : > { %7663 = dma.hbm_to_vmem [thread:$0]  (!%p9190_p6), %s10523_s6, 1024, %s826_s24, [#allocation21], %s10519_s0, %s10519_s0, %s10518_s4  }
 0x21e   : > { %s10524_s14 = sld [smem:[#allocation84_spill]] }
 0x224   : > { %s8559_s27 = scalar_lea.hbm %s10524_s14, 1024 }
 0x225   : > { %p8560_p1 = scmp.ne.s32.totalorder %s10524_s14, %s8559_s27  ;;  %p8566_p12 = scmp.lt.u32.totalorder %s8559_s27, %s10524_s14 }
 0x227   : > { %p8562_p3 = pnand %p8560_p1, %p9206_p8 }
 0x229   : > { %p8563_p11 = pneg %p8562_p3 }
 0x22b   : > { %p8568_p13 = pnand %p8566_p12, %p8563_p11 }
 0x22d   : > { %8571 = shalt.err (!%p8568_p13)
}
 0x22e   : > { %s8572_s10 = scalar_lea.vmem %s852_s3, 1024  ;;  %p8580_p7 = scmp.lt.s32.totalorder %s852_s3, %s852_s3 }
 0x22f   : > { %p8573_p0 = scmp.ne.s32.totalorder %s852_s3, %s8572_s10  ;;  %p8581_p9 = scmp.lt.s32.totalorder %s8572_s10, %s8572_s10 }
 0x231   : > { %p8575_p2 = pnand %p8573_p0, %p9206_p8  ;;  %p8582_p4 = por %p8581_p9, %p8580_p7 }
 0x233   : > { %p8576_p5 = pneg %p8575_p2 }
 0x235   : > { %p8583_p10 = pnand %p8582_p4, %p8576_p5 }
 0x237   : > { %8586 = shalt.err (!%p8583_p10)
}
 0x238   : > { %7669 = dma.hbm_to_vmem [thread:$0]  (!%p9190_p6), %s10524_s14, 1024, %s852_s3, [#allocation24], %s10519_s0, %s10519_s0, %s10518_s4  }
 0x239   : > { %s8994_s13 = smov [#allocation28]   ;;  %s8995_s12 = smov [#allocation31]  }
 0x23a   : > { %s877_s1 = sshll.u32 %s8994_s13, 4  ;;  %s903_s7 = sshll.u32 %s8995_s12, 4  ;;  %s878_s1 = int_to_ptr.vmem [resolvable:$true] %s877_s1  ;;  %s904_s7 = int_to_ptr.vmem [resolvable:$true] %s903_s7 }
 0x23b   : > { %s10525_s16 = sld [smem:[#allocation86_spill]] }
 0x241   : > { %s8587_s5 = scalar_lea.hbm %s10525_s16, 1024 }
 0x242   : > { %p8588_p1 = scmp.ne.s32.totalorder %s10525_s16, %s8587_s5  ;;  %p8594_p12 = scmp.lt.u32.totalorder %s8587_s5, %s10525_s16 }
 0x244   : > { %p8590_p3 = pnand %p8588_p1, %p9206_p8 }
 0x246   : > { %p8591_p11 = pneg %p8590_p3 }
 0x248   : > { %p8596_p13 = pnand %p8594_p12, %p8591_p11 }
 0x24a   : > { %8599 = shalt.err (!%p8596_p13)
}
 0x24b   : > { %s8600_s3 = scalar_lea.vmem %s878_s1, 1024  ;;  %p8608_p7 = scmp.lt.s32.totalorder %s878_s1, %s878_s1 }
 0x24c   : > { %p8601_p0 = scmp.ne.s32.totalorder %s878_s1, %s8600_s3  ;;  %p8609_p9 = scmp.lt.s32.totalorder %s8600_s3, %s8600_s3 }
 0x24e   : > { %p8603_p2 = pnand %p8601_p0, %p9206_p8  ;;  %p8610_p4 = por %p8609_p9, %p8608_p7 }
 0x250   : > { %p8604_p5 = pneg %p8603_p2 }
 0x252   : > { %p8611_p10 = pnand %p8610_p4, %p8604_p5 }
 0x254   : > { %8614 = shalt.err (!%p8611_p10)
}
 0x255   : > { %7675 = dma.hbm_to_vmem [thread:$0]  (!%p9190_p6), %s10525_s16, 1024, %s878_s1, [#allocation27], %s10519_s0, %s10519_s0, %s10518_s4  }
 0x256   : > { %s10526_s18 = sld [smem:[#allocation88_spill]] }
 0x25c   : > { %s8615_s29 = scalar_lea.hbm %s10526_s18, 256 }
 0x25d   : > { %p8616_p1 = scmp.ne.s32.totalorder %s10526_s18, %s8615_s29  ;;  %p8622_p12 = scmp.lt.u32.totalorder %s8615_s29, %s10526_s18 }
 0x25f   : > { %p8618_p3 = pnand %p8616_p1, %p9206_p8 }
 0x261   : > { %p8619_p11 = pneg %p8618_p3 }
 0x263   : > { %p8624_p13 = pnand %p8622_p12, %p8619_p11 }
 0x265   : > { %8627 = shalt.err (!%p8624_p13)
}
 0x266   : > { %s8628_s24 = scalar_lea.vmem %s904_s7, 256  ;;  %p8636_p7 = scmp.lt.s32.totalorder %s904_s7, %s904_s7 }
 0x267   : > { %p8629_p0 = scmp.ne.s32.totalorder %s904_s7, %s8628_s24  ;;  %p8637_p9 = scmp.lt.s32.totalorder %s8628_s24, %s8628_s24 }
 0x269   : > { %p8631_p2 = pnand %p8629_p0, %p9206_p8  ;;  %p8638_p4 = por %p8637_p9, %p8636_p7 }
 0x26b   : > { %p8632_p5 = pneg %p8631_p2 }
 0x26d   : > { %p8639_p10 = pnand %p8638_p4, %p8632_p5 }
 0x26f   : > { %8642 = shalt.err (!%p8639_p10)
}
 0x270   : > { %7681 = dma.hbm_to_vmem [thread:$0]  (!%p9190_p6), %s10526_s18, 256, %s904_s7, [#allocation30], %s10519_s0, %s10519_s0, %s10518_s4  }
 0x271   : > { %s8996_s30 = smov [#allocation34]   ;;  %s8997_s12 = smov [#allocation37]  }
 0x272   : > { %s928_s13 = sshll.u32 %s8996_s30, 4  ;;  %s949_s27 = sshll.u32 %s8997_s12, 4  ;;  %s929_s13 = int_to_ptr.vmem [resolvable:$true] %s928_s13  ;;  %s950_s27 = int_to_ptr.vmem [resolvable:$true] %s949_s27 }
 0x273   : > { %s10527_s20 = sld [smem:[#allocation90_spill]] }
 0x279   : > { %s8643_s9 = scalar_lea.hbm %s10527_s20, 16 }
 0x27a   : > { %p8644_p1 = scmp.ne.s32.totalorder %s10527_s20, %s8643_s9  ;;  %p8650_p12 = scmp.lt.u32.totalorder %s8643_s9, %s10527_s20 }
 0x27c   : > { %p8646_p3 = pnand %p8644_p1, %p9206_p8 }
 0x27e   : > { %p8647_p11 = pneg %p8646_p3 }
 0x280   : > { %p8652_p13 = pnand %p8650_p12, %p8647_p11 }
 0x282   : > { %8655 = shalt.err (!%p8652_p13)
}
 0x283   : > { %s8656_s7 = scalar_lea.vmem %s929_s13, 16  ;;  %s8663_s3 = scalar_lea.vmem %s929_s13, 32 }
 0x284   : > { %p8657_p0 = scmp.ne.s32.totalorder %s929_s13, %s8656_s7  ;;  %p8664_p7 = scmp.lt.s32.totalorder %s929_s13, %s929_s13 }
 0x285   : > { %p8665_p9 = scmp.lt.s32.totalorder %s8663_s3, %s8656_s7 }
 0x286   : > { %p8659_p2 = pnand %p8657_p0, %p9206_p8 }
 0x287   : > { %p8666_p4 = por %p8665_p9, %p8664_p7 }
 0x288   : > { %p8660_p5 = pneg %p8659_p2 }
 0x28a   : > { %p8667_p10 = pnand %p8666_p4, %p8660_p5 }
 0x28c   : > { %8670 = shalt.err (!%p8667_p10)
}
 0x28d   : > { %7687 = dma.hbm_to_vmem [thread:$0]  (!%p9190_p6), %s10527_s20, 16, %s929_s13, [#allocation33]  }
 0x28e   : > { %s8671_s9 = scalar_lea.hbm %s10414_s22, 4096 }
 0x28f   : > { %p8672_p1 = scmp.ne.s32.totalorder %s10414_s22, %s8671_s9  ;;  %p8678_p12 = scmp.lt.u32.totalorder %s8671_s9, %s10414_s22 }
 0x291   : > { %p8674_p3 = pnand %p8672_p1, %p9206_p8 }
 0x293   : > { %p8675_p11 = pneg %p8674_p3 }
 0x295   : > { %p8680_p13 = pnand %p8678_p12, %p8675_p11 }
 0x297   : > { %8683 = shalt.err (!%p8680_p13)
}
 0x298   : > { %s8684_s7 = scalar_lea.vmem %s950_s27, 4096  ;;  %p8692_p7 = scmp.lt.s32.totalorder %s950_s27, %s950_s27 }
 0x299   : > { %p8685_p0 = scmp.ne.s32.totalorder %s950_s27, %s8684_s7  ;;  %p8693_p9 = scmp.lt.s32.totalorder %s8684_s7, %s8684_s7 }
 0x29b   : > { %p8687_p2 = pnand %p8685_p0, %p9206_p8  ;;  %p8694_p4 = por %p8693_p9, %p8692_p7 }
 0x29d   : > { %p8688_p5 = pneg %p8687_p2 }
 0x29f   : > { %p8695_p10 = pnand %p8694_p4, %p8688_p5 }
 0x2a1   : > { %8698 = shalt.err (!%p8695_p10)
}
 0x2a2   : > { %s8998_s13 = smov 1024   ;;  %s8999_s12 = smov [#allocation40]  }
 0x2a3   : > { %7693 = dma.hbm_to_vmem [thread:$0]  (!%p9190_p6), %s10414_s22, 4096, %s950_s27, [#allocation36], %s8998_s13, %s8998_s13, %s10519_s0  }
 0x2a4   : > { %s973_s29 = sshll.u32 %s8999_s12, 4  ;;  %s9000_s5 = smov [#allocation43]   ;;  %s974_s29 = int_to_ptr.vmem [resolvable:$true] %s973_s29 }
 0x2a5   : > { %s998_s9 = sshll.u32 %s9000_s5, 4  ;;  %s10528_s24 = sld [smem:[#allocation91_spill]]  ;;  %s9672_s9 = int_to_ptr.vmem [resolvable:$true] %s998_s9 }
 0x2ab   : > { %s8699_s1 = scalar_lea.hbm %s10528_s24, 16384 }
 0x2ac   : > { %p8700_p1 = scmp.ne.s32.totalorder %s10528_s24, %s8699_s1  ;;  %p8706_p12 = scmp.lt.u32.totalorder %s8699_s1, %s10528_s24 }
 0x2ae   : > { %p8702_p3 = pnand %p8700_p1, %p9206_p8 }
 0x2b0   : > { %p8703_p11 = pneg %p8702_p3 }
 0x2b2   : > { %p8708_p13 = pnand %p8706_p12, %p8703_p11 }
 0x2b4   : > { %8711 = shalt.err (!%p8708_p13)
}
 0x2b5   : > { %s8712_s13 = scalar_lea.vmem %s974_s29, 16384  ;;  %p8720_p7 = scmp.lt.s32.totalorder %s974_s29, %s974_s29 }
 0x2b6   : > { %p8713_p0 = scmp.ne.s32.totalorder %s974_s29, %s8712_s13  ;;  %p8721_p9 = scmp.lt.s32.totalorder %s8712_s13, %s8712_s13 }
 0x2b8   : > { %p8715_p2 = pnand %p8713_p0, %p9206_p8  ;;  %p8722_p4 = por %p8721_p9, %p8720_p7 }
 0x2ba   : > { %p8716_p5 = pneg %p8715_p2 }
 0x2bc   : > { %p8723_p10 = pnand %p8722_p4, %p8716_p5 }
 0x2be   : > { %8726 = shalt.err (!%p8723_p10)
}
 0x2bf   : > { %7699 = dma.hbm_to_vmem [thread:$0]  (!%p9190_p6), %s10528_s24, 16384, %s974_s29, [#allocation39], %s10519_s0, %s10519_s0, %s10518_s4  }
 0x2c0   : > { %s10529_s8 = sld [smem:[#allocation92_spill]] }
 0x2c6   : > { %s10530_s10 = smov %s10529_s8  ;;  %s8727_s1 = scalar_lea.hbm %s10529_s8, 16 }
 0x2c7   : > { %p8728_p1 = scmp.ne.s32.totalorder %s10530_s10, %s8727_s1  ;;  %p8734_p12 = scmp.lt.u32.totalorder %s8727_s1, %s10530_s10 }
 0x2c9   : > { %p8730_p3 = pnand %p8728_p1, %p9206_p8 }
 0x2cb   : > { %p8731_p11 = pneg %p8730_p3 }
 0x2cd   : > { %p8736_p13 = pnand %p8734_p12, %p8731_p11 }
 0x2cf   : > { %8739 = shalt.err (!%p8736_p13)
}
 0x2d0   : > { %s8740_s4 = scalar_lea.vmem %s9672_s9, 16  ;;  %s8747_s0 = scalar_lea.vmem %s9672_s9, 32 }
 0x2d1   : > { %p8741_p0 = scmp.ne.s32.totalorder %s9672_s9, %s8740_s4  ;;  %p8748_p7 = scmp.lt.s32.totalorder %s9672_s9, %s9672_s9 }
 0x2d2   : > { %p8749_p9 = scmp.lt.s32.totalorder %s8747_s0, %s8740_s4 }
 0x2d3   : > { %p8743_p2 = pnand %p8741_p0, %p9206_p8 }
 0x2d4   : > { %p8750_p4 = por %p8749_p9, %p8748_p7 }
 0x2d5   : > { %p8744_p5 = pneg %p8743_p2 }
 0x2d7   : > { %p8751_p10 = pnand %p8750_p4, %p8744_p5 }
 0x2d9   : > { %8754 = shalt.err (!%p8751_p10)
}
 0x2da   : > { %7705 = dma.hbm_to_vmem [thread:$0]  (!%p9190_p6), %s10530_s10, 16, %s9672_s9, [#allocation42]  }
 0x2db   : > { %s9001_s30 = smov [#allocation44]   ;;  %s10531_s1 = sld [smem:[#allocation93_spill]] }
 0x2dc   : > { %s1009_s12 = sshll.u32 %s9001_s30, 4  ;;  %s1010_s12 = int_to_ptr.vmem [resolvable:$true] %s1009_s12 }
 0x2e1   : > { %s8755_s7 = scalar_lea.hbm %s10531_s1, 16 }
 0x2e2   : > { %p8756_p1 = scmp.ne.s32.totalorder %s10531_s1, %s8755_s7  ;;  %p8762_p12 = scmp.lt.u32.totalorder %s8755_s7, %s10531_s1 }
 0x2e4   : > { %p8758_p3 = pnand %p8756_p1, %p9206_p8 }
 0x2e6   : > { %p8759_p11 = pneg %p8758_p3 }
 0x2e8   : > { %p8764_p13 = pnand %p8762_p12, %p8759_p11 }
 0x2ea   : > { %8767 = shalt.err (!%p8764_p13)
}
 0x2eb   : > { %s8768_s9 = scalar_lea.vmem %s1010_s12, 16  ;;  %s8775_s0 = scalar_lea.vmem %s1010_s12, 32 }
 0x2ec   : > { %p8769_p0 = scmp.ne.s32.totalorder %s1010_s12, %s8768_s9  ;;  %p8776_p7 = scmp.lt.s32.totalorder %s1010_s12, %s1010_s12 }
 0x2ed   : > { %p8777_p9 = scmp.lt.s32.totalorder %s8775_s0, %s8768_s9 }
 0x2ee   : > { %p8771_p2 = pnand %p8769_p0, %p9206_p8 }
 0x2ef   : > { %p8778_p4 = por %p8777_p9, %p8776_p7 }
 0x2f0   : > { %p8772_p5 = pneg %p8771_p2 }
 0x2f2   : > { %p8779_p10 = pnand %p8778_p4, %p8772_p5 }
 0x2f4   : > { %8782 = shalt.err (!%p8779_p10)
}
 0x2f5   : > { %s10532_s30 = sld [smem:[#allocation67_spill]]  ;;  %s10533_s5 = sld [smem:[#allocation66_spill]] }
 0x2f6   : > { %s10534_s8 = sld [smem:[#allocation65_spill]]  ;;  %s10535_s11 = sld [smem:[#allocation64_spill]] }
 0x2f7   : > { %s10536_s7 = sld [smem:[#allocation68_spill]]  ;;  %s10543_s15 = sld [smem:[#allocation71_spill]] }
 0x2f8   : > { %7708 = dma.hbm_to_vmem [thread:$0]  (!%p9190_p6), %s10531_s1, 16, %s1010_s12, [#allocation45]  }
 0x2fb   : > { %s6524_s3 = sadd.s32 4294967294, %s10532_s30   ;;  %s9739_s2 = sadd.s32 1, %s10532_s30  }
 0x2fc   : > { %s67_s27 = sadd.s32 1, %s10533_s5  ;;  %s64_s13 = ssub.s32 %s10532_s30, %s9739_s2 }
 0x2fd   : > { %p74_p8 = scmp.ne.s32.totalorder %s10533_s5, %s10534_s8  ;;  %p65_p1 = scmp.eq.s32.totalorder %s64_s13, 0 }
 0x2fe   : > { %p75_p3 = scmp.eq.s32.totalorder %s10532_s30, 0  ;;  %p80_p11 = scmp.ne.s32.totalorder %s10534_s8, %s10535_s11 }
 0x2ff   : > { %p676_p12 = scmp.eq.s32.totalorder %s10536_s7, 1  ;;  %p10537_p0 = scmp.eq.s32.totalorder %s10536_s7, 0 }
 0x300   : > { %s9751_s4 = scalar_select %p65_p1, %s10533_s5, %s67_s27  }
 0x301   : > { %p76_p13 = por %p75_p3, %p74_p8  ;;  %p9755_p2 = por %p10537_p0, %p80_p11 }
 0x302   : > { %p9759_p6 = por %p676_p12, %p74_p8  ;;  %p682_p5 = scmp.eq.s32.totalorder %s6524_s3, 1 }
 0x303   : > { %s10538_s9 = scalar_select %p9755_p2, 1, 0 }
 0x304   : > { %s10539_s12 = scalar_select %p9759_p6, 1, 0 }
 0x305   : > { %p7746_p7 = scmp.lt.s32.totalorder %s10532_s30, 2  ;;  %s1020_s0 = sand.u32 1, %s10533_s5  }
 0x306   : > { %p9765_p9 = por %p682_p5, %p80_p11  ;;  %s9769_s6 = sshll.u32 %s1020_s0, 3 }
 0x307   : > { %s6554_s8 = sshll.u32 %s10532_s30, 7  ;;  %s10541_s27 = sld [smem:[#allocation70_spill]] }
 0x308   : > { %s10540_s29 = scalar_select %p9765_p9, 1, 0 }
 0x309   : > { %s1024_s3 = scalar_lea.vmem [#allocation2], %s9769_s6  ;;  %p9778_p4 = pnand %p7746_p7, %p76_p13 }
 0x30a   : > { %s1031_s1 = sshll.u32 %s1024_s3, 4  ;;  %s9787_s11 = scalar_lea.hbm %s10543_s15, %s6554_s8  ;;  %s9782_s1 = int_to_ptr.vmem [resolvable:$true] %s1031_s1 }
 0x30b   : > { %s1021_s7 = scalar_lea.sflag [#allocation3], %s1020_s0  ;;  %p8785_p8 = pneg %p9778_p4 }
 0x30d   : > { %s9775_s13 = scalar_lea.hbm %s10541_s27, %s6554_s8  ;;  %s8788_s18 = scalar_lea.hbm %s10541_s27, 256 }
 0x30e   : > { %s8783_s16 = scalar_lea.hbm %s9775_s13, 128  ;;  %p8789_p11 = scmp.lt.u32.totalorder %s9775_s13, %s10541_s27 }
 0x30f   : > { %p8784_p10 = scmp.ne.s32.totalorder %s9775_s13, %s8783_s16  ;;  %p8790_p12 = scmp.lt.u32.totalorder %s8788_s18, %s8783_s16 }
 0x310   : > { %p8792_p0 = scmp.lt.u32.totalorder %s8783_s16, %s9775_s13 }
 0x311   : > { %p8786_p1 = pnand %p8785_p8, %p8784_p10  ;;  %p8791_p13 = por %p8790_p12, %p8789_p11 }
 0x313   : > { %p8787_p3 = pneg %p8786_p1  ;;  %p8793_p5 = por %p8792_p0, %p8791_p13 }
 0x315   : > { %p8794_p7 = pnand %p8793_p5, %p8787_p3 }
 0x317   : > { %8797 = shalt.err (!%p8794_p7)
}
 0x318   : > { %s8798_s14 = scalar_lea.vmem %s9782_s1, 128  ;;  %s9002_s17 = smov [#allocation2]  }
 0x319   : > { %p8799_p10 = scmp.ne.s32.totalorder %s9782_s1, %s8798_s14  ;;  %s8803_s10 = sshll.u32 %s9002_s17, 4  ;;  %s8804_s10 = int_to_ptr.vmem [resolvable:$false] %s8803_s10 }
 0x31a   : > { %s8805_s19 = scalar_lea.vmem %s8804_s10, 256  ;;  %p8806_p6 = scmp.lt.s32.totalorder %s9782_s1, %s8804_s10 }
 0x31b   : > { %p8801_p1 = pnand %p8799_p10, %p8785_p8  ;;  %p8807_p11 = scmp.lt.s32.totalorder %s8805_s19, %s8798_s14 }
 0x31d   : > { %p8802_p9 = pneg %p8801_p1  ;;  %p8808_p12 = por %p8807_p11, %p8806_p6 }
 0x31f   : > { %p8809_p13 = pnand %p8808_p12, %p8802_p9 }
 0x321   : > { %8812 = shalt.err (!%p8809_p13)
}
 0x322   : > { %7712 = dma.hbm_to_vmem [thread:$0]  (!%p9778_p4), %s9775_s13, 128, %s9782_s1, %s1021_s7  }
 0x323   : > { %s1038_s16 = sand.u32 1, %s10532_s30   ;;  %s1042_s18 = scalar_lea.vmem [#allocation5], %s9769_s6 }
 0x324   : > { %s1049_s20 = sshll.u32 %s1042_s18, 4  ;;  %s1039_s0 = scalar_lea.sflag [#allocation6], %s1038_s16  ;;  %s1050_s20 = int_to_ptr.vmem [resolvable:$true] %s1049_s20 }
 0x325   : > { %s8813_s8 = scalar_lea.hbm %s9787_s11, 128  ;;  %s8818_s17 = scalar_lea.hbm %s10543_s15, 256 }
 0x326   : > { %p8814_p6 = scmp.ne.s32.totalorder %s9787_s11, %s8813_s8  ;;  %p8819_p0 = scmp.lt.u32.totalorder %s9787_s11, %s10543_s15 }
 0x327   : > { %p8820_p5 = scmp.lt.u32.totalorder %s8818_s17, %s8813_s8  ;;  %p8822_p10 = scmp.lt.u32.totalorder %s8813_s8, %s9787_s11 }
 0x328   : > { %p8816_p9 = pnand %p8814_p6, %p8785_p8 }
 0x329   : > { %p8821_p7 = por %p8820_p5, %p8819_p0 }
 0x32a   : > { %p8817_p3 = pneg %p8816_p9 }
 0x32b   : > { %p8823_p1 = por %p8822_p10, %p8821_p7 }
 0x32d   : > { %p8824_p11 = pnand %p8823_p1, %p8817_p3 }
 0x32f   : > { %8827 = shalt.err (!%p8824_p11)
}
 0x330   : > { %s8828_s1 = scalar_lea.vmem %s1050_s20, 128  ;;  %s9003_s30 = smov [#allocation5]  }
 0x331   : > { %p8829_p12 = scmp.ne.s32.totalorder %s1050_s20, %s8828_s1  ;;  %s8833_s6 = sshll.u32 %s9003_s30, 4  ;;  %s8834_s6 = int_to_ptr.vmem [resolvable:$false] %s8833_s6 }
 0x332   : > { %s8835_s13 = scalar_lea.vmem %s8834_s6, 256  ;;  %p8836_p9 = scmp.lt.s32.totalorder %s1050_s20, %s8834_s6 }
 0x333   : > { %p8831_p13 = pnand %p8829_p12, %p8785_p8  ;;  %p8837_p2 = scmp.lt.s32.totalorder %s8835_s13, %s8828_s1 }
 0x335   : > { %p8832_p6 = pneg %p8831_p13  ;;  %p8838_p0 = por %p8837_p2, %p8836_p9 }
 0x337   : > { %p8839_p5 = pnand %p8838_p0, %p8832_p6 }
 0x339   : > { %8842 = shalt.err (!%p8839_p5)
}
 0x33a   : > { %7715 = dma.hbm_to_vmem [thread:$0]  (!%p9778_p4), %s9787_s11, 128, %s1050_s20, %s1039_s0  }
 0x33b   : > { %s10544_s7 = sld [smem:[#allocation69_spill]] }
 0x341   : > { %p10545_p3 = scmp.ne.s32.totalorder %s10544_s7, 0 }
 0x342   : > { %s10546_s16 = sld [smem:[#allocation65_spill]] (!%p10545_p3)  ;;  %p10547_p2 = scmp.ne.s32.totalorder (!%p10545_p3), %s10538_s9, 0 }
 0x343   : > { %1058 = sbr.rel (%p10545_p3) target bundleno = 10159 (0x27af), region = 132 }
 0x348   : > { %s9838_s18 = sand.u32 (!%p10545_p3), 1, %s10546_s16  }
 0x349   : > { %s9841_s8 = sshll.u32 (!%p10545_p3), %s9838_s18, 3  ;;  %s1061_s3 = scalar_lea.sflag (!%p10545_p3), [#allocation3], %s9838_s18 }
 0x34a   : > { %s1064_s14 = scalar_lea.vmem [#allocation2], %s9841_s8 }
 0x34b   : > { %8888 = dma.done.wait (%p10547_p2), %s1061_s3, 128  }
 0x34c   : > { %8890 = vsyncadd (%p10547_p2), %s1061_s3, 4294967168  ;;  %s10548_s5 = sld [smem:[#allocation68_spill]]  ;;  %s1073_s0 = scalar_lea.vmem [#allocation5], %s9841_s8 }
 0x352   : > { %s1069_s11 = sand.u32 1, %s10548_s5  }
 0x353   : > { %s1070_s20 = scalar_lea.sflag [#allocation6], %s1069_s11 }
 0x354   : > { %8892 = dma.done.wait (%p10547_p2), %s1070_s20, 128  }
 0x355   : > { %8894 = vsyncadd (%p10547_p2), %s1070_s20, 4294967168  ;;  %p10549_p4 = scmp.eq.s32.totalorder %s10548_s5, 0 }
 0x357   : > { %8896 = dma.done.wait (%p10549_p4), [#allocation6], 1024   ;;  %p10550_p8 = pmov %p10549_p4 }
 0x358   : > { %p10551_p7 = pmov %p10549_p4 }
 0x359   : > { %8898 = vsyncadd (%p10550_p8), [#allocation6], 4294966272 }
 0x35a   : > { %8900 = dma.done.wait (%p10551_p7), [#allocation9], 1088   ;;  %p10552_p10 = pmov %p10549_p4 }
 0x35b   : > { %p10553_p1 = pmov %p10549_p4 }
 0x35c   : > { %8902 = vsyncadd (%p10552_p10), [#allocation9], 4294966208 }
 0x35d   : > { %8904 = dma.done.wait (%p10553_p1), [#allocation12], 1088   ;;  %p10554_p11 = pmov %p10553_p1 }
 0x35e   : > { %p10555_p12 = pmov %p10553_p1 }
 0x35f   : > { %8906 = vsyncadd (%p10554_p11), [#allocation12], 4294966208 }
 0x360   : > { %8908 = dma.done.wait (%p10555_p12), [#allocation15], 320   ;;  %p10556_p13 = pmov %p10553_p1 }
 0x361   : > { %p10557_p6 = pmov %p10553_p1 }
 0x362   : > { %8910 = vsyncadd (%p10556_p13), [#allocation15], 4294966976 }
 0x363   : > { %8912 = dma.done.wait (%p10557_p6), [#allocation18], 32   ;;  %p10558_p9 = pmov %p10553_p1 }
 0x364   : > { %p10559_p0 = pmov %p10553_p1 }
 0x365   : > { %8914 = vsyncadd (%p10558_p9), [#allocation18], 4294967264 }
 0x366   : > { %8916 = dma.done.wait (%p10559_p0), [#allocation21], 1040   ;;  %p10560_p5 = pmov %p10559_p0 }
 0x367   : > { %p10561_p3 = pmov %p10559_p0 }
 0x368   : > { %8918 = vsyncadd (%p10560_p5), [#allocation21], 4294966256 }
 0x369   : > { %8920 = dma.done.wait (%p10561_p3), [#allocation24], 1088   ;;  %p10562_p2 = pmov %p10559_p0 }
 0x36a   : > { %p10563_p4 = pmov %p10559_p0 }
 0x36b   : > { %8922 = vsyncadd (%p10562_p2), [#allocation24], 4294966208 }
 0x36c   : > { %8924 = dma.done.wait (%p10563_p4), [#allocation27], 1088   ;;  %p10564_p8 = pmov %p10559_p0 }
 0x36d   : > { %p10565_p7 = pmov %p10559_p0 }
 0x36e   : > { %8926 = vsyncadd (%p10564_p8), [#allocation27], 4294966208 }
 0x36f   : > { %8928 = dma.done.wait (%p10565_p7), [#allocation30], 320   ;;  %p10566_p10 = pmov %p10559_p0 }
 0x370   : > { %p10567_p1 = pmov %p10559_p0 }
 0x371   : > { %8930 = vsyncadd (%p10566_p10), [#allocation30], 4294966976 }
 0x372   : > { %8932 = dma.done.wait (%p10567_p1), [#allocation33], 32   ;;  %p10568_p11 = pmov %p10559_p0 }
 0x373   : > { %p10569_p12 = pmov %p10559_p0 }
 0x374   : > { %8934 = vsyncadd (%p10568_p11), [#allocation33], 4294967264 }
 0x375   : > { %8936 = dma.done.wait (%p10569_p12), [#allocation36], 4112   ;;  %p10570_p13 = pmov %p10559_p0 }
 0x376   : > { %p10571_p6 = pmov %p10559_p0 }
 0x377   : > { %8938 = vsyncadd (%p10570_p13), [#allocation36], 4294963184 }
 0x378   : > { %8940 = dma.done.wait (%p10571_p6), [#allocation39], 16640   ;;  %p10572_p9 = pmov %p10559_p0 }
 0x37a   : > { %8942 = vsyncadd (%p10572_p9), [#allocation39], 4294950656 }
 0x37b   : > { %8944 = dma.done.wait (%p10559_p0), [#allocation42], 32   ;;  %p10573_p5 = pmov %p10559_p0 }
 0x37c   : > { %p10574_p3 = pmov %p10559_p0 }
 0x37d   : > { %8946 = vsyncadd (%p10573_p5), [#allocation42], 4294967264 }
 0x37e   : > { %8948 = dma.done.wait (%p10574_p3), [#allocation45], 16   ;;  %p10575_p2 = pmov %p10559_p0 }
 0x37f   : > { %v9004_v0 = vmov 0.0   ;;  %vm9005_vm0 = vmmov 0   ;;  %v7840_v1 = vld [vmem:[#allocation10] sm:$0xff]   ;;  %v7841_v2 = vld [vmem:[#allocation10 + $0x8] sm:$0xff]   ;;  %vm1282_vm1 = vcmask 261120   ;;  %vm1454_vm2 = vcmask 64512  }
 0x380   : > { %8950 = vsyncadd (%p10575_p2), [#allocation45], 4294967280  ;;  %7192 = vmatprep.subr.bf16.mxu1 %v9004_v0  ;;  %7184 = vmatprep.subr.bf16.mxu0 %v9004_v0  ;;  %v7842_v3 = vld [vmem:[#allocation7] sm:$0xff]   ;;  %v7843_v5 = vld [vmem:[#allocation7 + $0x8] sm:$0xff]   ;;  %vm1517_vm3 = vcmask 1043456   ;;  %s6885_s9 = sshll.u32 %s10548_s5, 7 }
 0x381   : > { %7196 = vmatprep.mubr.msk.bf16.mxu1 %vm9005_vm0, %v9004_v0  ;;  %7188 = vmatprep.mubr.msk.bf16.mxu0 %vm9005_vm0, %v9004_v0  ;;  %v1256_v4 = vld [vmem:[%s1064_s14] sm:$0xff]  ;;  %v7845_v23 = vld [vmem:[#allocation13 + $0x8] sm:$0xff]   ;;  %v7849_v43 = vld [vmem:[#allocation7 + $0x18] sm:$0xff]   ;;  %s1254_s17 = scalar_lea.vmem [#allocation46], %s9841_s8  ;;  %s10576_s30 = sld [smem:[#allocation94_spill]] }
 0x382   : > { %7193 = vmatpush3.bf16.msra.mxu1 %v7840_v1  ;;  %7185 = vmatpush3.bf16.msra.mxu0 %v7842_v3  ;;  %v9920_v6 = vpack.c.bf16 %v1256_v4, %v1256_v4  ;;  %v6591_v7 = vld [vmem:[#allocation11] ss:$0 sm:$0xff]  ;;  %v6587_v12 = vld [vmem:[#allocation8] ss:$0 sm:$0xff]  ;;  %v7844_v22 = vld [vmem:[#allocation13] sm:$0xff]   ;;  %s6184_s10 = sshll.u32 %s1254_s17, 4  ;;  %s10349_s10 = int_to_ptr.vmem [resolvable:$true] %s6184_s10 }
 0x383   : > { %7194 = vmatprep.subr.bf16.mxu1 %v9004_v0  ;;  %7186 = vmatprep.subr.bf16.mxu0 %v9004_v0  ;;  %v6595_v37 = vld [vmem:[#allocation14] ss:$0 sm:$0xff]  ;;  %v7848_v42 = vld [vmem:[#allocation7 + $0x10] sm:$0xff]   ;;  %v7847_v49 = vld [vmem:[#allocation10 + $0x18] sm:$0xff]   ;;  %s6171_s7 = scalar_lea.sflag [#allocation4], %s9838_s18  ;;  %s8843_s16 = scalar_lea.vmem %s10349_s10, 128 }
 0x384   : > { %v7846_v47 = vld [vmem:[#allocation10 + $0x10] sm:$0xff]   ;;  %v6605_v58 = vld [vmem:[#allocation11 + $0x1] ss:$0 sm:$0xff]  ;;  %v6601_v63 = vld [vmem:[#allocation8 + $0x1] ss:$0 sm:$0xff]  ;;  %p8844_p4 = scmp.ne.s32.totalorder %s10349_s10, %s8843_s16  ;;  %p10578_p8 = scmp.ne.s32.totalorder %s10539_s12, 0 }
 0x385   : > { %s9007_s8 = smov [#allocation46]  }
 0x386   : > { %7195 = vmatpush3.bf16.msra.mxu1 %v7841_v2  ;;  %7187 = vmatpush3.bf16.msra.mxu0 %v7843_v5  ;;  %p8845_p7 = pnand %p8844_p4, %p10578_p8  ;;  %s8847_s3 = sshll.u32 %s9007_s8, 4  ;;  %s8848_s3 = int_to_ptr.vmem [resolvable:$false] %s8847_s3 }
 0x387   : > { %7208 = vmatprep.subr.bf16.mxu1 %v9004_v0  ;;  %7200 = vmatprep.subr.bf16.mxu0 %v9004_v0  ;;  %s10577_s6 = smov %s10576_s30  ;;  %s10347_s13 = scalar_lea.hbm %s10576_s30, %s6885_s9 }
 0x388   : > { %p8846_p10 = pneg %p8845_p7  ;;  %p8850_p1 = scmp.lt.s32.totalorder %s10349_s10, %s8848_s3 }
 0x389   : > { %7197 = vmatmul.mubr.msk.bf16.vlgmr.msra.gmra.mrb[0].mxu1 %vm1282_vm1, %v9920_v6  ;;  %7189 = vmatmul.mubr.msk.bf16.vlgmr.msra.gmra.mrb[0].mxu0 %vm1282_vm1, %v9920_v6 }
 0x38a   : > { %7210 = vmatprep.mubr.msk.bf16.mxu1 %vm9005_vm0, %v9004_v0  ;;  %7204 = vmatprep.mubr.msk.bf16.mxu0 %vm9005_vm0, %v9004_v0 }
 0x38b   : > { %7201 = vmatpush3.bf16.msra.mxu0 %v7844_v22 }
 0x38c   : > { %7202 = vmatprep.subr.bf16.mxu0 %v9004_v0 }
 0x38f   : > { %7203 = vmatpush3.bf16.msra.mxu0 %v7845_v23 }
 0x390   : > { %7214 = vmatprep.subr.bf16.mxu0 %v9004_v0 }
 0x392   : > { %7205 = vmatmul.mubr.msk.bf16.vlgmr.msra.gmra.mrb[4].mxu0 %vm1282_vm1, %v9920_v6 }
 0x393   : > { %7216 = vmatprep.mubr.msk.bf16.mxu0 %vm9005_vm0, %v9004_v0 }
 0x45c   : > { %v1383_v8 = vpop.f32.mrb[0].mxu1  ;;  %v1320_v13 = vpop.f32.mrb[0].mxu0 }
 0x45d   : > { %v1384_v9 = vadd.f32 %v6591_v7, %v1383_v8  ;;  %v7198_v10 = vpop.f32.mrb[1].mxu1  ;;  %v7190_v16 = vpop.f32.mrb[1].mxu0  ;;  %v1321_v19 = vadd.f32 %v6587_v12, %v1320_v13  ;;  %v7850_v7 = vld [vmem:[#allocation13 + $0x10] sm:$0xff]   ;;  %v7851_v8 = vld [vmem:[#allocation13 + $0x18] sm:$0xff]  }
 0x45e   : > { %v1386_v11 = vpop.f32.mrb[2].mxu1  ;;  %v1323_v17 = vpop.f32.mrb[2].mxu0 }
 0x45f   : > { %v1453_v14 = vpack.c.bf16 %v1384_v9, %v1384_v9  ;;  %v7199_v15 = vpop.f32.mrb[3].mxu1  ;;  %v7191_v20 = vpop.f32.mrb[3].mxu0  ;;  %v1452_v21 = vpack.c.bf16 %v1321_v19, %v1321_v19 }
 0x461   : > { %v1459_v18 = vsel %vm1454_vm2, %v1453_v14, 0  ;;  %v6609_v14 = vld [vmem:[#allocation14 + $0x1] ss:$0 sm:$0xff] }
 0x462   : > { %7209 = vmatpush3.bf16.xpose.msra.mxu1 %v1459_v18 }
 0x463   : > { %7220 = vmatprep.subr.bf16.mxu1 %v9004_v0 }
 0x465   : > { %v1446_v34 = vpop.f32.mrb[4].mxu0 }
 0x466   : > { %v7206_v35 = vpop.f32.mrb[5].mxu0  ;;  %v1447_v39 = vadd.f32 %v6595_v37, %v1446_v34  ;;  %v7853_v37 = vld [vmem:[#allocation10 + $0x28] sm:$0xff]  }
 0x467   : > { %v1449_v36 = vpop.f32.mrb[6].mxu0  ;;  %v7852_v35 = vld [vmem:[#allocation10 + $0x20] sm:$0xff]  }
 0x468   : > { %v7207_v38 = vpop.f32.mrb[7].mxu0  ;;  %v1513_v40 = vpack.c.bf16 %v1447_v39, %v1447_v39  ;;  %v7854_v39 = vld [vmem:[#allocation7 + $0x20] sm:$0xff]  }
 0x469   : > { %7211 = vmatmul.mubr.msk.bf16.vlgmr.msra.gmra.mrb[4].mxu1 %vm1454_vm2, %v1452_v21 }
 0x46a   : > { %7224 = vmatprep.mubr.msk.bf16.mxu1 %vm9005_vm0, %v9004_v0  ;;  %v1519_v41 = vsel %vm1517_vm3, %v1513_v40, 0  ;;  %7221 = vmatpush3.bf16.msra.mxu1 %v7848_v42 }
 0x46b   : > { %7215 = vmatpush3.bf16.msra.mxu0 %v1519_v41  ;;  %7222 = vmatprep.subr.bf16.mxu1 %v9004_v0 }
 0x46c   : > { %7228 = vmatprep.subr.bf16.mxu0 %v9004_v0 }
 0x46e   : > { %7223 = vmatpush3.bf16.msra.mxu1 %v7849_v43 }
 0x46f   : > { %7236 = vmatprep.subr.bf16.mxu1 %v9004_v0 }
 0x471   : > { %7225 = vmatmul.mubr.msk.bf16.vlgmr.msra.gmra.mrb[8].mxu1 %vm1282_vm1, %v9920_v6 }
 0x472   : > { %7240 = vmatprep.mubr.msk.bf16.mxu1 %vm9005_vm0, %v9004_v0  ;;  %7237 = vmatpush3.bf16.msra.mxu1 %v7850_v7  ;;  %v7856_v7 = vld [vmem:[#allocation13 + $0x20] sm:$0xff]  }
 0x473   : > { %7238 = vmatprep.subr.bf16.mxu1 %v9004_v0 }
 0x476   : > { %7239 = vmatpush3.bf16.msra.mxu1 %v7851_v8  ;;  %v7857_v8 = vld [vmem:[#allocation13 + $0x28] sm:$0xff]  }
 0x477   : > { %7250 = vmatprep.subr.bf16.mxu1 %v9004_v0 }
 0x479   : > { %7241 = vmatmul.mubr.msk.bf16.vlgmr.msra.gmra.mrb[12].mxu1 %vm1282_vm1, %v9920_v6 }
 0x47a   : > { %7252 = vmatprep.mubr.msk.bf16.mxu1 %vm9005_vm0, %v9004_v0 }
 0x53c   : > { %v1495_v24 = vpop.f32.mrb[4].mxu1 }
 0x53d   : > { %v7212_v25 = vpop.f32.mrb[5].mxu1  ;;  %v1501_v26 = vsel %vm1454_vm2, %v1495_v24, -inf }
 0x53e   : > { %1502 = vmax.xlane.f32.xlu0 %v1501_v26  ;;  %v1498_v27 = vpop.f32.mrb[6].mxu1 }
 0x53f   : > { %v7213_v28 = vpop.f32.mrb[7].mxu1  ;;  %v1867_v27 = vld [vmem:[#allocation16 + $0x4] sm:$0xf] }
 0x540   : > { %v1872_v28 = vsel %vm1517_vm3, %v1867_v27, 0  ;;  %v2264_v27 = vld [vmem:[#allocation16 + $0x8] sm:$0xf] }
 0x544   : > { %v1622_v50 = vpop.f32.mrb[8].mxu1 }
 0x545   : > { %v7226_v51 = vpop.f32.mrb[9].mxu1  ;;  %v1623_v4 = vadd.f32 %v6601_v63, %v1622_v50 }
 0x546   : > { %v1625_v52 = vpop.f32.mrb[10].mxu1 }
 0x547   : > { %v7227_v53 = vpop.f32.mrb[11].mxu1  ;;  %v1758_v5 = vpack.c.bf16 %v1623_v4, %v1623_v4 }
 0x54c   : > { %v1752_v15 = vpop.f32.mrb[12].mxu1 }
 0x54d   : > { %v1753_v16 = vadd.f32 %v6609_v14, %v1752_v15  ;;  %v7242_v17 = vpop.f32.mrb[13].mxu1 }
 0x54e   : > { %v1755_v18 = vpop.f32.mrb[14].mxu1 }
 0x54f   : > { %v1818_v19 = vpack.c.bf16 %v1753_v16, %v1753_v16  ;;  %v7243_v20 = vpop.f32.mrb[15].mxu1 }
 0x551   : > { %v1823_v21 = vsel %vm1517_vm3, %v1818_v19, 0 }
 0x552   : > { %7251 = vmatpush3.bf16.msra.mxu1 %v1823_v21 }
 0x553   : > { %7262 = vmatprep.subr.bf16.mxu1 %v9004_v0 }
 0x5cb   : > { %v1503_v29 = vpop.xlane.xlu0 %1502 }
 0x5cc   : > { %v1504_v30 = vsub.f32 %v1495_v24, %v1503_v29 }
 0x5ce   : > { %v1505_v31 = vmul.f32 1.442695, %v1504_v30 }
 0x5d0   : > { %8016 = vpow2.f32 %v1505_v31  ;;  %v1562_v31 = vld [vmem:[#allocation16] sm:$0xf] }
 0x5d1   : > { %v1918_v34 = vsel %vm1517_vm3, %v1562_v31, 0 }
 0x5da   : > { %v8017_v32 = vpop.eup %8016 }
 0x5db   : > { %v1507_v33 = vsel %vm1454_vm2, %v8017_v32, 0.0 }
 0x5dc   : > { %1508 = vadd.xlane.f32.xlu0 %v1507_v33 }
 0x669   : > { %v1509_v44 = vpop.xlane.xlu0 %1508 }
 0x66a   : > { %8018 = vrcp.f32 %v1509_v44  ;;  %v7855_v44 = vld [vmem:[#allocation7 + $0x28] sm:$0xff]  }
 0x674   : > { %v8019_v45 = vpop.eup %8018 }
 0x675   : > { %v1511_v46 = vmul.f32 %v8019_v45, %v8017_v32 }
 0x677   : > { %v1512_v48 = vpack.c.bf16 %v1511_v46, %v1511_v46 }
 0x679   : > { %7217 = vmatmul.mubr.msk.bf16.vlgmr.msra.gmra.mrb[8].mxu0 %vm1454_vm2, %v1512_v48 }
 0x67a   : > { %7229 = vmatpush3.bf16.msra.mxu0 %v7846_v47  ;;  %7232 = vmatprep.mubr.msk.bf16.mxu0 %vm9005_vm0, %v9004_v0 }
 0x67b   : > { %7230 = vmatprep.subr.bf16.mxu0 %v9004_v0 }
 0x67e   : > { %7231 = vmatpush3.bf16.msra.mxu0 %v7847_v49  ;;  %v6621_v49 = vld [vmem:[#allocation11 + $0x2] ss:$0 sm:$0xff] }
 0x67f   : > { %7244 = vmatprep.subr.bf16.mxu0 %v9004_v0 }
 0x681   : > { %7233 = vmatmul.mubr.msk.bf16.vlgmr.msra.gmra.mrb[12].mxu0 %vm1282_vm1, %v9920_v6 }
 0x682   : > { %7246 = vmatprep.mubr.msk.bf16.mxu0 %vm9005_vm0, %v9004_v0 }
 0x74c   : > { %v9963_v54 = vpop.f32.mrb[8].mxu0 }
 0x74d   : > { %v7218_v55 = vpop.f32.mrb[9].mxu0  ;;  %v1561_v36 = vpack.c.bf16 %v9963_v54, %v9963_v54 }
 0x74e   : > { %v1558_v56 = vpop.f32.mrb[10].mxu0 }
 0x74f   : > { %v7219_v57 = vpop.f32.mrb[11].mxu0 }
 0x754   : > { %v1687_v59 = vpop.f32.mrb[12].mxu0 }
 0x755   : > { %v1688_v60 = vadd.f32 %v6605_v58, %v1687_v59  ;;  %v7234_v61 = vpop.f32.mrb[13].mxu0 }
 0x756   : > { %v1690_v62 = vpop.f32.mrb[14].mxu0 }
 0x757   : > { %v1759_v1 = vpack.c.bf16 %v1688_v60, %v1688_v60  ;;  %v7235_v2 = vpop.f32.mrb[15].mxu0  ;;  %v6617_v62 = vld [vmem:[#allocation8 + $0x2] ss:$0 sm:$0xff] }
 0x759   : > { %v1764_v3 = vsel %vm1454_vm2, %v1759_v1, 0 }
 0x75a   : > { %7245 = vmatpush3.bf16.xpose.msra.mxu0 %v1764_v3 }
 0x75b   : > { %7256 = vmatprep.subr.bf16.mxu0 %v9004_v0 }
 0x761   : > { %7247 = vmatmul.mubr.msk.bf16.vlgmr.msra.gmra.mrb[16].mxu0 %vm1454_vm2, %v1758_v5 }
 0x762   : > { %7258 = vmatprep.mubr.msk.bf16.mxu0 %vm9005_vm0, %v9004_v0  ;;  %7257 = vmatpush3.bf16.msra.mxu0 %v1872_v28  ;;  %v2269_v28 = vsel %vm1517_vm3, %v2264_v27, 0 }
 0x763   : > { %7268 = vmatprep.subr.bf16.mxu0 %v9004_v0 }
 0x834   : > { %v1800_v9 = vpop.f32.mrb[16].mxu0 }
 0x835   : > { %v7248_v10 = vpop.f32.mrb[17].mxu0  ;;  %v1806_v11 = vsel %vm1454_vm2, %v1800_v9, -inf }
 0x836   : > { %1807 = vmax.xlane.f32.xlu1 %v1806_v11  ;;  %v1803_v12 = vpop.f32.mrb[18].mxu0 }
 0x837   : > { %v7249_v13 = vpop.f32.mrb[19].mxu0 }
 0x8c3   : > { %v1808_v22 = vpop.xlane.xlu1 %1807 }
 0x8c4   : > { %v1809_v23 = vsub.f32 %v1800_v9, %v1808_v22  ;;  %v6625_v22 = vld [vmem:[#allocation14 + $0x2] ss:$0 sm:$0xff] }
 0x8c6   : > { %v1810_v24 = vmul.f32 1.442695, %v1809_v23 }
 0x8c8   : > { %8020 = vpow2.f32 %v1810_v24 }
 0x8d2   : > { %v8021_v25 = vpop.eup %8020 }
 0x8d3   : > { %v1812_v26 = vsel %vm1454_vm2, %v8021_v25, 0.0 }
 0x8d4   : > { %1813 = vadd.xlane.f32.xlu1 %v1812_v26 }
 0x961   : > { %v1814_v29 = vpop.xlane.xlu1 %1813 }
 0x962   : > { %8022 = vrcp.f32 %v1814_v29 }
 0x96c   : > { %v8023_v30 = vpop.eup %8022 }
 0x96d   : > { %v1816_v32 = vmul.f32 %v8023_v30, %v8021_v25 }
 0x96f   : > { %v1817_v33 = vpack.c.bf16 %v1816_v32, %v1816_v32 }
 0x971   : > { %7253 = vmatmul.mubr.msk.bf16.vlgmr.msra.gmra.mrb[16].mxu1 %vm1454_vm2, %v1817_v33  ;;  %v7860_v33 = vld [vmem:[#allocation7 + $0x30] sm:$0xff]  }
 0x972   : > { %7263 = vmatpush3.bf16.msra.mxu1 %v1918_v34  ;;  %7264 = vmatprep.mubr.msk.bf16.mxu1 %vm9005_vm0, %v9004_v0  ;;  %v7861_v34 = vld [vmem:[#allocation7 + $0x38] sm:$0xff]  }
 0x973   : > { %7276 = vmatprep.subr.bf16.mxu1 %v9004_v0 }
 0x979   : > { %7265 = vmatmul.mubr.msk.bf16.vlgmr.msra.gmra.mrb[20].mxu1 %vm1454_vm2, %v1561_v36  ;;  %v7858_v36 = vld [vmem:[#allocation10 + $0x30] sm:$0xff]  }
 0x97a   : > { %7277 = vmatpush3.bf16.msra.mxu1 %v7852_v35  ;;  %7280 = vmatprep.mubr.msk.bf16.mxu1 %vm9005_vm0, %v9004_v0 }
 0x97b   : > { %7278 = vmatprep.subr.bf16.mxu1 %v9004_v0 }
 0x97e   : > { %7279 = vmatpush3.bf16.msra.mxu1 %v7853_v37 }
 0x97f   : > { %7292 = vmatprep.subr.bf16.mxu1 %v9004_v0 }
 0x981   : > { %7281 = vmatmul.mubr.msk.bf16.vlgmr.msra.gmra.mrb[24].mxu1 %vm1282_vm1, %v9920_v6 }
 0x982   : > { %7294 = vmatprep.mubr.msk.bf16.mxu1 %vm9005_vm0, %v9004_v0 }
 0xa44   : > { %v1859_v38 = vpop.f32.mrb[16].mxu1 }
 0xa45   : > { %v1865_v40 = vpack.c.bf16 %v1859_v38, %v1859_v38  ;;  %v7254_v41 = vpop.f32.mrb[17].mxu1 }
 0xa46   : > { %v1862_v42 = vpop.f32.mrb[18].mxu1  ;;  %v7859_v41 = vld [vmem:[#allocation10 + $0x38] sm:$0xff]  }
 0xa47   : > { %v7255_v43 = vpop.f32.mrb[19].mxu1  ;;  %7259 = vmatmul.mubr.msk.bf16.vlgmr.msra.gmra.mrb[20].mxu0 %vm1454_vm2, %v1865_v40 }
 0xa48   : > { %7269 = vmatpush3.bf16.msra.mxu0 %v7854_v39  ;;  %7272 = vmatprep.mubr.msk.bf16.mxu0 %vm9005_vm0, %v9004_v0 }
 0xa49   : > { %7270 = vmatprep.subr.bf16.mxu0 %v9004_v0 }
 0xa4c   : > { %v1954_v45 = vpop.f32.mrb[20].mxu1  ;;  %7271 = vmatpush3.bf16.msra.mxu0 %v7855_v44 }
 0xa4d   : > { %v7266_v46 = vpop.f32.mrb[21].mxu1  ;;  %7284 = vmatprep.subr.bf16.mxu0 %v9004_v0 }
 0xa4e   : > { %v1957_v47 = vpop.f32.mrb[22].mxu1 }
 0xa4f   : > { %v7267_v48 = vpop.f32.mrb[23].mxu1  ;;  %7273 = vmatmul.mubr.msk.bf16.vlgmr.msra.gmra.mrb[24].mxu0 %vm1282_vm1, %v9920_v6 }
 0xa50   : > { %7288 = vmatprep.mubr.msk.bf16.mxu0 %vm9005_vm0, %v9004_v0  ;;  %7285 = vmatpush3.bf16.msra.mxu0 %v7856_v7 }
 0xa51   : > { %7286 = vmatprep.subr.bf16.mxu0 %v9004_v0 }
 0xa54   : > { %v2084_v50 = vpop.f32.mrb[24].mxu1  ;;  %7287 = vmatpush3.bf16.msra.mxu0 %v7857_v8 }
 0xa55   : > { %v2085_v51 = vadd.f32 %v6621_v49, %v2084_v50  ;;  %v7282_v52 = vpop.f32.mrb[25].mxu1  ;;  %7298 = vmatprep.subr.bf16.mxu0 %v9004_v0 }
 0xa56   : > { %v2087_v53 = vpop.f32.mrb[26].mxu1 }
 0xa57   : > { %v2156_v54 = vpack.c.bf16 %v2085_v51, %v2085_v51  ;;  %v7283_v55 = vpop.f32.mrb[27].mxu1  ;;  %7289 = vmatmul.mubr.msk.bf16.vlgmr.msra.gmra.mrb[28].mxu0 %vm1282_vm1, %v9920_v6  ;;  %v6636_v51 = vld [vmem:[#allocation11 + $0x3] ss:$0 sm:$0xff] }
 0xa58   : > { %7300 = vmatprep.mubr.msk.bf16.mxu0 %vm9005_vm0, %v9004_v0 }
 0xa59   : > { %v2161_v56 = vsel %vm1454_vm2, %v2156_v54, 0 }
 0xa5a   : > { %7293 = vmatpush3.bf16.xpose.msra.mxu1 %v2161_v56  ;;  %v6632_v56 = vld [vmem:[#allocation8 + $0x3] ss:$0 sm:$0xff] }
 0xa5b   : > { %7304 = vmatprep.subr.bf16.mxu1 %v9004_v0 }
 0xb1a   : > { %v1908_v57 = vpop.f32.mrb[20].mxu0 }
 0xb1b   : > { %v10009_v58 = vadd.f32 %v1954_v45, %v1908_v57  ;;  %v7260_v59 = vpop.f32.mrb[21].mxu0 }
 0xb1c   : > { %v1911_v60 = vpop.f32.mrb[22].mxu0 }
 0xb1d   : > { %v7261_v61 = vpop.f32.mrb[23].mxu0 }
 0xb22   : > { %v2019_v63 = vpop.f32.mrb[24].mxu0 }
 0xb23   : > { %v2020_v1 = vadd.f32 %v6617_v62, %v2019_v63  ;;  %v7274_v2 = vpop.f32.mrb[25].mxu0  ;;  %v7863_v63 = vld [vmem:[#allocation13 + $0x38] sm:$0xff]  }
 0xb24   : > { %v2022_v3 = vpop.f32.mrb[26].mxu0 }
 0xb25   : > { %v2155_v4 = vpack.c.bf16 %v2020_v1, %v2020_v1  ;;  %v7275_v5 = vpop.f32.mrb[27].mxu0 }
 0xb27   : > { %7295 = vmatmul.mubr.msk.bf16.vlgmr.msra.gmra.mrb[28].mxu1 %vm1454_vm2, %v2155_v4 }
 0xb28   : > { %7306 = vmatprep.mubr.msk.bf16.mxu1 %vm9005_vm0, %v9004_v0  ;;  %7305 = vmatpush3.bf16.msra.mxu1 %v2269_v28 }
 0xb29   : > { %7318 = vmatprep.subr.bf16.mxu1 %v9004_v0 }
 0xb2a   : > { %v2149_v19 = vpop.f32.mrb[28].mxu0 }
 0xb2b   : > { %v7290_v20 = vpop.f32.mrb[29].mxu0  ;;  %v2150_v24 = vadd.f32 %v6625_v22, %v2149_v19  ;;  %v2616_v19 = vld [vmem:[#allocation16 + $0xc] sm:$0xf] }
 0xb2c   : > { %v2152_v21 = vpop.f32.mrb[30].mxu0  ;;  %v2621_v20 = vsel %vm1517_vm3, %v2616_v19, 0 }
 0xb2d   : > { %v7291_v23 = vpop.f32.mrb[31].mxu0  ;;  %v2215_v25 = vpack.c.bf16 %v2150_v24, %v2150_v24 }
 0xb2f   : > { %v2220_v26 = vsel %vm1517_vm3, %v2215_v25, 0 }
 0xb30   : > { %7299 = vmatpush3.bf16.msra.mxu0 %v2220_v26 }
 0xb31   : > { %7310 = vmatprep.subr.bf16.mxu0 %v9004_v0 }
 0xbfa   : > { %v2197_v9 = vpop.f32.mrb[28].mxu1 }
 0xbfb   : > { %v7296_v10 = vpop.f32.mrb[29].mxu1  ;;  %v2203_v11 = vsel %vm1454_vm2, %v2197_v9, -inf }
 0xbfc   : > { %2204 = vmax.xlane.f32.xlu0 %v2203_v11  ;;  %v2200_v12 = vpop.f32.mrb[30].mxu1 }
 0xbfd   : > { %v7297_v13 = vpop.f32.mrb[31].mxu1 }
 0xc89   : > { %v2205_v14 = vpop.xlane.xlu0 %2204 }
 0xc8a   : > { %v2206_v15 = vsub.f32 %v2197_v9, %v2205_v14  ;;  %v6640_v14 = vld [vmem:[#allocation14 + $0x3] ss:$0 sm:$0xff] }
 0xc8c   : > { %v2207_v16 = vmul.f32 1.442695, %v2206_v15 }
 0xc8e   : > { %8024 = vpow2.f32 %v2207_v16 }
 0xc98   : > { %v8025_v17 = vpop.eup %8024 }
 0xc99   : > { %v2209_v18 = vsel %vm1454_vm2, %v8025_v17, 0.0 }
 0xc9a   : > { %2210 = vadd.xlane.f32.xlu1 %v2209_v18 }
 0xd27   : > { %v2211_v29 = vpop.xlane.xlu1 %2210 }
 0xd28   : > { %8026 = vrcp.f32 %v2211_v29 }
 0xd32   : > { %v8027_v30 = vpop.eup %8026 }
 0xd33   : > { %v2213_v31 = vmul.f32 %v8027_v30, %v8025_v17 }
 0xd35   : > { %v2214_v32 = vpack.c.bf16 %v2213_v31, %v2213_v31  ;;  %v6647_v31 = vld [vmem:[#allocation17] ss:$0 sm:$0xff] }
 0xd37   : > { %7301 = vmatmul.mubr.msk.bf16.vlgmr.msra.gmra.mrb[32].mxu0 %vm1454_vm2, %v2214_v32 }
 0xd38   : > { %7314 = vmatprep.mubr.msk.bf16.mxu0 %vm9005_vm0, %v9004_v0  ;;  %7311 = vmatpush3.bf16.msra.mxu0 %v7860_v33 }
 0xd39   : > { %7312 = vmatprep.subr.bf16.mxu0 %v9004_v0 }
 0xd3c   : > { %7313 = vmatpush3.bf16.msra.mxu0 %v7861_v34 }
 0xd3d   : > { %7326 = vmatprep.subr.bf16.mxu0 %v9004_v0 }
 0xd3f   : > { %7315 = vmatmul.mubr.msk.bf16.vlgmr.msra.gmra.mrb[36].mxu0 %vm1282_vm1, %v9920_v6 }
 0xd40   : > { %7330 = vmatprep.mubr.msk.bf16.mxu0 %vm9005_vm0, %v9004_v0 }
 0xe0a   : > { %v2256_v35 = vpop.f32.mrb[32].mxu0 }
 0xe0b   : > { %v2262_v37 = vpack.c.bf16 %v2256_v35, %v2256_v35  ;;  %v7302_v38 = vpop.f32.mrb[33].mxu0 }
 0xe0c   : > { %v2259_v39 = vpop.f32.mrb[34].mxu0 }
 0xe0d   : > { %v7303_v40 = vpop.f32.mrb[35].mxu0  ;;  %7307 = vmatmul.mubr.msk.bf16.vlgmr.msra.gmra.mrb[32].mxu1 %vm1454_vm2, %v2262_v37  ;;  %v8054_v37 = vld [vmem:[%s1064_s14] sm:$0xff]  ;;  %s8849_s14 = scalar_lea.vmem %s8848_s3, 256 }
 0xe0e   : > { %7319 = vmatpush3.bf16.msra.mxu1 %v7858_v36  ;;  %7322 = vmatprep.mubr.msk.bf16.mxu1 %vm9005_vm0, %v9004_v0  ;;  %p8851_p11 = scmp.lt.s32.totalorder %s8849_s14, %s8843_s16 }
 0xe0f   : > { %7320 = vmatprep.subr.bf16.mxu1 %v9004_v0 }
 0xe10   : > { %p8852_p12 = por %p8851_p11, %p8850_p1 }
 0xe12   : > { %7321 = vmatpush3.bf16.msra.mxu1 %v7859_v41  ;;  %v2371_v42 = vpop.f32.mrb[36].mxu0  ;;  %p8853_p13 = pnand %p8852_p12, %p8846_p10 }
 0xe13   : > { %7334 = vmatprep.subr.bf16.mxu1 %v9004_v0  ;;  %v7316_v43 = vpop.f32.mrb[37].mxu0  ;;  %v2372_v61 = vadd.f32 %v6632_v56, %v2371_v42 }
 0xe14   : > { %v2374_v44 = vpop.f32.mrb[38].mxu0 }
 0xe15   : > { %7323 = vmatmul.mubr.msk.bf16.vlgmr.msra.gmra.mrb[36].mxu1 %vm1282_vm1, %v9920_v6  ;;  %v7317_v45 = vpop.f32.mrb[39].mxu0  ;;  %v2507_v62 = vpack.c.bf16 %v2372_v61, %v2372_v61 }
 0xe16   : > { %7336 = vmatprep.mubr.msk.bf16.mxu1 %vm9005_vm0, %v9004_v0  ;;  %v7864_v45 = vld [vmem:[#allocation25] sm:$0xff]  }
 0xee0   : > { %v2305_v46 = vpop.f32.mrb[32].mxu1 }
 0xee1   : > { %v10045_v47 = vadd.f32 %v2305_v46, %v10009_v58  ;;  %v7308_v48 = vpop.f32.mrb[33].mxu1  ;;  %v7862_v58 = vld [vmem:[#allocation13 + $0x30] sm:$0xff]   ;;  %v7865_v46 = vld [vmem:[#allocation25 + $0x8] sm:$0xff]  }
 0xee2   : > { %v2308_v49 = vpop.f32.mrb[34].mxu1  ;;  %7327 = vmatpush3.bf16.msra.mxu0 %v7862_v58 }
 0xee3   : > { %v7309_v50 = vpop.f32.mrb[35].mxu1  ;;  %7328 = vmatprep.subr.bf16.mxu0 %v9004_v0  ;;  %v7866_v49 = vld [vmem:[#allocation22] sm:$0xff]  }
 0xee4   : > { %v7867_v50 = vld [vmem:[#allocation22 + $0x8] sm:$0xff]  }
 0xee6   : > { %7329 = vmatpush3.bf16.msra.mxu0 %v7863_v63 }
 0xee7   : > { %7340 = vmatprep.subr.bf16.mxu0 %v9004_v0 }
 0xee8   : > { %v2436_v52 = vpop.f32.mrb[36].mxu1 }
 0xee9   : > { %v2437_v53 = vadd.f32 %v6636_v51, %v2436_v52  ;;  %v7324_v54 = vpop.f32.mrb[37].mxu1  ;;  %7331 = vmatmul.mubr.msk.bf16.vlgmr.msra.gmra.mrb[40].mxu0 %vm1282_vm1, %v9920_v6 }
 0xeea   : > { %v2439_v55 = vpop.f32.mrb[38].mxu1  ;;  %7342 = vmatprep.mubr.msk.bf16.mxu0 %vm9005_vm0, %v9004_v0 }
 0xeeb   : > { %v2508_v57 = vpack.c.bf16 %v2437_v53, %v2437_v53  ;;  %v7325_v59 = vpop.f32.mrb[39].mxu1  ;;  %v6648_v55 = vld [vmem:[#allocation19] ss:$0 sm:$0xff] }
 0xeed   : > { %v2513_v60 = vsel %vm1454_vm2, %v2508_v57, 0  ;;  %v6649_v57 = vld [vmem:[#allocation20] ss:$0 sm:$0xff] }
 0xeee   : > { %7335 = vmatpush3.bf16.xpose.msra.mxu1 %v2513_v60 }
 0xeef   : > { %7346 = vmatprep.subr.bf16.mxu1 %v9004_v0 }
 0xef5   : > { %7337 = vmatmul.mubr.msk.bf16.vlgmr.msra.gmra.mrb[40].mxu1 %vm1454_vm2, %v2507_v62  ;;  %v6654_v62 = vld [vmem:[#allocation26] ss:$0 sm:$0xff] }
 0xef6   : > { %7348 = vmatprep.mubr.msk.bf16.mxu1 %vm9005_vm0, %v9004_v0  ;;  %7347 = vmatpush3.bf16.msra.mxu1 %v2621_v20 }
 0xef7   : > { %7360 = vmatprep.subr.bf16.mxu1 %v9004_v0 }
 0xfbc   : > { %v2501_v12 = vpop.f32.mrb[40].mxu0 }
 0xfbd   : > { %v7332_v6 = vpop.f32.mrb[41].mxu0  ;;  %v2502_v16 = vadd.f32 %v6640_v14, %v2501_v12  ;;  %v7868_v12 = vld [vmem:[#allocation22 + $0x10] sm:$0xff]   ;;  %v7869_v14 = vld [vmem:[#allocation22 + $0x18] sm:$0xff]  }
 0xfbe   : > { %v2504_v13 = vpop.f32.mrb[42].mxu0 }
 0xfbf   : > { %v7333_v15 = vpop.f32.mrb[43].mxu0  ;;  %v2567_v17 = vpack.c.bf16 %v2502_v16, %v2502_v16  ;;  %v7871_v16 = vld [vmem:[#allocation28 + $0x8] sm:$0xff]  }
 0xfc0   : > { %v7870_v15 = vld [vmem:[#allocation28] sm:$0xff]  }
 0xfc1   : > { %v2572_v18 = vsel %vm1517_vm3, %v2567_v17, 0 }
 0xfc2   : > { %7341 = vmatpush3.bf16.msra.mxu0 %v2572_v18 }
 0xfc3   : > { %7352 = vmatprep.subr.bf16.mxu0 %v9004_v0 }
 0xfc8   : > { %v2549_v1 = vpop.f32.mrb[40].mxu1 }
 0xfc9   : > { %v7338_v2 = vpop.f32.mrb[41].mxu1  ;;  %v2555_v3 = vsel %vm1454_vm2, %v2549_v1, -inf }
 0xfca   : > { %2556 = vmax.xlane.f32.xlu0 %v2555_v3  ;;  %v2552_v4 = vpop.f32.mrb[42].mxu1 }
 0xfcb   : > { %v7339_v5 = vpop.f32.mrb[43].mxu1 }
0x1057   : > { %v2557_v7 = vpop.xlane.xlu0 %2556 }
0x1058   : > { %v2558_v8 = vsub.f32 %v2549_v1, %v2557_v7  ;;  %v6650_v7 = vld [vmem:[#allocation23] ss:$0 sm:$0xff] }
0x105a   : > { %v2559_v9 = vmul.f32 1.442695, %v2558_v8 }
0x105c   : > { %8028 = vpow2.f32 %v2559_v9 }
0x1066   : > { %v8029_v10 = vpop.eup %8028 }
0x1067   : > { %v2561_v11 = vsel %vm1454_vm2, %v8029_v10, 0.0 }
0x1068   : > { %2562 = vadd.xlane.f32.xlu1 %v2561_v11 }
0x10f5   : > { %v2563_v21 = vpop.xlane.xlu1 %2562 }
0x10f6   : > { %8030 = vrcp.f32 %v2563_v21 }
0x1100   : > { %v8031_v22 = vpop.eup %8030 }
0x1101   : > { %v2565_v23 = vmul.f32 %v8031_v22, %v8029_v10 }
0x1103   : > { %v2566_v24 = vpack.c.bf16 %v2565_v23, %v2565_v23 }
0x1105   : > { %7343 = vmatmul.mubr.msk.bf16.vlgmr.msra.gmra.mrb[44].mxu0 %vm1454_vm2, %v2566_v24 }
0x1106   : > { %7356 = vmatprep.mubr.msk.bf16.mxu0 %vm9005_vm0, %v9004_v0  ;;  %7353 = vmatpush3.bf16.msra.mxu0 %v7866_v49 }
0x1107   : > { %7354 = vmatprep.subr.bf16.mxu0 %v9004_v0 }
0x110a   : > { %7355 = vmatpush3.bf16.msra.mxu0 %v7867_v50  ;;  %v6668_v50 = vld [vmem:[#allocation26 + $0x1] ss:$0 sm:$0xff] }
0x110b   : > { %7368 = vmatprep.subr.bf16.mxu0 %v9004_v0 }
0x11d8   : > { %v2608_v25 = vpop.f32.mrb[44].mxu0 }
0x11d9   : > { %v2614_v26 = vpack.c.bf16 %v2608_v25, %v2608_v25  ;;  %v7344_v27 = vpop.f32.mrb[45].mxu0 }
0x11da   : > { %v2611_v28 = vpop.f32.mrb[46].mxu0 }
0x11db   : > { %v7345_v29 = vpop.f32.mrb[47].mxu0  ;;  %7349 = vmatmul.mubr.msk.bf16.vlgmr.msra.gmra.mrb[44].mxu1 %vm1454_vm2, %v2614_v26 }
0x11dc   : > { %7364 = vmatprep.mubr.msk.bf16.mxu1 %vm9005_vm0, %v9004_v0  ;;  %7361 = vmatpush3.bf16.msra.mxu1 %v7864_v45 }
0x11dd   : > { %7362 = vmatprep.subr.bf16.mxu1 %v9004_v0 }
0x11e0   : > { %7363 = vmatpush3.bf16.msra.mxu1 %v7865_v46 }
0x11e1   : > { %7376 = vmatprep.subr.bf16.mxu1 %v9004_v0 }
0x12ae   : > { %v2657_v30 = vpop.f32.mrb[44].mxu1 }
0x12af   : > { %v2663_v32 = vadd.f32 %v2657_v30, %v10045_v47  ;;  %v7350_v33 = vpop.f32.mrb[45].mxu1  ;;  %v1257_v47 = vld [vmem:[%s1073_s0] sm:$0xff] }
0x12b0   : > { %v2660_v34 = vpop.f32.mrb[46].mxu1  ;;  %v10078_v48 = vpack.c.bf16 %v1257_v47, %v1257_v47 }
0x12b1   : > { %v2671_v35 = vadd.f32 %v6647_v31, %v2663_v32  ;;  %v7351_v36 = vpop.f32.mrb[47].mxu1  ;;  %v6658_v34 = vld [vmem:[#allocation29] ss:$0 sm:$0xff] }
0x12b2   : > { %7365 = vmatmul.mubr.msk.bf16.vlgmr.msra.gmra.mrb[48].mxu1 %vm1282_vm1, %v10078_v48 }
0x12b3   : > { %v2672_v38 = vadd.f32 %v8054_v37, %v2671_v35  ;;  %7378 = vmatprep.mubr.msk.bf16.mxu1 %vm9005_vm0, %v9004_v0 }
0x12b5   : > { %v2673_v39 = vsel %vm1282_vm1, %v2672_v38, 0.0 }
0x12b6   : > { %2674 = vadd.xlane.f32.xlu0 %v2673_v39 }
0x1343   : > { %v2675_v40 = vpop.xlane.xlu0 %2674 }
0x1344   : > { %v2677_v41 = vmul.f32 0.03125, %v2675_v40 }
0x1346   : > { %v2678_v42 = vsub.f32 %v2672_v38, %v2677_v41 }
0x1348   : > { %v2679_v43 = vmul.f32 %v2678_v42, %v2678_v42 }
0x134a   : > { %v2680_v44 = vsel %vm1282_vm1, %v2679_v43, 0.0 }
0x134b   : > { %2681 = vadd.xlane.f32.xlu1 %v2680_v44  ;;  %v7873_v44 = vld [vmem:[#allocation25 + $0x18] sm:$0xff]  }
0x1385   : > { %v2831_v58 = vpop.f32.mrb[48].mxu1 }
0x1386   : > { %v2832_v63 = vadd.f32 %v6654_v62, %v2831_v58  ;;  %v7366_v1 = vpop.f32.mrb[49].mxu1 }
0x1387   : > { %v2834_v2 = vpop.f32.mrb[50].mxu1  ;;  %v7875_v1 = vld [vmem:[#allocation28 + $0x18] sm:$0xff]  }
0x1388   : > { %v2901_v3 = vpack.c.bf16 %v2832_v63, %v2832_v63  ;;  %v7367_v4 = vpop.f32.mrb[51].mxu1  ;;  %v7874_v63 = vld [vmem:[#allocation28 + $0x10] sm:$0xff]  }
0x138a   : > { %v2906_v5 = vsel %vm1454_vm2, %v2901_v3, 0 }
0x138b   : > { %7377 = vmatpush3.bf16.xpose.msra.mxu1 %v2906_v5 }
0x138c   : > { %7388 = vmatprep.subr.bf16.mxu1 %v9004_v0 }
0x13d8   : > { %v2682_v51 = vpop.xlane.xlu1 %2681 }
0x13d9   : > { %v2683_v52 = vmul.f32 0.03125, %v2682_v51 }
0x13db   : > { %v2684_v53 = vadd.f32 1e-05, %v2683_v52 }
0x13dd   : > { %8032 = vrsqrt.f32 %v2684_v53 }
0x13e7   : > { %v8033_v54 = vpop.eup %8032 }
0x13e8   : > { %v2686_v56 = vmul.f32 %v8033_v54, %v2678_v42  ;;  %v7872_v42 = vld [vmem:[#allocation25 + $0x10] sm:$0xff]  }
0x13ea   : > { %v2694_v59 = vmul.f32 %v6648_v55, %v2686_v56 }
0x13ec   : > { %v10087_v60 = vadd.f32 %v6649_v57, %v2694_v59  ;;  %v6664_v57 = vld [vmem:[#allocation23 + $0x1] ss:$0 sm:$0xff] }
0x13ee   : > { %v10091_v61 = vpack.c.bf16 %v10087_v60, %v10087_v60 }
0x13f0   : > { %7357 = vmatmul.mubr.msk.bf16.vlgmr.msra.gmra.mrb[48].mxu0 %vm1282_vm1, %v10091_v61 }
0x13f1   : > { %7372 = vmatprep.mubr.msk.bf16.mxu0 %vm9005_vm0, %v9004_v0  ;;  %7369 = vmatpush3.bf16.msra.mxu0 %v7870_v15 }
0x13f2   : > { %7370 = vmatprep.subr.bf16.mxu0 %v9004_v0 }
0x13f5   : > { %7371 = vmatpush3.bf16.msra.mxu0 %v7871_v16 }
0x13f6   : > { %7382 = vmatprep.subr.bf16.mxu0 %v9004_v0 }
0x13f8   : > { %7373 = vmatmul.mubr.msk.bf16.vlgmr.msra.gmra.mrb[52].mxu0 %vm1282_vm1, %v10078_v48 }
0x13f9   : > { %7384 = vmatprep.mubr.msk.bf16.mxu0 %vm9005_vm0, %v9004_v0 }
0x14c3   : > { %v2765_v8 = vpop.f32.mrb[48].mxu0 }
0x14c4   : > { %v2766_v9 = vadd.f32 %v6650_v7, %v2765_v8  ;;  %v7358_v10 = vpop.f32.mrb[49].mxu0  ;;  %v6672_v8 = vld [vmem:[#allocation29 + $0x1] ss:$0 sm:$0xff] }
0x14c5   : > { %v2768_v11 = vpop.f32.mrb[50].mxu0 }
0x14c6   : > { %v2900_v6 = vpack.c.bf16 %v2766_v9, %v2766_v9  ;;  %v7359_v13 = vpop.f32.mrb[51].mxu0 }
0x14c8   : > { %7379 = vmatmul.mubr.msk.bf16.vlgmr.msra.gmra.mrb[52].mxu1 %vm1454_vm2, %v2900_v6 }
0x14c9   : > { %7389 = vmatpush3.bf16.msra.mxu1 %v7868_v12  ;;  %7392 = vmatprep.mubr.msk.bf16.mxu1 %vm9005_vm0, %v9004_v0 }
0x14ca   : > { %7390 = vmatprep.subr.bf16.mxu1 %v9004_v0 }
0x14cb   : > { %v2894_v31 = vpop.f32.mrb[52].mxu0 }
0x14cc   : > { %v7374_v32 = vpop.f32.mrb[53].mxu0  ;;  %v2895_v36 = vadd.f32 %v6658_v34, %v2894_v31 }
0x14cd   : > { %7391 = vmatpush3.bf16.msra.mxu1 %v7869_v14  ;;  %v2897_v33 = vpop.f32.mrb[54].mxu0  ;;  %v7878_v32 = vld [vmem:[#allocation22 + $0x20] sm:$0xff]  }
0x14ce   : > { %7404 = vmatprep.subr.bf16.mxu1 %v9004_v0  ;;  %v7375_v35 = vpop.f32.mrb[55].mxu0  ;;  %v2960_v37 = vpack.c.bf16 %v2895_v36, %v2895_v36 }
0x14d0   : > { %7393 = vmatmul.mubr.msk.bf16.vlgmr.msra.gmra.mrb[56].mxu1 %vm1282_vm1, %v10091_v61  ;;  %v2965_v38 = vsel %vm1517_vm3, %v2960_v37, 0  ;;  %v7879_v37 = vld [vmem:[#allocation22 + $0x28] sm:$0xff]  }
0x14d1   : > { %7408 = vmatprep.mubr.msk.bf16.mxu1 %vm9005_vm0, %v9004_v0  ;;  %7383 = vmatpush3.bf16.msra.mxu0 %v2965_v38 }
0x14d2   : > { %7396 = vmatprep.subr.bf16.mxu0 %v9004_v0  ;;  %7405 = vmatpush3.bf16.msra.mxu1 %v7874_v63 }
0x14d3   : > { %7406 = vmatprep.subr.bf16.mxu1 %v9004_v0 }
0x14d6   : > { %7407 = vmatpush3.bf16.msra.mxu1 %v7875_v1 }
0x14d7   : > { %7418 = vmatprep.subr.bf16.mxu1 %v9004_v0 }
0x14d9   : > { %7409 = vmatmul.mubr.msk.bf16.vlgmr.msra.gmra.mrb[60].mxu1 %vm1282_vm1, %v10078_v48 }
0x14da   : > { %7420 = vmatprep.mubr.msk.bf16.mxu1 %vm9005_vm0, %v9004_v0 }
0x159b   : > { %v2942_v17 = vpop.f32.mrb[52].mxu1 }
0x159c   : > { %v7380_v18 = vpop.f32.mrb[53].mxu1  ;;  %v2948_v19 = vsel %vm1454_vm2, %v2942_v17, -inf }
0x159d   : > { %2949 = vmax.xlane.f32.xlu0 %v2948_v19  ;;  %v2945_v20 = vpop.f32.mrb[54].mxu1 }
0x159e   : > { %v7381_v21 = vpop.f32.mrb[55].mxu1  ;;  %v3313_v20 = vld [vmem:[#allocation31 + $0x4] sm:$0xf] }
0x159f   : > { %v3318_v21 = vsel %vm1517_vm3, %v3313_v20, 0 }
0x15a3   : > { %v3068_v22 = vpop.f32.mrb[56].mxu1 }
0x15a4   : > { %v7394_v23 = vpop.f32.mrb[57].mxu1  ;;  %v3069_v62 = vadd.f32 %v6664_v57, %v3068_v22 }
0x15a5   : > { %v3071_v24 = vpop.f32.mrb[58].mxu1 }
0x15a6   : > { %v7395_v25 = vpop.f32.mrb[59].mxu1  ;;  %v3204_v58 = vpack.c.bf16 %v3069_v62, %v3069_v62  ;;  %v3008_v24 = vld [vmem:[#allocation31] sm:$0xf] }
0x15ac   : > { %v3198_v9 = vpop.f32.mrb[60].mxu1 }
0x15ad   : > { %v3199_v10 = vadd.f32 %v6672_v8, %v3198_v9  ;;  %v7410_v11 = vpop.f32.mrb[61].mxu1 }
0x15ae   : > { %v3201_v12 = vpop.f32.mrb[62].mxu1 }
0x15af   : > { %v3264_v6 = vpack.c.bf16 %v3199_v10, %v3199_v10  ;;  %v7411_v13 = vpop.f32.mrb[63].mxu1 }
0x15b1   : > { %v3269_v14 = vsel %vm1517_vm3, %v3264_v6, 0 }
0x15b2   : > { %7419 = vmatpush3.bf16.msra.mxu1 %v3269_v14 }
0x15b3   : > { %7430 = vmatprep.subr.bf16.mxu1 %v9004_v0 }
0x162a   : > { %v2950_v26 = vpop.xlane.xlu0 %2949 }
0x162b   : > { %v2951_v27 = vsub.f32 %v2942_v17, %v2950_v26 }
0x162d   : > { %v2952_v28 = vmul.f32 1.442695, %v2951_v27  ;;  %v3364_v27 = vsel %vm1517_vm3, %v3008_v24, 0 }
0x162f   : > { %8034 = vpow2.f32 %v2952_v28  ;;  %v7876_v28 = vld [vmem:[#allocation25 + $0x20] sm:$0xff]  }
0x1639   : > { %v8035_v29 = vpop.eup %8034 }
0x163a   : > { %v2954_v30 = vsel %vm1454_vm2, %v8035_v29, 0.0 }
0x163b   : > { %2955 = vadd.xlane.f32.xlu1 %v2954_v30  ;;  %v7877_v30 = vld [vmem:[#allocation25 + $0x28] sm:$0xff]  }
0x16c8   : > { %v2956_v39 = vpop.xlane.xlu1 %2955 }
0x16c9   : > { %8036 = vrcp.f32 %v2956_v39 }
0x16d3   : > { %v8037_v40 = vpop.eup %8036 }
0x16d4   : > { %v2958_v41 = vmul.f32 %v8037_v40, %v8035_v29 }
0x16d6   : > { %v2959_v43 = vpack.c.bf16 %v2958_v41, %v2958_v41 }
0x16d8   : > { %7385 = vmatmul.mubr.msk.bf16.vlgmr.msra.gmra.mrb[56].mxu0 %vm1454_vm2, %v2959_v43 }
0x16d9   : > { %7397 = vmatpush3.bf16.msra.mxu0 %v7872_v42  ;;  %7400 = vmatprep.mubr.msk.bf16.mxu0 %vm9005_vm0, %v9004_v0  ;;  %v6684_v42 = vld [vmem:[#allocation26 + $0x2] ss:$0 sm:$0xff] }
0x16da   : > { %7398 = vmatprep.subr.bf16.mxu0 %v9004_v0 }
0x16dd   : > { %7399 = vmatpush3.bf16.msra.mxu0 %v7873_v44 }
0x16de   : > { %7412 = vmatprep.subr.bf16.mxu0 %v9004_v0 }
0x16e0   : > { %7401 = vmatmul.mubr.msk.bf16.vlgmr.msra.gmra.mrb[60].mxu0 %vm1282_vm1, %v10078_v48 }
0x16e1   : > { %7414 = vmatprep.mubr.msk.bf16.mxu0 %vm9005_vm0, %v9004_v0 }
0x17ab   : > { %v10127_v45 = vpop.f32.mrb[56].mxu0 }
0x17ac   : > { %v7386_v46 = vpop.f32.mrb[57].mxu0  ;;  %v3007_v29 = vpack.c.bf16 %v10127_v45, %v10127_v45 }
0x17ad   : > { %v3004_v47 = vpop.f32.mrb[58].mxu0 }
0x17ae   : > { %v7387_v49 = vpop.f32.mrb[59].mxu0 }
0x17b3   : > { %v3133_v51 = vpop.f32.mrb[60].mxu0 }
0x17b4   : > { %v3134_v52 = vadd.f32 %v6668_v50, %v3133_v51  ;;  %v7402_v53 = vpop.f32.mrb[61].mxu0 }
0x17b5   : > { %v3136_v54 = vpop.f32.mrb[62].mxu0 }
0x17b6   : > { %v3205_v55 = vpack.c.bf16 %v3134_v52, %v3134_v52  ;;  %v7403_v56 = vpop.f32.mrb[63].mxu0 }
0x17b7   : > { %v6680_v56 = vld [vmem:[#allocation23 + $0x2] ss:$0 sm:$0xff] }
0x17b8   : > { %v3210_v59 = vsel %vm1454_vm2, %v3205_v55, 0 }
0x17b9   : > { %7413 = vmatpush3.bf16.xpose.msra.mxu0 %v3210_v59 }
0x17ba   : > { %7424 = vmatprep.subr.bf16.mxu0 %v9004_v0 }
0x17c0   : > { %7415 = vmatmul.mubr.msk.bf16.vlgmr.msra.gmra.mrb[64].mxu0 %vm1454_vm2, %v3204_v58 }
0x17c1   : > { %7426 = vmatprep.mubr.msk.bf16.mxu0 %vm9005_vm0, %v9004_v0  ;;  %7425 = vmatpush3.bf16.msra.mxu0 %v3318_v21 }
0x17c2   : > { %7436 = vmatprep.subr.bf16.mxu0 %v9004_v0 }
0x1893   : > { %v3246_v2 = vpop.f32.mrb[64].mxu0 }
0x1894   : > { %v7416_v3 = vpop.f32.mrb[65].mxu0  ;;  %v3252_v4 = vsel %vm1454_vm2, %v3246_v2, -inf }
0x1895   : > { %3253 = vmax.xlane.f32.xlu0 %v3252_v4  ;;  %v3249_v5 = vpop.f32.mrb[66].mxu0  ;;  %v7881_v3 = vld [vmem:[#allocation28 + $0x28] sm:$0xff]  }
0x1896   : > { %v7417_v7 = vpop.f32.mrb[67].mxu0 }
0x1922   : > { %v3254_v15 = vpop.xlane.xlu0 %3253 }
0x1923   : > { %v3255_v16 = vsub.f32 %v3246_v2, %v3254_v15  ;;  %v7880_v2 = vld [vmem:[#allocation28 + $0x20] sm:$0xff]  }
0x1925   : > { %v3256_v17 = vmul.f32 1.442695, %v3255_v16 }
0x1927   : > { %8038 = vpow2.f32 %v3256_v17  ;;  %v6688_v17 = vld [vmem:[#allocation29 + $0x2] ss:$0 sm:$0xff] }
0x1931   : > { %v8039_v18 = vpop.eup %8038 }
0x1932   : > { %v3258_v19 = vsel %vm1454_vm2, %v8039_v18, 0.0 }
0x1933   : > { %3259 = vadd.xlane.f32.xlu1 %v3258_v19 }
0x19c0   : > { %v3260_v22 = vpop.xlane.xlu1 %3259 }
0x19c1   : > { %8040 = vrcp.f32 %v3260_v22  ;;  %v3710_v22 = vld [vmem:[#allocation31 + $0x8] sm:$0xf] }
0x19cb   : > { %v8041_v23 = vpop.eup %8040 }
0x19cc   : > { %v3262_v25 = vmul.f32 %v8041_v23, %v8039_v18  ;;  %v3715_v23 = vsel %vm1517_vm3, %v3710_v22, 0 }
0x19ce   : > { %v3263_v26 = vpack.c.bf16 %v3262_v25, %v3262_v25 }
0x19d0   : > { %7421 = vmatmul.mubr.msk.bf16.vlgmr.msra.gmra.mrb[64].mxu1 %vm1454_vm2, %v3263_v26 }
0x19d1   : > { %7431 = vmatpush3.bf16.msra.mxu1 %v3364_v27  ;;  %7432 = vmatprep.mubr.msk.bf16.mxu1 %vm9005_vm0, %v9004_v0  ;;  %v7882_v27 = vld [vmem:[#allocation22 + $0x30] sm:$0xff]  }
0x19d2   : > { %7444 = vmatprep.subr.bf16.mxu1 %v9004_v0 }
0x19d8   : > { %7433 = vmatmul.mubr.msk.bf16.vlgmr.msra.gmra.mrb[68].mxu1 %vm1454_vm2, %v3007_v29  ;;  %v7883_v29 = vld [vmem:[#allocation22 + $0x38] sm:$0xff]  }
0x19d9   : > { %7445 = vmatpush3.bf16.msra.mxu1 %v7876_v28  ;;  %7448 = vmatprep.mubr.msk.bf16.mxu1 %vm9005_vm0, %v9004_v0 }
0x19da   : > { %7446 = vmatprep.subr.bf16.mxu1 %v9004_v0 }
0x19dd   : > { %7447 = vmatpush3.bf16.msra.mxu1 %v7877_v30 }
0x19de   : > { %7460 = vmatprep.subr.bf16.mxu1 %v9004_v0 }
0x19e0   : > { %7449 = vmatmul.mubr.msk.bf16.vlgmr.msra.gmra.mrb[72].mxu1 %vm1282_vm1, %v10078_v48 }
0x19e1   : > { %7462 = vmatprep.mubr.msk.bf16.mxu1 %vm9005_vm0, %v9004_v0 }
0x1aa3   : > { %v3305_v31 = vpop.f32.mrb[64].mxu1 }
0x1aa4   : > { %v3311_v33 = vpack.c.bf16 %v3305_v31, %v3305_v31  ;;  %v7422_v34 = vpop.f32.mrb[65].mxu1  ;;  %v7884_v31 = vld [vmem:[#allocation25 + $0x30] sm:$0xff]  }
0x1aa5   : > { %v3308_v35 = vpop.f32.mrb[66].mxu1 }
0x1aa6   : > { %v7423_v36 = vpop.f32.mrb[67].mxu1  ;;  %7427 = vmatmul.mubr.msk.bf16.vlgmr.msra.gmra.mrb[68].mxu0 %vm1454_vm2, %v3311_v33 }
0x1aa7   : > { %7437 = vmatpush3.bf16.msra.mxu0 %v7878_v32  ;;  %7440 = vmatprep.mubr.msk.bf16.mxu0 %vm9005_vm0, %v9004_v0  ;;  %v7885_v36 = vld [vmem:[#allocation25 + $0x38] sm:$0xff]  }
0x1aa8   : > { %7438 = vmatprep.subr.bf16.mxu0 %v9004_v0 }
0x1aab   : > { %v3400_v38 = vpop.f32.mrb[68].mxu1  ;;  %7439 = vmatpush3.bf16.msra.mxu0 %v7879_v37 }
0x1aac   : > { %v7434_v39 = vpop.f32.mrb[69].mxu1  ;;  %7452 = vmatprep.subr.bf16.mxu0 %v9004_v0 }
0x1aad   : > { %v3403_v40 = vpop.f32.mrb[70].mxu1 }
0x1aae   : > { %v7435_v41 = vpop.f32.mrb[71].mxu1  ;;  %7441 = vmatmul.mubr.msk.bf16.vlgmr.msra.gmra.mrb[72].mxu0 %vm1282_vm1, %v10091_v61 }
0x1aaf   : > { %7456 = vmatprep.mubr.msk.bf16.mxu0 %vm9005_vm0, %v9004_v0  ;;  %7453 = vmatpush3.bf16.msra.mxu0 %v7880_v2 }
0x1ab0   : > { %7454 = vmatprep.subr.bf16.mxu0 %v9004_v0 }
0x1ab3   : > { %v3530_v43 = vpop.f32.mrb[72].mxu1  ;;  %7455 = vmatpush3.bf16.msra.mxu0 %v7881_v3 }
0x1ab4   : > { %v3531_v44 = vadd.f32 %v6684_v42, %v3530_v43  ;;  %v7450_v45 = vpop.f32.mrb[73].mxu1  ;;  %7466 = vmatprep.subr.bf16.mxu0 %v9004_v0 }
0x1ab5   : > { %v3533_v46 = vpop.f32.mrb[74].mxu1  ;;  %v6699_v45 = vld [vmem:[#allocation26 + $0x3] ss:$0 sm:$0xff] }
0x1ab6   : > { %v3602_v47 = vpack.c.bf16 %v3531_v44, %v3531_v44  ;;  %v7451_v49 = vpop.f32.mrb[75].mxu1  ;;  %7457 = vmatmul.mubr.msk.bf16.vlgmr.msra.gmra.mrb[76].mxu0 %vm1282_vm1, %v10078_v48 }
0x1ab7   : > { %7468 = vmatprep.mubr.msk.bf16.mxu0 %vm9005_vm0, %v9004_v0 }
0x1ab8   : > { %v3607_v50 = vsel %vm1454_vm2, %v3602_v47, 0 }
0x1ab9   : > { %7461 = vmatpush3.bf16.xpose.msra.mxu1 %v3607_v50 }
0x1aba   : > { %7472 = vmatprep.subr.bf16.mxu1 %v9004_v0 }
0x1b79   : > { %v3354_v51 = vpop.f32.mrb[68].mxu0 }
0x1b7a   : > { %v10173_v52 = vadd.f32 %v3400_v38, %v3354_v51  ;;  %v7428_v53 = vpop.f32.mrb[69].mxu0 }
0x1b7b   : > { %v3357_v54 = vpop.f32.mrb[70].mxu0 }
0x1b7c   : > { %v7429_v55 = vpop.f32.mrb[71].mxu0  ;;  %v6695_v54 = vld [vmem:[#allocation23 + $0x3] ss:$0 sm:$0xff] }
0x1b81   : > { %v3465_v57 = vpop.f32.mrb[72].mxu0 }
0x1b82   : > { %v3466_v59 = vadd.f32 %v6680_v56, %v3465_v57  ;;  %v7442_v62 = vpop.f32.mrb[73].mxu0 }
0x1b83   : > { %v3468_v58 = vpop.f32.mrb[74].mxu0 }
0x1b84   : > { %v3601_v63 = vpack.c.bf16 %v3466_v59, %v3466_v59  ;;  %v7443_v1 = vpop.f32.mrb[75].mxu0  ;;  %v7887_v59 = vld [vmem:[#allocation28 + $0x38] sm:$0xff]  }
0x1b86   : > { %7463 = vmatmul.mubr.msk.bf16.vlgmr.msra.gmra.mrb[76].mxu1 %vm1454_vm2, %v3601_v63 }
0x1b87   : > { %7474 = vmatprep.mubr.msk.bf16.mxu1 %vm9005_vm0, %v9004_v0  ;;  %7473 = vmatpush3.bf16.msra.mxu1 %v3715_v23 }
0x1b88   : > { %7486 = vmatprep.subr.bf16.mxu1 %v9004_v0 }
0x1b89   : > { %v3595_v14 = vpop.f32.mrb[76].mxu0 }
0x1b8a   : > { %v7458_v15 = vpop.f32.mrb[77].mxu0  ;;  %v3596_v19 = vadd.f32 %v6688_v17, %v3595_v14  ;;  %v4062_v14 = vld [vmem:[#allocation31 + $0xc] sm:$0xf] }
0x1b8b   : > { %v3598_v16 = vpop.f32.mrb[78].mxu0  ;;  %v4067_v15 = vsel %vm1517_vm3, %v4062_v14, 0 }
0x1b8c   : > { %v7459_v18 = vpop.f32.mrb[79].mxu0  ;;  %v3661_v20 = vpack.c.bf16 %v3596_v19, %v3596_v19 }
0x1b8e   : > { %v3666_v21 = vsel %vm1517_vm3, %v3661_v20, 0 }
0x1b8f   : > { %7467 = vmatpush3.bf16.msra.mxu0 %v3666_v21 }
0x1b90   : > { %7478 = vmatprep.subr.bf16.mxu0 %v9004_v0 }
0x1c59   : > { %v3643_v4 = vpop.f32.mrb[76].mxu1 }
0x1c5a   : > { %v7464_v5 = vpop.f32.mrb[77].mxu1  ;;  %v3649_v7 = vsel %vm1454_vm2, %v3643_v4, -inf }
0x1c5b   : > { %3650 = vmax.xlane.f32.xlu0 %v3649_v7  ;;  %v3646_v8 = vpop.f32.mrb[78].mxu1 }
0x1c5c   : > { %v7465_v9 = vpop.f32.mrb[79].mxu1 }
0x1ce8   : > { %v3651_v10 = vpop.xlane.xlu0 %3650 }
0x1ce9   : > { %v3652_v11 = vsub.f32 %v3643_v4, %v3651_v10 }
0x1ceb   : > { %v3653_v12 = vmul.f32 1.442695, %v3652_v11  ;;  %v6703_v11 = vld [vmem:[#allocation29 + $0x3] ss:$0 sm:$0xff] }
0x1ced   : > { %8042 = vpow2.f32 %v3653_v12 }
0x1cf7   : > { %v8043_v6 = vpop.eup %8042 }
0x1cf8   : > { %v3655_v13 = vsel %vm1454_vm2, %v8043_v6, 0.0 }
0x1cf9   : > { %3656 = vadd.xlane.f32.xlu1 %v3655_v13 }
0x1d86   : > { %v3657_v24 = vpop.xlane.xlu1 %3656 }
0x1d87   : > { %8044 = vrcp.f32 %v3657_v24 }
0x1d91   : > { %v8045_v25 = vpop.eup %8044 }
0x1d92   : > { %v3659_v26 = vmul.f32 %v8045_v25, %v8043_v6 }
0x1d94   : > { %v3660_v28 = vpack.c.bf16 %v3659_v26, %v3659_v26  ;;  %v6710_v26 = vld [vmem:[#allocation32] ss:$0 sm:$0xff] }
0x1d96   : > { %7469 = vmatmul.mubr.msk.bf16.vlgmr.msra.gmra.mrb[80].mxu0 %vm1454_vm2, %v3660_v28 }
0x1d97   : > { %7479 = vmatpush3.bf16.msra.mxu0 %v7882_v27  ;;  %7482 = vmatprep.mubr.msk.bf16.mxu0 %vm9005_vm0, %v9004_v0 }
0x1d98   : > { %7480 = vmatprep.subr.bf16.mxu0 %v9004_v0 }
0x1d9b   : > { %7481 = vmatpush3.bf16.msra.mxu0 %v7883_v29 }
0x1d9c   : > { %7494 = vmatprep.subr.bf16.mxu0 %v9004_v0 }
0x1d9e   : > { %7483 = vmatmul.mubr.msk.bf16.vlgmr.msra.gmra.mrb[84].mxu0 %vm1282_vm1, %v10091_v61 }
0x1d9f   : > { %7498 = vmatprep.mubr.msk.bf16.mxu0 %vm9005_vm0, %v9004_v0 }
0x1e69   : > { %v3702_v30 = vpop.f32.mrb[80].mxu0 }
0x1e6a   : > { %v3708_v32 = vpack.c.bf16 %v3702_v30, %v3702_v30  ;;  %v7470_v33 = vpop.f32.mrb[81].mxu0 }
0x1e6b   : > { %v3705_v34 = vpop.f32.mrb[82].mxu0 }
0x1e6c   : > { %v7471_v35 = vpop.f32.mrb[83].mxu0  ;;  %7475 = vmatmul.mubr.msk.bf16.vlgmr.msra.gmra.mrb[80].mxu1 %vm1454_vm2, %v3708_v32 }
0x1e6d   : > { %7487 = vmatpush3.bf16.msra.mxu1 %v7884_v31  ;;  %7490 = vmatprep.mubr.msk.bf16.mxu1 %vm9005_vm0, %v9004_v0 }
0x1e6e   : > { %7488 = vmatprep.subr.bf16.mxu1 %v9004_v0 }
0x1e71   : > { %v3817_v37 = vpop.f32.mrb[84].mxu0  ;;  %7489 = vmatpush3.bf16.msra.mxu1 %v7885_v36 }
0x1e72   : > { %v7484_v61 = vpop.f32.mrb[85].mxu0  ;;  %7502 = vmatprep.subr.bf16.mxu1 %v9004_v0  ;;  %v3818_v56 = vadd.f32 %v6695_v54, %v3817_v37 }
0x1e73   : > { %v3820_v38 = vpop.f32.mrb[86].mxu0 }
0x1e74   : > { %v7485_v39 = vpop.f32.mrb[87].mxu0  ;;  %7491 = vmatmul.mubr.msk.bf16.vlgmr.msra.gmra.mrb[84].mxu1 %vm1282_vm1, %v10078_v48  ;;  %v3953_v57 = vpack.c.bf16 %v3818_v56, %v3818_v56  ;;  %v4149_v38 = vld [vmem:[#allocation37] sm:$0xff]  ;;  %v4159_v56 = vld [vmem:[#allocation37 + $0x50] sm:$0xff] }
0x1e75   : > { %7504 = vmatprep.mubr.msk.bf16.mxu1 %vm9005_vm0, %v9004_v0  ;;  %v4157_v39 = vld [vmem:[#allocation37 + $0x40] sm:$0xff] }
0x1f3f   : > { %v3751_v40 = vpop.f32.mrb[80].mxu1 }
0x1f40   : > { %v10209_v41 = vadd.f32 %v3751_v40, %v10173_v52  ;;  %v7476_v42 = vpop.f32.mrb[81].mxu1  ;;  %v7886_v52 = vld [vmem:[#allocation28 + $0x30] sm:$0xff]   ;;  %v4150_v40 = vld [vmem:[#allocation37 + $0x8] sm:$0xff] }
0x1f41   : > { %v3754_v43 = vpop.f32.mrb[82].mxu1  ;;  %7495 = vmatpush3.bf16.msra.mxu0 %v7886_v52  ;;  %v4158_v42 = vld [vmem:[#allocation37 + $0x48] sm:$0xff] }
0x1f42   : > { %v7477_v44 = vpop.f32.mrb[83].mxu1  ;;  %7496 = vmatprep.subr.bf16.mxu0 %v9004_v0  ;;  %v6713_v43 = vcombine.low %v4149_v38, %v4157_v39 }
0x1f43   : > { %v6715_v44 = vcombine.low %v4150_v40, %v4158_v42 }
0x1f45   : > { %7497 = vmatpush3.bf16.msra.mxu0 %v7887_v59  ;;  %v4160_v59 = vld [vmem:[#allocation37 + $0x58] sm:$0xff] }
0x1f46   : > { %7508 = vmatprep.subr.bf16.mxu0 %v9004_v0 }
0x1f47   : > { %v3882_v46 = vpop.f32.mrb[84].mxu1 }
0x1f48   : > { %v3883_v47 = vadd.f32 %v6699_v45, %v3882_v46  ;;  %v7492_v49 = vpop.f32.mrb[85].mxu1  ;;  %7499 = vmatmul.mubr.msk.bf16.vlgmr.msra.gmra.mrb[88].mxu0 %vm1282_vm1, %v10078_v48  ;;  %v6716_v45 = vcombine.high %v4150_v40, %v4158_v42  ;;  %v4173_v46 = vld [vmem:[#allocation37 + $0xc0] sm:$0xff]  ;;  %v4179_v40 = vld [vmem:[#allocation37 + $0xf0] sm:$0xff]  ;;  %v4180_v42 = vld [vmem:[#allocation37 + $0xf8] sm:$0xff] }
0x1f49   : > { %v3885_v50 = vpop.f32.mrb[86].mxu1  ;;  %7510 = vmatprep.mubr.msk.bf16.mxu0 %vm9005_vm0, %v9004_v0 }
0x1f4a   : > { %v3954_v51 = vpack.c.bf16 %v3883_v47, %v3883_v47  ;;  %v7493_v53 = vpop.f32.mrb[87].mxu1  ;;  %v4166_v47 = vld [vmem:[#allocation37 + $0x88] sm:$0xff] }
0x1f4b   : > { %v4174_v50 = vld [vmem:[#allocation37 + $0xc8] sm:$0xff] }
0x1f4c   : > { %v3959_v55 = vsel %vm1454_vm2, %v3954_v51, 0  ;;  %v6731_v53 = vcombine.low %v4166_v47, %v4174_v50  ;;  %v6732_v54 = vcombine.high %v4166_v47, %v4174_v50  ;;  %v7889_v50 = vld [vmem:[#allocation40 + $0xc0] sm:$0xff]  }
0x1f4d   : > { %7503 = vmatpush3.bf16.xpose.msra.mxu1 %v3959_v55  ;;  %v4151_v55 = vld [vmem:[#allocation37 + $0x10] sm:$0xff] }
0x1f4e   : > { %7514 = vmatprep.subr.bf16.mxu1 %v9004_v0  ;;  %v6718_v52 = vcombine.high %v4151_v55, %v4159_v56 }
0x1f54   : > { %7505 = vmatmul.mubr.msk.bf16.vlgmr.msra.gmra.mrb[88].mxu1 %vm1454_vm2, %v3953_v57  ;;  %v4152_v57 = vld [vmem:[#allocation37 + $0x18] sm:$0xff] }
0x1f55   : > { %7516 = vmatprep.mubr.msk.bf16.mxu1 %vm9005_vm0, %v9004_v0  ;;  %7515 = vmatpush3.bf16.msra.mxu1 %v4067_v15 }
0x1f56   : > { %4469 = vmatprep.subr.bf16.mxu1 %v6716_v45 }
0x201b   : > { %v3947_v9 = vpop.f32.mrb[88].mxu0 }
0x201c   : > { %v7500_v48 = vpop.f32.mrb[89].mxu0  ;;  %v3948_v12 = vadd.f32 %v6703_v11, %v3947_v9  ;;  %v6712_v9 = vld [vmem:[#allocation35] ss:$0 sm:$0xff]  ;;  %v4175_v11 = vld [vmem:[#allocation37 + $0xd0] sm:$0xff] }
0x201d   : > { %v3950_v10 = vpop.f32.mrb[90].mxu0 }
0x201e   : > { %v7501_v0 = vpop.f32.mrb[91].mxu0  ;;  %v4013_v6 = vpack.c.bf16 %v3948_v12, %v3948_v12  ;;  %v4167_v10 = vld [vmem:[#allocation37 + $0x90] sm:$0xff]  ;;  %v4176_v12 = vld [vmem:[#allocation37 + $0xd8] sm:$0xff] }
0x201f   : > { %v4168_v0 = vld [vmem:[#allocation37 + $0x98] sm:$0xff]  ;;  %v6734_v14 = vcombine.high %v4167_v10, %v4175_v11 }
0x2020   : > { %v4018_v13 = vsel %vm1517_vm3, %v4013_v6, 0  ;;  %v6736_v15 = vcombine.high %v4168_v0, %v4176_v12 }
0x2021   : > { %7509 = vmatpush3.bf16.msra.mxu0 %v4018_v13 }
0x2027   : > { %v3995_v62 = vpop.f32.mrb[88].mxu1 }
0x2028   : > { %v7506_v58 = vpop.f32.mrb[89].mxu1  ;;  %v4001_v63 = vsel %vm1454_vm2, %v3995_v62, -inf }
0x2029   : > { %4002 = vmax.xlane.f32.xlu0 %v4001_v63  ;;  %v3998_v1 = vpop.f32.mrb[90].mxu1  ;;  %v6717_v58 = vcombine.low %v4151_v55, %v4159_v56  ;;  %v6719_v63 = vcombine.low %v4152_v57, %v4160_v59  ;;  %v7893_v55 = vld [vmem:[#allocation40 + $0xc8] sm:$0xff]  }
0x202a   : > { %v7507_v2 = vpop.f32.mrb[91].mxu1  ;;  %v6720_v1 = vcombine.high %v4152_v57, %v4160_v59  ;;  %v7894_v56 = vld [vmem:[#allocation40 + $0x8] sm:$0xff]   ;;  %v7897_v59 = vld [vmem:[#allocation40 + $0xd0] sm:$0xff]  }
0x202b   : > { %v7895_v57 = vld [vmem:[#allocation40 + $0x88] sm:$0xff]  }
0x20b6   : > { %v4003_v3 = vpop.xlane.xlu0 %4002 }
0x20b7   : > { %v4004_v4 = vsub.f32 %v3995_v62, %v4003_v3  ;;  %v9006_v62 = vmov 0  }
0x20b9   : > { %v4005_v5 = vmul.f32 1.442695, %v4004_v4 }
0x20bb   : > { %8046 = vpow2.f32 %v4005_v5 }
0x20c5   : > { %v8047_v7 = vpop.eup %8046 }
0x20c6   : > { %v4007_v8 = vsel %vm1454_vm2, %v8047_v7, 0.0 }
0x20c7   : > { %4008 = vadd.xlane.f32.xlu1 %v4007_v8 }
0x2154   : > { %v4009_v16 = vpop.xlane.xlu1 %4008 }
0x2155   : > { %8048 = vrcp.f32 %v4009_v16  ;;  %v4153_v16 = vld [vmem:[#allocation37 + $0x20] sm:$0xff] }
0x215f   : > { %v8049_v17 = vpop.eup %8048 }
0x2160   : > { %v4011_v18 = vmul.f32 %v8049_v17, %v8047_v7  ;;  %v6711_v7 = vld [vmem:[#allocation34] ss:$0 sm:$0xff]  ;;  %v4161_v17 = vld [vmem:[#allocation37 + $0x60] sm:$0xff] }
0x2162   : > { %v4012_v19 = vpack.c.bf16 %v4011_v18, %v4011_v18  ;;  %v4154_v18 = vld [vmem:[#allocation37 + $0x28] sm:$0xff] }
0x2164   : > { %7511 = vmatmul.mubr.msk.bf16.vlgmr.msra.gmra.mrb[92].mxu0 %vm1454_vm2, %v4012_v19  ;;  %v4162_v19 = vld [vmem:[#allocation37 + $0x68] sm:$0xff] }
0x2165   : > { %4460 = vmatprep.mubr.bf16.mxu0 %v9006_v62 }
0x2237   : > { %v4054_v20 = vpop.f32.mrb[92].mxu0 }
0x2238   : > { %v4060_v21 = vpack.c.bf16 %v4054_v20, %v4054_v20  ;;  %v7512_v22 = vpop.f32.mrb[93].mxu0  ;;  %v6733_v20 = vcombine.low %v4167_v10, %v4175_v11  ;;  %v7910_v10 = vld [vmem:[#allocation40 + $0x28] sm:$0xff]  }
0x2239   : > { %v4057_v23 = vpop.f32.mrb[94].mxu0  ;;  %v6722_v22 = vcombine.high %v4153_v16, %v4161_v17  ;;  %v7911_v11 = vld [vmem:[#allocation40 + $0xa8] sm:$0xff]  }
0x223a   : > { %v7513_v24 = vpop.f32.mrb[95].mxu0  ;;  %7517 = vmatmul.mubr.msk.bf16.vlgmr.msra.gmra.mrb[92].mxu1 %vm1454_vm2, %v4060_v21  ;;  %v6735_v21 = vcombine.low %v4168_v0, %v4176_v12  ;;  %v6724_v23 = vcombine.high %v4154_v18, %v4162_v19  ;;  %v7912_v0 = vld [vmem:[#allocation40 + $0x70] sm:$0xff]  }
0x223b   : > { %4470 = vmatpush1.bf16.msra.mxu1 %v6715_v44  ;;  %4501 = vmatprep.mubr.bf16.mxu1 %v9006_v62  ;;  %v4169_v24 = vld [vmem:[#allocation37 + $0xa0] sm:$0xff] }
0x223c   : > { %4471 = vmatprep.subr.bf16.mxu1 %v6732_v54  ;;  %v7892_v54 = vld [vmem:[#allocation40 + $0x48] sm:$0xff]   ;;  %v7913_v12 = vld [vmem:[#allocation40 + $0xf0] sm:$0xff]  }
0x223f   : > { %4472 = vmatpush1.bf16.msra.mxu1 %v6731_v53  ;;  %v7891_v53 = vld [vmem:[#allocation40 + $0x80] sm:$0xff]  }
0x2240   : > { %4551 = vmatprep.subr.bf16.mxu1 %v6720_v1  ;;  %v7901_v1 = vld [vmem:[#allocation40 + $0xd8] sm:$0xff]  }
0x230d   : > { %v4103_v25 = vpop.f32.mrb[92].mxu1 }
0x230e   : > { %v4109_v27 = vadd.f32 %v4103_v25, %v10209_v41  ;;  %v7518_v28 = vpop.f32.mrb[93].mxu1  ;;  %v6714_v41 = vcombine.high %v4149_v38, %v4157_v39  ;;  %v4177_v25 = vld [vmem:[#allocation37 + $0xe0] sm:$0xff]  ;;  %v4171_v39 = vld [vmem:[#allocation37 + $0xb0] sm:$0xff] }
0x230f   : > { %v4106_v29 = vpop.f32.mrb[94].mxu1  ;;  %v6721_v28 = vcombine.low %v4153_v16, %v4161_v17  ;;  %v6742_v45 = vcombine.high %v4171_v39, %v4179_v40  ;;  %v7917_v16 = vld [vmem:[#allocation40 + $0xf8] sm:$0xff]  }
0x2310   : > { %v4117_v30 = vadd.f32 %v6710_v26, %v4109_v27  ;;  %v7519_v31 = vpop.f32.mrb[95].mxu1  ;;  %4428 = vmatprep.subr.bf16.mxu0 %v6714_v41  ;;  %v4170_v26 = vld [vmem:[#allocation37 + $0xa8] sm:$0xff]  ;;  %v6723_v29 = vcombine.low %v4154_v18, %v4162_v19  ;;  %v4172_v41 = vld [vmem:[#allocation37 + $0xb8] sm:$0xff]  ;;  %v7920_v19 = vld [vmem:[#allocation40 + $0x140] sm:$0xff]  }
0x2311   : > { %4429 = vmatpush1.bf16.msra.mxu0 %v6713_v43  ;;  %v4178_v27 = vld [vmem:[#allocation37 + $0xe8] sm:$0xff]  ;;  %v6743_v47 = vcombine.low %v4172_v41, %v4180_v42 }
0x2312   : > { %v4118_v32 = vadd.f32 %v4117_v30, %v10087_v60  ;;  %v4165_v60 = vld [vmem:[#allocation37 + $0x80] sm:$0xff]  ;;  %v6738_v30 = vcombine.high %v4169_v24, %v4177_v25  ;;  %v6740_v31 = vcombine.high %v4170_v26, %v4178_v27  ;;  %v7918_v17 = vld [vmem:[#allocation40 + $0x38] sm:$0xff]  }
0x2313   : > { %v6730_v49 = vcombine.high %v4165_v60, %v4173_v46  ;;  %v6729_v51 = vcombine.low %v4165_v60, %v4173_v46  ;;  %v6744_v60 = vcombine.high %v4172_v41, %v4180_v42  ;;  %v6741_v46 = vcombine.low %v4171_v39, %v4179_v40  ;;  %v7919_v18 = vld [vmem:[#allocation40 + $0xb8] sm:$0xff]  }
0x2314   : > { %v4119_v33 = vsel %vm1282_vm1, %v4118_v32, 0.0 }
0x2315   : > { %4120 = vadd.xlane.f32.xlu0 %v4119_v33  ;;  %4430 = vmatprep.subr.bf16.mxu0 %v6730_v49  ;;  %v4163_v33 = vld [vmem:[#allocation37 + $0x70] sm:$0xff] }
0x2316   : > { %4431 = vmatpush1.bf16.msra.mxu0 %v6729_v51  ;;  %v7888_v49 = vld [vmem:[#allocation40 + $0x40] sm:$0xff]  }
0x2317   : > { %4510 = vmatprep.subr.bf16.mxu0 %v6718_v52  ;;  %v7890_v51 = vld [vmem:[#allocation40] sm:$0xff]   ;;  %v7896_v52 = vld [vmem:[#allocation40 + $0x50] sm:$0xff]  }
0x23a2   : > { %v4121_v34 = vpop.xlane.xlu0 %4120 }
0x23a3   : > { %v4122_v35 = vmul.f32 0.03125, %v4121_v34  ;;  %v4156_v34 = vld [vmem:[#allocation37 + $0x38] sm:$0xff] }
0x23a5   : > { %v4123_v36 = vsub.f32 %v4118_v32, %v4122_v35  ;;  %v4155_v32 = vld [vmem:[#allocation37 + $0x30] sm:$0xff]  ;;  %v4164_v35 = vld [vmem:[#allocation37 + $0x78] sm:$0xff] }
0x23a6   : > { %v6728_v38 = vcombine.high %v4156_v34, %v4164_v35  ;;  %v6725_v43 = vcombine.low %v4155_v32, %v4163_v33  ;;  %v6727_v44 = vcombine.low %v4156_v34, %v4164_v35 }
0x23a7   : > { %v4124_v37 = vmul.f32 %v4123_v36, %v4123_v36 }
0x23a9   : > { %v4125_v61 = vsel %vm1282_vm1, %v4124_v37, 0.0  ;;  %v6739_v37 = vcombine.low %v4170_v26, %v4178_v27 }
0x23aa   : > { %4126 = vadd.xlane.f32.xlu1 %v4125_v61  ;;  %v6726_v61 = vcombine.high %v4155_v32, %v4163_v33 }
0x2437   : > { %v4127_v2 = vpop.xlane.xlu1 %4126 }
0x2438   : > { %v4128_v3 = vmul.f32 0.03125, %v4127_v2  ;;  %v7902_v2 = vld [vmem:[#allocation40 + $0x18] sm:$0xff]  }
0x243a   : > { %v4129_v4 = vadd.f32 1e-05, %v4128_v3  ;;  %v7903_v3 = vld [vmem:[#allocation40 + $0x98] sm:$0xff]  }
0x243c   : > { %8050 = vrsqrt.f32 %v4129_v4  ;;  %v7904_v4 = vld [vmem:[#allocation40 + $0x60] sm:$0xff]  }
0x2446   : > { %v8051_v5 = vpop.eup %8050 }
0x2447   : > { %v4131_v8 = vmul.f32 %v8051_v5, %v4123_v36  ;;  %v6737_v36 = vcombine.low %v4169_v24, %v4177_v25  ;;  %v7905_v5 = vld [vmem:[#allocation40 + $0xe0] sm:$0xff]   ;;  %v10265_v24 = vld [vmem:[#allocation38 + $0x8] sm:$0xff] }
0x2449   : > { %v4139_v48 = vmul.f32 %v6711_v7, %v4131_v8  ;;  %v7906_v7 = vld [vmem:[#allocation40 + $0x20] sm:$0xff]  }
0x244a   : > { %v7907_v8 = vld [vmem:[#allocation40 + $0xa0] sm:$0xff]  }
0x244b   : > { %v10234_v6 = vadd.f32 %v6712_v9, %v4139_v48  ;;  %v7908_v9 = vld [vmem:[#allocation40 + $0x68] sm:$0xff]  }
0x244c   : > { %v7909_v48 = vld [vmem:[#allocation40 + $0xe8] sm:$0xff]  }
0x244d   : > { %v10238_v13 = vpack.c.bf16 %v10234_v6, %v10234_v6 }
0x244f   : > { %6745 = vmatmul.mubr.msk.bf16.vlgmr.msra.gmra.mrb[96].mxu0 %vm1282_vm1, %v10238_v13  ;;  %6746 = vmatmul.mubr.msk.bf16.vlgmr.msra.gmra.mrb[96].mxu1 %vm1282_vm1, %v10238_v13 }
0x2450   : > { %4511 = vmatpush1.bf16.msra.mxu0 %v6717_v58  ;;  %4552 = vmatpush1.bf16.msra.mxu1 %v6719_v63  ;;  %v7899_v58 = vld [vmem:[#allocation40 + $0x90] sm:$0xff]   ;;  %v7900_v63 = vld [vmem:[#allocation40 + $0x58] sm:$0xff]  }
0x2451   : > { %4512 = vmatprep.subr.bf16.mxu0 %v6734_v14  ;;  %4553 = vmatprep.subr.bf16.mxu1 %v6736_v15  ;;  %v7915_v14 = vld [vmem:[#allocation40 + $0xb0] sm:$0xff]   ;;  %v7916_v15 = vld [vmem:[#allocation40 + $0x78] sm:$0xff]  }
0x2452   : > { %4542 = vmatprep.mubr.bf16.mxu0 %v9006_v62  ;;  %4583 = vmatprep.mubr.bf16.mxu1 %v9006_v62 }
0x2454   : > { %4513 = vmatpush1.bf16.msra.mxu0 %v6733_v20  ;;  %4554 = vmatpush1.bf16.msra.mxu1 %v6735_v21  ;;  %v7921_v20 = vld [vmem:[#allocation40 + $0x1c0] sm:$0xff]   ;;  %v4185_v21 = vlaneseq }
0x2455   : > { %4592 = vmatprep.subr.bf16.mxu0 %v6722_v22  ;;  %4633 = vmatprep.subr.bf16.mxu1 %v6724_v23 }
0x2456   : > { %v10262_v22 = vshrl.u32 %v4185_v21, 7  ;;  %v7931_v21 = vld [vmem:[#allocation40 + $0x190] sm:$0xff]  }
0x2457   : > { %6747 = vmatmul.mubr.msk.bf16.vlgmr.msra.gmra.mrb[100].mxu0 %vm1282_vm1, %v10238_v13  ;;  %6748 = vmatmul.mubr.msk.bf16.vlgmr.msra.gmra.mrb[100].mxu1 %vm1282_vm1, %v10238_v13 }
0x2458   : > { %4593 = vmatpush1.bf16.msra.mxu0 %v6721_v28  ;;  %4634 = vmatpush1.bf16.msra.mxu1 %v6723_v29  ;;  %v4211_v23 = vsub.s32 6, %v10262_v22  ;;  %v4187_v26 = vsub.s32 0, %v10262_v22  ;;  %v4195_v27 = vsub.s32 2, %v10262_v22  ;;  %v10274_v28 = vld [vmem:[#allocation38] sm:$0xff]  ;;  %v4191_v29 = vsub.s32 1, %v10262_v22 }
0x2459   : > { %4594 = vmatprep.subr.bf16.mxu0 %v6738_v30  ;;  %4635 = vmatprep.subr.bf16.mxu1 %v6740_v31  ;;  %v4199_v30 = vsub.s32 3, %v10262_v22 }
0x245a   : > { %4624 = vmatprep.mubr.bf16.mxu0 %v9006_v62  ;;  %4665 = vmatprep.mubr.bf16.mxu1 %v9006_v62  ;;  %v10270_v25 = vrot.slane %v10265_v24, %v4211_v23  ;;  %v4188_v31 = vrot.slane %v10274_v28, %v4187_v26  ;;  %v4196_v32 = vrot.slane %v10274_v28, %v4195_v27 }
0x245b   : > { %v4192_v33 = vrot.slane %v10274_v28, %v4191_v29  ;;  %v4200_v34 = vrot.slane %v10274_v28, %v4199_v30 }
0x245c   : > { %4595 = vmatpush1.bf16.msra.mxu0 %v6737_v36  ;;  %4636 = vmatpush1.bf16.msra.mxu1 %v6739_v37 }
0x245d   : > { %4674 = vmatprep.subr.bf16.mxu0 %v6726_v61  ;;  %4715 = vmatprep.subr.bf16.mxu1 %v6728_v38 }
0x245f   : > { %6749 = vmatmul.mubr.msk.bf16.vlgmr.msra.gmra.mrb[104].mxu0 %vm1282_vm1, %v10238_v13  ;;  %6750 = vmatmul.mubr.msk.bf16.vlgmr.msra.gmra.mrb[104].mxu1 %vm1282_vm1, %v10238_v13 }
0x2460   : > { %4675 = vmatpush1.bf16.msra.mxu0 %v6725_v43  ;;  %4716 = vmatpush1.bf16.msra.mxu1 %v6727_v44  ;;  %v4207_v44 = vsub.s32 5, %v10262_v22 }
0x2461   : > { %4676 = vmatprep.subr.bf16.mxu0 %v6742_v45  ;;  %4717 = vmatprep.subr.bf16.mxu1 %v6744_v60  ;;  %v4215_v45 = vsub.s32 7, %v10262_v22 }
0x2462   : > { %4706 = vmatprep.mubr.bf16.mxu0 %v9006_v62  ;;  %4747 = vmatprep.mubr.bf16.mxu1 %v9006_v62  ;;  %v7898_v62 = vld [vmem:[#allocation40 + $0x10] sm:$0xff]  }
0x2464   : > { %4677 = vmatpush1.bf16.msra.mxu0 %v6741_v46  ;;  %4718 = vmatpush1.bf16.msra.mxu1 %v6743_v47 }
0x2465   : > { %7008 = vmatprep.subr.bf16.mxu0 %v7888_v49  ;;  %7030 = vmatprep.subr.bf16.mxu1 %v7889_v50 }
0x2467   : > { %6751 = vmatmul.mubr.msk.bf16.vlgmr.msra.gmra.mrb[108].mxu0 %vm1282_vm1, %v10238_v13  ;;  %6752 = vmatmul.mubr.msk.bf16.vlgmr.msra.gmra.mrb[108].mxu1 %vm1282_vm1, %v10238_v13  ;;  %v7914_v13 = vld [vmem:[#allocation40 + $0x30] sm:$0xff]  }
0x2468   : > { %7009 = vmatpush3.bf16.msra.mxu0 %v7890_v51  ;;  %7031 = vmatpush3.bf16.msra.mxu1 %v7891_v53 }
0x2469   : > { %7010 = vmatprep.subr.bf16.mxu0 %v7892_v54  ;;  %7032 = vmatprep.subr.bf16.mxu1 %v7893_v55  ;;  %v4208_v55 = vrot.slane %v10274_v28, %v4207_v44 }
0x246c   : > { %7011 = vmatpush3.bf16.msra.mxu0 %v7894_v56  ;;  %7033 = vmatpush3.bf16.msra.mxu1 %v7895_v57  ;;  %v4216_v56 = vrot.slane %v10274_v28, %v4215_v45  ;;  %v7922_v57 = vld [vmem:[#allocation40 + $0x100] sm:$0xff]  }
0x246d   : > { %7012 = vmatprep.subr.bf16.mxu0 %v7896_v52  ;;  %7034 = vmatprep.subr.bf16.mxu1 %v7897_v59  ;;  %v7923_v52 = vld [vmem:[#allocation40 + $0x180] sm:$0xff]  }
0x2470   : > { %7013 = vmatpush3.bf16.msra.mxu0 %v7898_v62  ;;  %7035 = vmatpush3.bf16.msra.mxu1 %v7899_v58  ;;  %v7924_v58 = vld [vmem:[#allocation40 + $0x148] sm:$0xff]  }
0x2471   : > { %7014 = vmatprep.subr.bf16.mxu0 %v7900_v63  ;;  %7036 = vmatprep.subr.bf16.mxu1 %v7901_v1  ;;  %v7925_v63 = vld [vmem:[#allocation40 + $0x1c8] sm:$0xff]  }
0x2474   : > { %7015 = vmatpush3.bf16.msra.mxu0 %v7902_v2  ;;  %7037 = vmatpush3.bf16.msra.mxu1 %v7903_v3 }
0x2475   : > { %7016 = vmatprep.subr.bf16.mxu0 %v7904_v4  ;;  %7038 = vmatprep.subr.bf16.mxu1 %v7905_v5 }
0x2478   : > { %7017 = vmatpush3.bf16.msra.mxu0 %v7906_v7  ;;  %7039 = vmatpush3.bf16.msra.mxu1 %v7907_v8 }
0x2479   : > { %7018 = vmatprep.subr.bf16.mxu0 %v7908_v9  ;;  %7040 = vmatprep.subr.bf16.mxu1 %v7909_v48  ;;  %v7926_v48 = vld [vmem:[#allocation40 + $0x108] sm:$0xff]  }
0x247c   : > { %7019 = vmatpush3.bf16.msra.mxu0 %v7910_v10  ;;  %7041 = vmatpush3.bf16.msra.mxu1 %v7911_v11  ;;  %v7927_v10 = vld [vmem:[#allocation40 + $0x188] sm:$0xff]  }
0x247d   : > { %7020 = vmatprep.subr.bf16.mxu0 %v7912_v0  ;;  %7042 = vmatprep.subr.bf16.mxu1 %v7913_v12  ;;  %v7928_v12 = vld [vmem:[#allocation40 + $0x150] sm:$0xff]  }
0x2480   : > { %7021 = vmatpush3.bf16.msra.mxu0 %v7914_v13  ;;  %7043 = vmatpush3.bf16.msra.mxu1 %v7915_v14  ;;  %v7929_v13 = vld [vmem:[#allocation40 + $0x1d0] sm:$0xff]  }
0x2481   : > { %7022 = vmatprep.subr.bf16.mxu0 %v7916_v15  ;;  %7044 = vmatprep.subr.bf16.mxu1 %v7917_v16  ;;  %v4220_v16 = vrot.slane %v10265_v24, %v4187_v26 }
0x2484   : > { %7023 = vmatpush3.bf16.msra.mxu0 %v7918_v17  ;;  %7045 = vmatpush3.bf16.msra.mxu1 %v7919_v18  ;;  %v4228_v17 = vrot.slane %v10265_v24, %v4195_v27 }
0x2485   : > { %7052 = vmatprep.subr.bf16.mxu0 %v7920_v19  ;;  %7074 = vmatprep.subr.bf16.mxu1 %v7921_v20  ;;  %v7930_v20 = vld [vmem:[#allocation40 + $0x110] sm:$0xff]  }
0x2522   : > { %v4462_v35 = vpop.f32.mrb[96].mxu0  ;;  %v4503_v36 = vpop.f32.mrb[96].mxu1 }
0x2523   : > { %v4463_v37 = vadd.f32 %v4462_v35, %v4188_v31  ;;  %v4504_v61 = vadd.f32 %v4503_v36, %v4196_v32  ;;  %v4464_v38 = vpop.f32.mrb[97].mxu0  ;;  %v4505_v39 = vpop.f32.mrb[97].mxu1  ;;  %v7932_v31 = vld [vmem:[#allocation40 + $0x158] sm:$0xff]  }
0x2524   : > { %v4465_v40 = vadd.f32 %v4464_v38, %v4192_v33  ;;  %v4506_v41 = vadd.f32 %v4505_v39, %v4200_v34  ;;  %v4466_v42 = vpop.f32.mrb[98].mxu0  ;;  %v4507_v43 = vpop.f32.mrb[98].mxu1  ;;  %v7933_v32 = vld [vmem:[#allocation40 + $0x1d8] sm:$0xff]  }
0x2525   : > { %v4756_v60 = vmax.f32 %v4463_v37, 0.0  ;;  %v4758_v46 = vmax.f32 %v4504_v61, 0.0  ;;  %v4467_v47 = vpop.f32.mrb[99].mxu0  ;;  %v4508_v49 = vpop.f32.mrb[99].mxu1  ;;  %v7934_v38 = vld [vmem:[#allocation40 + $0x118] sm:$0xff]   ;;  %v7936_v43 = vld [vmem:[#allocation40 + $0x160] sm:$0xff]  }
0x2526   : > { %v4757_v50 = vmax.f32 %v4465_v40, 0.0  ;;  %v4759_v51 = vmax.f32 %v4506_v41, 0.0  ;;  %v7935_v39 = vld [vmem:[#allocation40 + $0x198] sm:$0xff]   ;;  %v4203_v40 = vsub.s32 4, %v10262_v22  ;;  %v7938_v47 = vld [vmem:[#allocation40 + $0x120] sm:$0xff]  }
0x2527   : > { %v4772_v59 = vpack.c.bf16 %v4756_v60, %v4756_v60  ;;  %v4774_v62 = vpack.c.bf16 %v4758_v46, %v4758_v46  ;;  %v7937_v60 = vld [vmem:[#allocation40 + $0x1e0] sm:$0xff]   ;;  %v7983_v22 = vld [vmem:[#allocation40 + $0x2b8] sm:$0xff]  }
0x2528   : > { %v4773_v53 = vpack.c.bf16 %v4757_v50, %v4757_v50  ;;  %v4775_v54 = vpack.c.bf16 %v4759_v51, %v4759_v51  ;;  %v4236_v46 = vrot.slane %v10265_v24, %v4203_v40  ;;  %v7939_v49 = vld [vmem:[#allocation40 + $0x1a0] sm:$0xff]   ;;  %v7940_v50 = vld [vmem:[#allocation40 + $0x168] sm:$0xff]  }
0x2529   : > { %v7941_v51 = vld [vmem:[#allocation40 + $0x1e8] sm:$0xff]  }
0x252a   : > { %v10294_v1 = vpop.f32.mrb[100].mxu0  ;;  %v10296_v2 = vpop.f32.mrb[100].mxu1  ;;  %5851 = vmatprep.mubr.bf16.mxu0 %v4773_v53  ;;  %5891 = vmatprep.mubr.bf16.mxu1 %v4775_v54 }
0x252b   : > { %v4546_v3 = vpop.f32.mrb[101].mxu0  ;;  %v4587_v4 = vpop.f32.mrb[101].mxu1  ;;  %5852 = vmatmul.mubr.bf16.vlgmr.msra.gmra.mrb[112].mxu0 %v4772_v59  ;;  %5892 = vmatmul.mubr.bf16.vlgmr.msra.gmra.mrb[112].mxu1 %v4774_v62 }
0x252c   : > { %v4547_v5 = vadd.f32 %v4546_v3, %v4208_v55  ;;  %v4588_v7 = vadd.f32 %v4587_v4, %v4216_v56  ;;  %7053 = vmatpush3.bf16.msra.mxu0 %v7922_v57  ;;  %7075 = vmatpush3.bf16.msra.mxu1 %v7923_v52  ;;  %v4548_v8 = vpop.f32.mrb[102].mxu0  ;;  %v4589_v9 = vpop.f32.mrb[102].mxu1  ;;  %v4204_v3 = vrot.slane %v10274_v28, %v4203_v40  ;;  %v7963_v40 = vld [vmem:[#allocation40 + $0x290] sm:$0xff]  }
0x252d   : > { %v4549_v11 = vpop.f32.mrb[103].mxu0  ;;  %v4590_v0 = vpop.f32.mrb[103].mxu1  ;;  %7054 = vmatprep.subr.bf16.mxu0 %v7924_v58  ;;  %7076 = vmatprep.subr.bf16.mxu1 %v7925_v63  ;;  %v7942_v58 = vld [vmem:[#allocation40 + $0x128] sm:$0xff]   ;;  %v4212_v4 = vrot.slane %v10274_v28, %v4211_v23  ;;  %v7945_v8 = vld [vmem:[#allocation40 + $0x1f0] sm:$0xff]   ;;  %v4224_v9 = vrot.slane %v10265_v24, %v4191_v29  ;;  %v7950_v29 = vld [vmem:[#allocation40 + $0x138] sm:$0xff]  }
0x252e   : > { %v4761_v14 = vmax.f32 %v4547_v5, 0.0  ;;  %v4763_v15 = vmax.f32 %v4588_v7, 0.0  ;;  %v7943_v63 = vld [vmem:[#allocation40 + $0x1a8] sm:$0xff]   ;;  %v7947_v11 = vld [vmem:[#allocation40 + $0x1b0] sm:$0xff]   ;;  %v4545_v23 = vadd.f32 %v10294_v1, %v4204_v3  ;;  %v7948_v0 = vld [vmem:[#allocation40 + $0x178] sm:$0xff]   ;;  %v4248_v3 = vrot.slane %v10265_v24, %v4215_v45 }
0x252f   : > { %v4586_v28 = vadd.f32 %v10296_v2, %v4212_v4  ;;  %v7954_v2 = vld [vmem:[#allocation40 + $0x200] sm:$0xff]   ;;  %v7978_v4 = vld [vmem:[#allocation40 + $0x230] sm:$0xff]  }
0x2530   : > { %v4777_v18 = vpack.c.bf16 %v4761_v14, %v4761_v14  ;;  %v4779_v19 = vpack.c.bf16 %v4763_v15, %v4763_v15  ;;  %7055 = vmatpush3.bf16.msra.mxu0 %v7926_v48  ;;  %7077 = vmatpush3.bf16.msra.mxu1 %v7927_v10  ;;  %v4232_v48 = vrot.slane %v10265_v24, %v4199_v30  ;;  %v7946_v10 = vld [vmem:[#allocation40 + $0x130] sm:$0xff]   ;;  %v7951_v15 = vld [vmem:[#allocation40 + $0x1b8] sm:$0xff]  }
0x2531   : > { %7056 = vmatprep.subr.bf16.mxu0 %v7928_v12  ;;  %7078 = vmatprep.subr.bf16.mxu1 %v7929_v13  ;;  %v7949_v12 = vld [vmem:[#allocation40 + $0x1f8] sm:$0xff]   ;;  %v4762_v30 = vmax.f32 %v4586_v28, 0.0  ;;  %v7986_v28 = vld [vmem:[#allocation40 + $0x300] sm:$0xff]  }
0x2532   : > { %v4626_v33 = vpop.f32.mrb[104].mxu0  ;;  %v4667_v34 = vpop.f32.mrb[104].mxu1  ;;  %5931 = vmatprep.mubr.bf16.mxu0 %v4777_v18  ;;  %5971 = vmatprep.mubr.bf16.mxu1 %v4779_v19  ;;  %v7953_v18 = vld [vmem:[#allocation40 + $0x2c0] sm:$0xff]  }
0x2533   : > { %v10300_v35 = vadd.f32 %v4626_v33, %v4220_v16  ;;  %v10302_v36 = vadd.f32 %v4667_v34, %v4228_v17  ;;  %v4628_v26 = vpop.f32.mrb[105].mxu0  ;;  %v4669_v27 = vpop.f32.mrb[105].mxu1  ;;  %v4760_v16 = vmax.f32 %v4545_v23, 0.0  ;;  %v7952_v17 = vld [vmem:[#allocation40 + $0x240] sm:$0xff]   ;;  %v7956_v33 = vld [vmem:[#allocation40 + $0x248] sm:$0xff]  }
0x2534   : > { %7057 = vmatpush3.bf16.msra.mxu0 %v7930_v20  ;;  %7079 = vmatpush3.bf16.msra.mxu1 %v7931_v21  ;;  %v4630_v37 = vpop.f32.mrb[106].mxu0  ;;  %v4671_v61 = vpop.f32.mrb[106].mxu1  ;;  %v4629_v13 = vadd.f32 %v4628_v26, %v4224_v9  ;;  %v4670_v14 = vadd.f32 %v4669_v27, %v4232_v48  ;;  %v4778_v21 = vpack.c.bf16 %v4762_v30, %v4762_v30  ;;  %v7957_v34 = vld [vmem:[#allocation40 + $0x2c8] sm:$0xff]   ;;  %v7982_v48 = vld [vmem:[#allocation40 + $0x238] sm:$0xff]   ;;  %v7994_v30 = vld [vmem:[#allocation40 + $0x310] sm:$0xff]  }
0x2535   : > { %v4631_v41 = vpop.f32.mrb[107].mxu0  ;;  %v4672_v42 = vpop.f32.mrb[107].mxu1  ;;  %7058 = vmatprep.subr.bf16.mxu0 %v7932_v31  ;;  %7080 = vmatprep.subr.bf16.mxu1 %v7933_v32  ;;  %v4776_v20 = vpack.c.bf16 %v4760_v16, %v4760_v16  ;;  %v7955_v31 = vld [vmem:[#allocation40 + $0x280] sm:$0xff]   ;;  %v7958_v27 = vld [vmem:[#allocation40 + $0x208] sm:$0xff]   ;;  %v7960_v61 = vld [vmem:[#allocation40 + $0x250] sm:$0xff]   ;;  %v4766_v45 = vmax.f32 %v10302_v36, 0.0 }
0x2536   : > { %v4765_v19 = vmax.f32 %v4629_v13, 0.0  ;;  %v4767_v1 = vmax.f32 %v4670_v14, 0.0  ;;  %v7959_v37 = vld [vmem:[#allocation40 + $0x288] sm:$0xff]   ;;  %v7964_v41 = vld [vmem:[#allocation40 + $0x258] sm:$0xff]   ;;  %v7993_v16 = vld [vmem:[#allocation40 + $0x3d0] sm:$0xff]  }
0x2537   : > { %v7965_v42 = vld [vmem:[#allocation40 + $0x2d8] sm:$0xff]   ;;  %v7989_v13 = vld [vmem:[#allocation40 + $0x3c8] sm:$0xff]  }
0x2538   : > { %7059 = vmatpush3.bf16.msra.mxu0 %v7934_v38  ;;  %7081 = vmatpush3.bf16.msra.mxu1 %v7935_v39  ;;  %v4781_v32 = vpack.c.bf16 %v4765_v19, %v4765_v19  ;;  %v4783_v26 = vpack.c.bf16 %v4767_v1, %v4767_v1  ;;  %v7961_v38 = vld [vmem:[#allocation40 + $0x2d0] sm:$0xff]   ;;  %v7990_v36 = vld [vmem:[#allocation40 + $0x308] sm:$0xff]   ;;  %v7997_v19 = vld [vmem:[#allocation40 + $0x3d8] sm:$0xff]  }
0x2539   : > { %7060 = vmatprep.subr.bf16.mxu0 %v7936_v43  ;;  %7082 = vmatprep.subr.bf16.mxu1 %v7937_v60  ;;  %v7962_v39 = vld [vmem:[#allocation40 + $0x210] sm:$0xff]   ;;  %v7966_v43 = vld [vmem:[#allocation40 + $0x218] sm:$0xff]  }
0x253a   : > { %v4708_v53 = vpop.f32.mrb[108].mxu0  ;;  %v4749_v54 = vpop.f32.mrb[108].mxu1  ;;  %v7967_v60 = vld [vmem:[#allocation40 + $0x298] sm:$0xff]  }
0x253b   : > { %v10306_v55 = vadd.f32 %v4708_v53, %v4236_v46  ;;  %v10309_v56 = vadd.f32 %v4749_v54, %v10270_v25  ;;  %v10311_v57 = vpop.f32.mrb[109].mxu0  ;;  %v10313_v52 = vpop.f32.mrb[109].mxu1  ;;  %v7944_v25 = vld [vmem:[#allocation40 + $0x170] sm:$0xff]   ;;  %v7968_v46 = vld [vmem:[#allocation40 + $0x260] sm:$0xff]   ;;  %v7973_v53 = vld [vmem:[#allocation40 + $0x2e8] sm:$0xff]  }
0x253c   : > { %7061 = vmatpush3.bf16.msra.mxu0 %v7938_v47  ;;  %7083 = vmatpush3.bf16.msra.mxu1 %v7939_v49  ;;  %v4712_v59 = vpop.f32.mrb[110].mxu0  ;;  %v4753_v62 = vpop.f32.mrb[110].mxu1  ;;  %v7969_v47 = vld [vmem:[#allocation40 + $0x2e0] sm:$0xff]   ;;  %v7974_v54 = vld [vmem:[#allocation40 + $0x228] sm:$0xff]   ;;  %v4752_v9 = vadd.f32 %v10313_v52, %v4248_v3  ;;  %v4782_v52 = vpack.c.bf16 %v4766_v45, %v4766_v45  ;;  %v7998_v1 = vld [vmem:[#allocation40 + $0x318] sm:$0xff]  }
0x253d   : > { %v4713_v5 = vpop.f32.mrb[111].mxu0  ;;  %v4754_v7 = vpop.f32.mrb[111].mxu1  ;;  %7062 = vmatprep.subr.bf16.mxu0 %v7940_v50  ;;  %7084 = vmatprep.subr.bf16.mxu1 %v7941_v51  ;;  %v7970_v49 = vld [vmem:[#allocation40 + $0x220] sm:$0xff]   ;;  %v7972_v51 = vld [vmem:[#allocation40 + $0x268] sm:$0xff]   ;;  %v7976_v62 = vld [vmem:[#allocation40 + $0x270] sm:$0xff]  }
0x253e   : > { %v7971_v50 = vld [vmem:[#allocation40 + $0x2a0] sm:$0xff]   ;;  %v7975_v59 = vld [vmem:[#allocation40 + $0x2a8] sm:$0xff]   ;;  %v7979_v5 = vld [vmem:[#allocation40 + $0x2b0] sm:$0xff]   ;;  %v4771_v23 = vmax.f32 %v4752_v9, 0.0 }
0x253f   : > { %v7980_v7 = vld [vmem:[#allocation40 + $0x278] sm:$0xff]  }
0x2540   : > { %7063 = vmatpush3.bf16.msra.mxu0 %v7942_v58  ;;  %7085 = vmatpush3.bf16.msra.mxu1 %v7943_v63  ;;  %v7977_v58 = vld [vmem:[#allocation40 + $0x2f0] sm:$0xff]   ;;  %v4240_v63 = vrot.slane %v10265_v24, %v4207_v44  ;;  %v4764_v44 = vmax.f32 %v10300_v35, 0.0  ;;  %v7984_v24 = vld [vmem:[#allocation40 + $0x340] sm:$0xff]   ;;  %v4787_v14 = vpack.c.bf16 %v4771_v23, %v4771_v23 }
0x2541   : > { %7064 = vmatprep.subr.bf16.mxu0 %v7944_v25  ;;  %7086 = vmatprep.subr.bf16.mxu1 %v7945_v8  ;;  %v7981_v25 = vld [vmem:[#allocation40 + $0x2f8] sm:$0xff]  }
0x2542   : > { %v4711_v8 = vadd.f32 %v10311_v57, %v4240_v63  ;;  %v7987_v57 = vld [vmem:[#allocation40 + $0x380] sm:$0xff]  }
0x2544   : > { %7065 = vmatpush3.bf16.msra.mxu0 %v7946_v10  ;;  %7087 = vmatpush3.bf16.msra.mxu1 %v7947_v11  ;;  %v7985_v10 = vld [vmem:[#allocation40 + $0x3c0] sm:$0xff]   ;;  %v4769_v11 = vmax.f32 %v4711_v8, 0.0 }
0x2545   : > { %7066 = vmatprep.subr.bf16.mxu0 %v7948_v0  ;;  %7088 = vmatprep.subr.bf16.mxu1 %v7949_v12  ;;  %v4780_v0 = vpack.c.bf16 %v4764_v44, %v4764_v44  ;;  %v7988_v12 = vld [vmem:[#allocation40 + $0x348] sm:$0xff]  }
0x2546   : > { %v4785_v35 = vpack.c.bf16 %v4769_v11, %v4769_v11 }
0x2548   : > { %7067 = vmatpush3.bf16.msra.mxu0 %v7950_v29  ;;  %7089 = vmatpush3.bf16.msra.mxu1 %v7951_v15  ;;  %v7991_v29 = vld [vmem:[#allocation40 + $0x388] sm:$0xff]   ;;  %v7992_v15 = vld [vmem:[#allocation40 + $0x350] sm:$0xff]  }
0x2549   : > { %7096 = vmatprep.subr.bf16.mxu0 %v7952_v17  ;;  %7118 = vmatprep.subr.bf16.mxu1 %v7953_v18  ;;  %v7995_v17 = vld [vmem:[#allocation40 + $0x390] sm:$0xff]   ;;  %v7996_v18 = vld [vmem:[#allocation40 + $0x358] sm:$0xff]  }
0x254b   : > { %5932 = vmatmul.mubr.bf16.vlgmr.msra.gmra.mrb[116].mxu0 %v4776_v20  ;;  %5972 = vmatmul.mubr.bf16.vlgmr.msra.gmra.mrb[116].mxu1 %v4778_v21  ;;  %v8000_v20 = vld [vmem:[#allocation40 + $0x360] sm:$0xff]  }
0x254c   : > { %7097 = vmatpush3.bf16.msra.mxu0 %v7954_v2  ;;  %6011 = vmatprep.mubr.bf16.mxu0 %v4781_v32  ;;  %v7999_v2 = vld [vmem:[#allocation40 + $0x398] sm:$0xff]   ;;  %v8001_v21 = vld [vmem:[#allocation40 + $0x3e0] sm:$0xff]  }
0x254d   : > { %7119 = vmatpush3.bf16.msra.mxu1 %v7955_v31  ;;  %6051 = vmatprep.mubr.bf16.mxu1 %v4783_v26  ;;  %v8002_v31 = vld [vmem:[#allocation40 + $0x320] sm:$0xff]   ;;  %v8006_v26 = vld [vmem:[#allocation40 + $0x328] sm:$0xff]  }
0x254e   : > { %7098 = vmatprep.subr.bf16.mxu0 %v7956_v33  ;;  %7120 = vmatprep.subr.bf16.mxu1 %v7957_v34  ;;  %v8003_v32 = vld [vmem:[#allocation40 + $0x3a0] sm:$0xff]   ;;  %v8004_v33 = vld [vmem:[#allocation40 + $0x368] sm:$0xff]  }
0x254f   : > { %v8005_v34 = vld [vmem:[#allocation40 + $0x3e8] sm:$0xff]  }
0x2550   : > { %7099 = vmatpush3.bf16.msra.mxu0 %v7958_v27  ;;  %v8007_v27 = vld [vmem:[#allocation40 + $0x3a8] sm:$0xff]  }
0x2551   : > { %7121 = vmatpush3.bf16.msra.mxu1 %v7959_v37  ;;  %7100 = vmatprep.subr.bf16.mxu0 %v7960_v61  ;;  %v8008_v37 = vld [vmem:[#allocation40 + $0x370] sm:$0xff]  }
0x2552   : > { %7122 = vmatprep.subr.bf16.mxu1 %v7961_v38  ;;  %v8009_v61 = vld [vmem:[#allocation40 + $0x3f0] sm:$0xff]  }
0x2553   : > { %v8010_v38 = vld [vmem:[#allocation40 + $0x330] sm:$0xff]  }
0x2554   : > { %7101 = vmatpush3.bf16.msra.mxu0 %v7962_v39  ;;  %v8011_v39 = vld [vmem:[#allocation40 + $0x3b0] sm:$0xff]  }
0x2555   : > { %7123 = vmatpush3.bf16.msra.mxu1 %v7963_v40  ;;  %7102 = vmatprep.subr.bf16.mxu0 %v7964_v41  ;;  %v8012_v40 = vld [vmem:[#allocation40 + $0x378] sm:$0xff]  }
0x2556   : > { %7124 = vmatprep.subr.bf16.mxu1 %v7965_v42  ;;  %v8013_v41 = vld [vmem:[#allocation40 + $0x3f8] sm:$0xff]  }
0x2557   : > { %v8014_v42 = vld [vmem:[#allocation40 + $0x338] sm:$0xff]  }
0x2558   : > { %7103 = vmatpush3.bf16.msra.mxu0 %v7966_v43  ;;  %v4768_v43 = vmax.f32 %v10306_v55, 0.0 }
0x2559   : > { %7125 = vmatpush3.bf16.msra.mxu1 %v7967_v60  ;;  %7104 = vmatprep.subr.bf16.mxu0 %v7968_v46  ;;  %v8015_v60 = vld [vmem:[#allocation40 + $0x3b8] sm:$0xff]   ;;  %v4770_v46 = vmax.f32 %v10309_v56, 0.0 }
0x255a   : > { %7126 = vmatprep.subr.bf16.mxu1 %v7969_v47  ;;  %v4784_v47 = vpack.c.bf16 %v4768_v43, %v4768_v43 }
0x255c   : > { %7105 = vmatpush3.bf16.msra.mxu0 %v7970_v49  ;;  %v4786_v49 = vpack.c.bf16 %v4770_v46, %v4770_v46 }
0x255d   : > { %7127 = vmatpush3.bf16.msra.mxu1 %v7971_v50  ;;  %7106 = vmatprep.subr.bf16.mxu0 %v7972_v51 }
0x255e   : > { %7128 = vmatprep.subr.bf16.mxu1 %v7973_v53  ;;  %v6753_v53 = vld [vmem:[#allocation41] ss:$0 sm:$0xff] }
0x2560   : > { %7107 = vmatpush3.bf16.msra.mxu0 %v7974_v54 }
0x2561   : > { %7129 = vmatpush3.bf16.msra.mxu1 %v7975_v59  ;;  %7108 = vmatprep.subr.bf16.mxu0 %v7976_v62 }
0x2562   : > { %7130 = vmatprep.subr.bf16.mxu1 %v7977_v58 }
0x2564   : > { %7109 = vmatpush3.bf16.msra.mxu0 %v7978_v4 }
0x2565   : > { %7131 = vmatpush3.bf16.msra.mxu1 %v7979_v5  ;;  %7110 = vmatprep.subr.bf16.mxu0 %v7980_v7 }
0x2566   : > { %7132 = vmatprep.subr.bf16.mxu1 %v7981_v25 }
0x2568   : > { %7111 = vmatpush3.bf16.msra.mxu0 %v7982_v48 }
0x2569   : > { %7133 = vmatpush3.bf16.msra.mxu1 %v7983_v22  ;;  %7140 = vmatprep.subr.bf16.mxu0 %v7984_v24 }
0x256a   : > { %7162 = vmatprep.subr.bf16.mxu1 %v7985_v10 }
0x256b   : > { %6012 = vmatmul.mubr.bf16.vlgmr.msra.gmra.mrb[120].mxu0 %v4780_v0 }
0x256c   : > { %6052 = vmatmul.mubr.bf16.vlgmr.msra.gmra.mrb[120].mxu1 %v4782_v52  ;;  %7141 = vmatpush3.bf16.msra.mxu0 %v7986_v28 }
0x256d   : > { %6091 = vmatprep.mubr.bf16.mxu0 %v4785_v35  ;;  %7163 = vmatpush3.bf16.msra.mxu1 %v7987_v57 }
0x256e   : > { %6131 = vmatprep.mubr.bf16.mxu1 %v4787_v14  ;;  %7142 = vmatprep.subr.bf16.mxu0 %v7988_v12 }
0x256f   : > { %7164 = vmatprep.subr.bf16.mxu1 %v7989_v13 }
0x2570   : > { %7143 = vmatpush3.bf16.msra.mxu0 %v7990_v36 }
0x2571   : > { %7165 = vmatpush3.bf16.msra.mxu1 %v7991_v29  ;;  %7144 = vmatprep.subr.bf16.mxu0 %v7992_v15 }
0x2572   : > { %7166 = vmatprep.subr.bf16.mxu1 %v7993_v16 }
0x2574   : > { %7145 = vmatpush3.bf16.msra.mxu0 %v7994_v30 }
0x2575   : > { %7167 = vmatpush3.bf16.msra.mxu1 %v7995_v17  ;;  %7146 = vmatprep.subr.bf16.mxu0 %v7996_v18 }
0x2576   : > { %7168 = vmatprep.subr.bf16.mxu1 %v7997_v19 }
0x2578   : > { %7147 = vmatpush3.bf16.msra.mxu0 %v7998_v1 }
0x2579   : > { %7169 = vmatpush3.bf16.msra.mxu1 %v7999_v2  ;;  %7148 = vmatprep.subr.bf16.mxu0 %v8000_v20 }
0x257a   : > { %7170 = vmatprep.subr.bf16.mxu1 %v8001_v21 }
0x257c   : > { %7149 = vmatpush3.bf16.msra.mxu0 %v8002_v31 }
0x257d   : > { %7171 = vmatpush3.bf16.msra.mxu1 %v8003_v32  ;;  %7150 = vmatprep.subr.bf16.mxu0 %v8004_v33 }
0x257e   : > { %7172 = vmatprep.subr.bf16.mxu1 %v8005_v34 }
0x2580   : > { %7151 = vmatpush3.bf16.msra.mxu0 %v8006_v26 }
0x2581   : > { %7173 = vmatpush3.bf16.msra.mxu1 %v8007_v27  ;;  %7152 = vmatprep.subr.bf16.mxu0 %v8008_v37 }
0x2582   : > { %7174 = vmatprep.subr.bf16.mxu1 %v8009_v61 }
0x2584   : > { %7153 = vmatpush3.bf16.msra.mxu0 %v8010_v38 }
0x2585   : > { %7175 = vmatpush3.bf16.msra.mxu1 %v8011_v39  ;;  %7154 = vmatprep.subr.bf16.mxu0 %v8012_v40 }
0x2586   : > { %7176 = vmatprep.subr.bf16.mxu1 %v8013_v41 }
0x2588   : > { %7155 = vmatpush3.bf16.msra.mxu0 %v8014_v42 }
0x2589   : > { %7177 = vmatpush3.bf16.msra.mxu1 %v8015_v60 }
0x258b   : > { %6092 = vmatmul.mubr.bf16.vlgmr.msra.gmra.mrb[124].mxu0 %v4784_v47  ;;  %v6883_v47 = vld [vmem:[#allocation44] ss:$0 sm:$0xff] }
0x258c   : > { %6132 = vmatmul.mubr.bf16.vlgmr.msra.gmra.mrb[124].mxu1 %v4786_v49 }
0x25fe   : > { %v7024_v50 = vpop.f32.mrb[112].mxu0  ;;  %v7046_v51 = vpop.f32.mrb[112].mxu1 }
0x25ff   : > { %v7025_v54 = vpop.f32.mrb[113].mxu0  ;;  %v7047_v59 = vpop.f32.mrb[113].mxu1 }
0x2600   : > { %v7026_v62 = vadd.f32 %v7025_v54, %v7024_v50  ;;  %v7048_v58 = vadd.f32 %v7047_v59, %v7046_v51  ;;  %v7027_v55 = vpop.f32.mrb[114].mxu0  ;;  %v7049_v63 = vpop.f32.mrb[114].mxu1 }
0x2601   : > { %v7028_v3 = vpop.f32.mrb[115].mxu0  ;;  %v7050_v4 = vpop.f32.mrb[115].mxu1 }
0x2602   : > { %v5854_v5 = vadd.f32 %v7026_v62, %v6753_v53 }
0x2604   : > { %v5894_v56 = vadd.f32 %v7048_v58, %v5854_v5 }
0x261e   : > { %v7068_v7 = vpop.f32.mrb[116].mxu0  ;;  %v7090_v25 = vpop.f32.mrb[116].mxu1 }
0x261f   : > { %v7069_v8 = vpop.f32.mrb[117].mxu0  ;;  %v7091_v9 = vpop.f32.mrb[117].mxu1 }
0x2620   : > { %v7070_v48 = vadd.f32 %v7069_v8, %v7068_v7  ;;  %v7092_v44 = vadd.f32 %v7091_v9, %v7090_v25  ;;  %v7071_v22 = vpop.f32.mrb[118].mxu0  ;;  %v7093_v24 = vpop.f32.mrb[118].mxu1 }
0x2621   : > { %v7072_v45 = vpop.f32.mrb[119].mxu0  ;;  %v7094_v10 = vpop.f32.mrb[119].mxu1 }
0x2622   : > { %v5934_v11 = vadd.f32 %v7070_v48, %v5894_v56 }
0x2624   : > { %v5974_v23 = vadd.f32 %v7092_v44, %v5934_v11 }
0x263e   : > { %v7112_v28 = vpop.f32.mrb[120].mxu0 }
0x263f   : > { %v7134_v0 = vpop.f32.mrb[120].mxu1  ;;  %v7113_v57 = vpop.f32.mrb[121].mxu0 }
0x2640   : > { %v7114_v52 = vadd.f32 %v7113_v57, %v7112_v28  ;;  %v7135_v12 = vpop.f32.mrb[121].mxu1  ;;  %v7115_v35 = vpop.f32.mrb[122].mxu0 }
0x2641   : > { %v7136_v13 = vadd.f32 %v7135_v12, %v7134_v0  ;;  %v7137_v14 = vpop.f32.mrb[122].mxu1  ;;  %v7116_v36 = vpop.f32.mrb[123].mxu0 }
0x2642   : > { %v6014_v29 = vadd.f32 %v7114_v52, %v5974_v23  ;;  %v7138_v15 = vpop.f32.mrb[123].mxu1 }
0x2644   : > { %v6054_v16 = vadd.f32 %v7136_v13, %v6014_v29 }
0x265e   : > { %v7156_v30 = vpop.f32.mrb[124].mxu0 }
0x265f   : > { %v7178_v17 = vpop.f32.mrb[124].mxu1  ;;  %v7157_v18 = vpop.f32.mrb[125].mxu0 }
0x2660   : > { %v7158_v19 = vadd.f32 %v7157_v18, %v7156_v30  ;;  %v7179_v1 = vpop.f32.mrb[125].mxu1  ;;  %v7159_v2 = vpop.f32.mrb[126].mxu0 }
0x2661   : > { %v7180_v20 = vadd.f32 %v7179_v1, %v7178_v17  ;;  %v7181_v21 = vpop.f32.mrb[126].mxu1  ;;  %v7160_v31 = vpop.f32.mrb[127].mxu0 }
0x2662   : > { %v6094_v32 = vadd.f32 %v7158_v19, %v6054_v16  ;;  %v7182_v33 = vpop.f32.mrb[127].mxu1 }
0x2664   : > { %v6134_v34 = vadd.f32 %v7180_v20, %v6094_v32 }
0x2666   : > { %v6139_v26 = vadd.f32 %v6134_v34, %v10234_v6  ;;  %v6882_v6 = vld [vmem:[#allocation43] ss:$0 sm:$0xff] }
0x2668   : > { %v6140_v27 = vsel %vm1282_vm1, %v6139_v26, 0.0 }
0x2669   : > { %6141 = vadd.xlane.f32.xlu0 %v6140_v27 }
0x26f6   : > { %v6142_v37 = vpop.xlane.xlu0 %6141 }
0x26f7   : > { %v6143_v61 = vmul.f32 0.03125, %v6142_v37 }
0x26f9   : > { %v6144_v38 = vsub.f32 %v6139_v26, %v6143_v61 }
0x26fb   : > { %v6145_v39 = vmul.f32 %v6144_v38, %v6144_v38 }
0x26fd   : > { %v6146_v40 = vsel %vm1282_vm1, %v6145_v39, 0.0 }
0x26fe   : > { %6147 = vadd.xlane.f32.xlu1 %v6146_v40 }
0x278b   : > { %v6148_v41 = vpop.xlane.xlu1 %6147 }
0x278c   : > { %v6149_v42 = vmul.f32 0.03125, %v6148_v41 }
0x278e   : > { %v6150_v43 = vadd.f32 1e-05, %v6149_v42 }
0x2790   : > { %8052 = vrsqrt.f32 %v6150_v43 }
0x279a   : > { %v8053_v60 = vpop.eup %8052 }
0x279b   : > { %v6152_v46 = vmul.f32 %v8053_v60, %v6144_v38 }
0x279d   : > { %v6160_v49 = vmul.f32 %v6882_v6, %v6152_v46 }
0x279f   : > { %v6168_v50 = vadd.f32 %v6883_v47, %v6160_v49 }
0x27a1   : > { %6169 = vst.msk [vmem:[%s1254_s17] sm:$0xff] %vm1282_vm1, %v6168_v50 }
0x27a2   : > { %8856 = shalt.err (!%p8853_p13)
}
0x27a3   : > { %s8857_s18 = scalar_lea.hbm %s10347_s13, 128  ;;  %s8861_s20 = scalar_lea.hbm %s10577_s6, 256 }
0x27a4   : > { %p8858_p6 = scmp.ne.s32.totalorder %s10347_s13, %s8857_s18  ;;  %p8862_p5 = scmp.lt.u32.totalorder %s10347_s13, %s10577_s6 }
0x27a5   : > { %p8863_p3 = scmp.lt.u32.totalorder %s8861_s20, %s8857_s18  ;;  %p8865_p4 = scmp.lt.u32.totalorder %s8857_s18, %s10347_s13 }
0x27a6   : > { %p8859_p9 = pnand %p8858_p6, %p10578_p8 }
0x27a7   : > { %p8864_p2 = por %p8863_p3, %p8862_p5 }
0x27a8   : > { %p8860_p0 = pneg %p8859_p9 }
0x27a9   : > { %p8866_p7 = por %p8865_p4, %p8864_p2 }
0x27ab   : > { %p8867_p10 = pnand %p8866_p7, %p8860_p0 }
0x27ad   : > { %8870 = shalt.err (!%p8867_p10)
}
0x27ae   : > { %7628 = dma.vmem_to_hbm [thread:$0]  (%p10578_p8), %s10349_s10, 128, %s10347_s13, %s6171_s7  }
0x27af PF: > { %s10579_s17 = sld [smem:[#allocation64_spill]]  ;;  %s10580_s19 = sld [smem:[#allocation67_spill]] }
0x27b0   : > { %p10581_p1 = scmp.ne.s32.totalorder %s10540_s29, 0 }
0x27b5   : > { %s6196_s1 = sand.u32 1, %s10579_s17   ;;  %p10582_p11 = scmp.ge.s32.totalorder %s10580_s19, 2 }
0x27b6   : > { %s6197_s30 = scalar_lea.sflag [#allocation4], %s6196_s1 }
0x27b7   : > { %p7717_p12 = pnand %p10582_p11, %p10581_p1 }
0x27b9   : > { %8952 = dma.done.wait (!%p7717_p12), %s6197_s30, 128  }
0x27ba   : > { %8954 = vsyncadd (!%p7717_p12), %s6197_s30, 4294967168  ;;  %s10583_s8 = sld [smem:[#allocation65_spill]]  ;;  %s10584_s5 = sld [smem:[#allocation66_spill]] }
0x27bb   : > { %p57_p13 = scmp.ge.s32.totalorder %s9739_s2, 4   ;;  %s10585_s9 = smov %s9751_s4 }
0x27bc   : > { %s10586_s30 = smov %s9739_s2 }
0x27bd   :  { %59 = sbr.rel (!%p57_p13) target bundleno = 46 (0x2e), region = 336 }
0x27c4   :  { %6202 = vsyncpa [#allocation3], 1 }
0x27c5   :  { %6204 = vsyncpa [#allocation3 + $0x1], 1 }
0x27c6   :  { %6205 = vsyncpa [#allocation6], 1 }
0x27c7   :  { %6207 = vsyncpa [#allocation6 + $0x1], 1 }
0x27c8   :  { %6208 = vsyncpa [#allocation9], 1 }
0x27c9   :  { %6209 = vsyncpa [#allocation12], 1 }
0x27ca   :  { %6210 = vsyncpa [#allocation15], 1 }
0x27cb   :  { %6211 = vsyncpa [#allocation18], 1 }
0x27cc   :  { %6212 = vsyncpa [#allocation21], 1 }
0x27cd   :  { %6213 = vsyncpa [#allocation24], 1 }
0x27ce   :  { %6214 = vsyncpa [#allocation27], 1 }
0x27cf   :  { %6215 = vsyncpa [#allocation30], 1 }
0x27d0   :  { %6216 = vsyncpa [#allocation33], 1 }
0x27d1   :  { %6217 = vsyncpa [#allocation36], 1 }
0x27d2   :  { %6218 = vsyncpa [#allocation39], 1 }
0x27d3   :  { %6219 = vsyncpa [#allocation42], 1 }
0x27d4   :  { %6220 = vsyncpa [#allocation45], 1 }
0x27d5   :  { %6221 = vsyncpa [#allocation4], 1 }
0x27d6   :  { %6223 = vsyncpa [#allocation4 + $0x1], 1 }

</bundles_post_ra>
